<compile_context>
chip_gen: v5e
topology: v5e:2x2
jax: 0.10.0
libtpu: 0.0.40
codegen_flags: <defaults>
</compile_context>

<pallas_src>
import jax
import jax.numpy as jnp
from jax.experimental import pallas as pl
from jax.experimental.pallas import tpu as pltpu


def ffn_kernel(x_ref, w1_ref, b1_ref, w2_ref, b2_ref, o_ref, acc_ref):
    # x_ref:  (tm, d_model)  bf16
    # w1_ref: (d_model, tf)  bf16     b1_ref: (1, tf)      f32
    # w2_ref: (tf, d_model)  bf16     b2_ref: (1, d_model) f32
    # o_ref:  (tm, d_model)           acc_ref: (tm, d_model) f32 scratch
    k = pl.program_id(1)

    @pl.when(k == 0)
    def _init():
        acc_ref[...] = jnp.zeros_like(acc_ref)

    # First matmul on this d_ff slice: (tm, d_model) @ (d_model, tf) -> f32.
    h = jnp.dot(x_ref[...], w1_ref[...], preferred_element_type=jnp.float32)
    # Bias + ReLU in f32 on the VPU (v5e VALU has no bf16).
    h = jnp.maximum(h + b1_ref[...], 0.0)
    # Second matmul contribution of this slice; accumulate in f32.
    acc_ref[...] += jnp.dot(h.astype(w2_ref.dtype), w2_ref[...],
                            preferred_element_type=jnp.float32)

    @pl.when(k == pl.num_programs(1) - 1)
    def _finalize():
        o_ref[...] = (acc_ref[...] + b2_ref[...]).astype(o_ref.dtype)


def position_wise_ffn(x, w1, b1, w2, b2, *, tm=256, tf=512):
    """x: (B, S, d_model). w1: (d_model, d_ff), b1: (d_ff,), w2: (d_ff, d_model), b2: (d_model,)."""
    B, S, d_model = x.shape
    d_ff = w1.shape[1]
    assert d_model % 128 == 0 and d_ff % 128 == 0, "lane dims must be 128-multiples"

    M = B * S
    # Row tile: multiple of 128 so the MXU M dimension is filled; pad ragged M.
    tm = max(128, min(tm, 512))
    M_pad = ((M + tm - 1) // tm) * tm
    # Hidden tile must evenly divide d_ff; fall back to whole d_ff otherwise.
    if d_ff % tf != 0:
        tf = d_ff

    x2d = x.reshape(M, d_model)
    if M_pad != M:
        x2d = jnp.pad(x2d, ((0, M_pad - M), (0, 0)))

    # bf16 operands for the MXU; f32 biases / accumulation.
    x_bf = x2d.astype(jnp.bfloat16)
    w1_bf = w1.astype(jnp.bfloat16)
    w2_bf = w2.astype(jnp.bfloat16)
    b1_2d = b1.reshape(1, d_ff).astype(jnp.float32)
    b2_2d = b2.reshape(1, d_model).astype(jnp.float32)

    out_dtype = x.dtype
    out_size = jnp.dtype(out_dtype).itemsize

    # VMEM budget: double-buffered streaming tiles + f32 accumulator + live h.
    vmem_bytes = (
        2 * tm * d_model * 2            # x tile (bf16, double-buffered)
        + 2 * d_model * tf * 2          # W1 slice (bf16, double-buffered)
        + 2 * tf * d_model * 2          # W2 slice (bf16, double-buffered)
        + 2 * (tf + d_model) * 4        # bias slices (f32)
        + 2 * tm * d_model * out_size   # output tile (double-buffered)
        + tm * d_model * 4              # f32 accumulator scratch
        + tm * tf * 4                   # live hidden intermediate
    )
    vmem_limit = min(int(vmem_bytes * 1.5) + (2 << 20), 60 << 20)

    cost = pl.CostEstimate(
        flops=2 * M_pad * d_model * d_ff * 2,           # two matmuls
        transcendentals=0,
        bytes_accessed=(x_bf.size * 2 + w1_bf.size * 2 + w2_bf.size * 2
                        + (d_ff + d_model) * 4 + M_pad * d_model * out_size),
    )

    out = pl.pallas_call(
        ffn_kernel,
        out_shape=jax.ShapeDtypeStruct((M_pad, d_model), out_dtype),
        grid_spec=pltpu.PrefetchScalarGridSpec(
            num_scalar_prefetch=0,
            grid=(M_pad // tm, d_ff // tf),
            in_specs=[
                pl.BlockSpec((tm, d_model), lambda i, k: (i, 0)),   # x rows
                pl.BlockSpec((d_model, tf), lambda i, k: (0, k)),   # W1 slice
                pl.BlockSpec((1, tf), lambda i, k: (0, k)),         # b1 slice
                pl.BlockSpec((tf, d_model), lambda i, k: (k, 0)),   # W2 slice
                pl.BlockSpec((1, d_model), lambda i, k: (0, 0)),    # b2
            ],
            out_specs=pl.BlockSpec((tm, d_model), lambda i, k: (i, 0)),
            scratch_shapes=[pltpu.VMEM((tm, d_model), jnp.float32)],
        ),
        compiler_params=pltpu.CompilerParams(
            dimension_semantics=("parallel", "arbitrary"),
            vmem_limit_bytes=vmem_limit,
        ),
        cost_estimate=cost,
    )(x_bf, w1_bf, b1_2d, w2_bf, b2_2d)

    return out[:M].reshape(B, S, d_model)


if __name__ == "__main__":
    # Module-spec widths (d_model=512, d_ff=2048), small batch/seq so the
    # grid still has multiple steps on both axes: grid = (2, 4).
    B, S = 2, 256
    d_model, d_ff = 512, 2048

    key = jax.random.PRNGKey(0)
    kx, kw1, kb1, kw2, kb2 = jax.random.split(key, 5)

    x = jax.random.normal(kx, (B, S, d_model), dtype=jnp.float32)

    # PyTorch Linear stores weight as (out, in); we keep the transposed
    # (in, out) layout for the kernel.  Deterministic uniform init.
    bound1 = 1.0 / (d_model ** 0.5)
    bound2 = 1.0 / (d_ff ** 0.5)
    w1 = jax.random.uniform(kw1, (d_model, d_ff), jnp.float32, -bound1, bound1)
    b1 = jax.random.uniform(kb1, (d_ff,), jnp.float32, -bound1, bound1)
    w2 = jax.random.uniform(kw2, (d_ff, d_model), jnp.float32, -bound2, bound2)
    b2 = jax.random.uniform(kb2, (d_model,), jnp.float32, -bound2, bound2)

    out = position_wise_ffn(x, w1, b1, w2, b2)
    out = jax.block_until_ready(out)

    # Reference in plain f32 JAX (same math as the PyTorch module).
    ref = jnp.maximum(x @ w1 + b1, 0.0) @ w2 + b2
    assert out.shape == (B, S, d_model)
    # bf16 matmul inputs with f32 accumulation: loose tolerance vs f32 ref.
    max_err = float(jnp.max(jnp.abs(out - ref)))
    assert jnp.allclose(out, ref, atol=5e-2, rtol=5e-2), f"max_err={max_err}"

    print("KERNEL_OK")
</pallas_src>

<mosaic_0001>
module attributes {stable_mosaic.version = 11 : i64} {
  func.func @ffn_kernel(%arg0: i32, %arg1: i32, %arg2: memref<256x512xbf16, #tpu.memory_space<vmem>>, %arg3: memref<512x512xbf16, #tpu.memory_space<vmem>>, %arg4: memref<1x512xf32, #tpu.memory_space<vmem>>, %arg5: memref<512x512xbf16, #tpu.memory_space<vmem>>, %arg6: memref<1x512xf32, #tpu.memory_space<vmem>>, %arg7: memref<256x512xf32, #tpu.memory_space<vmem>>, %arg8: memref<256x512xf32, #tpu.memory_space<vmem>>) attributes {dimension_semantics = [#tpu.dimension_semantics<parallel>, #tpu.dimension_semantics<arbitrary>], iteration_bounds = array<i64: 2, 4>, scalar_prefetch = 0 : i64, scratch_operands = 1 : i64, tpu.core_type = #tpu.core_type<tc>, window_params = [{transform_indices = @transform_0, window_bounds = array<i64: 256, 512>}, {transform_indices = @transform_1, window_bounds = array<i64: 512, 512>}, {transform_indices = @transform_2, window_bounds = array<i64: 1, 512>}, {transform_indices = @transform_3, window_bounds = array<i64: 512, 512>}, {pipeline_mode = #tpu.pipeline_mode<synchronous>, transform_indices = @transform_4, window_bounds = array<i64: 1, 512>}, {transform_indices = @transform_5, window_bounds = array<i64: 256, 512>}]} {
    %c0_i32 = arith.constant 0 : i32
    %0 = arith.cmpi eq, %arg1, %c0_i32 : i32
    %1 = arith.extui %0 : i1 to i32
    %c0_i32_0 = arith.constant 0 : i32
    %2 = arith.cmpi ne, %1, %c0_i32_0 : i32
    scf.if %2 {
      %cst_15 = arith.constant 0.000000e+00 : f32
      %20 = vector.broadcast %cst_15 : f32 to vector<256x512xf32>
      %c0_16 = arith.constant 0 : index
      %c0_17 = arith.constant 0 : index
      %21 = vector.load %arg8[%c0_16, %c0_17] : memref<256x512xf32, #tpu.memory_space<vmem>>, vector<256x512xf32>
      tpu.vector_store %arg8[%c0_16, %c0_17], %20 {strides = array<i32>} : memref<256x512xf32, #tpu.memory_space<vmem>>, vector<256x512xf32>,
    } else {
    }
    %c0 = arith.constant 0 : index
    %c0_1 = arith.constant 0 : index
    %3 = vector.load %arg2[%c0, %c0_1] : memref<256x512xbf16, #tpu.memory_space<vmem>>, vector<256x512xbf16>
    %c0_2 = arith.constant 0 : index
    %c0_3 = arith.constant 0 : index
    %4 = vector.load %arg3[%c0_2, %c0_3] : memref<512x512xbf16, #tpu.memory_space<vmem>>, vector<512x512xbf16>
    %cst = arith.constant dense<0.000000e+00> : vector<256x512xf32>
    %5 = tpu.matmul %3, %4, %cst {dimension_numbers = #tpu.dot_dimension_numbers<[1], [0], [0], [1], [0, 0, 1, 1], [], []>} : vector<256x512xbf16>, vector<512x512xbf16>, vector<256x512xf32> -> vector<256x512xf32>
    %c0_4 = arith.constant 0 : index
    %c0_5 = arith.constant 0 : index
    %6 = vector.load %arg4[%c0_4, %c0_5] : memref<1x512xf32, #tpu.memory_space<vmem>>, vector<1x512xf32>
    %7 = vector.broadcast %6 : vector<1x512xf32> to vector<256x512xf32>
    %8 = arith.addf %5, %7 : vector<256x512xf32>
    %cst_6 = arith.constant 0.000000e+00 : f32
    %9 = vector.broadcast %cst_6 : f32 to vector<256x512xf32>
    %10 = arith.maximumf %8, %9 : vector<256x512xf32>
    %c0_7 = arith.constant 0 : index
    %c0_8 = arith.constant 0 : index
    %11 = vector.load %arg8[%c0_7, %c0_8] : memref<256x512xf32, #tpu.memory_space<vmem>>, vector<256x512xf32>
    %12 = arith.truncf %10 : vector<256x512xf32> to vector<256x512xbf16>
    %c0_9 = arith.constant 0 : index
    %c0_10 = arith.constant 0 : index
    %13 = vector.load %arg5[%c0_9, %c0_10] : memref<512x512xbf16, #tpu.memory_space<vmem>>, vector<512x512xbf16>
    %cst_11 = arith.constant dense<0.000000e+00> : vector<256x512xf32>
    %14 = tpu.matmul %12, %13, %cst_11 {dimension_numbers = #tpu.dot_dimension_numbers<[1], [0], [0], [1], [0, 0, 1, 1], [], []>} : vector<256x512xbf16>, vector<512x512xbf16>, vector<256x512xf32> -> vector<256x512xf32>
    %15 = arith.addf %11, %14 : vector<256x512xf32>
    %c0_12 = arith.constant 0 : index
    %c0_13 = arith.constant 0 : index
    %16 = vector.load %arg8[%c0_12, %c0_13] : memref<256x512xf32, #tpu.memory_space<vmem>>, vector<256x512xf32>
    tpu.vector_store %arg8[%c0_12, %c0_13], %15 {strides = array<i32>} : memref<256x512xf32, #tpu.memory_space<vmem>>, vector<256x512xf32>,
    %c3_i32 = arith.constant 3 : i32
    %17 = arith.cmpi eq, %arg1, %c3_i32 : i32
    %18 = arith.extui %17 : i1 to i32
    %c0_i32_14 = arith.constant 0 : i32
    %19 = arith.cmpi ne, %18, %c0_i32_14 : i32
    scf.if %19 {
      %c0_15 = arith.constant 0 : index
      %c0_16 = arith.constant 0 : index
      %20 = vector.load %arg8[%c0_15, %c0_16] : memref<256x512xf32, #tpu.memory_space<vmem>>, vector<256x512xf32>
      %c0_17 = arith.constant 0 : index
      %c0_18 = arith.constant 0 : index
      %21 = vector.load %arg6[%c0_17, %c0_18] : memref<1x512xf32, #tpu.memory_space<vmem>>, vector<1x512xf32>
      %22 = vector.broadcast %21 : vector<1x512xf32> to vector<256x512xf32>
      %23 = arith.addf %20, %22 : vector<256x512xf32>
      %c0_19 = arith.constant 0 : index
      %c0_20 = arith.constant 0 : index
      %24 = vector.load %arg7[%c0_19, %c0_20] : memref<256x512xf32, #tpu.memory_space<vmem>>, vector<256x512xf32>
      tpu.vector_store %arg7[%c0_19, %c0_20], %23 {strides = array<i32>} : memref<256x512xf32, #tpu.memory_space<vmem>>, vector<256x512xf32>,
    } else {
    }
    return
  }
  func.func @transform_0(%arg0: i32, %arg1: i32) -> (i32, i32) {
    %c0_i32 = arith.constant 0 : i32
    %c0_i32_0 = arith.constant 0 : i32
    return %arg0, %c0_i32 : i32, i32
  }
  func.func @transform_1(%arg0: i32, %arg1: i32) -> (i32, i32) {
    %c0_i32 = arith.constant 0 : i32
    %c0_i32_0 = arith.constant 0 : i32
    return %c0_i32, %arg1 : i32, i32
  }
  func.func @transform_2(%arg0: i32, %arg1: i32) -> (i32, i32) {
    %c0_i32 = arith.constant 0 : i32
    %c0_i32_0 = arith.constant 0 : i32
    return %c0_i32, %arg1 : i32, i32
  }
  func.func @transform_3(%arg0: i32, %arg1: i32) -> (i32, i32) {
    %c0_i32 = arith.constant 0 : i32
    %c0_i32_0 = arith.constant 0 : i32
    return %arg1, %c0_i32 : i32, i32
  }
  func.func @transform_4(%arg0: i32, %arg1: i32) -> (i32, i32) {
    %c0_i32 = arith.constant 0 : i32
    %c0_i32_0 = arith.constant 0 : i32
    %c0_i32_1 = arith.constant 0 : i32
    return %c0_i32, %c0_i32_0 : i32, i32
  }
  func.func @transform_5(%arg0: i32, %arg1: i32) -> (i32, i32) {
    %c0_i32 = arith.constant 0 : i32
    %c0_i32_0 = arith.constant 0 : i32
    return %arg0, %c0_i32 : i32, i32
  }
}

</mosaic_0001>

<bundles_post_ra>
// kernel: tpu_custom_call.1
= control target key start
LH: loop header
LB: loop body
LE: loop exit
PB: predicated region body
PF: predicated region fallthrough
CT: control target
= control target key end

     0   :  { %s10788_s0 = inlined_call_operand.hbm [shape: bf16[512,512], index: 0, kind: input, shape index: {}]   ;;  %s10789_s1 = inlined_call_operand.hbm [shape: bf16[512,2048], index: 1, kind: input, shape index: {}]   ;;  %s10790_s2 = inlined_call_operand.hbm [shape: f32[1,2048], index: 2, kind: input, shape index: {}]   ;;  %s10791_s3 = inlined_call_operand.hbm [shape: bf16[2048,512], index: 3, kind: input, shape index: {}]   ;;  %s10792_s4 = inlined_call_operand.hbm [shape: f32[1,512], index: 4, kind: input, shape index: {}]   ;;  %s10793_s5 = inlined_call_operand.hbm [shape: f32[512,512], index: 5, kind: output, shape index: {}]  }
   0x1   :  { %10923 = sst [smem:[#allocation96_spill]] %s10788_s0 }
   0x2   :  { %10924 = sst [smem:[#allocation97_spill]] %s10789_s1 }
   0x3   :  { %10925 = sst [smem:[#allocation98_spill]] %s10792_s4 }
   0x4   :  { %10926 = sst [smem:[#allocation99_spill]] %s10793_s5 }
   0x5   :  { %10 = vsyncpa [#allocation4], 0 }
   0x6   :  { %12 = vsyncpa [#allocation4 + $0x1], 0 }
   0x7   :  { %13 = vsyncpa [#allocation7], 0 }
   0x8   :  { %15 = vsyncpa [#allocation7 + $0x1], 0 }
   0x9   :  { %16 = vsyncpa [#allocation10], 0 }
   0xa   :  { %18 = vsyncpa [#allocation10 + $0x1], 0 }
   0xb   :  { %19 = vsyncpa [#allocation5], 0 }
   0xc   :  { %21 = vsyncpa [#allocation5 + $0x1], 0  ;;  %s8557_s18 = smov 0   ;;  %s8559_s19 = smov 0  }
   0xd   :  { %s8561_s20 = smov 0   ;;  %s8563_s21 = smov 0  }
   0xe   :  { %s8565_s22 = smov 0   ;;  %s8567_s23 = smov 0  }
   0xf   :  { %s8569_s24 = smov 0   ;;  %s8571_s25 = smov 0  }
  0x10   :  { %s8573_s26 = smov 0   ;;  %s8575_s27 = smov 0  }
  0x11   :  { %s8577_s28 = smov 0  }
  0x12 LB: > { %10927 = sst [smem:[#allocation18_spill]] %s8490_s21  ;;  %s8611_s29 = sadd.s32 4294967295, %s8518_s28   ;;  %s8518_s28 = sphi %s8577_s28, %s27_s28   ;;  %s8514_s27 = sphi %s8575_s27, %s11214_s27   ;;  %s8510_s26 = sphi %s8573_s26, %s11221_s26   ;;  %s8506_s25 = sphi %s8571_s25, %s11212_s25   ;;  %s8502_s24 = sphi %s8569_s24, %s11220_s24   ;;  %s8498_s23 = sphi %s8567_s23, %s11211_s23   ;;  %s8494_s22 = sphi %s8565_s22, %s11219_s22   ;;  %s8490_s21 = sphi %s8563_s21, %s11218_s21   ;;  %s8486_s20 = sphi %s8561_s20, %s11217_s20   ;;  %s8482_s19 = sphi %s8559_s19, %s11216_s19   ;;  %s8478_s18 = sphi %s8557_s18, %s11215_s18  }
  0x13   : > { %10928 = sst [smem:[#allocation19_spill]] %s8498_s23  ;;  %s6459_s30 = sadd.s32 4294967294, %s8518_s28  }
  0x14   : > { %10929 = sst [smem:[#allocation20_spill]] %s8502_s24  ;;  %p54_p0 = scmp.eq.s32.totalorder %s8518_s28, 0 }
  0x15   : > { %10930 = sst [smem:[#allocation21_spill]] %s8506_s25  ;;  %p59_p1 = scmp.ne.s32.totalorder %s8494_s22, %s8490_s21 }
  0x16   : > { %10931 = sst [smem:[#allocation22_spill]] %s8514_s27  ;;  %p10798_p2 = scmp.eq.s32.totalorder %s8611_s29, 0 }
  0x17   : > { %p79_p3 = scmp.ne.s32.totalorder %s8486_s20, %s8482_s19  ;;  %p85_p4 = scmp.ne.s32.totalorder %s8482_s19, %s8478_s18 }
  0x18   : > { %p8624_p5 = por %p10798_p2, %p59_p1  ;;  %p182_p6 = scmp.eq.s32.totalorder %s8611_s29, 7 }
  0x19   : > { %p8631_p7 = por %p79_p3, %p54_p0  ;;  %p8637_p8 = por %p85_p4, %p10798_p2 }
  0x1a   : > { %p188_p9 = scmp.eq.s32.totalorder %s6459_s30, 7  ;;  %p6460_p10 = scmp.ge.s32.totalorder %s8518_s28, 1 }
  0x1b   : > { %s10934_s9 = scalar_select %p8637_p8, 1, 0 }
  0x1c   : > { %p195_p11 = scmp.lt.s32.totalorder %s8518_s28, 9  ;;  %p8643_p12 = por %p188_p9, %p59_p1 }
  0x1d   : > { %10935 = sst [smem:[#allocation23_spill]] %s10934_s9  ;;  %s8520_s15 = smov [#allocation11]  }
  0x1e   : > { %s10936_s10 = scalar_select %p8643_p12, 1, 0 }
  0x1f   : > { %s10938_s4 = sld [smem:[#allocation98_spill]]  ;;  %p8650_p13 = pnand %p6460_p10, %p195_p11 }
  0x20   : > { %10937 = sst [smem:[#allocation24_spill]] %s10936_s10  ;;  %s209_s16 = sshll.u32 %s8520_s15, 4  ;;  %s210_s16 = int_to_ptr.vmem [resolvable:$true] %s209_s16 }
  0x21   : > { %p8112_p3 = pneg %p8650_p13  ;;  %p8134_p1 = scmp.lt.s32.totalorder %s8518_s28, 8 }
  0x22   : > { %s10797_s18 = sand.u32 1, %s8518_s28   ;;  %s10795_s30 = sand.u32 1, %s8486_s20  }
  0x23   : > { %p8113_p4 = pnand %p8112_p3, %p10798_p2  ;;  %p8663_p9 = pnand %p8134_p1, %p8631_p7 }
  0x24   : > { %s8671_s11 = sshll.u32 %s10795_s30, 10  ;;  %s7773_s12 = sshll.u32 %s8510_s26, 4 }
  0x25   : > { %s207_s13 = sshll.u32 %s10938_s4, 4  ;;  %s10941_s1 = sld [smem:[#allocation97_spill]]  ;;  %s208_s13 = int_to_ptr.hbm [resolvable:$true] %s207_s13 }
  0x26   : > { %8115 = dma.hbm_to_vmem [thread:$0]  (!%p8113_p4), %s208_s13, 64, %s210_s16, [#allocation10]  }
  0x27   : > { %s247_s4 = scalar_lea.vmem [#allocation6], %s8671_s11  ;;  %s8680_s16 = scalar_lea.sflag [#allocation7], %s10797_s18 }
  0x28   : > { %s255_s10 = sshll.u32 %s247_s4, 4  ;;  %s8521_s30 = smov 1024   ;;  %s256_s10 = int_to_ptr.vmem [resolvable:$true] %s255_s10 }
  0x29   : > { %s10799_s21 = smov 256   ;;  %s10801_s6 = smov 16  }
  0x2a   : > { %s36_s4 = sadd.s32 1, %s8510_s26  ;;  %s46_s15 = sadd.s32 1, %s8498_s23 }
  0x2b   : > { %s252_s8 = scalar_lea.hbm %s10941_s1, %s7773_s12  ;;  %s39_s12 = sadd.s32 1, %s8514_s27 }
  0x2c   : > { %s253_s13 = sshll.u32 %s252_s8, 4  ;;  %p37_p7 = scmp.ge.s32.totalorder %s36_s4, 4  ;;  %s254_s13 = int_to_ptr.hbm [resolvable:$true] %s253_s13 }
  0x2d   : > { %8122 = dma.hbm_to_vmem [thread:$0]  (!%p8663_p9), %s254_s13, 16384, %s256_s10, %s8680_s16, %s8521_s30, %s10799_s21, %s10801_s6  }
  0x2e   : > { %p53_p10 = scmp.ne.s32.totalorder %s8498_s23, %s8494_s22  ;;  %s220_s8 = sand.u32 1, %s8498_s23  }
  0x2f   : > { %s11223_s4 = smov (%p37_p7, %s36_s4), 0  ;;  %s11225_s12 = smov (!%p37_p7, %s39_s12), %s8514_s27 }
  0x30   : > { %10942 = sst [smem:[#allocation25_spill]] %s11223_s4  ;;  %p8698_p11 = por %p54_p0, %p53_p10 }
  0x31   : > { %s69_s1 = ssub.s32 %s8510_s26, %s11223_s4  ;;  %p41_p3 = scmp.ge.s32.totalorder %s11225_s12, 2 }
  0x32   : > { %p70_p4 = scmp.eq.s32.totalorder %s69_s1, 0  ;;  %p8706_p2 = por %p182_p6, %p53_p10 }
  0x33   : > { %s11227_s12 = smov (%p41_p3, %s11225_s12), 0  ;;  %s10947_s30 = sadd.s32 1, %s8486_s20 }
  0x34   : > { %s10944_s10 = scalar_select %p8706_p2, 1, 0 }
  0x35   : > { %10946 = sst [smem:[#allocation27_spill]] %s11227_s12  ;;  %s43_s21 = ssub.s32 %s8514_s27, %s11227_s12 }
  0x36   : > { %10945 = sst [smem:[#allocation26_spill]] %s10944_s10  ;;  %s6463_s6 = sshll.u32 %s220_s8, 9 }
  0x37   : > { %s8715_s13 = scalar_select %p70_p4, %s8486_s20, %s10947_s30  }
  0x38   : > { %p44_p0 = scmp.eq.s32.totalorder %s43_s21, 0  ;;  %s7772_s4 = sshll.u32 %s8514_s27, 9 }
  0x39   : > { %10948 = sst [smem:[#allocation28_spill]] %s8715_s13  ;;  %s224_s5 = scalar_lea.vmem [#allocation3], %s6463_s6 }
  0x3a   : > { %s233_s25 = sshll.u32 %s224_s5, 4  ;;  %s10950_s0 = sld [smem:[#allocation96_spill]]  ;;  %s234_s25 = int_to_ptr.vmem [resolvable:$true] %s233_s25 }
  0x3b   : > { %s8721_s1 = scalar_select %p44_p0, %s8498_s23, %s46_s15  }
  0x3c   : > { %p8117_p6 = pnand %p8134_p1, %p8698_p11  ;;  %s10951_s21 = sand.u32 1, %s8486_s20  }
  0x3d   : > { %10949 = sst [smem:[#allocation29_spill]] %s8721_s1  ;;  %s6470_s12 = sshll.u32 %s10951_s21, 2 }
  0x3e   : > { %s221_s6 = scalar_lea.sflag [#allocation4], %s220_s8  ;;  %s10952_s5 = smov 16  }
  0x3f   : > { %s10953_s15 = smov 256   ;;  %s6471_s24 = sshll.u32 %s8510_s26, 2 }
  0x40   : > { %s230_s10 = scalar_lea.hbm %s10950_s0, %s7772_s4  ;;  %s269_s9 = scalar_lea.vmem [#allocation8], %s6470_s12 }
  0x41   : > { %s231_s30 = sshll.u32 %s230_s10, 4  ;;  %s277_s4 = sshll.u32 %s269_s9, 4  ;;  %s232_s30 = int_to_ptr.hbm [resolvable:$true] %s231_s30  ;;  %s278_s4 = int_to_ptr.vmem [resolvable:$true] %s277_s4 }
  0x42   : > { %8119 = dma.hbm_to_vmem [thread:$0]  (!%p8117_p6), %s232_s30, 8192, %s234_s25, %s221_s6, %s10953_s15, %s10953_s15, %s10952_s5  }
  0x43   : > { %s273_s10 = scalar_lea.hbm %s10790_s2, %s6471_s24  ;;  %s7775_s21 = sshll.u32 %s8510_s26, 10 }
  0x44   : > { %s275_s18 = sshll.u32 %s273_s10, 4  ;;  %s288_s8 = scalar_lea.vmem [#allocation9], %s8671_s11  ;;  %s276_s18 = int_to_ptr.hbm [resolvable:$true] %s275_s18 }
  0x45   : > { %8125 = dma.hbm_to_vmem [thread:$0]  (!%p8663_p9), %s276_s18, 64, %s278_s4, %s8680_s16  }
  0x46   : > { %s297_s1 = sshll.u32 %s288_s8, 4  ;;  %s294_s25 = scalar_lea.hbm %s10791_s3, %s7775_s21  ;;  %s298_s1 = int_to_ptr.vmem [resolvable:$true] %s297_s1 }
  0x47   : > { %s295_s30 = sshll.u32 %s294_s25, 4  ;;  %s10954_s12 = sand.u32 1, %s8518_s28   ;;  %s296_s30 = int_to_ptr.hbm [resolvable:$true] %s295_s30 }
  0x48   : > { %s285_s6 = scalar_lea.sflag [#allocation10], %s10954_s12  ;;  %309 = sbr.rel (%p8650_p13) target bundleno = 2603 (0xa2b), region = 40 }
  0x49   : > { %8128 = dma.hbm_to_vmem [thread:$0]  (!%p8663_p9), %s296_s30, 16384, %s298_s1, %s285_s6, %s10953_s15, %s10953_s15, %s10952_s5  }
  0x4d   : > { %s8757_s0 = sand.u32 1, %s8494_s22  }
  0x4e   : > { %s6477_s23 = sshll.u32 %s8757_s0, 9  ;;  %s312_s27 = scalar_lea.sflag [#allocation4], %s8757_s0 }
  0x4f   : > { %s8761_s11 = scalar_lea.vmem [#allocation3], %s6477_s23 }
  0x50   : > { %8457 = dma.done.wait (%p8624_p5), %s312_s27, 8192  }
  0x51   : > { %8459 = vsyncadd (%p8624_p5), %s312_s27, 4294959104  ;;  %s321_s14 = sand.u32 1, %s8611_s29   ;;  %s323_s16 = sand.u32 1, %s8482_s19  }
  0x52   : > { %s6478_s13 = sshll.u32 %s323_s16, 10  ;;  %s322_s1 = scalar_lea.sflag [#allocation7], %s321_s14 }
  0x53   : > { %s8769_s5 = scalar_lea.vmem [#allocation6], %s6478_s13 }
  0x54   : > { %8461 = dma.done.wait (%p8637_p8), %s322_s1, 16448  }
  0x55   : > { %8463 = vsyncadd (%p8637_p8), %s322_s1, 4294950848  ;;  %s6479_s15 = sshll.u32 %s323_s16, 2  ;;  %s342_s7 = scalar_lea.sflag [#allocation10], %s321_s14 }
  0x56   : > { %s8775_s24 = scalar_lea.vmem [#allocation8], %s6479_s15  ;;  %s8777_s9 = scalar_lea.vmem [#allocation9], %s6478_s13 }
  0x57   : > { %8465 = dma.done.wait (%p8637_p8), %s342_s7, 16384  }
  0x58   : > { %8467 = vsyncadd (%p8637_p8), %s342_s7, 4294950912  ;;  %p10956_p5 = scmp.eq.s32.totalorder %s8611_s29, 0 }
  0x5a   : > { %8469 = dma.done.wait (%p10956_p5), [#allocation10], 64   ;;  %p10957_p13 = pmov %p10956_p5 }
  0x5b   : > { %s6482_s4 = sshll.u32 %s8757_s0, 10  ;;  %s10958_s18 = sld [smem:[#allocation20_spill]] }
  0x5c   : > { %8471 = vsyncadd (%p10957_p13), [#allocation10], 4294967232  ;;  %s8788_s10 = scalar_lea.vmem [#allocation12], %s6482_s4 }
  0x61   : > { %p6483_p1 = scmp.ne.s32.totalorder %s10958_s18, 0 }
  0x63   : > { %401 = sbr.rel (%p6483_p1) target bundleno = 233 (0xe9), region = 64 }
  0x68   : > { %v8524_v0 = vmov 0.0  }
  0x69   : > { %402 = vst [vmem:[#allocation2 + $0x2b0] sm:$0xff] %v8524_v0 }
  0x6a   : > { %403 = vst [vmem:[#allocation2 + $0x3b0] sm:$0xff] %v8524_v0 }
  0x6b   : > { %404 = vst [vmem:[#allocation2 + $0xd8] sm:$0xff] %v8524_v0 }
  0x6c   : > { %405 = vst [vmem:[#allocation2 + $0x18] sm:$0xff] %v8524_v0 }
  0x6d   : > { %406 = vst [vmem:[#allocation2 + $0x50] sm:$0xff] %v8524_v0 }
  0x6e   : > { %407 = vst [vmem:[#allocation2 + $0x368] sm:$0xff] %v8524_v0 }
  0x6f   : > { %408 = vst [vmem:[#allocation2 + $0x330] sm:$0xff] %v8524_v0 }
  0x70   : > { %409 = vst [vmem:[#allocation2 + $0x48] sm:$0xff] %v8524_v0 }
  0x71   : > { %410 = vst [vmem:[#allocation2 + $0x380] sm:$0xff] %v8524_v0 }
  0x72   : > { %411 = vst [vmem:[#allocation2 + $0x110] sm:$0xff] %v8524_v0 }
  0x73   : > { %412 = vst [vmem:[#allocation2 + $0x118] sm:$0xff] %v8524_v0 }
  0x74   : > { %413 = vst [vmem:[#allocation2 + $0x98] sm:$0xff] %v8524_v0 }
  0x75   : > { %414 = vst [vmem:[#allocation2 + $0x320] sm:$0xff] %v8524_v0 }
  0x76   : > { %415 = vst [vmem:[#allocation2 + $0x150] sm:$0xff] %v8524_v0 }
  0x77   : > { %416 = vst [vmem:[#allocation2 + $0x108] sm:$0xff] %v8524_v0 }
  0x78   : > { %417 = vst [vmem:[#allocation2 + $0x60] sm:$0xff] %v8524_v0 }
  0x79   : > { %418 = vst [vmem:[#allocation2 + $0x2e0] sm:$0xff] %v8524_v0 }
  0x7a   : > { %419 = vst [vmem:[#allocation2 + $0x388] sm:$0xff] %v8524_v0 }
  0x7b   : > { %420 = vst [vmem:[#allocation2 + $0x338] sm:$0xff] %v8524_v0 }
  0x7c   : > { %421 = vst [vmem:[#allocation2 + $0x340] sm:$0xff] %v8524_v0 }
  0x7d   : > { %422 = vst [vmem:[#allocation2 + $0x80] sm:$0xff] %v8524_v0 }
  0x7e   : > { %423 = vst [vmem:[#allocation2 + $0x1a8] sm:$0xff] %v8524_v0 }
  0x7f   : > { %424 = vst [vmem:[#allocation2 + $0x1b8] sm:$0xff] %v8524_v0 }
  0x80   : > { %425 = vst [vmem:[#allocation2 + $0x168] sm:$0xff] %v8524_v0 }
  0x81   : > { %426 = vst [vmem:[#allocation2 + $0x3e8] sm:$0xff] %v8524_v0 }
  0x82   : > { %427 = vst [vmem:[#allocation2 + $0x2f8] sm:$0xff] %v8524_v0 }
  0x83   : > { %428 = vst [vmem:[#allocation2 + $0x290] sm:$0xff] %v8524_v0 }
  0x84   : > { %429 = vst [vmem:[#allocation2 + $0x28] sm:$0xff] %v8524_v0 }
  0x85   : > { %430 = vst [vmem:[#allocation2 + $0x138] sm:$0xff] %v8524_v0 }
  0x86   : > { %431 = vst [vmem:[#allocation2 + $0xc0] sm:$0xff] %v8524_v0 }
  0x87   : > { %432 = vst [vmem:[#allocation2 + $0x1c0] sm:$0xff] %v8524_v0 }
  0x88   : > { %433 = vst [vmem:[#allocation2 + $0x280] sm:$0xff] %v8524_v0 }
  0x89   : > { %434 = vst [vmem:[#allocation2 + $0x100] sm:$0xff] %v8524_v0 }
  0x8a   : > { %435 = vst [vmem:[#allocation2 + $0x3c0] sm:$0xff] %v8524_v0 }
  0x8b   : > { %436 = vst [vmem:[#allocation2 + $0x158] sm:$0xff] %v8524_v0 }
  0x8c   : > { %437 = vst [vmem:[#allocation2 + $0x3e0] sm:$0xff] %v8524_v0 }
  0x8d   : > { %438 = vst [vmem:[#allocation2 + $0x218] sm:$0xff] %v8524_v0 }
  0x8e   : > { %439 = vst [vmem:[#allocation2 + $0x3f8] sm:$0xff] %v8524_v0 }
  0x8f   : > { %440 = vst [vmem:[#allocation2 + $0x8] sm:$0xff] %v8524_v0 }
  0x90   : > { %441 = vst [vmem:[#allocation2 + $0x128] sm:$0xff] %v8524_v0 }
  0x91   : > { %442 = vst [vmem:[#allocation2 + $0x2a0] sm:$0xff] %v8524_v0 }
  0x92   : > { %443 = vst [vmem:[#allocation2 + $0x3f0] sm:$0xff] %v8524_v0 }
  0x93   : > { %444 = vst [vmem:[#allocation2 + $0xa0] sm:$0xff] %v8524_v0 }
  0x94   : > { %445 = vst [vmem:[#allocation2 + $0x2c0] sm:$0xff] %v8524_v0 }
  0x95   : > { %446 = vst [vmem:[#allocation2 + $0xb0] sm:$0xff] %v8524_v0 }
  0x96   : > { %447 = vst [vmem:[#allocation2 + $0x1e0] sm:$0xff] %v8524_v0 }
  0x97   : > { %448 = vst [vmem:[#allocation2 + $0x1f0] sm:$0xff] %v8524_v0 }
  0x98   : > { %449 = vst [vmem:[#allocation2 + $0x10] sm:$0xff] %v8524_v0 }
  0x99   : > { %450 = vst [vmem:[#allocation2 + $0x230] sm:$0xff] %v8524_v0 }
  0x9a   : > { %451 = vst [vmem:[#allocation2 + $0x240] sm:$0xff] %v8524_v0 }
  0x9b   : > { %452 = vst [vmem:[#allocation2 + $0x90] sm:$0xff] %v8524_v0 }
  0x9c   : > { %453 = vst [vmem:[#allocation2 + $0x3a0] sm:$0xff] %v8524_v0 }
  0x9d   : > { %454 = vst [vmem:[#allocation2 + $0x208] sm:$0xff] %v8524_v0 }
  0x9e   : > { %455 = vst [vmem:[#allocation2 + $0xd0] sm:$0xff] %v8524_v0 }
  0x9f   : > { %456 = vst [vmem:[#allocation2 + $0x88] sm:$0xff] %v8524_v0 }
  0xa0   : > { %457 = vst [vmem:[#allocation2 + $0x2f0] sm:$0xff] %v8524_v0 }
  0xa1   : > { %458 = vst [vmem:[#allocation2 + $0x358] sm:$0xff] %v8524_v0 }
  0xa2   : > { %459 = vst [vmem:[#allocation2 + $0x268] sm:$0xff] %v8524_v0 }
  0xa3   : > { %460 = vst [vmem:[#allocation2 + $0x350] sm:$0xff] %v8524_v0 }
  0xa4   : > { %461 = vst [vmem:[#allocation2 + $0x188] sm:$0xff] %v8524_v0 }
  0xa5   : > { %462 = vst [vmem:[#allocation2 + $0x1d8] sm:$0xff] %v8524_v0 }
  0xa6   : > { %463 = vst [vmem:[#allocation2 + $0x30] sm:$0xff] %v8524_v0 }
  0xa7   : > { %464 = vst [vmem:[#allocation2 + $0x140] sm:$0xff] %v8524_v0 }
  0xa8   : > { %465 = vst [vmem:[#allocation2 + $0x2a8] sm:$0xff] %v8524_v0 }
  0xa9   : > { %466 = vst [vmem:[#allocation2 + $0x130] sm:$0xff] %v8524_v0 }
  0xaa   : > { %467 = vst [vmem:[#allocation2 + $0x200] sm:$0xff] %v8524_v0 }
  0xab   : > { %468 = vst [vmem:[#allocation2 + $0x318] sm:$0xff] %v8524_v0 }
  0xac   : > { %469 = vst [vmem:[#allocation2 + $0x220] sm:$0xff] %v8524_v0 }
  0xad   : > { %470 = vst [vmem:[#allocation2 + $0x70] sm:$0xff] %v8524_v0 }
  0xae   : > { %471 = vst [vmem:[#allocation2 + $0x300] sm:$0xff] %v8524_v0 }
  0xaf   : > { %472 = vst [vmem:[#allocation2 + $0xe0] sm:$0xff] %v8524_v0 }
  0xb0   : > { %473 = vst [vmem:[#allocation2 + $0x178] sm:$0xff] %v8524_v0 }
  0xb1   : > { %474 = vst [vmem:[#allocation2 + $0x328] sm:$0xff] %v8524_v0 }
  0xb2   : > { %475 = vst [vmem:[#allocation2 + $0x260] sm:$0xff] %v8524_v0 }
  0xb3   : > { %476 = vst [vmem:[#allocation2 + $0x3b8] sm:$0xff] %v8524_v0 }
  0xb4   : > { %477 = vst [vmem:[#allocation2 + $0x2b8] sm:$0xff] %v8524_v0 }
  0xb5   : > { %478 = vst [vmem:[#allocation2 + $0x248] sm:$0xff] %v8524_v0 }
  0xb6   : > { %479 = vst [vmem:[#allocation2 + $0x40] sm:$0xff] %v8524_v0 }
  0xb7   : > { %480 = vst [vmem:[#allocation2 + $0x20] sm:$0xff] %v8524_v0 }
  0xb8   : > { %481 = vst [vmem:[#allocation2 + $0xe8] sm:$0xff] %v8524_v0 }
  0xb9   : > { %482 = vst [vmem:[#allocation2 + $0x288] sm:$0xff] %v8524_v0 }
  0xba   : > { %483 = vst [vmem:[#allocation2 + $0x3a8] sm:$0xff] %v8524_v0 }
  0xbb   : > { %484 = vst [vmem:[#allocation2 + $0x3c8] sm:$0xff] %v8524_v0 }
  0xbc   : > { %485 = vst [vmem:[#allocation2 + $0x160] sm:$0xff] %v8524_v0 }
  0xbd   : > { %486 = vst [vmem:[#allocation2 + $0x2c8] sm:$0xff] %v8524_v0 }
  0xbe   : > { %487 = vst [vmem:[#allocation2 + $0x210] sm:$0xff] %v8524_v0 }
  0xbf   : > { %488 = vst [vmem:[#allocation2 + $0x3d8] sm:$0xff] %v8524_v0 }
  0xc0   : > { %489 = vst [vmem:[#allocation2 + $0x1e8] sm:$0xff] %v8524_v0 }
  0xc1   : > { %490 = vst [vmem:[#allocation2 + $0x1b0] sm:$0xff] %v8524_v0 }
  0xc2   : > { %491 = vst [vmem:[#allocation2 + $0x1c8] sm:$0xff] %v8524_v0 }
  0xc3   : > { %492 = vst [vmem:[#allocation2 + $0x2d0] sm:$0xff] %v8524_v0 }
  0xc4   : > { %493 = vst [vmem:[#allocation2 + $0x1d0] sm:$0xff] %v8524_v0 }
  0xc5   : > { %494 = vst [vmem:[#allocation2 + $0x58] sm:$0xff] %v8524_v0 }
  0xc6   : > { %495 = vst [vmem:[#allocation2 + $0x120] sm:$0xff] %v8524_v0 }
  0xc7   : > { %496 = vst [vmem:[#allocation2 + $0x198] sm:$0xff] %v8524_v0 }
  0xc8   : > { %497 = vst [vmem:[#allocation2 + $0x2e8] sm:$0xff] %v8524_v0 }
  0xc9   : > { %498 = vst [vmem:[#allocation2 + $0x1f8] sm:$0xff] %v8524_v0 }
  0xca   : > { %499 = vst [vmem:[#allocation2 + $0x238] sm:$0xff] %v8524_v0 }
  0xcb   : > { %500 = vst [vmem:[#allocation2 + $0x398] sm:$0xff] %v8524_v0 }
  0xcc   : > { %501 = vst [vmem:[#allocation2 + $0x390] sm:$0xff] %v8524_v0 }
  0xcd   : > { %502 = vst [vmem:[#allocation2 + $0x1a0] sm:$0xff] %v8524_v0 }
  0xce   : > { %503 = vst [vmem:[#allocation2 + $0xa8] sm:$0xff] %v8524_v0 }
  0xcf   : > { %504 = vst [vmem:[#allocation2 + $0x258] sm:$0xff] %v8524_v0 }
  0xd0   : > { %505 = vst [vmem:[#allocation2 + $0x2d8] sm:$0xff] %v8524_v0 }
  0xd1   : > { %506 = vst [vmem:[#allocation2 + $0xf0] sm:$0xff] %v8524_v0 }
  0xd2   : > { %507 = vst [vmem:[#allocation2 + $0x180] sm:$0xff] %v8524_v0 }
  0xd3   : > { %508 = vst [vmem:[#allocation2 + $0x170] sm:$0xff] %v8524_v0 }
  0xd4   : > { %509 = vst [vmem:[#allocation2 + $0x3d0] sm:$0xff] %v8524_v0 }
  0xd5   : > { %510 = vst [vmem:[#allocation2 + $0x250] sm:$0xff] %v8524_v0 }
  0xd6   : > { %511 = vst [vmem:[#allocation2 + $0x378] sm:$0xff] %v8524_v0 }
  0xd7   : > { %512 = vst [vmem:[#allocation2 + $0xb8] sm:$0xff] %v8524_v0 }
  0xd8   : > { %513 = vst [vmem:[#allocation2 + $0x38] sm:$0xff] %v8524_v0 }
  0xd9   : > { %514 = vst [vmem:[#allocation2 + $0x78] sm:$0xff] %v8524_v0 }
  0xda   : > { %515 = vst [vmem:[#allocation2 + $0x308] sm:$0xff] %v8524_v0 }
  0xdb   : > { %516 = vst [vmem:[#allocation2 + $0x370] sm:$0xff] %v8524_v0 }
  0xdc   : > { %517 = vst [vmem:[#allocation2 + $0xc8] sm:$0xff] %v8524_v0 }
  0xdd   : > { %518 = vst [vmem:[#allocation2 + $0x278] sm:$0xff] %v8524_v0 }
  0xde   : > { %519 = vst [vmem:[#allocation2 + $0x360] sm:$0xff] %v8524_v0 }
  0xdf   : > { %520 = vst [vmem:[#allocation2 + $0x228] sm:$0xff] %v8524_v0 }
  0xe0   : > { %521 = vst [vmem:[#allocation2 + $0x348] sm:$0xff] %v8524_v0 }
  0xe1   : > { %522 = vst [vmem:[#allocation2 + $0x148] sm:$0xff] %v8524_v0 }
  0xe2   : > { %523 = vst [vmem:[#allocation2 + $0xf8] sm:$0xff] %v8524_v0 }
  0xe3   : > { %524 = vst [vmem:[#allocation2 + $0x68] sm:$0xff] %v8524_v0 }
  0xe4   : > { %525 = vst [vmem:[#allocation2] sm:$0xff] %v8524_v0 }
  0xe5   : > { %526 = vst [vmem:[#allocation2 + $0x298] sm:$0xff] %v8524_v0 }
  0xe6   : > { %527 = vst [vmem:[#allocation2 + $0x270] sm:$0xff] %v8524_v0 }
  0xe7   : > { %528 = vst [vmem:[#allocation2 + $0x310] sm:$0xff] %v8524_v0 }
  0xe8   : > { %529 = vst [vmem:[#allocation2 + $0x190] sm:$0xff] %v8524_v0 }
  0xe9 PF: > { %v6854_v1 = vld [vmem:[%s8769_s5 + $0xe0] sm:$0xf]  ;;  %v7870_v2 = vld [vmem:[%s8769_s5 + $0xec] sm:$0xf0]  ;;  %s11203_s29 = sld [smem:[#allocation20_spill]] }
  0xea   : > { %v6982_v3 = vld [vmem:[%s8769_s5 + $0x1e0] sm:$0xf]  ;;  %v6855_v4 = vor.u32 %v7870_v2, %v6854_v1  ;;  %v7902_v5 = vld [vmem:[%s8769_s5 + $0x1ec] sm:$0xf0] }
  0xeb   : > { %v7110_v6 = vld [vmem:[%s8769_s5 + $0x2e0] sm:$0xf]  ;;  %v7934_v7 = vld [vmem:[%s8769_s5 + $0x2ec] sm:$0xf0]  ;;  %v6983_v8 = vor.u32 %v7902_v5, %v6982_v3 }
  0xec   : > { %v7111_v9 = vor.u32 %v7934_v7, %v7110_v6  ;;  %v7238_v10 = vld [vmem:[%s8769_s5 + $0x3e0] sm:$0xf]  ;;  %v7966_v11 = vld [vmem:[%s8769_s5 + $0x3ec] sm:$0xf0]  ;;  %1692 = vmatpush.bf16.msra.mxu0 %v6855_v4 }
  0xed   : > { %v6838_v12 = vld [vmem:[%s8769_s5 + $0xc0] sm:$0xf]  ;;  %v7239_v13 = vor.u32 %v7966_v11, %v7238_v10  ;;  %v7866_v14 = vld [vmem:[%s8769_s5 + $0xcc] sm:$0xf0]  ;;  %1781 = vmatpush.bf16.msra.mxu1 %v6983_v8 }
  0xee   : > { %v6966_v15 = vld [vmem:[%s8769_s5 + $0x1c0] sm:$0xf]  ;;  %v7898_v16 = vld [vmem:[%s8769_s5 + $0x1cc] sm:$0xf0]  ;;  %1870 = vmatpush.bf16.msra.mxu2 %v7111_v9  ;;  %v6839_v17 = vor.u32 %v7866_v14, %v6838_v12 }
  0xef   : > { %v6967_v18 = vor.u32 %v7898_v16, %v6966_v15  ;;  %v7094_v19 = vld [vmem:[%s8769_s5 + $0x2c0] sm:$0xf]  ;;  %v7930_v20 = vld [vmem:[%s8769_s5 + $0x2cc] sm:$0xf0]  ;;  %1959 = vmatpush.bf16.msra.mxu3 %v7239_v13  ;;  %p7764_p8 = scmp.ne.s32.totalorder %s11203_s29, 3 }
  0xf0   : > { %v7222_v21 = vld [vmem:[%s8769_s5 + $0x3c0] sm:$0xf]  ;;  %v7095_v22 = vor.u32 %v7930_v20, %v7094_v19  ;;  %v7962_v23 = vld [vmem:[%s8769_s5 + $0x3cc] sm:$0xf0]  ;;  %1693 = vmatpush.bf16.msra.mxu0 %v6839_v17 }
  0xf1   : > { %v6822_v24 = vld [vmem:[%s8769_s5 + $0xa0] sm:$0xf]  ;;  %v7862_v25 = vld [vmem:[%s8769_s5 + $0xac] sm:$0xf0]  ;;  %v7223_v26 = vor.u32 %v7962_v23, %v7222_v21  ;;  %1782 = vmatpush.bf16.msra.mxu1 %v6967_v18 }
  0xf2   : > { %v6950_v27 = vld [vmem:[%s8769_s5 + $0x1a0] sm:$0xf]  ;;  %v7894_v28 = vld [vmem:[%s8769_s5 + $0x1ac] sm:$0xf0]  ;;  %v6823_v30 = vor.u32 %v7862_v25, %v6822_v24  ;;  %1871 = vmatpush.bf16.msra.mxu2 %v7095_v22 }
  0xf3   : > { %v7078_v29 = vld [vmem:[%s8769_s5 + $0x2a0] sm:$0xf]  ;;  %v7926_v31 = vld [vmem:[%s8769_s5 + $0x2ac] sm:$0xf0]  ;;  %v6951_v34 = vor.u32 %v7894_v28, %v6950_v27  ;;  %1960 = vmatpush.bf16.msra.mxu3 %v7223_v26 }
  0xf4   : > { %v7206_v32 = vld [vmem:[%s8769_s5 + $0x3a0] sm:$0xf]  ;;  %v7958_v33 = vld [vmem:[%s8769_s5 + $0x3ac] sm:$0xf0]  ;;  %v7079_v35 = vor.u32 %v7926_v31, %v7078_v29  ;;  %1694 = vmatpush.bf16.msra.mxu0 %v6823_v30  ;;  %v7776_v31 = vld [vmem:[%s8761_s11 + $0x4] sm:$0xf] }
  0xf5   : > { %v6806_v36 = vld [vmem:[%s8769_s5 + $0x80] sm:$0xf]  ;;  %v7858_v37 = vld [vmem:[%s8769_s5 + $0x8c] sm:$0xf0]  ;;  %v7207_v39 = vor.u32 %v7958_v33, %v7206_v32  ;;  %1783 = vmatpush.bf16.msra.mxu1 %v6951_v34  ;;  %v7932_v32 = vld [vmem:[%s8769_s5 + $0x2e4] sm:$0xf] }
  0xf6   : > { %v6934_v38 = vld [vmem:[%s8769_s5 + $0x180] sm:$0xf]  ;;  %v7890_v40 = vld [vmem:[%s8769_s5 + $0x18c] sm:$0xf0]  ;;  %v6807_v45 = vor.u32 %v7858_v37, %v6806_v36  ;;  %1872 = vmatpush.bf16.msra.mxu2 %v7079_v35  ;;  %v7112_v33 = vld [vmem:[%s8769_s5 + $0x2f0] sm:$0xf0] }
  0xf7   : > { %v7062_v41 = vld [vmem:[%s8769_s5 + $0x280] sm:$0xf]  ;;  %v7922_v42 = vld [vmem:[%s8769_s5 + $0x28c] sm:$0xf0]  ;;  %v6935_v46 = vor.u32 %v7890_v40, %v6934_v38  ;;  %1961 = vmatpush.bf16.msra.mxu3 %v7207_v39  ;;  %v6488_v35 = vld [vmem:[%s8761_s11 + $0x10] sm:$0xf0] }
  0xf8   : > { %v7190_v43 = vld [vmem:[%s8769_s5 + $0x380] sm:$0xf]  ;;  %v7954_v44 = vld [vmem:[%s8769_s5 + $0x38c] sm:$0xf0]  ;;  %v7063_v47 = vor.u32 %v7922_v42, %v7062_v41  ;;  %1695 = vmatpush.bf16.msra.mxu0 %v6807_v45  ;;  %v7964_v36 = vld [vmem:[%s8769_s5 + $0x3e4] sm:$0xf]  ;;  %v7115_v45 = vor.u32 %v7932_v32, %v7112_v33 }
  0xf9   : > { %v6790_v48 = vld [vmem:[%s8769_s5 + $0x60] sm:$0xf]  ;;  %v7854_v49 = vld [vmem:[%s8769_s5 + $0x6c] sm:$0xf0]  ;;  %v7191_v51 = vor.u32 %v7954_v44, %v7190_v43  ;;  %1784 = vmatpush.bf16.msra.mxu1 %v6935_v46  ;;  %v7240_v37 = vld [vmem:[%s8769_s5 + $0x3f0] sm:$0xf0] }
  0xfa   : > { %v6918_v50 = vld [vmem:[%s8769_s5 + $0x160] sm:$0xf]  ;;  %v7886_v52 = vld [vmem:[%s8769_s5 + $0x16c] sm:$0xf0]  ;;  %v6791_v57 = vor.u32 %v7854_v49, %v6790_v48  ;;  %1873 = vmatpush.bf16.msra.mxu2 %v7063_v47  ;;  %v6494_v40 = vld [vmem:[%s8761_s11 + $0x8] sm:$0xf]  ;;  %v7243_v49 = vor.u32 %v7964_v36, %v7240_v37 }
  0xfb   : > { %v7046_v53 = vld [vmem:[%s8769_s5 + $0x260] sm:$0xf]  ;;  %v7918_v54 = vld [vmem:[%s8769_s5 + $0x26c] sm:$0xf0]  ;;  %v6919_v58 = vor.u32 %v7886_v52, %v6918_v50  ;;  %1962 = vmatpush.bf16.msra.mxu3 %v7191_v51  ;;  %v7779_v41 = vld [vmem:[%s8761_s11 + $0x14] sm:$0xf0]  ;;  %v9001_v52 = vor.u32 %v7776_v31, %v6488_v35 }
  0xfc   : > { %v7174_v55 = vld [vmem:[%s8769_s5 + $0x360] sm:$0xf]  ;;  %v7950_v56 = vld [vmem:[%s8769_s5 + $0x36c] sm:$0xf0]  ;;  %v7047_v59 = vor.u32 %v7918_v54, %v7046_v53  ;;  %1696 = vmatpush.bf16.msra.mxu0 %v6791_v57  ;;  %v7777_v42 = vld [vmem:[%s8761_s11 + $0xc] sm:$0xf]  ;;  %v9003_v53 = vor.u32 %v7779_v41, %v6494_v40 }
  0xfd   : > { %v6774_v60 = vld [vmem:[%s8769_s5 + $0x40] sm:$0xf]  ;;  %v7850_v61 = vld [vmem:[%s8769_s5 + $0x4c] sm:$0xf0]  ;;  %v7175_v63 = vor.u32 %v7950_v56, %v7174_v55  ;;  %1785 = vmatpush.bf16.msra.mxu1 %v6919_v58  ;;  %v6496_v44 = vld [vmem:[%s8761_s11 + $0x18] sm:$0xf0] }
  0xfe   : > { %v6902_v62 = vld [vmem:[%s8769_s5 + $0x140] sm:$0xf]  ;;  %v7882_v0 = vld [vmem:[%s8769_s5 + $0x14c] sm:$0xf0]  ;;  %v6775_v5 = vor.u32 %v7850_v61, %v6774_v60  ;;  %1874 = vmatpush.bf16.msra.mxu2 %v7047_v59  ;;  %v7868_v46 = vld [vmem:[%s8769_s5 + $0xe4] sm:$0xf]  ;;  %v9005_v54 = vor.u32 %v7777_v42, %v6496_v44 }
  0xff   : > { %v7030_v1 = vld [vmem:[%s8769_s5 + $0x240] sm:$0xf]  ;;  %v7914_v2 = vld [vmem:[%s8769_s5 + $0x24c] sm:$0xf0]  ;;  %v6903_v6 = vor.u32 %v7882_v0, %v6902_v62  ;;  %1963 = vmatpush.bf16.msra.mxu3 %v7175_v63  ;;  %v6856_v47 = vld [vmem:[%s8769_s5 + $0xf0] sm:$0xf0] }
 0x100   : > { %v7158_v3 = vld [vmem:[%s8769_s5 + $0x340] sm:$0xf]  ;;  %v7946_v4 = vld [vmem:[%s8769_s5 + $0x34c] sm:$0xf0]  ;;  %v7031_v7 = vor.u32 %v7914_v2, %v7030_v1  ;;  %1697 = vmatpush.bf16.msra.mxu0 %v6775_v5  ;;  %v7900_v50 = vld [vmem:[%s8769_s5 + $0x1e4] sm:$0xf]  ;;  %v6859_v55 = vor.u32 %v7868_v46, %v6856_v47 }
 0x101   : > { %v6758_v8 = vld [vmem:[%s8769_s5 + $0x20] sm:$0xf]  ;;  %v7846_v9 = vld [vmem:[%s8769_s5 + $0x2c] sm:$0xf0]  ;;  %v7159_v11 = vor.u32 %v7946_v4, %v7158_v3  ;;  %1786 = vmatpush.bf16.msra.mxu1 %v6903_v6  ;;  %v6984_v51 = vld [vmem:[%s8769_s5 + $0x1f0] sm:$0xf0] }
 0x102   : > { %v6886_v10 = vld [vmem:[%s8769_s5 + $0x120] sm:$0xf]  ;;  %v7878_v12 = vld [vmem:[%s8769_s5 + $0x12c] sm:$0xf0]  ;;  %v6759_v18 = vor.u32 %v7846_v9, %v6758_v8  ;;  %1875 = vmatpush.bf16.msra.mxu2 %v7031_v7  ;;  %v6987_v56 = vor.u32 %v7900_v50, %v6984_v51  ;;  %v7928_v57 = vld [vmem:[%s8769_s5 + $0x2c4] sm:$0xf] }
 0x103   : > { %v7014_v13 = vld [vmem:[%s8769_s5 + $0x220] sm:$0xf]  ;;  %v7910_v14 = vld [vmem:[%s8769_s5 + $0x22c] sm:$0xf0]  ;;  %v6887_v22 = vor.u32 %v7878_v12, %v6886_v10  ;;  %1964 = vmatpush.bf16.msra.mxu3 %v7159_v11  ;;  %v7096_v58 = vld [vmem:[%s8769_s5 + $0x2d0] sm:$0xf0] }
 0x104   : > { %v7142_v15 = vld [vmem:[%s8769_s5 + $0x320] sm:$0xf]  ;;  %v7942_v16 = vld [vmem:[%s8769_s5 + $0x32c] sm:$0xf0]  ;;  %v7015_v23 = vor.u32 %v7910_v14, %v7014_v13  ;;  %1698 = vmatpush.bf16.msra.mxu0 %v6759_v18  ;;  %v7960_v59 = vld [vmem:[%s8769_s5 + $0x3c4] sm:$0xf]  ;;  %v7099_v60 = vor.u32 %v7928_v57, %v7096_v58 }
 0x105   : > { %v6742_v17 = vld [vmem:[%s8769_s5] sm:$0xf]  ;;  %v7842_v19 = vld [vmem:[%s8769_s5 + $0xc] sm:$0xf0]  ;;  %v7143_v27 = vor.u32 %v7942_v16, %v7142_v15  ;;  %1787 = vmatpush.bf16.msra.mxu1 %v6887_v22  ;;  %v7224_v61 = vld [vmem:[%s8769_s5 + $0x3d0] sm:$0xf0] }
 0x106   : > { %v6870_v20 = vld [vmem:[%s8769_s5 + $0x100] sm:$0xf]  ;;  %v7874_v21 = vld [vmem:[%s8769_s5 + $0x10c] sm:$0xf0]  ;;  %v6743_v34 = vor.u32 %v7842_v19, %v6742_v17  ;;  %1876 = vmatpush.bf16.msra.mxu2 %v7015_v23  ;;  %v7864_v62 = vld [vmem:[%s8769_s5 + $0xc4] sm:$0xf]  ;;  %v7227_v0 = vor.u32 %v7960_v59, %v7224_v61 }
 0x107   : > { %v6998_v24 = vld [vmem:[%s8769_s5 + $0x200] sm:$0xf]  ;;  %v7906_v25 = vld [vmem:[%s8769_s5 + $0x20c] sm:$0xf0]  ;;  %v6871_v38 = vor.u32 %v7874_v21, %v6870_v20  ;;  %1965 = vmatpush.bf16.msra.mxu3 %v7143_v27  ;;  %v6840_v63 = vld [vmem:[%s8769_s5 + $0xd0] sm:$0xf0] }
 0x108   : > { %v7126_v26 = vld [vmem:[%s8769_s5 + $0x300] sm:$0xf]  ;;  %v7938_v28 = vld [vmem:[%s8769_s5 + $0x30c] sm:$0xf0]  ;;  %v6999_v39 = vor.u32 %v7906_v25, %v6998_v24  ;;  %1699 = vmatpush.bf16.msra.mxu0 %v6743_v34  ;;  %v6843_v1 = vor.u32 %v7864_v62, %v6840_v63  ;;  %v7896_v2 = vld [vmem:[%s8769_s5 + $0x1c4] sm:$0xf] }
 0x109   : > { %v6486_v29 = vld [vmem:[%s8761_s11] sm:$0xf]  ;;  %v7778_v30 = vld [vmem:[%s8761_s11 + $0xc] sm:$0xf0]  ;;  %v7127_v43 = vor.u32 %v7938_v28, %v7126_v26  ;;  %1788 = vmatpush.bf16.msra.mxu1 %v6871_v38  ;;  %v6968_v3 = vld [vmem:[%s8769_s5 + $0x1d0] sm:$0xf0] }
 0x10a   : > { %v8997_v48 = vor.u32 %v7778_v30, %v6486_v29  ;;  %1877 = vmatpush.bf16.msra.mxu2 %v6999_v39  ;;  %v6971_v4 = vor.u32 %v7896_v2, %v6968_v3  ;;  %v6502_v5 = vld [vmem:[%s8761_s11 + $0x20] sm:$0xf]  ;;  %v7782_v6 = vld [vmem:[%s8761_s11 + $0x2c] sm:$0xf0]  ;;  %v7780_v7 = vld [vmem:[%s8761_s11 + $0x24] sm:$0xf] }
 0x10b   : > { %1966 = vmatpush.bf16.msra.mxu3 %v7127_v43  ;;  %v6504_v8 = vld [vmem:[%s8761_s11 + $0x30] sm:$0xf0]  ;;  %v6510_v9 = vld [vmem:[%s8761_s11 + $0x28] sm:$0xf]  ;;  %v7783_v10 = vld [vmem:[%s8761_s11 + $0x34] sm:$0xf0]  ;;  %v9027_v13 = vor.u32 %v7782_v6, %v6502_v5 }
 0x10c   : > { %1700 = vmatmul.bf16.vlgmr.msra.gmra.mxu0 %v8997_v48  ;;  %1789 = vmatmul.bf16.vlgmr.msra.gmra.mxu1 %v9001_v52  ;;  %v7781_v11 = vld [vmem:[%s8761_s11 + $0x2c] sm:$0xf]  ;;  %v6512_v12 = vld [vmem:[%s8761_s11 + $0x38] sm:$0xf0]  ;;  %v9029_v14 = vor.u32 %v7780_v7, %v6504_v8  ;;  %v9031_v15 = vor.u32 %v7783_v10, %v6510_v9  ;;  %v6518_v17 = vld [vmem:[%s8761_s11 + $0x40] sm:$0xf] }
 0x10d   : > { %1878 = vmatmul.bf16.vlgmr.msra.gmra.mxu2 %v9003_v53  ;;  %2048 = vmatpush.bf16.msrb.mxu0 %v6859_v55  ;;  %v9033_v16 = vor.u32 %v7781_v11, %v6512_v12  ;;  %v7786_v18 = vld [vmem:[%s8761_s11 + $0x4c] sm:$0xf0]  ;;  %v7784_v19 = vld [vmem:[%s8761_s11 + $0x44] sm:$0xf]  ;;  %v6520_v20 = vld [vmem:[%s8761_s11 + $0x50] sm:$0xf0] }
 0x10e   : > { %2226 = vmatpush.bf16.msrb.mxu2 %v7115_v45  ;;  %1967 = vmatmul.bf16.vlgmr.msra.gmra.mxu3 %v9005_v54  ;;  %v6526_v21 = vld [vmem:[%s8761_s11 + $0x48] sm:$0xf]  ;;  %v7787_v22 = vld [vmem:[%s8761_s11 + $0x54] sm:$0xf0]  ;;  %v7785_v23 = vld [vmem:[%s8761_s11 + $0x4c] sm:$0xf]  ;;  %v9047_v25 = vor.u32 %v7786_v18, %v6518_v17  ;;  %v9049_v26 = vor.u32 %v7784_v19, %v6520_v20 }
 0x10f   : > { %2315 = vmatpush.bf16.msrb.mxu3 %v7243_v49  ;;  %2137 = vmatpush.bf16.msrb.mxu1 %v6987_v56  ;;  %v6528_v24 = vld [vmem:[%s8761_s11 + $0x58] sm:$0xf0]  ;;  %v9051_v27 = vor.u32 %v7787_v22, %v6526_v21  ;;  %v7924_v29 = vld [vmem:[%s8769_s5 + $0x2a4] sm:$0xf]  ;;  %v7080_v30 = vld [vmem:[%s8769_s5 + $0x2b0] sm:$0xf0] }
 0x110   : > { %v9053_v28 = vor.u32 %v7785_v23, %v6528_v24  ;;  %v7956_v31 = vld [vmem:[%s8769_s5 + $0x3a4] sm:$0xf]  ;;  %v7083_v32 = vor.u32 %v7924_v29, %v7080_v30  ;;  %v7208_v33 = vld [vmem:[%s8769_s5 + $0x3b0] sm:$0xf0]  ;;  %v6534_v41 = vld [vmem:[%s8761_s11 + $0x60] sm:$0xf] }
 0x111   : > { %2049 = vmatpush.bf16.msrb.mxu0 %v6843_v1  ;;  %v7860_v34 = vld [vmem:[%s8769_s5 + $0xa4] sm:$0xf]  ;;  %v6824_v35 = vld [vmem:[%s8769_s5 + $0xb0] sm:$0xf0]  ;;  %v7211_v36 = vor.u32 %v7956_v31, %v7208_v33  ;;  %v7790_v42 = vld [vmem:[%s8761_s11 + $0x6c] sm:$0xf0] }
 0x112   : > { %2227 = vmatpush.bf16.msrb.mxu2 %v7099_v60  ;;  %v6827_v37 = vor.u32 %v7860_v34, %v6824_v35  ;;  %v7892_v38 = vld [vmem:[%s8769_s5 + $0x1a4] sm:$0xf]  ;;  %v6952_v39 = vld [vmem:[%s8769_s5 + $0x1b0] sm:$0xf0]  ;;  %v6542_v45 = vld [vmem:[%s8761_s11 + $0x68] sm:$0xf]  ;;  %v9075_v50 = vor.u32 %v7790_v42, %v6534_v41 }
 0x113   : > { %2316 = vmatpush.bf16.msrb.mxu3 %v7227_v0  ;;  %2138 = vmatpush.bf16.msrb.mxu1 %v6971_v4  ;;  %v6955_v40 = vor.u32 %v7892_v38, %v6952_v39  ;;  %v7788_v43 = vld [vmem:[%s8761_s11 + $0x64] sm:$0xf]  ;;  %v6536_v44 = vld [vmem:[%s8761_s11 + $0x70] sm:$0xf0]  ;;  %v7791_v46 = vld [vmem:[%s8761_s11 + $0x74] sm:$0xf0] }
 0x114   : > { %v7789_v47 = vld [vmem:[%s8761_s11 + $0x6c] sm:$0xf]  ;;  %v6544_v49 = vld [vmem:[%s8761_s11 + $0x78] sm:$0xf0]  ;;  %v9077_v51 = vor.u32 %v7788_v43, %v6536_v44  ;;  %v9079_v55 = vor.u32 %v7791_v46, %v6542_v45  ;;  %v6550_v57 = vld [vmem:[%s8761_s11 + $0x80] sm:$0xf] }
 0x115   : > { %2050 = vmatpush.bf16.msrb.mxu0 %v6827_v37  ;;  %v9081_v56 = vor.u32 %v7789_v47, %v6544_v49  ;;  %v7794_v58 = vld [vmem:[%s8761_s11 + $0x8c] sm:$0xf0]  ;;  %v7792_v59 = vld [vmem:[%s8761_s11 + $0x84] sm:$0xf]  ;;  %v6552_v60 = vld [vmem:[%s8761_s11 + $0x90] sm:$0xf0] }
 0x116   : > { %2228 = vmatpush.bf16.msrb.mxu2 %v7083_v32  ;;  %v6558_v61 = vld [vmem:[%s8761_s11 + $0x88] sm:$0xf]  ;;  %v7795_v62 = vld [vmem:[%s8761_s11 + $0x94] sm:$0xf0]  ;;  %v7793_v63 = vld [vmem:[%s8761_s11 + $0x8c] sm:$0xf]  ;;  %v9095_v1 = vor.u32 %v7794_v58, %v6550_v57  ;;  %v9097_v2 = vor.u32 %v7792_v59, %v6552_v60 }
 0x117   : > { %2317 = vmatpush.bf16.msrb.mxu3 %v7211_v36  ;;  %2139 = vmatpush.bf16.msrb.mxu1 %v6955_v40  ;;  %v6560_v0 = vld [vmem:[%s8761_s11 + $0x98] sm:$0xf0]  ;;  %v9099_v3 = vor.u32 %v7795_v62, %v6558_v61  ;;  %v7920_v5 = vld [vmem:[%s8769_s5 + $0x284] sm:$0xf]  ;;  %v7064_v6 = vld [vmem:[%s8769_s5 + $0x290] sm:$0xf0] }
 0x118   : > { %v9101_v4 = vor.u32 %v7793_v63, %v6560_v0  ;;  %v7952_v7 = vld [vmem:[%s8769_s5 + $0x384] sm:$0xf]  ;;  %v7067_v8 = vor.u32 %v7920_v5, %v7064_v6  ;;  %v7192_v9 = vld [vmem:[%s8769_s5 + $0x390] sm:$0xf0]  ;;  %v6566_v21 = vld [vmem:[%s8761_s11 + $0xa0] sm:$0xf] }
 0x119   : > { %v7856_v10 = vld [vmem:[%s8769_s5 + $0x84] sm:$0xf]  ;;  %v6808_v11 = vld [vmem:[%s8769_s5 + $0x90] sm:$0xf0]  ;;  %v7195_v12 = vor.u32 %v7952_v7, %v7192_v9  ;;  %v7798_v22 = vld [vmem:[%s8761_s11 + $0xac] sm:$0xf0] }
 0x11a   : > { %v6811_v17 = vor.u32 %v7856_v10, %v6808_v11  ;;  %v7888_v18 = vld [vmem:[%s8769_s5 + $0x184] sm:$0xf]  ;;  %v6936_v19 = vld [vmem:[%s8769_s5 + $0x190] sm:$0xf0]  ;;  %2229 = vmatpush.bf16.msrb.mxu2 %v7067_v8  ;;  %v6574_v29 = vld [vmem:[%s8761_s11 + $0xa8] sm:$0xf]  ;;  %v9123_v33 = vor.u32 %v7798_v22, %v6566_v21 }
 0x11b   : > { %v6939_v20 = vor.u32 %v7888_v18, %v6936_v19  ;;  %2318 = vmatpush.bf16.msrb.mxu3 %v7195_v12  ;;  %v7796_v23 = vld [vmem:[%s8761_s11 + $0xa4] sm:$0xf]  ;;  %v6568_v24 = vld [vmem:[%s8761_s11 + $0xb0] sm:$0xf0]  ;;  %v7799_v30 = vld [vmem:[%s8761_s11 + $0xb4] sm:$0xf0] }
 0x11c   : > { %1705 = vmatmul.bf16.gmra.mxu0 %v9027_v13  ;;  %1794 = vmatmul.bf16.gmra.mxu1 %v9029_v14  ;;  %v7797_v31 = vld [vmem:[%s8761_s11 + $0xac] sm:$0xf]  ;;  %v6576_v32 = vld [vmem:[%s8761_s11 + $0xb8] sm:$0xf0]  ;;  %v9125_v34 = vor.u32 %v7796_v23, %v6568_v24  ;;  %v9127_v35 = vor.u32 %v7799_v30, %v6574_v29  ;;  %v6582_v37 = vld [vmem:[%s8761_s11 + $0xc0] sm:$0xf] }
 0x11d   : > { %1883 = vmatmul.bf16.gmra.mxu2 %v9031_v15  ;;  %2051 = vmatpush.bf16.msrb.mxu0 %v6811_v17  ;;  %v9129_v36 = vor.u32 %v7797_v31, %v6576_v32  ;;  %v7802_v38 = vld [vmem:[%s8761_s11 + $0xcc] sm:$0xf0]  ;;  %v7800_v39 = vld [vmem:[%s8761_s11 + $0xc4] sm:$0xf]  ;;  %v6584_v40 = vld [vmem:[%s8761_s11 + $0xd0] sm:$0xf0] }
 0x11e   : > { %1972 = vmatmul.bf16.gmra.mxu3 %v9033_v16  ;;  %2140 = vmatpush.bf16.msrb.mxu1 %v6939_v20  ;;  %v6590_v41 = vld [vmem:[%s8761_s11 + $0xc8] sm:$0xf]  ;;  %v7803_v42 = vld [vmem:[%s8761_s11 + $0xd4] sm:$0xf0]  ;;  %v7801_v43 = vld [vmem:[%s8761_s11 + $0xcc] sm:$0xf]  ;;  %v9143_v45 = vor.u32 %v7802_v38, %v6582_v37  ;;  %v9145_v46 = vor.u32 %v7800_v39, %v6584_v40 }
 0x11f   : > { %v6592_v44 = vld [vmem:[%s8761_s11 + $0xd8] sm:$0xf0]  ;;  %v9147_v47 = vor.u32 %v7803_v42, %v6590_v41  ;;  %v7916_v57 = vld [vmem:[%s8769_s5 + $0x264] sm:$0xf]  ;;  %v7048_v58 = vld [vmem:[%s8769_s5 + $0x270] sm:$0xf0] }
 0x120   : > { %v9149_v49 = vor.u32 %v7801_v43, %v6592_v44  ;;  %v7948_v59 = vld [vmem:[%s8769_s5 + $0x364] sm:$0xf]  ;;  %v7051_v60 = vor.u32 %v7916_v57, %v7048_v58  ;;  %v7176_v61 = vld [vmem:[%s8769_s5 + $0x370] sm:$0xf0]  ;;  %v6598_v63 = vld [vmem:[%s8761_s11 + $0xe0] sm:$0xf] }
 0x121   : > { %v7179_v62 = vor.u32 %v7948_v59, %v7176_v61  ;;  %v7806_v0 = vld [vmem:[%s8761_s11 + $0xec] sm:$0xf0]  ;;  %v7804_v5 = vld [vmem:[%s8761_s11 + $0xe4] sm:$0xf]  ;;  %v6600_v6 = vld [vmem:[%s8761_s11 + $0xf0] sm:$0xf0] }
 0x122   : > { %2230 = vmatpush.bf16.msrb.mxu2 %v7051_v60  ;;  %v7852_v7 = vld [vmem:[%s8769_s5 + $0x64] sm:$0xf]  ;;  %v6792_v8 = vld [vmem:[%s8769_s5 + $0x70] sm:$0xf0]  ;;  %v6606_v10 = vld [vmem:[%s8761_s11 + $0xe8] sm:$0xf]  ;;  %v9171_v21 = vor.u32 %v7806_v0, %v6598_v63  ;;  %v9173_v22 = vor.u32 %v7804_v5, %v6600_v6 }
 0x123   : > { %2319 = vmatpush.bf16.msrb.mxu3 %v7179_v62  ;;  %v7884_v9 = vld [vmem:[%s8769_s5 + $0x164] sm:$0xf]  ;;  %v7807_v11 = vld [vmem:[%s8761_s11 + $0xf4] sm:$0xf0]  ;;  %v6795_v12 = vor.u32 %v7852_v7, %v6792_v8  ;;  %v6920_v17 = vld [vmem:[%s8769_s5 + $0x170] sm:$0xf0] }
 0x124   : > { %v7805_v18 = vld [vmem:[%s8761_s11 + $0xec] sm:$0xf]  ;;  %v6608_v19 = vld [vmem:[%s8761_s11 + $0xf8] sm:$0xf0]  ;;  %v6923_v20 = vor.u32 %v7884_v9, %v6920_v17  ;;  %v9175_v23 = vor.u32 %v7807_v11, %v6606_v10  ;;  %v722_v29 = vld [vmem:[%s8775_s24] sm:$0xf] }
 0x125   : > { %2052 = vmatpush.bf16.msrb.mxu0 %v6795_v12  ;;  %v9177_v24 = vor.u32 %v7805_v18, %v6608_v19  ;;  %v9184_v30 = vperm.slane %v722_v29, 0  ;;  %v6614_v31 = vld [vmem:[%s8761_s11 + $0x100] sm:$0xf]  ;;  %v7810_v32 = vld [vmem:[%s8761_s11 + $0x10c] sm:$0xf0] }
 0x126   : > { %2141 = vmatpush.bf16.msrb.mxu1 %v6923_v20  ;;  %v7808_v37 = vld [vmem:[%s8761_s11 + $0x104] sm:$0xf]  ;;  %v6616_v38 = vld [vmem:[%s8761_s11 + $0x110] sm:$0xf0]  ;;  %v6622_v39 = vld [vmem:[%s8761_s11 + $0x108] sm:$0xf]  ;;  %v9194_v43 = vor.u32 %v7810_v32, %v6614_v31 }
 0x127   : > { %v7811_v40 = vld [vmem:[%s8761_s11 + $0x114] sm:$0xf0]  ;;  %v7809_v41 = vld [vmem:[%s8761_s11 + $0x10c] sm:$0xf]  ;;  %v6624_v42 = vld [vmem:[%s8761_s11 + $0x118] sm:$0xf0]  ;;  %v9196_v57 = vor.u32 %v7808_v37, %v6616_v38 }
 0x128   : > { %v9198_v58 = vor.u32 %v7811_v40, %v6622_v39  ;;  %v9201_v61 = vor.u32 %v7809_v41, %v6624_v42  ;;  %v7912_v63 = vld [vmem:[%s8769_s5 + $0x244] sm:$0xf]  ;;  %v7032_v0 = vld [vmem:[%s8769_s5 + $0x250] sm:$0xf0]  ;;  %v6630_v20 = vld [vmem:[%s8761_s11 + $0x120] sm:$0xf] }
 0x129   : > { %v7944_v5 = vld [vmem:[%s8769_s5 + $0x344] sm:$0xf]  ;;  %v7035_v7 = vor.u32 %v7912_v63, %v7032_v0  ;;  %v7160_v8 = vld [vmem:[%s8769_s5 + $0x350] sm:$0xf0]  ;;  %v7814_v31 = vld [vmem:[%s8761_s11 + $0x12c] sm:$0xf0] }
 0x12a   : > { %v7163_v12 = vor.u32 %v7944_v5, %v7160_v8  ;;  %v7812_v32 = vld [vmem:[%s8761_s11 + $0x124] sm:$0xf]  ;;  %v6632_v37 = vld [vmem:[%s8761_s11 + $0x130] sm:$0xf0]  ;;  %v6638_v38 = vld [vmem:[%s8761_s11 + $0x128] sm:$0xf]  ;;  %v9224_v5 = vor.u32 %v7814_v31, %v6630_v20 }
 0x12b   : > { %2231 = vmatpush.bf16.msrb.mxu2 %v7035_v7  ;;  %v7848_v39 = vld [vmem:[%s8769_s5 + $0x44] sm:$0xf]  ;;  %v6776_v40 = vld [vmem:[%s8769_s5 + $0x50] sm:$0xf0]  ;;  %v7815_v41 = vld [vmem:[%s8761_s11 + $0x134] sm:$0xf0] }
 0x12c   : > { %1710 = vmatmul.bf16.gmra.mxu0 %v9047_v25  ;;  %1799 = vmatmul.bf16.gmra.mxu1 %v9049_v26  ;;  %v6779_v42 = vor.u32 %v7848_v39, %v6776_v40 }
 0x12d   : > { %1888 = vmatmul.bf16.gmra.mxu2 %v9051_v27  ;;  %2320 = vmatpush.bf16.msrb.mxu3 %v7163_v12 }
 0x12e   : > { %1977 = vmatmul.bf16.gmra.mxu3 %v9053_v28  ;;  %2053 = vmatpush.bf16.msrb.mxu0 %v6779_v42 }
 0x13c   : > { %1715 = vmatmul.bf16.gmra.mxu0 %v9075_v50  ;;  %1804 = vmatmul.bf16.gmra.mxu1 %v9077_v51 }
 0x13d   : > { %1893 = vmatmul.bf16.gmra.mxu2 %v9079_v55 }
 0x13e   : > { %1982 = vmatmul.bf16.gmra.mxu3 %v9081_v56 }
 0x14c   : > { %1720 = vmatmul.bf16.gmra.mxu0 %v9095_v1  ;;  %1809 = vmatmul.bf16.gmra.mxu1 %v9097_v2 }
 0x14d   : > { %1898 = vmatmul.bf16.gmra.mxu2 %v9099_v3 }
 0x14e   : > { %1987 = vmatmul.bf16.gmra.mxu3 %v9101_v4 }
 0x15c   : > { %1725 = vmatmul.bf16.gmra.mxu0 %v9123_v33  ;;  %1814 = vmatmul.bf16.gmra.mxu1 %v9125_v34 }
 0x15d   : > { %1903 = vmatmul.bf16.gmra.mxu2 %v9127_v35 }
 0x15e   : > { %1992 = vmatmul.bf16.gmra.mxu3 %v9129_v36 }
 0x16c   : > { %1730 = vmatmul.bf16.gmra.mxu0 %v9143_v45  ;;  %1819 = vmatmul.bf16.gmra.mxu1 %v9145_v46 }
 0x16d   : > { %1908 = vmatmul.bf16.gmra.mxu2 %v9147_v47 }
 0x16e   : > { %1997 = vmatmul.bf16.gmra.mxu3 %v9149_v49 }
 0x17c   : > { %1735 = vmatmul.bf16.gmra.mxu0 %v9171_v21  ;;  %1824 = vmatmul.bf16.gmra.mxu1 %v9173_v22 }
 0x17d   : > { %1913 = vmatmul.bf16.gmra.mxu2 %v9175_v23 }
 0x17e   : > { %2002 = vmatmul.bf16.gmra.mxu3 %v9177_v24 }
 0x189   : > { %v1701_v44 = vpop.f32.mrf.mxu0  ;;  %v1790_v60 = vpop.f32.mrf.mxu1 }
 0x18a   : > { %v1702_v59 = vadd.f32 %v1701_v44, %v9184_v30  ;;  %v7880_v44 = vld [vmem:[%s8769_s5 + $0x144] sm:$0xf] }
 0x18c   : > { %v1791_v62 = vadd.f32 %v1790_v60, %v1702_v59  ;;  %1740 = vmatmul.bf16.gmra.mxu0 %v9194_v43  ;;  %1829 = vmatmul.bf16.gmra.mxu1 %v9196_v57  ;;  %v6904_v59 = vld [vmem:[%s8769_s5 + $0x150] sm:$0xf0]  ;;  %v7813_v60 = vld [vmem:[%s8761_s11 + $0x12c] sm:$0xf] }
 0x18d   : > { %1918 = vmatmul.bf16.gmra.mxu2 %v9198_v58  ;;  %v6907_v63 = vor.u32 %v7880_v44, %v6904_v59  ;;  %v6646_v59 = vld [vmem:[%s8761_s11 + $0x140] sm:$0xf] }
 0x18e   : > { %2007 = vmatmul.bf16.gmra.mxu3 %v9201_v61 }
 0x18f   : > { %2142 = vmatpush.bf16.msrb.mxu1 %v6907_v63  ;;  %v6648_v63 = vld [vmem:[%s8761_s11 + $0x150] sm:$0xf0] }
 0x190   : > { %v1879_v6 = vpop.f32.mrf.mxu2 }
 0x191   : > { %v1880_v9 = vadd.f32 %v1879_v6, %v1791_v62  ;;  %v1968_v10 = vpop.f32.mrf.mxu3  ;;  %v1703_v11 = vpop.f32.mrf.mxu0  ;;  %v6640_v62 = vld [vmem:[%s8761_s11 + $0x138] sm:$0xf0] }
 0x192   : > { %v1704_v17 = vadd.f32 %v1703_v11, %v9184_v30  ;;  %v1792_v18 = vpop.f32.mrf.mxu1 }
 0x193   : > { %v1969_v19 = vadd.f32 %v1968_v10, %v1880_v9  ;;  %v9226_v9 = vor.u32 %v7812_v32, %v6632_v37  ;;  %v9228_v10 = vor.u32 %v7815_v41, %v6638_v38 }
 0x194   : > { %v1793_v29 = vadd.f32 %v1792_v18, %v1704_v17  ;;  %v9231_v17 = vor.u32 %v7813_v60, %v6640_v62  ;;  %v7818_v60 = vld [vmem:[%s8761_s11 + $0x14c] sm:$0xf0]  ;;  %v7816_v62 = vld [vmem:[%s8761_s11 + $0x144] sm:$0xf] }
 0x195   : > { %10959 = vst [vmem:[#allocation30_spill] sm:$0xff] %v9226_v9  ;;  %v3116_v20 = vmax.f32 %v1969_v19, 0.0 }
 0x196   : > { %10960 = vst [vmem:[#allocation31_spill] sm:$0xff] %v9228_v10 }
 0x197   : > { %10961 = vst [vmem:[#allocation32_spill] sm:$0xff] %v9231_v17 }
 0x198   : > { %v1881_v0 = vpop.f32.mrf.mxu2 }
 0x199   : > { %v1882_v6 = vadd.f32 %v1881_v0, %v1793_v29  ;;  %v1970_v7 = vpop.f32.mrf.mxu3  ;;  %v1706_v8 = vpop.f32.mrf.mxu0  ;;  %v6654_v0 = vld [vmem:[%s8761_s11 + $0x148] sm:$0xf] }
 0x19a   : > { %v1707_v11 = vadd.f32 %v1706_v8, %v9184_v30  ;;  %v1795_v12 = vpop.f32.mrf.mxu1  ;;  %v6656_v8 = vld [vmem:[%s8761_s11 + $0x158] sm:$0xf0] }
 0x19b   : > { %v1971_v18 = vadd.f32 %v1970_v7, %v1882_v6  ;;  %v7819_v6 = vld [vmem:[%s8761_s11 + $0x154] sm:$0xf0]  ;;  %v7817_v7 = vld [vmem:[%s8761_s11 + $0x14c] sm:$0xf] }
 0x19c   : > { %v1796_v39 = vadd.f32 %v1795_v12, %v1707_v11  ;;  %1745 = vmatmul.bf16.gmra.mxu0 %v9224_v5  ;;  %1834 = vmatmul.bf16.gmra.mxu1 %v9226_v9  ;;  %v9248_v12 = vor.u32 %v7818_v60, %v6646_v59 }
 0x19d   : > { %v3120_v29 = vmax.f32 %v1971_v18, 0.0  ;;  %1923 = vmatmul.bf16.gmra.mxu2 %v9228_v10 }
 0x19e   : > { %2012 = vmatmul.bf16.gmra.mxu3 %v9231_v17  ;;  %10963 = vst [vmem:[#allocation34_spill] sm:$0xff] %v9248_v12 }
 0x19f   : > { %v9237_v31 = vpack.c.bf16 %v3120_v29, %v3116_v20  ;;  %v9250_v29 = vor.u32 %v7816_v62, %v6648_v63  ;;  %v7908_v62 = vld [vmem:[%s8769_s5 + $0x224] sm:$0xf]  ;;  %v7016_v63 = vld [vmem:[%s8769_s5 + $0x230] sm:$0xf0] }
 0x1a0   : > { %v1884_v32 = vpop.f32.mrf.mxu2 }
 0x1a1   : > { %10962 = vst [vmem:[#allocation33_spill] sm:$0xff] %v9237_v31  ;;  %v1885_v37 = vadd.f32 %v1884_v32, %v1796_v39  ;;  %v1973_v38 = vpop.f32.mrf.mxu3  ;;  %v1708_v40 = vpop.f32.mrf.mxu0  ;;  %v9252_v32 = vor.u32 %v7819_v6, %v6654_v0  ;;  %v7940_v0 = vld [vmem:[%s8769_s5 + $0x324] sm:$0xf]  ;;  %v7823_v31 = vld [vmem:[%s8761_s11 + $0x174] sm:$0xf0] }
 0x1a2   : > { %v1709_v19 = vadd.f32 %v1708_v40, %v9184_v30  ;;  %v1797_v41 = vpop.f32.mrf.mxu1  ;;  %10964 = vst [vmem:[#allocation35_spill] sm:$0xff] %v9250_v29  ;;  %v9255_v40 = vor.u32 %v7817_v7, %v6656_v8  ;;  %v7019_v7 = vor.u32 %v7908_v62, %v7016_v63  ;;  %v7820_v62 = vld [vmem:[%s8761_s11 + $0x164] sm:$0xf]  ;;  %v6670_v63 = vld [vmem:[%s8761_s11 + $0x168] sm:$0xf] }
 0x1a3   : > { %v1974_v42 = vadd.f32 %v1973_v38, %v1885_v37  ;;  %10965 = vst [vmem:[#allocation36_spill] sm:$0xff] %v9252_v32 }
 0x1a4   : > { %v1798_v44 = vadd.f32 %v1797_v41, %v1709_v19  ;;  %10966 = vst [vmem:[#allocation37_spill] sm:$0xff] %v9255_v40  ;;  %2232 = vmatpush.bf16.msrb.mxu2 %v7019_v7 }
 0x1a8   : > { %v1886_v11 = vpop.f32.mrf.mxu2 }
 0x1a9   : > { %v1887_v18 = vadd.f32 %v1886_v11, %v1798_v44  ;;  %v1975_v39 = vpop.f32.mrf.mxu3  ;;  %v1711_v20 = vpop.f32.mrf.mxu0  ;;  %v3124_v44 = vmax.f32 %v1974_v42, 0.0  ;;  %v7144_v42 = vld [vmem:[%s8769_s5 + $0x330] sm:$0xf0] }
 0x1aa   : > { %v1712_v37 = vadd.f32 %v1711_v20, %v9184_v30  ;;  %v1800_v38 = vpop.f32.mrf.mxu1 }
 0x1ab   : > { %v1976_v19 = vadd.f32 %v1975_v39, %v1887_v18  ;;  %v7147_v39 = vor.u32 %v7940_v0, %v7144_v42  ;;  %v7876_v42 = vld [vmem:[%s8769_s5 + $0x124] sm:$0xf] }
 0x1ac   : > { %v1801_v41 = vadd.f32 %v1800_v38, %v1712_v37  ;;  %1750 = vmatmul.bf16.gmra.mxu0 %v9248_v12  ;;  %1839 = vmatmul.bf16.gmra.mxu1 %v9250_v29 }
 0x1ad   : > { %v3128_v59 = vmax.f32 %v1976_v19, 0.0  ;;  %1928 = vmatmul.bf16.gmra.mxu2 %v9252_v32  ;;  %v6662_v19 = vld [vmem:[%s8761_s11 + $0x160] sm:$0xf]  ;;  %2321 = vmatpush.bf16.msrb.mxu3 %v7147_v39  ;;  %v6672_v32 = vld [vmem:[%s8761_s11 + $0x178] sm:$0xf0] }
 0x1ae   : > { %2017 = vmatmul.bf16.gmra.mxu3 %v9255_v40  ;;  %v6888_v40 = vld [vmem:[%s8769_s5 + $0x130] sm:$0xf0] }
 0x1af   : > { %v9261_v60 = vpack.c.bf16 %v3128_v59, %v3124_v44  ;;  %v7822_v59 = vld [vmem:[%s8761_s11 + $0x16c] sm:$0xf0]  ;;  %v6891_v29 = vor.u32 %v7876_v42, %v6888_v40  ;;  %v6686_v42 = vld [vmem:[%s8761_s11 + $0x188] sm:$0xf] }
 0x1b0   : > { %v1889_v6 = vpop.f32.mrf.mxu2  ;;  %v9280_v7 = vor.u32 %v7822_v59, %v6662_v19 }
 0x1b1   : > { %10967 = vst [vmem:[#allocation38_spill] sm:$0xff] %v9261_v60  ;;  %v1890_v8 = vadd.f32 %v1889_v6, %v1801_v41  ;;  %v1978_v11 = vpop.f32.mrf.mxu3  ;;  %v1713_v18 = vpop.f32.mrf.mxu0  ;;  %v6664_v41 = vld [vmem:[%s8761_s11 + $0x170] sm:$0xf0]  ;;  %v7844_v6 = vld [vmem:[%s8769_s5 + $0x24] sm:$0xf]  ;;  %2143 = vmatpush.bf16.msrb.mxu1 %v6891_v29 }
 0x1b2   : > { %v1714_v20 = vadd.f32 %v1713_v18, %v9184_v30  ;;  %v1802_v37 = vpop.f32.mrf.mxu1  ;;  %v6760_v60 = vld [vmem:[%s8769_s5 + $0x30] sm:$0xf0]  ;;  %v7821_v18 = vld [vmem:[%s8761_s11 + $0x16c] sm:$0xf]  ;;  %10968 = vst [vmem:[#allocation39_spill] sm:$0xff] %v9280_v7 }
 0x1b3   : > { %v1979_v38 = vadd.f32 %v1978_v11, %v1890_v8  ;;  %v6763_v0 = vor.u32 %v7844_v6, %v6760_v60  ;;  %v9287_v6 = vor.u32 %v7821_v18, %v6672_v32  ;;  %v7827_v18 = vld [vmem:[%s8761_s11 + $0x194] sm:$0xf0] }
 0x1b4   : > { %v1803_v44 = vadd.f32 %v1802_v37, %v1714_v20  ;;  %v9282_v20 = vor.u32 %v7820_v62, %v6664_v41  ;;  %v9284_v37 = vor.u32 %v7823_v31, %v6670_v63  ;;  %v6678_v62 = vld [vmem:[%s8761_s11 + $0x180] sm:$0xf]  ;;  %v7826_v41 = vld [vmem:[%s8761_s11 + $0x18c] sm:$0xf0]  ;;  %v7824_v63 = vld [vmem:[%s8761_s11 + $0x184] sm:$0xf] }
 0x1b5   : > { %2054 = vmatpush.bf16.msrb.mxu0 %v6763_v0  ;;  %10971 = vst [vmem:[#allocation42_spill] sm:$0xff] %v9287_v6  ;;  %v3132_v40 = vmax.f32 %v1979_v38, 0.0  ;;  %v6680_v0 = vld [vmem:[%s8761_s11 + $0x190] sm:$0xf0] }
 0x1b6   : > { %10969 = vst [vmem:[#allocation40_spill] sm:$0xff] %v9282_v20 }
 0x1b7   : > { %10970 = vst [vmem:[#allocation41_spill] sm:$0xff] %v9284_v37 }
 0x1b8   : > { %v1891_v12 = vpop.f32.mrf.mxu2 }
 0x1b9   : > { %v1892_v8 = vadd.f32 %v1891_v12, %v1803_v44  ;;  %v1980_v11 = vpop.f32.mrf.mxu3  ;;  %v1716_v39 = vpop.f32.mrf.mxu0 }
 0x1ba   : > { %v1717_v17 = vadd.f32 %v1716_v39, %v9184_v30  ;;  %v1805_v60 = vpop.f32.mrf.mxu1 }
 0x1bb   : > { %v1981_v10 = vadd.f32 %v1980_v11, %v1892_v8  ;;  %v7825_v8 = vld [vmem:[%s8761_s11 + $0x18c] sm:$0xf]  ;;  %v6688_v11 = vld [vmem:[%s8761_s11 + $0x198] sm:$0xf0] }
 0x1bc   : > { %v1806_v9 = vadd.f32 %v1805_v60, %v1717_v17  ;;  %1755 = vmatmul.bf16.gmra.mxu0 %v9280_v7  ;;  %1844 = vmatmul.bf16.gmra.mxu1 %v9282_v20  ;;  %v9304_v60 = vor.u32 %v7826_v41, %v6678_v62 }
 0x1bd   : > { %v3136_v12 = vmax.f32 %v1981_v10, 0.0  ;;  %1933 = vmatmul.bf16.gmra.mxu2 %v9284_v37 }
 0x1be   : > { %2022 = vmatmul.bf16.gmra.mxu3 %v9287_v6  ;;  %10973 = vst [vmem:[#allocation44_spill] sm:$0xff] %v9304_v60 }
 0x1bf   : > { %v9293_v31 = vpack.c.bf16 %v3136_v12, %v3132_v40 }
 0x1c0   : > { %v1894_v17 = vpop.f32.mrf.mxu2 }
 0x1c1   : > { %10972 = vst [vmem:[#allocation43_spill] sm:$0xff] %v9293_v31  ;;  %v1895_v29 = vadd.f32 %v1894_v17, %v1806_v9  ;;  %v1983_v32 = vpop.f32.mrf.mxu3  ;;  %v1718_v19 = vpop.f32.mrf.mxu0  ;;  %v9306_v17 = vor.u32 %v7824_v63, %v6680_v0  ;;  %v7904_v63 = vld [vmem:[%s8769_s5 + $0x204] sm:$0xf]  ;;  %v7000_v0 = vld [vmem:[%s8769_s5 + $0x210] sm:$0xf0] }
 0x1c2   : > { %v1719_v38 = vadd.f32 %v1718_v19, %v9184_v30  ;;  %v1807_v10 = vpop.f32.mrf.mxu1 }
 0x1c3   : > { %v1984_v44 = vadd.f32 %v1983_v32, %v1895_v29  ;;  %10974 = vst [vmem:[#allocation45_spill] sm:$0xff] %v9306_v17  ;;  %v9308_v29 = vor.u32 %v7827_v18, %v6686_v42  ;;  %v7936_v42 = vld [vmem:[%s8769_s5 + $0x304] sm:$0xf] }
 0x1c4   : > { %v1808_v59 = vadd.f32 %v1807_v10, %v1719_v38  ;;  %v9311_v38 = vor.u32 %v7825_v8, %v6688_v11  ;;  %v7003_v8 = vor.u32 %v7904_v63, %v7000_v0  ;;  %v7828_v63 = vld [vmem:[%s8761_s11 + $0x1a4] sm:$0xf]  ;;  %v6702_v0 = vld [vmem:[%s8761_s11 + $0x1a8] sm:$0xf] }
 0x1c5   : > { %10975 = vst [vmem:[#allocation46_spill] sm:$0xff] %v9308_v29 }
 0x1c6   : > { %10976 = vst [vmem:[#allocation47_spill] sm:$0xff] %v9311_v38  ;;  %2233 = vmatpush.bf16.msrb.mxu2 %v7003_v8 }
 0x1c8   : > { %v1896_v39 = vpop.f32.mrf.mxu2 }
 0x1c9   : > { %v1897_v40 = vadd.f32 %v1896_v39, %v1808_v59  ;;  %v1985_v9 = vpop.f32.mrf.mxu3  ;;  %v1721_v12 = vpop.f32.mrf.mxu0  ;;  %v3140_v59 = vmax.f32 %v1984_v44, 0.0  ;;  %v7128_v44 = vld [vmem:[%s8769_s5 + $0x310] sm:$0xf0] }
 0x1ca   : > { %v1722_v32 = vadd.f32 %v1721_v12, %v9184_v30  ;;  %v1810_v19 = vpop.f32.mrf.mxu1 }
 0x1cb   : > { %v1986_v10 = vadd.f32 %v1985_v9, %v1897_v40  ;;  %v7131_v9 = vor.u32 %v7936_v42, %v7128_v44  ;;  %v7872_v44 = vld [vmem:[%s8769_s5 + $0x104] sm:$0xf] }
 0x1cc   : > { %v1811_v31 = vadd.f32 %v1810_v19, %v1722_v32  ;;  %1760 = vmatmul.bf16.gmra.mxu0 %v9304_v60  ;;  %1849 = vmatmul.bf16.gmra.mxu1 %v9306_v17  ;;  %v6704_v17 = vld [vmem:[%s8761_s11 + $0x1b8] sm:$0xf0] }
 0x1cd   : > { %v3144_v62 = vmax.f32 %v1986_v10, 0.0  ;;  %1938 = vmatmul.bf16.gmra.mxu2 %v9308_v29  ;;  %v6694_v10 = vld [vmem:[%s8761_s11 + $0x1a0] sm:$0xf]  ;;  %2322 = vmatpush.bf16.msrb.mxu3 %v7131_v9  ;;  %v6872_v29 = vld [vmem:[%s8769_s5 + $0x110] sm:$0xf0] }
 0x1ce   : > { %2027 = vmatmul.bf16.gmra.mxu3 %v9311_v38  ;;  %v7831_v38 = vld [vmem:[%s8761_s11 + $0x1b4] sm:$0xf0]  ;;  %v6875_v60 = vor.u32 %v7872_v44, %v6872_v29  ;;  %v6718_v44 = vld [vmem:[%s8761_s11 + $0x1c8] sm:$0xf] }
 0x1cf   : > { %v9317_v41 = vpack.c.bf16 %v3144_v62, %v3140_v59  ;;  %v7830_v62 = vld [vmem:[%s8761_s11 + $0x1ac] sm:$0xf0] }
 0x1d0   : > { %v1899_v18 = vpop.f32.mrf.mxu2  ;;  %v9336_v8 = vor.u32 %v7830_v62, %v6694_v10  ;;  %2144 = vmatpush.bf16.msrb.mxu1 %v6875_v60 }
 0x1d1   : > { %10977 = vst [vmem:[#allocation48_spill] sm:$0xff] %v9317_v41  ;;  %v1900_v11 = vadd.f32 %v1899_v18, %v1811_v31  ;;  %v1988_v39 = vpop.f32.mrf.mxu3  ;;  %v1723_v40 = vpop.f32.mrf.mxu0  ;;  %v6696_v31 = vld [vmem:[%s8761_s11 + $0x1b0] sm:$0xf0]  ;;  %v7840_v18 = vld [vmem:[%s8769_s5 + $0x4] sm:$0xf] }
 0x1d2   : > { %v1724_v12 = vadd.f32 %v1723_v40, %v9184_v30  ;;  %v1812_v32 = vpop.f32.mrf.mxu1  ;;  %v6744_v41 = vld [vmem:[%s8769_s5 + $0x10] sm:$0xf0]  ;;  %v7829_v40 = vld [vmem:[%s8761_s11 + $0x1ac] sm:$0xf]  ;;  %10978 = vst [vmem:[#allocation49_spill] sm:$0xff] %v9336_v8 }
 0x1d3   : > { %v1989_v19 = vadd.f32 %v1988_v39, %v1900_v11  ;;  %v6747_v42 = vor.u32 %v7840_v18, %v6744_v41  ;;  %v9343_v18 = vor.u32 %v7829_v40, %v6704_v17  ;;  %v7835_v40 = vld [vmem:[%s8761_s11 + $0x1d4] sm:$0xf0] }
 0x1d4   : > { %v1813_v59 = vadd.f32 %v1812_v32, %v1724_v12  ;;  %v9338_v12 = vor.u32 %v7828_v63, %v6696_v31  ;;  %v9340_v32 = vor.u32 %v7831_v38, %v6702_v0  ;;  %v6710_v63 = vld [vmem:[%s8761_s11 + $0x1c0] sm:$0xf]  ;;  %v7834_v31 = vld [vmem:[%s8761_s11 + $0x1cc] sm:$0xf0]  ;;  %v7832_v0 = vld [vmem:[%s8761_s11 + $0x1c4] sm:$0xf] }
 0x1d5   : > { %2055 = vmatpush.bf16.msrb.mxu0 %v6747_v42  ;;  %10981 = vst [vmem:[#allocation52_spill] sm:$0xff] %v9343_v18  ;;  %v3148_v29 = vmax.f32 %v1989_v19, 0.0  ;;  %v6712_v42 = vld [vmem:[%s8761_s11 + $0x1d0] sm:$0xf0] }
 0x1d6   : > { %10979 = vst [vmem:[#allocation50_spill] sm:$0xff] %v9338_v12 }
 0x1d7   : > { %10980 = vst [vmem:[#allocation51_spill] sm:$0xff] %v9340_v32 }
 0x1d8   : > { %v1901_v6 = vpop.f32.mrf.mxu2 }
 0x1d9   : > { %v1902_v11 = vadd.f32 %v1901_v6, %v1813_v59  ;;  %v1990_v39 = vpop.f32.mrf.mxu3  ;;  %v1726_v9 = vpop.f32.mrf.mxu0 }
 0x1da   : > { %v1727_v37 = vadd.f32 %v1726_v9, %v9184_v30  ;;  %v1815_v41 = vpop.f32.mrf.mxu1 }
 0x1db   : > { %v1991_v20 = vadd.f32 %v1990_v39, %v1902_v11  ;;  %v7833_v11 = vld [vmem:[%s8761_s11 + $0x1cc] sm:$0xf]  ;;  %v6720_v39 = vld [vmem:[%s8761_s11 + $0x1d8] sm:$0xf0] }
 0x1dc   : > { %v1816_v7 = vadd.f32 %v1815_v41, %v1727_v37  ;;  %1765 = vmatmul.bf16.gmra.mxu0 %v9336_v8  ;;  %1854 = vmatmul.bf16.gmra.mxu1 %v9338_v12  ;;  %v9360_v41 = vor.u32 %v7834_v31, %v6710_v63 }
 0x1dd   : > { %v3152_v6 = vmax.f32 %v1991_v20, 0.0  ;;  %1943 = vmatmul.bf16.gmra.mxu2 %v9340_v32 }
 0x1de   : > { %2032 = vmatmul.bf16.gmra.mxu3 %v9343_v18  ;;  %10983 = vst [vmem:[#allocation54_spill] sm:$0xff] %v9360_v41 }
 0x1df   : > { %v9349_v60 = vpack.c.bf16 %v3152_v6, %v3148_v29 }
 0x1e0   : > { %v1904_v37 = vpop.f32.mrf.mxu2 }
 0x1e1   : > { %10982 = vst [vmem:[#allocation53_spill] sm:$0xff] %v9349_v60  ;;  %v1905_v17 = vadd.f32 %v1904_v37, %v1816_v7  ;;  %v1993_v38 = vpop.f32.mrf.mxu3  ;;  %v1728_v10 = vpop.f32.mrf.mxu0  ;;  %v9362_v37 = vor.u32 %v7832_v0, %v6712_v42  ;;  %v7118_v0 = vld [vmem:[%s8769_s5 + $0x2e8] sm:$0xf]  ;;  %v7935_v42 = vld [vmem:[%s8769_s5 + $0x2f4] sm:$0xf0] }
 0x1e2   : > { %v1729_v19 = vadd.f32 %v1728_v10, %v9184_v30  ;;  %v1817_v20 = vpop.f32.mrf.mxu1 }
 0x1e3   : > { %v1994_v59 = vadd.f32 %v1993_v38, %v1905_v17  ;;  %10984 = vst [vmem:[#allocation55_spill] sm:$0xff] %v9362_v37  ;;  %v9364_v17 = vor.u32 %v7835_v40, %v6718_v44  ;;  %v7246_v44 = vld [vmem:[%s8769_s5 + $0x3e8] sm:$0xf] }
 0x1e4   : > { %v1818_v62 = vadd.f32 %v1817_v20, %v1729_v19  ;;  %v9367_v19 = vor.u32 %v7833_v11, %v6720_v39  ;;  %v7119_v11 = vor.u32 %v7935_v42, %v7118_v0  ;;  %v7836_v0 = vld [vmem:[%s8761_s11 + $0x1e4] sm:$0xf]  ;;  %v6734_v42 = vld [vmem:[%s8761_s11 + $0x1e8] sm:$0xf] }
 0x1e5   : > { %10985 = vst [vmem:[#allocation56_spill] sm:$0xff] %v9364_v17 }
 0x1e6   : > { %10986 = vst [vmem:[#allocation57_spill] sm:$0xff] %v9367_v19  ;;  %2582 = vmatpush.bf16.msra.mxu2 %v7119_v11 }
 0x1e8   : > { %v1906_v9 = vpop.f32.mrf.mxu2 }
 0x1e9   : > { %v1907_v29 = vadd.f32 %v1906_v9, %v1818_v62  ;;  %v1995_v7 = vpop.f32.mrf.mxu3  ;;  %v1731_v6 = vpop.f32.mrf.mxu0  ;;  %v3156_v62 = vmax.f32 %v1994_v59, 0.0  ;;  %v7967_v59 = vld [vmem:[%s8769_s5 + $0x3f4] sm:$0xf0] }
 0x1ea   : > { %v1732_v38 = vadd.f32 %v1731_v6, %v9184_v30  ;;  %v1820_v10 = vpop.f32.mrf.mxu1 }
 0x1eb   : > { %v1996_v20 = vadd.f32 %v1995_v7, %v1907_v29  ;;  %v7247_v7 = vor.u32 %v7967_v59, %v7246_v44  ;;  %v6990_v59 = vld [vmem:[%s8769_s5 + $0x1e8] sm:$0xf] }
 0x1ec   : > { %v1821_v60 = vadd.f32 %v1820_v10, %v1732_v38  ;;  %1770 = vmatmul.bf16.gmra.mxu0 %v9360_v41  ;;  %1859 = vmatmul.bf16.gmra.mxu1 %v9362_v37  ;;  %v6736_v37 = vld [vmem:[%s8761_s11 + $0x1f8] sm:$0xf0] }
 0x1ed   : > { %v3160_v63 = vmax.f32 %v1996_v20, 0.0  ;;  %1948 = vmatmul.bf16.gmra.mxu2 %v9364_v17  ;;  %v6726_v20 = vld [vmem:[%s8761_s11 + $0x1e0] sm:$0xf]  ;;  %2671 = vmatpush.bf16.msra.mxu3 %v7247_v7  ;;  %v7903_v17 = vld [vmem:[%s8769_s5 + $0x1f4] sm:$0xf0] }
 0x1ee   : > { %2037 = vmatmul.bf16.gmra.mxu3 %v9367_v19  ;;  %v7839_v19 = vld [vmem:[%s8761_s11 + $0x1f4] sm:$0xf0]  ;;  %v6991_v41 = vor.u32 %v7903_v17, %v6990_v59 }
 0x1ef   : > { %v9373_v31 = vpack.c.bf16 %v3160_v63, %v3156_v62  ;;  %v7838_v63 = vld [vmem:[%s8761_s11 + $0x1ec] sm:$0xf0] }
 0x1f0   : > { %v1909_v40 = vpop.f32.mrf.mxu2  ;;  %v9392_v11 = vor.u32 %v7838_v63, %v6726_v20  ;;  %2493 = vmatpush.bf16.msra.mxu1 %v6991_v41 }
 0x1f1   : > { %10987 = vst [vmem:[#allocation58_spill] sm:$0xff] %v9373_v31  ;;  %v1910_v39 = vadd.f32 %v1909_v40, %v1821_v60  ;;  %v1998_v9 = vpop.f32.mrf.mxu3  ;;  %v1733_v29 = vpop.f32.mrf.mxu0  ;;  %v6728_v60 = vld [vmem:[%s8761_s11 + $0x1f0] sm:$0xf0]  ;;  %v6862_v40 = vld [vmem:[%s8769_s5 + $0xe8] sm:$0xf] }
 0x1f2   : > { %v1734_v6 = vadd.f32 %v1733_v29, %v9184_v30  ;;  %v1822_v38 = vpop.f32.mrf.mxu1  ;;  %v7871_v31 = vld [vmem:[%s8769_s5 + $0xf4] sm:$0xf0]  ;;  %v7837_v29 = vld [vmem:[%s8761_s11 + $0x1ec] sm:$0xf] }
 0x1f3   : > { %v1999_v10 = vadd.f32 %v1998_v9, %v1910_v39  ;;  %v6863_v44 = vor.u32 %v7871_v31, %v6862_v40  ;;  %v9399_v40 = vor.u32 %v7837_v29, %v6736_v37 }
 0x1f4   : > { %v1823_v62 = vadd.f32 %v1822_v38, %v1734_v6  ;;  %v9394_v6 = vor.u32 %v7836_v0, %v6728_v60  ;;  %v9396_v38 = vor.u32 %v7839_v19, %v6734_v42 }
 0x1f5   : > { %2404 = vmatpush.bf16.msra.mxu0 %v6863_v44  ;;  %v3164_v17 = vmax.f32 %v1999_v10, 0.0 }
 0x1f8   : > { %v1911_v18 = vpop.f32.mrf.mxu2 }
 0x1f9   : > { %v1912_v39 = vadd.f32 %v1911_v18, %v1823_v62  ;;  %v2000_v9 = vpop.f32.mrf.mxu3  ;;  %v1736_v7 = vpop.f32.mrf.mxu0 }
 0x1fa   : > { %v1737_v32 = vadd.f32 %v1736_v7, %v9184_v30  ;;  %v1825_v31 = vpop.f32.mrf.mxu1 }
 0x1fb   : > { %v2001_v12 = vadd.f32 %v2000_v9, %v1912_v39 }
 0x1fc   : > { %v1826_v8 = vadd.f32 %v1825_v31, %v1737_v32  ;;  %1775 = vmatmul.bf16.gmra.mxu0 %v9392_v11  ;;  %1864 = vmatmul.bf16.gmra.mxu1 %v9394_v6 }
 0x1fd   : > { %v3168_v20 = vmax.f32 %v2001_v12, 0.0  ;;  %1953 = vmatmul.bf16.gmra.mxu2 %v9396_v38 }
 0x1fe   : > { %2042 = vmatmul.bf16.gmra.mxu3 %v9399_v40 }
 0x1ff   : > { %v9405_v18 = vpack.c.bf16 %v3168_v20, %v3164_v17  ;;  %v7102_v17 = vld [vmem:[%s8769_s5 + $0x2c8] sm:$0xf]  ;;  %v7931_v20 = vld [vmem:[%s8769_s5 + $0x2d4] sm:$0xf0] }
 0x200   : > { %v1914_v41 = vpop.f32.mrf.mxu2 }
 0x201   : > { %10988 = vst [vmem:[#allocation59_spill] sm:$0xff] %v9405_v18  ;;  %v1915_v19 = vadd.f32 %v1914_v41, %v1826_v8  ;;  %v2003_v62 = vpop.f32.mrf.mxu3  ;;  %v1738_v63 = vpop.f32.mrf.mxu0  ;;  %v7230_v41 = vld [vmem:[%s8769_s5 + $0x3c8] sm:$0xf] }
 0x202   : > { %v1739_v37 = vadd.f32 %v1738_v63, %v9184_v30  ;;  %v1827_v0 = vpop.f32.mrf.mxu1  ;;  %v7963_v63 = vld [vmem:[%s8769_s5 + $0x3d4] sm:$0xf0] }
 0x203   : > { %v2004_v32 = vadd.f32 %v2003_v62, %v1915_v19  ;;  %v7103_v62 = vor.u32 %v7931_v20, %v7102_v17 }
 0x204   : > { %v1828_v60 = vadd.f32 %v1827_v0, %v1739_v37 }
 0x205   : > { %v3172_v9 = vmax.f32 %v2004_v32, 0.0  ;;  %2583 = vmatpush.bf16.msra.mxu2 %v7103_v62 }
 0x208   : > { %v1916_v10 = vpop.f32.mrf.mxu2 }
 0x209   : > { %v1917_v12 = vadd.f32 %v1916_v10, %v1828_v60  ;;  %v2005_v42 = vpop.f32.mrf.mxu3  ;;  %v1741_v44 = vpop.f32.mrf.mxu0  ;;  %v7231_v60 = vor.u32 %v7963_v63, %v7230_v41 }
 0x20a   : > { %v1742_v59 = vadd.f32 %v1741_v44, %v9184_v30  ;;  %v1830_v29 = vpop.f32.mrf.mxu1 }
 0x20b   : > { %v2006_v39 = vadd.f32 %v2005_v42, %v1917_v12  ;;  %2672 = vmatpush.bf16.msra.mxu3 %v7231_v60 }
 0x20c   : > { %v1831_v8 = vadd.f32 %v1830_v29, %v1742_v59  ;;  %2056 = vmatmul.bf16.vlgmr.msrb.gmra.mxu0 %v8997_v48  ;;  %2145 = vmatmul.bf16.vlgmr.msrb.gmra.mxu1 %v9001_v52  ;;  %v6846_v59 = vld [vmem:[%s8769_s5 + $0xc8] sm:$0xf]  ;;  %v7867_v29 = vld [vmem:[%s8769_s5 + $0xd4] sm:$0xf0] }
 0x20d   : > { %v3176_v7 = vmax.f32 %v2006_v39, 0.0  ;;  %2234 = vmatmul.bf16.vlgmr.msrb.gmra.mxu2 %v9003_v53  ;;  %v6847_v39 = vor.u32 %v7867_v29, %v6846_v59 }
 0x20e   : > { %2323 = vmatmul.bf16.vlgmr.msrb.gmra.mxu3 %v9005_v54 }
 0x20f   : > { %v9413_v31 = vpack.c.bf16 %v3176_v7, %v3172_v9  ;;  %v6974_v9 = vld [vmem:[%s8769_s5 + $0x1c8] sm:$0xf]  ;;  %v7899_v7 = vld [vmem:[%s8769_s5 + $0x1d4] sm:$0xf0]  ;;  %2405 = vmatpush.bf16.msra.mxu0 %v6847_v39 }
 0x210   : > { %v1919_v19 = vpop.f32.mrf.mxu2 }
 0x211   : > { %10989 = vst [vmem:[#allocation60_spill] sm:$0xff] %v9413_v31  ;;  %v1920_v37 = vadd.f32 %v1919_v19, %v1831_v8  ;;  %v2008_v0 = vpop.f32.mrf.mxu3  ;;  %v1743_v32 = vpop.f32.mrf.mxu0  ;;  %v6975_v31 = vor.u32 %v7899_v7, %v6974_v9 }
 0x212   : > { %v1744_v10 = vadd.f32 %v1743_v32, %v9184_v30  ;;  %v1832_v12 = vpop.f32.mrf.mxu1 }
 0x213   : > { %v2009_v42 = vadd.f32 %v2008_v0, %v1920_v37  ;;  %2494 = vmatpush.bf16.msra.mxu1 %v6975_v31 }
 0x214   : > { %v1833_v44 = vadd.f32 %v1832_v12, %v1744_v10 }
 0x215   : > { %v3180_v37 = vmax.f32 %v2009_v42, 0.0 }
 0x218   : > { %v1921_v17 = vpop.f32.mrf.mxu2 }
 0x219   : > { %v1922_v20 = vadd.f32 %v1921_v17, %v1833_v44  ;;  %v2010_v8 = vpop.f32.mrf.mxu3  ;;  %v1746_v19 = vpop.f32.mrf.mxu0 }
 0x21a   : > { %v1747_v41 = vadd.f32 %v1746_v19, %v9184_v30  ;;  %v1835_v63 = vpop.f32.mrf.mxu1 }
 0x21b   : > { %v2011_v32 = vadd.f32 %v2010_v8, %v1922_v20 }
 0x21c   : > { %v1836_v62 = vadd.f32 %v1835_v63, %v1747_v41  ;;  %2061 = vmatmul.bf16.gmra.mxu0 %v9027_v13  ;;  %2150 = vmatmul.bf16.gmra.mxu1 %v9029_v14 }
 0x21d   : > { %v3184_v0 = vmax.f32 %v2011_v32, 0.0  ;;  %2239 = vmatmul.bf16.gmra.mxu2 %v9031_v15 }
 0x21e   : > { %2328 = vmatmul.bf16.gmra.mxu3 %v9033_v16 }
 0x21f   : > { %v9429_v60 = vpack.c.bf16 %v3184_v0, %v3180_v37  ;;  %v7086_v0 = vld [vmem:[%s8769_s5 + $0x2a8] sm:$0xf] }
 0x220   : > { %v1924_v10 = vpop.f32.mrf.mxu2 }
 0x221   : > { %10990 = vst [vmem:[#allocation61_spill] sm:$0xff] %v9429_v60  ;;  %v1925_v12 = vadd.f32 %v1924_v10, %v1836_v62  ;;  %v2013_v31 = vpop.f32.mrf.mxu3  ;;  %v1748_v44 = vpop.f32.mrf.mxu0  ;;  %v7927_v10 = vld [vmem:[%s8769_s5 + $0x2b4] sm:$0xf0] }
 0x222   : > { %v1749_v59 = vadd.f32 %v1748_v44, %v9184_v30  ;;  %v1837_v29 = vpop.f32.mrf.mxu1  ;;  %v7087_v44 = vor.u32 %v7927_v10, %v7086_v0 }
 0x223   : > { %v2014_v39 = vadd.f32 %v2013_v31, %v1925_v12  ;;  %v7214_v12 = vld [vmem:[%s8769_s5 + $0x3a8] sm:$0xf] }
 0x224   : > { %v1838_v9 = vadd.f32 %v1837_v29, %v1749_v59  ;;  %v7959_v59 = vld [vmem:[%s8769_s5 + $0x3b4] sm:$0xf0]  ;;  %2584 = vmatpush.bf16.msra.mxu2 %v7087_v44 }
 0x225   : > { %v3188_v32 = vmax.f32 %v2014_v39, 0.0 }
 0x228   : > { %v1926_v42 = vpop.f32.mrf.mxu2 }
 0x229   : > { %v1927_v7 = vadd.f32 %v1926_v42, %v1838_v9  ;;  %v2015_v17 = vpop.f32.mrf.mxu3  ;;  %v1751_v20 = vpop.f32.mrf.mxu0  ;;  %v7215_v42 = vor.u32 %v7959_v59, %v7214_v12 }
 0x22a   : > { %v1752_v8 = vadd.f32 %v1751_v20, %v9184_v30  ;;  %v1840_v19 = vpop.f32.mrf.mxu1 }
 0x22b   : > { %v2016_v41 = vadd.f32 %v2015_v17, %v1927_v7  ;;  %2673 = vmatpush.bf16.msra.mxu3 %v7215_v42 }
 0x22c   : > { %v1841_v63 = vadd.f32 %v1840_v19, %v1752_v8  ;;  %2066 = vmatmul.bf16.gmra.mxu0 %v9047_v25  ;;  %2155 = vmatmul.bf16.gmra.mxu1 %v9049_v26  ;;  %v6830_v19 = vld [vmem:[%s8769_s5 + $0xa8] sm:$0xf] }
 0x22d   : > { %v3192_v62 = vmax.f32 %v2016_v41, 0.0  ;;  %2244 = vmatmul.bf16.gmra.mxu2 %v9051_v27  ;;  %v7863_v41 = vld [vmem:[%s8769_s5 + $0xb4] sm:$0xf0] }
 0x22e   : > { %2333 = vmatmul.bf16.gmra.mxu3 %v9053_v28 }
 0x22f   : > { %v9437_v37 = vpack.c.bf16 %v3192_v62, %v3188_v32  ;;  %v6831_v32 = vor.u32 %v7863_v41, %v6830_v19  ;;  %v6958_v62 = vld [vmem:[%s8769_s5 + $0x1a8] sm:$0xf] }
 0x230   : > { %v1929_v31 = vpop.f32.mrf.mxu2 }
 0x231   : > { %10991 = vst [vmem:[#allocation62_spill] sm:$0xff] %v9437_v37  ;;  %v1930_v29 = vadd.f32 %v1929_v31, %v1841_v63  ;;  %v2018_v39 = vpop.f32.mrf.mxu3  ;;  %v1753_v9 = vpop.f32.mrf.mxu0  ;;  %v7895_v37 = vld [vmem:[%s8769_s5 + $0x1b4] sm:$0xf0]  ;;  %2406 = vmatpush.bf16.msra.mxu0 %v6831_v32 }
 0x232   : > { %v1754_v7 = vadd.f32 %v1753_v9, %v9184_v30  ;;  %v1842_v17 = vpop.f32.mrf.mxu1  ;;  %v6959_v60 = vor.u32 %v7895_v37, %v6958_v62 }
 0x233   : > { %v2019_v20 = vadd.f32 %v2018_v39, %v1930_v29 }
 0x234   : > { %v1843_v8 = vadd.f32 %v1842_v17, %v1754_v7  ;;  %2495 = vmatpush.bf16.msra.mxu1 %v6959_v60 }
 0x235   : > { %v3196_v29 = vmax.f32 %v2019_v20, 0.0 }
 0x238   : > { %v1931_v0 = vpop.f32.mrf.mxu2 }
 0x239   : > { %v1932_v10 = vadd.f32 %v1931_v0, %v1843_v8  ;;  %v2020_v63 = vpop.f32.mrf.mxu3  ;;  %v1756_v31 = vpop.f32.mrf.mxu0 }
 0x23a   : > { %v1757_v12 = vadd.f32 %v1756_v31, %v9184_v30  ;;  %v1845_v59 = vpop.f32.mrf.mxu1 }
 0x23b   : > { %v2021_v9 = vadd.f32 %v2020_v63, %v1932_v10 }
 0x23c   : > { %v1846_v44 = vadd.f32 %v1845_v59, %v1757_v12  ;;  %2071 = vmatmul.bf16.gmra.mxu0 %v9075_v50  ;;  %2160 = vmatmul.bf16.gmra.mxu1 %v9077_v51 }
 0x23d   : > { %v3200_v39 = vmax.f32 %v2021_v9, 0.0  ;;  %2249 = vmatmul.bf16.gmra.mxu2 %v9079_v55 }
 0x23e   : > { %2338 = vmatmul.bf16.gmra.mxu3 %v9081_v56 }
 0x23f   : > { %v9453_v37 = vpack.c.bf16 %v3200_v39, %v3196_v29  ;;  %v7070_v39 = vld [vmem:[%s8769_s5 + $0x288] sm:$0xf] }
 0x240   : > { %v1934_v42 = vpop.f32.mrf.mxu2 }
 0x241   : > { %10992 = vst [vmem:[#allocation63_spill] sm:$0xff] %v9453_v37  ;;  %v1935_v7 = vadd.f32 %v1934_v42, %v1846_v44  ;;  %v2023_v60 = vpop.f32.mrf.mxu3  ;;  %v1758_v17 = vpop.f32.mrf.mxu0  ;;  %v7923_v42 = vld [vmem:[%s8769_s5 + $0x294] sm:$0xf0] }
 0x242   : > { %v1759_v8 = vadd.f32 %v1758_v17, %v9184_v30  ;;  %v1847_v19 = vpop.f32.mrf.mxu1  ;;  %v7071_v17 = vor.u32 %v7923_v42, %v7070_v39 }
 0x243   : > { %v2024_v41 = vadd.f32 %v2023_v60, %v1935_v7  ;;  %v7198_v7 = vld [vmem:[%s8769_s5 + $0x388] sm:$0xf] }
 0x244   : > { %v1848_v32 = vadd.f32 %v1847_v19, %v1759_v8  ;;  %v7955_v8 = vld [vmem:[%s8769_s5 + $0x394] sm:$0xf0]  ;;  %2585 = vmatpush.bf16.msra.mxu2 %v7071_v17 }
 0x245   : > { %v3204_v9 = vmax.f32 %v2024_v41, 0.0 }
 0x248   : > { %v1936_v20 = vpop.f32.mrf.mxu2 }
 0x249   : > { %v1937_v62 = vadd.f32 %v1936_v20, %v1848_v32  ;;  %v2025_v0 = vpop.f32.mrf.mxu3  ;;  %v1761_v10 = vpop.f32.mrf.mxu0  ;;  %v7199_v20 = vor.u32 %v7955_v8, %v7198_v7 }
 0x24a   : > { %v1762_v63 = vadd.f32 %v1761_v10, %v9184_v30  ;;  %v1850_v31 = vpop.f32.mrf.mxu1 }
 0x24b   : > { %v2026_v12 = vadd.f32 %v2025_v0, %v1937_v62  ;;  %2674 = vmatpush.bf16.msra.mxu3 %v7199_v20 }
 0x24c   : > { %v1851_v59 = vadd.f32 %v1850_v31, %v1762_v63  ;;  %2076 = vmatmul.bf16.gmra.mxu0 %v9095_v1  ;;  %2165 = vmatmul.bf16.gmra.mxu1 %v9097_v2  ;;  %v6814_v31 = vld [vmem:[%s8769_s5 + $0x88] sm:$0xf] }
 0x24d   : > { %v3208_v44 = vmax.f32 %v2026_v12, 0.0  ;;  %2254 = vmatmul.bf16.gmra.mxu2 %v9099_v3  ;;  %v7859_v12 = vld [vmem:[%s8769_s5 + $0x94] sm:$0xf0] }
 0x24e   : > { %2343 = vmatmul.bf16.gmra.mxu3 %v9101_v4 }
 0x24f   : > { %v9461_v29 = vpack.c.bf16 %v3208_v44, %v3204_v9  ;;  %v6815_v9 = vor.u32 %v7859_v12, %v6814_v31  ;;  %v6942_v44 = vld [vmem:[%s8769_s5 + $0x188] sm:$0xf] }
 0x250   : > { %v1939_v60 = vpop.f32.mrf.mxu2 }
 0x251   : > { %10993 = vst [vmem:[#allocation64_spill] sm:$0xff] %v9461_v29  ;;  %v1940_v19 = vadd.f32 %v1939_v60, %v1851_v59  ;;  %v2028_v41 = vpop.f32.mrf.mxu3  ;;  %v1763_v32 = vpop.f32.mrf.mxu0  ;;  %v7891_v29 = vld [vmem:[%s8769_s5 + $0x194] sm:$0xf0]  ;;  %2407 = vmatpush.bf16.msra.mxu0 %v6815_v9 }
 0x252   : > { %v1764_v62 = vadd.f32 %v1763_v32, %v9184_v30  ;;  %v1852_v0 = vpop.f32.mrf.mxu1  ;;  %v6943_v37 = vor.u32 %v7891_v29, %v6942_v44 }
 0x253   : > { %v2029_v10 = vadd.f32 %v2028_v41, %v1940_v19 }
 0x254   : > { %v1853_v63 = vadd.f32 %v1852_v0, %v1764_v62  ;;  %2496 = vmatpush.bf16.msra.mxu1 %v6943_v37 }
 0x255   : > { %v3212_v19 = vmax.f32 %v2029_v10, 0.0 }
 0x258   : > { %v1941_v39 = vpop.f32.mrf.mxu2 }
 0x259   : > { %v1942_v42 = vadd.f32 %v1941_v39, %v1853_v63  ;;  %v2030_v59 = vpop.f32.mrf.mxu3  ;;  %v1766_v60 = vpop.f32.mrf.mxu0 }
 0x25a   : > { %v1767_v7 = vadd.f32 %v1766_v60, %v9184_v30  ;;  %v1855_v8 = vpop.f32.mrf.mxu1 }
 0x25b   : > { %v2031_v32 = vadd.f32 %v2030_v59, %v1942_v42 }
 0x25c   : > { %v1856_v17 = vadd.f32 %v1855_v8, %v1767_v7  ;;  %2081 = vmatmul.bf16.gmra.mxu0 %v9123_v33  ;;  %2170 = vmatmul.bf16.gmra.mxu1 %v9125_v34 }
 0x25d   : > { %v3216_v41 = vmax.f32 %v2031_v32, 0.0  ;;  %2259 = vmatmul.bf16.gmra.mxu2 %v9127_v35 }
 0x25e   : > { %2348 = vmatmul.bf16.gmra.mxu3 %v9129_v36 }
 0x25f   : > { %v9477_v29 = vpack.c.bf16 %v3216_v41, %v3212_v19  ;;  %v7054_v41 = vld [vmem:[%s8769_s5 + $0x268] sm:$0xf] }
 0x260   : > { %v1944_v20 = vpop.f32.mrf.mxu2 }
 0x261   : > { %10994 = vst [vmem:[#allocation65_spill] sm:$0xff] %v9477_v29  ;;  %v1945_v62 = vadd.f32 %v1944_v20, %v1856_v17  ;;  %v2033_v37 = vpop.f32.mrf.mxu3  ;;  %v1768_v0 = vpop.f32.mrf.mxu0  ;;  %v7919_v20 = vld [vmem:[%s8769_s5 + $0x274] sm:$0xf0] }
 0x262   : > { %v1769_v63 = vadd.f32 %v1768_v0, %v9184_v30  ;;  %v1857_v31 = vpop.f32.mrf.mxu1  ;;  %v7055_v0 = vor.u32 %v7919_v20, %v7054_v41 }
 0x263   : > { %v2034_v12 = vadd.f32 %v2033_v37, %v1945_v62  ;;  %v7182_v62 = vld [vmem:[%s8769_s5 + $0x368] sm:$0xf] }
 0x264   : > { %v1858_v9 = vadd.f32 %v1857_v31, %v1769_v63  ;;  %v7951_v63 = vld [vmem:[%s8769_s5 + $0x374] sm:$0xf0]  ;;  %2586 = vmatpush.bf16.msra.mxu2 %v7055_v0 }
 0x265   : > { %v3220_v32 = vmax.f32 %v2034_v12, 0.0 }
 0x268   : > { %v1946_v10 = vpop.f32.mrf.mxu2 }
 0x269   : > { %v1947_v44 = vadd.f32 %v1946_v10, %v1858_v9  ;;  %v2035_v39 = vpop.f32.mrf.mxu3  ;;  %v1771_v42 = vpop.f32.mrf.mxu0  ;;  %v7183_v10 = vor.u32 %v7951_v63, %v7182_v62 }
 0x26a   : > { %v1772_v59 = vadd.f32 %v1771_v42, %v9184_v30  ;;  %v1860_v60 = vpop.f32.mrf.mxu1 }
 0x26b   : > { %v2036_v7 = vadd.f32 %v2035_v39, %v1947_v44  ;;  %2675 = vmatpush.bf16.msra.mxu3 %v7183_v10 }
 0x26c   : > { %v1861_v8 = vadd.f32 %v1860_v60, %v1772_v59  ;;  %2086 = vmatmul.bf16.gmra.mxu0 %v9143_v45  ;;  %2175 = vmatmul.bf16.gmra.mxu1 %v9145_v46  ;;  %v6798_v60 = vld [vmem:[%s8769_s5 + $0x68] sm:$0xf] }
 0x26d   : > { %v3224_v17 = vmax.f32 %v2036_v7, 0.0  ;;  %2264 = vmatmul.bf16.gmra.mxu2 %v9147_v47  ;;  %v7855_v7 = vld [vmem:[%s8769_s5 + $0x74] sm:$0xf0] }
 0x26e   : > { %2353 = vmatmul.bf16.gmra.mxu3 %v9149_v49 }
 0x26f   : > { %v9485_v19 = vpack.c.bf16 %v3224_v17, %v3220_v32  ;;  %v6799_v32 = vor.u32 %v7855_v7, %v6798_v60  ;;  %v6926_v17 = vld [vmem:[%s8769_s5 + $0x168] sm:$0xf] }
 0x270   : > { %v1949_v37 = vpop.f32.mrf.mxu2 }
 0x271   : > { %10995 = vst [vmem:[#allocation66_spill] sm:$0xff] %v9485_v19  ;;  %v1950_v31 = vadd.f32 %v1949_v37, %v1861_v8  ;;  %v2038_v12 = vpop.f32.mrf.mxu3  ;;  %v1773_v9 = vpop.f32.mrf.mxu0  ;;  %v7887_v19 = vld [vmem:[%s8769_s5 + $0x174] sm:$0xf0]  ;;  %2408 = vmatpush.bf16.msra.mxu0 %v6799_v32 }
 0x272   : > { %v1774_v44 = vadd.f32 %v1773_v9, %v9184_v30  ;;  %v1862_v39 = vpop.f32.mrf.mxu1  ;;  %v6927_v29 = vor.u32 %v7887_v19, %v6926_v17  ;;  %v9505_v17 = vld [vmem:[%s8775_s24] sm:$0xf] }
 0x273   : > { %v2039_v42 = vadd.f32 %v2038_v12, %v1950_v31 }
 0x274   : > { %v1863_v59 = vadd.f32 %v1862_v39, %v1774_v44  ;;  %2497 = vmatpush.bf16.msra.mxu1 %v6927_v29 }
 0x275   : > { %v3228_v31 = vmax.f32 %v2039_v42, 0.0  ;;  %v9508_v42 = vperm.slane %v9505_v17, 1 }
 0x278   : > { %v1951_v41 = vpop.f32.mrf.mxu2 }
 0x279   : > { %v1952_v20 = vadd.f32 %v1951_v41, %v1863_v59  ;;  %v2040_v8 = vpop.f32.mrf.mxu3  ;;  %v1776_v37 = vpop.f32.mrf.mxu0 }
 0x27a   : > { %v1777_v62 = vadd.f32 %v1776_v37, %v9184_v30  ;;  %v1865_v63 = vpop.f32.mrf.mxu1 }
 0x27b   : > { %v2041_v9 = vadd.f32 %v2040_v8, %v1952_v20 }
 0x27c   : > { %v1866_v0 = vadd.f32 %v1865_v63, %v1777_v62  ;;  %2091 = vmatmul.bf16.gmra.mxu0 %v9171_v21  ;;  %2180 = vmatmul.bf16.gmra.mxu1 %v9173_v22 }
 0x27d   : > { %v3232_v12 = vmax.f32 %v2041_v9, 0.0  ;;  %2269 = vmatmul.bf16.gmra.mxu2 %v9175_v23 }
 0x27e   : > { %2358 = vmatmul.bf16.gmra.mxu3 %v9177_v24 }
 0x27f   : > { %v9501_v19 = vpack.c.bf16 %v3232_v12, %v3228_v31 }
 0x280   : > { %v1954_v10 = vpop.f32.mrf.mxu2 }
 0x281   : > { %10996 = vst [vmem:[#allocation67_spill] sm:$0xff] %v9501_v19  ;;  %v1955_v29 = vadd.f32 %v1954_v10, %v1866_v0  ;;  %v2043_v44 = vpop.f32.mrf.mxu3  ;;  %v1778_v39 = vpop.f32.mrf.mxu0  ;;  %v7038_v10 = vld [vmem:[%s8769_s5 + $0x248] sm:$0xf]  ;;  %v7883_v19 = vld [vmem:[%s8769_s5 + $0x154] sm:$0xf0] }
 0x282   : > { %v1779_v59 = vadd.f32 %v1778_v39, %v9184_v30  ;;  %v1867_v60 = vpop.f32.mrf.mxu1 }
 0x283   : > { %v2044_v7 = vadd.f32 %v2043_v44, %v1955_v29  ;;  %v7915_v29 = vld [vmem:[%s8769_s5 + $0x254] sm:$0xf0]  ;;  %v7166_v44 = vld [vmem:[%s8769_s5 + $0x348] sm:$0xf] }
 0x284   : > { %v1868_v32 = vadd.f32 %v1867_v60, %v1779_v59  ;;  %v7039_v59 = vor.u32 %v7915_v29, %v7038_v10  ;;  %v7947_v60 = vld [vmem:[%s8769_s5 + $0x354] sm:$0xf0] }
 0x285   : > { %v3236_v0 = vmax.f32 %v2044_v7, 0.0 }
 0x286   : > { %2587 = vmatpush.bf16.msra.mxu2 %v7039_v59 }
 0x288   : > { %v1956_v41 = vpop.f32.mrf.mxu2 }
 0x289   : > { %v1957_v20 = vadd.f32 %v1956_v41, %v1868_v32  ;;  %v2045_v8 = vpop.f32.mrf.mxu3  ;;  %v2057_v37 = vpop.f32.mrf.mxu0 }
 0x28a   : > { %v2058_v62 = vadd.f32 %v2057_v37, %v9508_v42  ;;  %v2146_v63 = vpop.f32.mrf.mxu1 }
 0x28b   : > { %v2046_v30 = vadd.f32 %v2045_v8, %v1957_v20  ;;  %v7167_v20 = vor.u32 %v7947_v60, %v7166_v44 }
 0x28c   : > { %v2147_v9 = vadd.f32 %v2146_v63, %v2058_v62  ;;  %2096 = vmatmul.bf16.gmra.mxu0 %v9194_v43  ;;  %2185 = vmatmul.bf16.gmra.mxu1 %v9196_v57 }
 0x28d   : > { %v3240_v31 = vmax.f32 %v2046_v30, 0.0  ;;  %2274 = vmatmul.bf16.gmra.mxu2 %v9198_v58  ;;  %2676 = vmatpush.bf16.msra.mxu3 %v7167_v20  ;;  %v6782_v30 = vld [vmem:[%s8769_s5 + $0x48] sm:$0xf]  ;;  %v10998_v20 = vld [vmem:[#allocation30_spill] sm:$0xff] }
 0x28e   : > { %2363 = vmatmul.bf16.gmra.mxu3 %v9201_v61 }
 0x28f   : > { %v9515_v12 = vpack.c.bf16 %v3240_v31, %v3236_v0  ;;  %v7851_v0 = vld [vmem:[%s8769_s5 + $0x54] sm:$0xf0] }
 0x290   : > { %v2235_v39 = vpop.f32.mrf.mxu2  ;;  %v6783_v31 = vor.u32 %v7851_v0, %v6782_v30 }
 0x291   : > { %10997 = vst [vmem:[#allocation68_spill] sm:$0xff] %v9515_v12  ;;  %v2236_v7 = vadd.f32 %v2235_v39, %v2147_v9  ;;  %v2324_v32 = vpop.f32.mrf.mxu3  ;;  %v2059_v41 = vpop.f32.mrf.mxu0  ;;  %v6910_v12 = vld [vmem:[%s8769_s5 + $0x148] sm:$0xf] }
 0x292   : > { %v2060_v8 = vadd.f32 %v2059_v41, %v9508_v42  ;;  %v2148_v37 = vpop.f32.mrf.mxu1  ;;  %v6911_v18 = vor.u32 %v7883_v19, %v6910_v12  ;;  %2409 = vmatpush.bf16.msra.mxu0 %v6783_v31  ;;  %v11000_v19 = vld [vmem:[#allocation32_spill] sm:$0xff] }
 0x293   : > { %v2325_v62 = vadd.f32 %v2324_v32, %v2236_v7 }
 0x294   : > { %v2149_v63 = vadd.f32 %v2148_v37, %v2060_v8  ;;  %2498 = vmatpush.bf16.msra.mxu1 %v6911_v18  ;;  %v10999_v8 = vld [vmem:[#allocation31_spill] sm:$0xff] }
 0x295   : > { %v3117_v7 = vmax.f32 %v2325_v62, 0.0 }
 0x298   : > { %v2237_v10 = vpop.f32.mrf.mxu2 }
 0x299   : > { %v2238_v29 = vadd.f32 %v2237_v10, %v2149_v63  ;;  %v2326_v9 = vpop.f32.mrf.mxu3  ;;  %v2062_v39 = vpop.f32.mrf.mxu0 }
 0x29a   : > { %v2063_v44 = vadd.f32 %v2062_v39, %v9508_v42  ;;  %v2151_v60 = vpop.f32.mrf.mxu1 }
 0x29b   : > { %v2327_v41 = vadd.f32 %v2326_v9, %v2238_v29 }
 0x29c   : > { %v2152_v59 = vadd.f32 %v2151_v60, %v2063_v44  ;;  %2101 = vmatmul.bf16.gmra.mxu0 %v9224_v5  ;;  %2190 = vmatmul.bf16.gmra.mxu1 %v10998_v20 }
 0x29d   : > { %v3121_v32 = vmax.f32 %v2327_v41, 0.0  ;;  %2279 = vmatmul.bf16.gmra.mxu2 %v10999_v8  ;;  %v7879_v8 = vld [vmem:[%s8769_s5 + $0x134] sm:$0xf0] }
 0x29e   : > { %2368 = vmatmul.bf16.gmra.mxu3 %v11000_v19  ;;  %v6894_v19 = vld [vmem:[%s8769_s5 + $0x128] sm:$0xf] }
 0x29f   : > { %v9531_v12 = vpack.c.bf16 %v3121_v32, %v3117_v7  ;;  %v11002_v32 = vld [vmem:[#allocation34_spill] sm:$0xff]  ;;  %v6895_v20 = vor.u32 %v7879_v8, %v6894_v19 }
 0x2a0   : > { %v2240_v37 = vpop.f32.mrf.mxu2  ;;  %v11010_v8 = vld [vmem:[#allocation42_spill] sm:$0xff] }
 0x2a1   : > { %11001 = vst [vmem:[#allocation69_spill] sm:$0xff] %v9531_v12  ;;  %v2241_v63 = vadd.f32 %v2240_v37, %v2152_v59  ;;  %v2329_v18 = vpop.f32.mrf.mxu3  ;;  %v2064_v30 = vpop.f32.mrf.mxu0  ;;  %v11003_v12 = vld [vmem:[#allocation35_spill] sm:$0xff]  ;;  %2499 = vmatpush.bf16.msra.mxu1 %v6895_v20 }
 0x2a2   : > { %v2065_v0 = vadd.f32 %v2064_v30, %v9508_v42  ;;  %v2153_v31 = vpop.f32.mrf.mxu1 }
 0x2a3   : > { %v2330_v10 = vadd.f32 %v2329_v18, %v2241_v63  ;;  %v11004_v63 = vld [vmem:[#allocation36_spill] sm:$0xff]  ;;  %v11005_v18 = vld [vmem:[#allocation37_spill] sm:$0xff] }
 0x2a4   : > { %v2154_v29 = vadd.f32 %v2153_v31, %v2065_v0  ;;  %v7022_v31 = vld [vmem:[%s8769_s5 + $0x228] sm:$0xf] }
 0x2a5   : > { %v3125_v37 = vmax.f32 %v2330_v10, 0.0 }
 0x2a8   : > { %v2242_v62 = vpop.f32.mrf.mxu2 }
 0x2a9   : > { %v2243_v9 = vadd.f32 %v2242_v62, %v2154_v29  ;;  %v2331_v39 = vpop.f32.mrf.mxu3  ;;  %v2067_v44 = vpop.f32.mrf.mxu0  ;;  %v7911_v29 = vld [vmem:[%s8769_s5 + $0x234] sm:$0xf0]  ;;  %v7150_v62 = vld [vmem:[%s8769_s5 + $0x328] sm:$0xf] }
 0x2aa   : > { %v2068_v60 = vadd.f32 %v2067_v44, %v9508_v42  ;;  %v2156_v41 = vpop.f32.mrf.mxu1 }
 0x2ab   : > { %v2332_v7 = vadd.f32 %v2331_v39, %v2243_v9  ;;  %v7023_v9 = vor.u32 %v7911_v29, %v7022_v31  ;;  %v7943_v39 = vld [vmem:[%s8769_s5 + $0x334] sm:$0xf0] }
 0x2ac   : > { %v2157_v59 = vadd.f32 %v2156_v41, %v2068_v60  ;;  %2106 = vmatmul.bf16.gmra.mxu0 %v11002_v32  ;;  %2195 = vmatmul.bf16.gmra.mxu1 %v11003_v12 }
 0x2ad   : > { %v3129_v30 = vmax.f32 %v2332_v7, 0.0  ;;  %2284 = vmatmul.bf16.gmra.mxu2 %v11004_v63  ;;  %v7151_v7 = vor.u32 %v7943_v39, %v7150_v62 }
 0x2ae   : > { %2373 = vmatmul.bf16.gmra.mxu3 %v11005_v18  ;;  %2588 = vmatpush.bf16.msra.mxu2 %v7023_v9  ;;  %v7847_v18 = vld [vmem:[%s8769_s5 + $0x34] sm:$0xf0] }
 0x2af   : > { %v9539_v0 = vpack.c.bf16 %v3129_v30, %v3125_v37  ;;  %2677 = vmatpush.bf16.msra.mxu3 %v7151_v7 }
 0x2b0   : > { %v2245_v44 = vpop.f32.mrf.mxu2 }
 0x2b1   : > { %11006 = vst [vmem:[#allocation70_spill] sm:$0xff] %v9539_v0  ;;  %v2246_v10 = vadd.f32 %v2245_v44, %v2157_v59  ;;  %v2334_v60 = vpop.f32.mrf.mxu3  ;;  %v2069_v41 = vpop.f32.mrf.mxu0  ;;  %v6766_v0 = vld [vmem:[%s8769_s5 + $0x28] sm:$0xf] }
 0x2b2   : > { %v2070_v63 = vadd.f32 %v2069_v41, %v9508_v42  ;;  %v2158_v12 = vpop.f32.mrf.mxu1  ;;  %v6767_v32 = vor.u32 %v7847_v18, %v6766_v0  ;;  %v11009_v18 = vld [vmem:[#allocation41_spill] sm:$0xff] }
 0x2b3   : > { %v2335_v37 = vadd.f32 %v2334_v60, %v2246_v10  ;;  %v11007_v10 = vld [vmem:[#allocation39_spill] sm:$0xff]  ;;  %v11008_v60 = vld [vmem:[#allocation40_spill] sm:$0xff] }
 0x2b4   : > { %v2159_v30 = vadd.f32 %v2158_v12, %v2070_v63  ;;  %2410 = vmatpush.bf16.msra.mxu0 %v6767_v32 }
 0x2b5   : > { %v3133_v12 = vmax.f32 %v2335_v37, 0.0 }
 0x2b8   : > { %v2247_v31 = vpop.f32.mrf.mxu2 }
 0x2b9   : > { %v2248_v29 = vadd.f32 %v2247_v31, %v2159_v30  ;;  %v2336_v59 = vpop.f32.mrf.mxu3  ;;  %v2072_v44 = vpop.f32.mrf.mxu0 }
 0x2ba   : > { %v2073_v62 = vadd.f32 %v2072_v44, %v9508_v42  ;;  %v2161_v39 = vpop.f32.mrf.mxu1 }
 0x2bb   : > { %v2337_v41 = vadd.f32 %v2336_v59, %v2248_v29 }
 0x2bc   : > { %v2162_v9 = vadd.f32 %v2161_v39, %v2073_v62  ;;  %2111 = vmatmul.bf16.gmra.mxu0 %v11007_v10  ;;  %2200 = vmatmul.bf16.gmra.mxu1 %v11008_v60  ;;  %v7875_v60 = vld [vmem:[%s8769_s5 + $0x114] sm:$0xf0] }
 0x2bd   : > { %v3137_v63 = vmax.f32 %v2337_v41, 0.0  ;;  %2289 = vmatmul.bf16.gmra.mxu2 %v11009_v18  ;;  %v6878_v18 = vld [vmem:[%s8769_s5 + $0x108] sm:$0xf] }
 0x2be   : > { %2378 = vmatmul.bf16.gmra.mxu3 %v11010_v8  ;;  %v11013_v8 = vld [vmem:[#allocation45_spill] sm:$0xff]  ;;  %v6879_v10 = vor.u32 %v7875_v60, %v6878_v18  ;;  %v11020_v60 = vld [vmem:[#allocation52_spill] sm:$0xff] }
 0x2bf   : > { %v9555_v19 = vpack.c.bf16 %v3137_v63, %v3133_v12 }
 0x2c0   : > { %v2250_v32 = vpop.f32.mrf.mxu2  ;;  %2500 = vmatpush.bf16.msra.mxu1 %v6879_v10 }
 0x2c1   : > { %11011 = vst [vmem:[#allocation71_spill] sm:$0xff] %v9555_v19  ;;  %v2251_v0 = vadd.f32 %v2250_v32, %v2162_v9  ;;  %v2339_v20 = vpop.f32.mrf.mxu3  ;;  %v2074_v7 = vpop.f32.mrf.mxu0  ;;  %v11012_v32 = vld [vmem:[#allocation44_spill] sm:$0xff] }
 0x2c2   : > { %v2075_v30 = vadd.f32 %v2074_v7, %v9508_v42  ;;  %v2163_v31 = vpop.f32.mrf.mxu1 }
 0x2c3   : > { %v2340_v29 = vadd.f32 %v2339_v20, %v2251_v0  ;;  %v11014_v0 = vld [vmem:[#allocation46_spill] sm:$0xff]  ;;  %v11015_v20 = vld [vmem:[#allocation47_spill] sm:$0xff] }
 0x2c4   : > { %v2164_v59 = vadd.f32 %v2163_v31, %v2075_v30  ;;  %v7006_v31 = vld [vmem:[%s8769_s5 + $0x208] sm:$0xf] }
 0x2c5   : > { %v3141_v19 = vmax.f32 %v2340_v29, 0.0 }
 0x2c8   : > { %v2252_v37 = vpop.f32.mrf.mxu2 }
 0x2c9   : > { %v2253_v44 = vadd.f32 %v2252_v37, %v2164_v59  ;;  %v2341_v62 = vpop.f32.mrf.mxu3  ;;  %v2077_v39 = vpop.f32.mrf.mxu0  ;;  %v7907_v59 = vld [vmem:[%s8769_s5 + $0x214] sm:$0xf0]  ;;  %v7134_v37 = vld [vmem:[%s8769_s5 + $0x308] sm:$0xf] }
 0x2ca   : > { %v2078_v41 = vadd.f32 %v2077_v39, %v9508_v42  ;;  %v2166_v12 = vpop.f32.mrf.mxu1 }
 0x2cb   : > { %v2342_v63 = vadd.f32 %v2341_v62, %v2253_v44  ;;  %v7007_v44 = vor.u32 %v7907_v59, %v7006_v31  ;;  %v7939_v62 = vld [vmem:[%s8769_s5 + $0x314] sm:$0xf0] }
 0x2cc   : > { %v2167_v9 = vadd.f32 %v2166_v12, %v2078_v41  ;;  %2116 = vmatmul.bf16.gmra.mxu0 %v11012_v32  ;;  %2205 = vmatmul.bf16.gmra.mxu1 %v11013_v8 }
 0x2cd   : > { %v3145_v7 = vmax.f32 %v2342_v63, 0.0  ;;  %2294 = vmatmul.bf16.gmra.mxu2 %v11014_v0  ;;  %v7135_v63 = vor.u32 %v7939_v62, %v7134_v37 }
 0x2ce   : > { %2383 = vmatmul.bf16.gmra.mxu3 %v11015_v20  ;;  %2589 = vmatpush.bf16.msra.mxu2 %v7007_v44  ;;  %v7843_v20 = vld [vmem:[%s8769_s5 + $0x14] sm:$0xf0] }
 0x2cf   : > { %v9563_v30 = vpack.c.bf16 %v3145_v7, %v3141_v19  ;;  %2678 = vmatpush.bf16.msra.mxu3 %v7135_v63 }
 0x2d0   : > { %v2255_v39 = vpop.f32.mrf.mxu2 }
 0x2d1   : > { %11016 = vst [vmem:[#allocation72_spill] sm:$0xff] %v9563_v30  ;;  %v2256_v29 = vadd.f32 %v2255_v39, %v2167_v9  ;;  %v2344_v41 = vpop.f32.mrf.mxu3  ;;  %v2079_v12 = vpop.f32.mrf.mxu0  ;;  %v6750_v30 = vld [vmem:[%s8769_s5 + $0x8] sm:$0xf] }
 0x2d2   : > { %v2080_v0 = vadd.f32 %v2079_v12, %v9508_v42  ;;  %v2168_v8 = vpop.f32.mrf.mxu1  ;;  %v6751_v32 = vor.u32 %v7843_v20, %v6750_v30  ;;  %v11019_v20 = vld [vmem:[#allocation51_spill] sm:$0xff] }
 0x2d3   : > { %v2345_v19 = vadd.f32 %v2344_v41, %v2256_v29  ;;  %v11017_v29 = vld [vmem:[#allocation49_spill] sm:$0xff]  ;;  %v11018_v41 = vld [vmem:[#allocation50_spill] sm:$0xff] }
 0x2d4   : > { %v2169_v7 = vadd.f32 %v2168_v8, %v2080_v0  ;;  %2411 = vmatpush.bf16.msra.mxu0 %v6751_v32 }
 0x2d5   : > { %v3149_v8 = vmax.f32 %v2345_v19, 0.0 }
 0x2d8   : > { %v2257_v31 = vpop.f32.mrf.mxu2 }
 0x2d9   : > { %v2258_v59 = vadd.f32 %v2257_v31, %v2169_v7  ;;  %v2346_v9 = vpop.f32.mrf.mxu3  ;;  %v2082_v39 = vpop.f32.mrf.mxu0 }
 0x2da   : > { %v2083_v37 = vadd.f32 %v2082_v39, %v9508_v42  ;;  %v2171_v62 = vpop.f32.mrf.mxu1 }
 0x2db   : > { %v2347_v12 = vadd.f32 %v2346_v9, %v2258_v59 }
 0x2dc   : > { %v2172_v44 = vadd.f32 %v2171_v62, %v2083_v37  ;;  %2121 = vmatmul.bf16.gmra.mxu0 %v11017_v29  ;;  %2210 = vmatmul.bf16.gmra.mxu1 %v11018_v41  ;;  %v6992_v41 = vld [vmem:[%s8769_s5 + $0x1f8] sm:$0xf0] }
 0x2dd   : > { %v3153_v0 = vmax.f32 %v2347_v12, 0.0  ;;  %2299 = vmatmul.bf16.gmra.mxu2 %v11019_v20  ;;  %v7901_v20 = vld [vmem:[%s8769_s5 + $0x1ec] sm:$0xf] }
 0x2de   : > { %2388 = vmatmul.bf16.gmra.mxu3 %v11020_v60  ;;  %v11023_v60 = vld [vmem:[#allocation55_spill] sm:$0xff]  ;;  %v6995_v29 = vor.u32 %v7901_v20, %v6992_v41 }
 0x2df   : > { %v9579_v18 = vpack.c.bf16 %v3153_v0, %v3149_v8 }
 0x2e0   : > { %v2260_v32 = vpop.f32.mrf.mxu2  ;;  %2849 = vmatpush.bf16.msrb.mxu1 %v6995_v29 }
 0x2e1   : > { %11021 = vst [vmem:[#allocation73_spill] sm:$0xff] %v9579_v18  ;;  %v2261_v30 = vadd.f32 %v2260_v32, %v2172_v44  ;;  %v2349_v10 = vpop.f32.mrf.mxu3  ;;  %v2084_v63 = vpop.f32.mrf.mxu0  ;;  %v11022_v32 = vld [vmem:[#allocation54_spill] sm:$0xff] }
 0x2e2   : > { %v2085_v7 = vadd.f32 %v2084_v63, %v9508_v42  ;;  %v2173_v31 = vpop.f32.mrf.mxu1 }
 0x2e3   : > { %v2350_v59 = vadd.f32 %v2349_v10, %v2261_v30  ;;  %v11024_v30 = vld [vmem:[#allocation56_spill] sm:$0xff]  ;;  %v11025_v10 = vld [vmem:[#allocation57_spill] sm:$0xff] }
 0x2e4   : > { %v2174_v9 = vadd.f32 %v2173_v31, %v2085_v7  ;;  %v7933_v31 = vld [vmem:[%s8769_s5 + $0x2ec] sm:$0xf] }
 0x2e5   : > { %v3157_v18 = vmax.f32 %v2350_v59, 0.0 }
 0x2e8   : > { %v2262_v19 = vpop.f32.mrf.mxu2 }
 0x2e9   : > { %v2263_v39 = vadd.f32 %v2262_v19, %v2174_v9  ;;  %v2351_v37 = vpop.f32.mrf.mxu3  ;;  %v2087_v62 = vpop.f32.mrf.mxu0  ;;  %v7120_v9 = vld [vmem:[%s8769_s5 + $0x2f8] sm:$0xf0]  ;;  %v7965_v19 = vld [vmem:[%s8769_s5 + $0x3ec] sm:$0xf] }
 0x2ea   : > { %v2088_v12 = vadd.f32 %v2087_v62, %v9508_v42  ;;  %v2176_v8 = vpop.f32.mrf.mxu1 }
 0x2eb   : > { %v2352_v0 = vadd.f32 %v2351_v37, %v2263_v39  ;;  %v7123_v39 = vor.u32 %v7933_v31, %v7120_v9  ;;  %v7248_v37 = vld [vmem:[%s8769_s5 + $0x3f8] sm:$0xf0] }
 0x2ec   : > { %v2177_v44 = vadd.f32 %v2176_v8, %v2088_v12  ;;  %2126 = vmatmul.bf16.gmra.mxu0 %v11022_v32  ;;  %2215 = vmatmul.bf16.gmra.mxu1 %v11023_v60 }
 0x2ed   : > { %v3161_v63 = vmax.f32 %v2352_v0, 0.0  ;;  %2304 = vmatmul.bf16.gmra.mxu2 %v11024_v30  ;;  %v7251_v0 = vor.u32 %v7965_v19, %v7248_v37 }
 0x2ee   : > { %2393 = vmatmul.bf16.gmra.mxu3 %v11025_v10  ;;  %2938 = vmatpush.bf16.msrb.mxu2 %v7123_v39  ;;  %v6864_v10 = vld [vmem:[%s8769_s5 + $0xf8] sm:$0xf0] }
 0x2ef   : > { %v9587_v7 = vpack.c.bf16 %v3161_v63, %v3157_v18  ;;  %3027 = vmatpush.bf16.msrb.mxu3 %v7251_v0 }
 0x2f0   : > { %v2265_v62 = vpop.f32.mrf.mxu2 }
 0x2f1   : > { %11026 = vst [vmem:[#allocation74_spill] sm:$0xff] %v9587_v7  ;;  %v2266_v59 = vadd.f32 %v2265_v62, %v2177_v44  ;;  %v2354_v12 = vpop.f32.mrf.mxu3  ;;  %v2089_v8 = vpop.f32.mrf.mxu0  ;;  %v7869_v7 = vld [vmem:[%s8769_s5 + $0xec] sm:$0xf] }
 0x2f2   : > { %v2090_v30 = vadd.f32 %v2089_v8, %v9508_v42  ;;  %v2178_v60 = vpop.f32.mrf.mxu1  ;;  %v6867_v32 = vor.u32 %v7869_v7, %v6864_v10 }
 0x2f3   : > { %v2355_v18 = vadd.f32 %v2354_v12, %v2266_v59 }
 0x2f4   : > { %v2179_v63 = vadd.f32 %v2178_v60, %v2090_v30  ;;  %2760 = vmatpush.bf16.msrb.mxu0 %v6867_v32 }
 0x2f5   : > { %v3165_v60 = vmax.f32 %v2355_v18, 0.0 }
 0x2f8   : > { %v2267_v31 = vpop.f32.mrf.mxu2 }
 0x2f9   : > { %v2268_v9 = vadd.f32 %v2267_v31, %v2179_v63  ;;  %v2356_v44 = vpop.f32.mrf.mxu3  ;;  %v2092_v62 = vpop.f32.mrf.mxu0 }
 0x2fa   : > { %v2093_v19 = vadd.f32 %v2092_v62, %v9508_v42  ;;  %v2181_v37 = vpop.f32.mrf.mxu1 }
 0x2fb   : > { %v2357_v8 = vadd.f32 %v2356_v44, %v2268_v9 }
 0x2fc   : > { %v2182_v39 = vadd.f32 %v2181_v37, %v2093_v19  ;;  %2131 = vmatmul.bf16.gmra.mxu0 %v9392_v11  ;;  %2220 = vmatmul.bf16.gmra.mxu1 %v9394_v6 }
 0x2fd   : > { %v3169_v30 = vmax.f32 %v2357_v8, 0.0  ;;  %2309 = vmatmul.bf16.gmra.mxu2 %v9396_v38 }
 0x2fe   : > { %2398 = vmatmul.bf16.gmra.mxu3 %v9399_v40 }
 0x2ff   : > { %v9603_v41 = vpack.c.bf16 %v3169_v30, %v3165_v60  ;;  %v7929_v30 = vld [vmem:[%s8769_s5 + $0x2cc] sm:$0xf] }
 0x300   : > { %v2270_v20 = vpop.f32.mrf.mxu2 }
 0x301   : > { %11027 = vst [vmem:[#allocation75_spill] sm:$0xff] %v9603_v41  ;;  %v2271_v32 = vadd.f32 %v2270_v20, %v2182_v39  ;;  %v2359_v29 = vpop.f32.mrf.mxu3  ;;  %v2094_v10 = vpop.f32.mrf.mxu0  ;;  %v7104_v20 = vld [vmem:[%s8769_s5 + $0x2d8] sm:$0xf0] }
 0x302   : > { %v2095_v7 = vadd.f32 %v2094_v10, %v9508_v42  ;;  %v2183_v59 = vpop.f32.mrf.mxu1  ;;  %v7107_v10 = vor.u32 %v7929_v30, %v7104_v20 }
 0x303   : > { %v2360_v12 = vadd.f32 %v2359_v29, %v2271_v32  ;;  %v7961_v32 = vld [vmem:[%s8769_s5 + $0x3cc] sm:$0xf] }
 0x304   : > { %v2184_v0 = vadd.f32 %v2183_v59, %v2095_v7  ;;  %v7232_v7 = vld [vmem:[%s8769_s5 + $0x3d8] sm:$0xf0]  ;;  %2939 = vmatpush.bf16.msrb.mxu2 %v7107_v10 }
 0x305   : > { %v3173_v8 = vmax.f32 %v2360_v12, 0.0 }
 0x308   : > { %v2272_v18 = vpop.f32.mrf.mxu2 }
 0x309   : > { %v2273_v63 = vadd.f32 %v2272_v18, %v2184_v0  ;;  %v2361_v31 = vpop.f32.mrf.mxu3  ;;  %v2097_v9 = vpop.f32.mrf.mxu0  ;;  %v7235_v18 = vor.u32 %v7961_v32, %v7232_v7 }
 0x30a   : > { %v2098_v44 = vadd.f32 %v2097_v9, %v9508_v42  ;;  %v2186_v62 = vpop.f32.mrf.mxu1 }
 0x30b   : > { %v2362_v19 = vadd.f32 %v2361_v31, %v2273_v63  ;;  %3028 = vmatpush.bf16.msrb.mxu3 %v7235_v18 }
 0x30c   : > { %v2187_v37 = vadd.f32 %v2186_v62, %v2098_v44  ;;  %2412 = vmatmul.bf16.vlgmr.msra.gmra.mxu0 %v8997_v48  ;;  %2501 = vmatmul.bf16.vlgmr.msra.gmra.mxu1 %v9001_v52  ;;  %v7865_v62 = vld [vmem:[%s8769_s5 + $0xcc] sm:$0xf] }
 0x30d   : > { %v3177_v39 = vmax.f32 %v2362_v19, 0.0  ;;  %2590 = vmatmul.bf16.vlgmr.msra.gmra.mxu2 %v9003_v53  ;;  %v6848_v19 = vld [vmem:[%s8769_s5 + $0xd8] sm:$0xf0] }
 0x30e   : > { %2679 = vmatmul.bf16.vlgmr.msra.gmra.mxu3 %v9005_v54 }
 0x30f   : > { %v9611_v60 = vpack.c.bf16 %v3177_v39, %v3173_v8  ;;  %v6851_v8 = vor.u32 %v7865_v62, %v6848_v19  ;;  %v7897_v39 = vld [vmem:[%s8769_s5 + $0x1cc] sm:$0xf] }
 0x310   : > { %v2275_v29 = vpop.f32.mrf.mxu2 }
 0x311   : > { %11028 = vst [vmem:[#allocation76_spill] sm:$0xff] %v9611_v60  ;;  %v2276_v59 = vadd.f32 %v2275_v29, %v2187_v37  ;;  %v2364_v12 = vpop.f32.mrf.mxu3  ;;  %v2099_v0 = vpop.f32.mrf.mxu0  ;;  %v6976_v60 = vld [vmem:[%s8769_s5 + $0x1d8] sm:$0xf0]  ;;  %2761 = vmatpush.bf16.msrb.mxu0 %v6851_v8 }
 0x312   : > { %v2100_v63 = vadd.f32 %v2099_v0, %v9508_v42  ;;  %v2188_v31 = vpop.f32.mrf.mxu1  ;;  %v6979_v41 = vor.u32 %v7897_v39, %v6976_v60 }
 0x313   : > { %v2365_v9 = vadd.f32 %v2364_v12, %v2276_v59 }
 0x314   : > { %v2189_v44 = vadd.f32 %v2188_v31, %v2100_v63  ;;  %2850 = vmatpush.bf16.msrb.mxu1 %v6979_v41 }
 0x315   : > { %v3181_v59 = vmax.f32 %v2365_v9, 0.0 }
 0x318   : > { %v2277_v30 = vpop.f32.mrf.mxu2 }
 0x319   : > { %v2278_v20 = vadd.f32 %v2277_v30, %v2189_v44  ;;  %v2366_v37 = vpop.f32.mrf.mxu3  ;;  %v2102_v29 = vpop.f32.mrf.mxu0 }
 0x31a   : > { %v2103_v32 = vadd.f32 %v2102_v29, %v9508_v42  ;;  %v2191_v7 = vpop.f32.mrf.mxu1 }
 0x31b   : > { %v2367_v0 = vadd.f32 %v2366_v37, %v2278_v20 }
 0x31c   : > { %v2192_v10 = vadd.f32 %v2191_v7, %v2103_v32  ;;  %2417 = vmatmul.bf16.gmra.mxu0 %v9027_v13  ;;  %2506 = vmatmul.bf16.gmra.mxu1 %v9029_v14 }
 0x31d   : > { %v3185_v12 = vmax.f32 %v2367_v0, 0.0  ;;  %2595 = vmatmul.bf16.gmra.mxu2 %v9031_v15 }
 0x31e   : > { %2684 = vmatmul.bf16.gmra.mxu3 %v9033_v16 }
 0x31f   : > { %v9627_v60 = vpack.c.bf16 %v3185_v12, %v3181_v59  ;;  %v7925_v12 = vld [vmem:[%s8769_s5 + $0x2ac] sm:$0xf] }
 0x320   : > { %v2280_v18 = vpop.f32.mrf.mxu2 }
 0x321   : > { %11029 = vst [vmem:[#allocation77_spill] sm:$0xff] %v9627_v60  ;;  %v2281_v63 = vadd.f32 %v2280_v18, %v2192_v10  ;;  %v2369_v41 = vpop.f32.mrf.mxu3  ;;  %v2104_v31 = vpop.f32.mrf.mxu0  ;;  %v7088_v18 = vld [vmem:[%s8769_s5 + $0x2b8] sm:$0xf0] }
 0x322   : > { %v2105_v44 = vadd.f32 %v2104_v31, %v9508_v42  ;;  %v2193_v62 = vpop.f32.mrf.mxu1  ;;  %v7091_v31 = vor.u32 %v7925_v12, %v7088_v18 }
 0x323   : > { %v2370_v19 = vadd.f32 %v2369_v41, %v2281_v63  ;;  %v7957_v63 = vld [vmem:[%s8769_s5 + $0x3ac] sm:$0xf] }
 0x324   : > { %v2194_v8 = vadd.f32 %v2193_v62, %v2105_v44  ;;  %v7216_v44 = vld [vmem:[%s8769_s5 + $0x3b8] sm:$0xf0]  ;;  %2940 = vmatpush.bf16.msrb.mxu2 %v7091_v31 }
 0x325   : > { %v3189_v0 = vmax.f32 %v2370_v19, 0.0 }
 0x328   : > { %v2282_v9 = vpop.f32.mrf.mxu2 }
 0x329   : > { %v2283_v39 = vadd.f32 %v2282_v9, %v2194_v8  ;;  %v2371_v30 = vpop.f32.mrf.mxu3  ;;  %v2107_v20 = vpop.f32.mrf.mxu0  ;;  %v7219_v9 = vor.u32 %v7957_v63, %v7216_v44 }
 0x32a   : > { %v2108_v37 = vadd.f32 %v2107_v20, %v9508_v42  ;;  %v2196_v29 = vpop.f32.mrf.mxu1 }
 0x32b   : > { %v2372_v32 = vadd.f32 %v2371_v30, %v2283_v39  ;;  %3029 = vmatpush.bf16.msrb.mxu3 %v7219_v9 }
 0x32c   : > { %v2197_v7 = vadd.f32 %v2196_v29, %v2108_v37  ;;  %2422 = vmatmul.bf16.gmra.mxu0 %v9047_v25  ;;  %2511 = vmatmul.bf16.gmra.mxu1 %v9049_v26  ;;  %v7861_v29 = vld [vmem:[%s8769_s5 + $0xac] sm:$0xf] }
 0x32d   : > { %v3193_v10 = vmax.f32 %v2372_v32, 0.0  ;;  %2600 = vmatmul.bf16.gmra.mxu2 %v9051_v27  ;;  %v6832_v32 = vld [vmem:[%s8769_s5 + $0xb8] sm:$0xf0] }
 0x32e   : > { %2689 = vmatmul.bf16.gmra.mxu3 %v9053_v28 }
 0x32f   : > { %v9635_v59 = vpack.c.bf16 %v3193_v10, %v3189_v0  ;;  %v6835_v0 = vor.u32 %v7861_v29, %v6832_v32  ;;  %v7893_v10 = vld [vmem:[%s8769_s5 + $0x1ac] sm:$0xf] }
 0x330   : > { %v2285_v41 = vpop.f32.mrf.mxu2 }
 0x331   : > { %11030 = vst [vmem:[#allocation78_spill] sm:$0xff] %v9635_v59  ;;  %v2286_v62 = vadd.f32 %v2285_v41, %v2197_v7  ;;  %v2374_v19 = vpop.f32.mrf.mxu3  ;;  %v2109_v8 = vpop.f32.mrf.mxu0  ;;  %v6960_v59 = vld [vmem:[%s8769_s5 + $0x1b8] sm:$0xf0]  ;;  %2762 = vmatpush.bf16.msrb.mxu0 %v6835_v0 }
 0x332   : > { %v2110_v39 = vadd.f32 %v2109_v8, %v9508_v42  ;;  %v2198_v30 = vpop.f32.mrf.mxu1  ;;  %v6963_v60 = vor.u32 %v7893_v10, %v6960_v59 }
 0x333   : > { %v2375_v20 = vadd.f32 %v2374_v19, %v2286_v62 }
 0x334   : > { %v2199_v37 = vadd.f32 %v2198_v30, %v2110_v39  ;;  %2851 = vmatpush.bf16.msrb.mxu1 %v6963_v60 }
 0x335   : > { %v3197_v62 = vmax.f32 %v2375_v20, 0.0 }
 0x338   : > { %v2287_v12 = vpop.f32.mrf.mxu2 }
 0x339   : > { %v2288_v18 = vadd.f32 %v2287_v12, %v2199_v37  ;;  %v2376_v7 = vpop.f32.mrf.mxu3  ;;  %v2112_v41 = vpop.f32.mrf.mxu0 }
 0x33a   : > { %v2113_v63 = vadd.f32 %v2112_v41, %v9508_v42  ;;  %v2201_v44 = vpop.f32.mrf.mxu1 }
 0x33b   : > { %v2377_v8 = vadd.f32 %v2376_v7, %v2288_v18 }
 0x33c   : > { %v2202_v31 = vadd.f32 %v2201_v44, %v2113_v63  ;;  %2427 = vmatmul.bf16.gmra.mxu0 %v9075_v50  ;;  %2516 = vmatmul.bf16.gmra.mxu1 %v9077_v51 }
 0x33d   : > { %v3201_v19 = vmax.f32 %v2377_v8, 0.0  ;;  %2605 = vmatmul.bf16.gmra.mxu2 %v9079_v55 }
 0x33e   : > { %2694 = vmatmul.bf16.gmra.mxu3 %v9081_v56 }
 0x33f   : > { %v9651_v59 = vpack.c.bf16 %v3201_v19, %v3197_v62  ;;  %v7921_v19 = vld [vmem:[%s8769_s5 + $0x28c] sm:$0xf] }
 0x340   : > { %v2290_v9 = vpop.f32.mrf.mxu2 }
 0x341   : > { %11031 = vst [vmem:[#allocation79_spill] sm:$0xff] %v9651_v59  ;;  %v2291_v39 = vadd.f32 %v2290_v9, %v2202_v31  ;;  %v2379_v60 = vpop.f32.mrf.mxu3  ;;  %v2114_v30 = vpop.f32.mrf.mxu0  ;;  %v7072_v9 = vld [vmem:[%s8769_s5 + $0x298] sm:$0xf0] }
 0x342   : > { %v2115_v37 = vadd.f32 %v2114_v30, %v9508_v42  ;;  %v2203_v29 = vpop.f32.mrf.mxu1  ;;  %v7075_v30 = vor.u32 %v7921_v19, %v7072_v9 }
 0x343   : > { %v2380_v32 = vadd.f32 %v2379_v60, %v2291_v39  ;;  %v7953_v39 = vld [vmem:[%s8769_s5 + $0x38c] sm:$0xf] }
 0x344   : > { %v2204_v0 = vadd.f32 %v2203_v29, %v2115_v37  ;;  %v7200_v37 = vld [vmem:[%s8769_s5 + $0x398] sm:$0xf0]  ;;  %2941 = vmatpush.bf16.msrb.mxu2 %v7075_v30 }
 0x345   : > { %v3205_v8 = vmax.f32 %v2380_v32, 0.0 }
 0x348   : > { %v2292_v20 = vpop.f32.mrf.mxu2 }
 0x349   : > { %v2293_v10 = vadd.f32 %v2292_v20, %v2204_v0  ;;  %v2381_v12 = vpop.f32.mrf.mxu3  ;;  %v2117_v18 = vpop.f32.mrf.mxu0  ;;  %v7203_v20 = vor.u32 %v7953_v39, %v7200_v37 }
 0x34a   : > { %v2118_v7 = vadd.f32 %v2117_v18, %v9508_v42  ;;  %v2206_v41 = vpop.f32.mrf.mxu1 }
 0x34b   : > { %v2382_v63 = vadd.f32 %v2381_v12, %v2293_v10  ;;  %3030 = vmatpush.bf16.msrb.mxu3 %v7203_v20 }
 0x34c   : > { %v2207_v44 = vadd.f32 %v2206_v41, %v2118_v7  ;;  %2432 = vmatmul.bf16.gmra.mxu0 %v9095_v1  ;;  %2521 = vmatmul.bf16.gmra.mxu1 %v9097_v2  ;;  %v7857_v41 = vld [vmem:[%s8769_s5 + $0x8c] sm:$0xf] }
 0x34d   : > { %v3209_v31 = vmax.f32 %v2382_v63, 0.0  ;;  %2610 = vmatmul.bf16.gmra.mxu2 %v9099_v3  ;;  %v6816_v63 = vld [vmem:[%s8769_s5 + $0x98] sm:$0xf0] }
 0x34e   : > { %2699 = vmatmul.bf16.gmra.mxu3 %v9101_v4 }
 0x34f   : > { %v9659_v62 = vpack.c.bf16 %v3209_v31, %v3205_v8  ;;  %v6819_v8 = vor.u32 %v7857_v41, %v6816_v63  ;;  %v7889_v31 = vld [vmem:[%s8769_s5 + $0x18c] sm:$0xf] }
 0x350   : > { %v2295_v60 = vpop.f32.mrf.mxu2 }
 0x351   : > { %11032 = vst [vmem:[#allocation80_spill] sm:$0xff] %v9659_v62  ;;  %v2296_v29 = vadd.f32 %v2295_v60, %v2207_v44  ;;  %v2384_v32 = vpop.f32.mrf.mxu3  ;;  %v2119_v0 = vpop.f32.mrf.mxu0  ;;  %v6944_v62 = vld [vmem:[%s8769_s5 + $0x198] sm:$0xf0]  ;;  %2763 = vmatpush.bf16.msrb.mxu0 %v6819_v8 }
 0x352   : > { %v2120_v10 = vadd.f32 %v2119_v0, %v9508_v42  ;;  %v2208_v12 = vpop.f32.mrf.mxu1  ;;  %v6947_v59 = vor.u32 %v7889_v31, %v6944_v62 }
 0x353   : > { %v2385_v18 = vadd.f32 %v2384_v32, %v2296_v29 }
 0x354   : > { %v2209_v7 = vadd.f32 %v2208_v12, %v2120_v10  ;;  %2852 = vmatpush.bf16.msrb.mxu1 %v6947_v59 }
 0x355   : > { %v3213_v29 = vmax.f32 %v2385_v18, 0.0 }
 0x358   : > { %v2297_v19 = vpop.f32.mrf.mxu2 }
 0x359   : > { %v2298_v9 = vadd.f32 %v2297_v19, %v2209_v7  ;;  %v2386_v44 = vpop.f32.mrf.mxu3  ;;  %v2122_v60 = vpop.f32.mrf.mxu0 }
 0x35a   : > { %v2123_v39 = vadd.f32 %v2122_v60, %v9508_v42  ;;  %v2211_v37 = vpop.f32.mrf.mxu1 }
 0x35b   : > { %v2387_v0 = vadd.f32 %v2386_v44, %v2298_v9 }
 0x35c   : > { %v2212_v30 = vadd.f32 %v2211_v37, %v2123_v39  ;;  %2437 = vmatmul.bf16.gmra.mxu0 %v9123_v33  ;;  %2526 = vmatmul.bf16.gmra.mxu1 %v9125_v34 }
 0x35d   : > { %v3217_v32 = vmax.f32 %v2387_v0, 0.0  ;;  %2615 = vmatmul.bf16.gmra.mxu2 %v9127_v35 }
 0x35e   : > { %2704 = vmatmul.bf16.gmra.mxu3 %v9129_v36 }
 0x35f   : > { %v9675_v62 = vpack.c.bf16 %v3217_v32, %v3213_v29  ;;  %v7917_v32 = vld [vmem:[%s8769_s5 + $0x26c] sm:$0xf] }
 0x360   : > { %v2300_v20 = vpop.f32.mrf.mxu2 }
 0x361   : > { %11033 = vst [vmem:[#allocation81_spill] sm:$0xff] %v9675_v62  ;;  %v2301_v10 = vadd.f32 %v2300_v20, %v2212_v30  ;;  %v2389_v59 = vpop.f32.mrf.mxu3  ;;  %v2124_v12 = vpop.f32.mrf.mxu0  ;;  %v7056_v20 = vld [vmem:[%s8769_s5 + $0x278] sm:$0xf0] }
 0x362   : > { %v2125_v7 = vadd.f32 %v2124_v12, %v9508_v42  ;;  %v2213_v41 = vpop.f32.mrf.mxu1  ;;  %v7059_v12 = vor.u32 %v7917_v32, %v7056_v20 }
 0x363   : > { %v2390_v63 = vadd.f32 %v2389_v59, %v2301_v10  ;;  %v7949_v10 = vld [vmem:[%s8769_s5 + $0x36c] sm:$0xf] }
 0x364   : > { %v2214_v8 = vadd.f32 %v2213_v41, %v2125_v7  ;;  %v7184_v7 = vld [vmem:[%s8769_s5 + $0x378] sm:$0xf0]  ;;  %2942 = vmatpush.bf16.msrb.mxu2 %v7059_v12 }
 0x365   : > { %v3221_v0 = vmax.f32 %v2390_v63, 0.0 }
 0x368   : > { %v2302_v18 = vpop.f32.mrf.mxu2 }
 0x369   : > { %v2303_v31 = vadd.f32 %v2302_v18, %v2214_v8  ;;  %v2391_v19 = vpop.f32.mrf.mxu3  ;;  %v2127_v9 = vpop.f32.mrf.mxu0  ;;  %v7187_v18 = vor.u32 %v7949_v10, %v7184_v7 }
 0x36a   : > { %v2128_v44 = vadd.f32 %v2127_v9, %v9508_v42  ;;  %v2216_v60 = vpop.f32.mrf.mxu1 }
 0x36b   : > { %v2392_v39 = vadd.f32 %v2391_v19, %v2303_v31  ;;  %3031 = vmatpush.bf16.msrb.mxu3 %v7187_v18 }
 0x36c   : > { %v2217_v37 = vadd.f32 %v2216_v60, %v2128_v44  ;;  %2442 = vmatmul.bf16.gmra.mxu0 %v9143_v45  ;;  %2531 = vmatmul.bf16.gmra.mxu1 %v9145_v46  ;;  %v7853_v60 = vld [vmem:[%s8769_s5 + $0x6c] sm:$0xf] }
 0x36d   : > { %v3225_v30 = vmax.f32 %v2392_v39, 0.0  ;;  %2620 = vmatmul.bf16.gmra.mxu2 %v9147_v47  ;;  %v6800_v39 = vld [vmem:[%s8769_s5 + $0x78] sm:$0xf0] }
 0x36e   : > { %2709 = vmatmul.bf16.gmra.mxu3 %v9149_v49 }
 0x36f   : > { %v9683_v29 = vpack.c.bf16 %v3225_v30, %v3221_v0  ;;  %v6803_v0 = vor.u32 %v7853_v60, %v6800_v39  ;;  %v7885_v30 = vld [vmem:[%s8769_s5 + $0x16c] sm:$0xf] }
 0x370   : > { %v2305_v59 = vpop.f32.mrf.mxu2 }
 0x371   : > { %11034 = vst [vmem:[#allocation82_spill] sm:$0xff] %v9683_v29  ;;  %v2306_v41 = vadd.f32 %v2305_v59, %v2217_v37  ;;  %v2394_v63 = vpop.f32.mrf.mxu3  ;;  %v2129_v8 = vpop.f32.mrf.mxu0  ;;  %v6928_v29 = vld [vmem:[%s8769_s5 + $0x178] sm:$0xf0]  ;;  %2764 = vmatpush.bf16.msrb.mxu0 %v6803_v0 }
 0x372   : > { %v2130_v31 = vadd.f32 %v2129_v8, %v9508_v42  ;;  %v2218_v19 = vpop.f32.mrf.mxu1  ;;  %v6931_v62 = vor.u32 %v7885_v30, %v6928_v29 }
 0x373   : > { %v2395_v9 = vadd.f32 %v2394_v63, %v2306_v41 }
 0x374   : > { %v2219_v44 = vadd.f32 %v2218_v19, %v2130_v31  ;;  %2853 = vmatpush.bf16.msrb.mxu1 %v6931_v62 }
 0x375   : > { %v3229_v41 = vmax.f32 %v2395_v9, 0.0  ;;  %v9703_v9 = vperm.slane %v9505_v17, 2 }
 0x378   : > { %v2307_v32 = vpop.f32.mrf.mxu2 }
 0x379   : > { %v2308_v20 = vadd.f32 %v2307_v32, %v2219_v44  ;;  %v2396_v37 = vpop.f32.mrf.mxu3  ;;  %v2132_v59 = vpop.f32.mrf.mxu0 }
 0x37a   : > { %v2133_v10 = vadd.f32 %v2132_v59, %v9508_v42  ;;  %v2221_v7 = vpop.f32.mrf.mxu1 }
 0x37b   : > { %v2397_v8 = vadd.f32 %v2396_v37, %v2308_v20 }
 0x37c   : > { %v2222_v12 = vadd.f32 %v2221_v7, %v2133_v10  ;;  %2447 = vmatmul.bf16.gmra.mxu0 %v9171_v21  ;;  %2536 = vmatmul.bf16.gmra.mxu1 %v9173_v22 }
 0x37d   : > { %v3233_v63 = vmax.f32 %v2397_v8, 0.0  ;;  %2625 = vmatmul.bf16.gmra.mxu2 %v9175_v23 }
 0x37e   : > { %2714 = vmatmul.bf16.gmra.mxu3 %v9177_v24 }
 0x37f   : > { %v9699_v29 = vpack.c.bf16 %v3233_v63, %v3229_v41  ;;  %v7913_v41 = vld [vmem:[%s8769_s5 + $0x24c] sm:$0xf]  ;;  %v7040_v63 = vld [vmem:[%s8769_s5 + $0x258] sm:$0xf0] }
 0x380   : > { %v2310_v18 = vpop.f32.mrf.mxu2 }
 0x381   : > { %11035 = vst [vmem:[#allocation83_spill] sm:$0xff] %v9699_v29  ;;  %v2311_v31 = vadd.f32 %v2310_v18, %v2222_v12  ;;  %v2399_v62 = vpop.f32.mrf.mxu3  ;;  %v2134_v19 = vpop.f32.mrf.mxu0  ;;  %v7945_v18 = vld [vmem:[%s8769_s5 + $0x34c] sm:$0xf]  ;;  %v11042_v29 = vld [vmem:[#allocation35_spill] sm:$0xff] }
 0x382   : > { %v2135_v44 = vadd.f32 %v2134_v19, %v9508_v42  ;;  %v2223_v60 = vpop.f32.mrf.mxu1  ;;  %v7168_v19 = vld [vmem:[%s8769_s5 + $0x358] sm:$0xf0] }
 0x383   : > { %v2400_v39 = vadd.f32 %v2399_v62, %v2311_v31  ;;  %v7043_v62 = vor.u32 %v7913_v41, %v7040_v63 }
 0x384   : > { %v2224_v0 = vadd.f32 %v2223_v60, %v2135_v44 }
 0x385   : > { %v3237_v42 = vmax.f32 %v2400_v39, 0.0  ;;  %2943 = vmatpush.bf16.msrb.mxu2 %v7043_v62 }
 0x388   : > { %v2312_v30 = vpop.f32.mrf.mxu2 }
 0x389   : > { %v2313_v32 = vadd.f32 %v2312_v30, %v2224_v0  ;;  %v2401_v20 = vpop.f32.mrf.mxu3  ;;  %v2413_v37 = vpop.f32.mrf.mxu0  ;;  %v7171_v0 = vor.u32 %v7945_v18, %v7168_v19 }
 0x38a   : > { %v2414_v59 = vadd.f32 %v2413_v37, %v9703_v9  ;;  %v2502_v10 = vpop.f32.mrf.mxu1 }
 0x38b   : > { %v2402_v7 = vadd.f32 %v2401_v20, %v2313_v32  ;;  %3032 = vmatpush.bf16.msrb.mxu3 %v7171_v0  ;;  %v11037_v0 = vld [vmem:[#allocation30_spill] sm:$0xff] }
 0x38c   : > { %v2503_v8 = vadd.f32 %v2502_v10, %v2414_v59  ;;  %2452 = vmatmul.bf16.gmra.mxu0 %v9194_v43  ;;  %2541 = vmatmul.bf16.gmra.mxu1 %v9196_v57  ;;  %v7849_v59 = vld [vmem:[%s8769_s5 + $0x4c] sm:$0xf]  ;;  %v6784_v10 = vld [vmem:[%s8769_s5 + $0x58] sm:$0xf0] }
 0x38d   : > { %v3241_v12 = vmax.f32 %v2402_v7, 0.0  ;;  %2630 = vmatmul.bf16.gmra.mxu2 %v9198_v58  ;;  %v6787_v7 = vor.u32 %v7849_v59, %v6784_v10 }
 0x38e   : > { %2719 = vmatmul.bf16.gmra.mxu3 %v9201_v61 }
 0x38f   : > { %v9710_v17 = vpack.c.bf16 %v3241_v12, %v3237_v42  ;;  %v7881_v42 = vld [vmem:[%s8769_s5 + $0x14c] sm:$0xf]  ;;  %v6912_v12 = vld [vmem:[%s8769_s5 + $0x158] sm:$0xf0]  ;;  %2765 = vmatpush.bf16.msrb.mxu0 %v6787_v7 }
 0x390   : > { %v2591_v31 = vpop.f32.mrf.mxu2 }
 0x391   : > { %11036 = vst [vmem:[#allocation84_spill] sm:$0xff] %v9710_v17  ;;  %v2592_v44 = vadd.f32 %v2591_v31, %v2503_v8  ;;  %v2680_v60 = vpop.f32.mrf.mxu3  ;;  %v2415_v39 = vpop.f32.mrf.mxu0  ;;  %v6915_v17 = vor.u32 %v7881_v42, %v6912_v12 }
 0x392   : > { %v2416_v30 = vadd.f32 %v2415_v39, %v9703_v9  ;;  %v2504_v32 = vpop.f32.mrf.mxu1 }
 0x393   : > { %v2681_v20 = vadd.f32 %v2680_v60, %v2592_v44  ;;  %2854 = vmatpush.bf16.msrb.mxu1 %v6915_v17 }
 0x394   : > { %v2505_v37 = vadd.f32 %v2504_v32, %v2416_v30  ;;  %v11038_v30 = vld [vmem:[#allocation31_spill] sm:$0xff]  ;;  %v11039_v32 = vld [vmem:[#allocation32_spill] sm:$0xff] }
 0x395   : > { %v3118_v44 = vmax.f32 %v2681_v20, 0.0 }
 0x398   : > { %v2593_v41 = vpop.f32.mrf.mxu2 }
 0x399   : > { %v2594_v63 = vadd.f32 %v2593_v41, %v2505_v37  ;;  %v2682_v8 = vpop.f32.mrf.mxu3  ;;  %v2418_v31 = vpop.f32.mrf.mxu0 }
 0x39a   : > { %v2419_v18 = vadd.f32 %v2418_v31, %v9703_v9  ;;  %v2507_v19 = vpop.f32.mrf.mxu1 }
 0x39b   : > { %v2683_v39 = vadd.f32 %v2682_v8, %v2594_v63 }
 0x39c   : > { %v2508_v62 = vadd.f32 %v2507_v19, %v2419_v18  ;;  %2457 = vmatmul.bf16.gmra.mxu0 %v9224_v5  ;;  %2546 = vmatmul.bf16.gmra.mxu1 %v11037_v0 }
 0x39d   : > { %v3122_v60 = vmax.f32 %v2683_v39, 0.0  ;;  %2635 = vmatmul.bf16.gmra.mxu2 %v11038_v30 }
 0x39e   : > { %2724 = vmatmul.bf16.gmra.mxu3 %v11039_v32  ;;  %v6896_v32 = vld [vmem:[%s8769_s5 + $0x138] sm:$0xf0] }
 0x39f   : > { %v9726_v59 = vpack.c.bf16 %v3122_v60, %v3118_v44  ;;  %v11041_v60 = vld [vmem:[#allocation34_spill] sm:$0xff] }
 0x3a0   : > { %v2596_v37 = vpop.f32.mrf.mxu2 }
 0x3a1   : > { %11040 = vst [vmem:[#allocation30_spill] sm:$0xff] %v9726_v59  ;;  %v2597_v10 = vadd.f32 %v2596_v37, %v2508_v62  ;;  %v2685_v17 = vpop.f32.mrf.mxu3  ;;  %v2420_v7 = vpop.f32.mrf.mxu0 }
 0x3a2   : > { %v2421_v42 = vadd.f32 %v2420_v7, %v9703_v9  ;;  %v2509_v12 = vpop.f32.mrf.mxu1 }
 0x3a3   : > { %v2686_v41 = vadd.f32 %v2685_v17, %v2597_v10  ;;  %v11043_v10 = vld [vmem:[#allocation36_spill] sm:$0xff]  ;;  %v11044_v17 = vld [vmem:[#allocation37_spill] sm:$0xff] }
 0x3a4   : > { %v2510_v63 = vadd.f32 %v2509_v12, %v2421_v42  ;;  %v7909_v12 = vld [vmem:[%s8769_s5 + $0x22c] sm:$0xf] }
 0x3a5   : > { %v3126_v37 = vmax.f32 %v2686_v41, 0.0 }
 0x3a8   : > { %v2598_v20 = vpop.f32.mrf.mxu2 }
 0x3a9   : > { %v2599_v8 = vadd.f32 %v2598_v20, %v2510_v63  ;;  %v2687_v31 = vpop.f32.mrf.mxu3  ;;  %v2423_v18 = vpop.f32.mrf.mxu0  ;;  %v7024_v63 = vld [vmem:[%s8769_s5 + $0x238] sm:$0xf0]  ;;  %v7941_v20 = vld [vmem:[%s8769_s5 + $0x32c] sm:$0xf] }
 0x3aa   : > { %v2424_v19 = vadd.f32 %v2423_v18, %v9703_v9  ;;  %v2512_v39 = vpop.f32.mrf.mxu1 }
 0x3ab   : > { %v2688_v44 = vadd.f32 %v2687_v31, %v2599_v8  ;;  %v7027_v8 = vor.u32 %v7909_v12, %v7024_v63  ;;  %v7152_v31 = vld [vmem:[%s8769_s5 + $0x338] sm:$0xf0] }
 0x3ac   : > { %v2513_v62 = vadd.f32 %v2512_v39, %v2424_v19  ;;  %2462 = vmatmul.bf16.gmra.mxu0 %v11041_v60  ;;  %2551 = vmatmul.bf16.gmra.mxu1 %v11042_v29  ;;  %v7877_v60 = vld [vmem:[%s8769_s5 + $0x12c] sm:$0xf] }
 0x3ad   : > { %v3130_v7 = vmax.f32 %v2688_v44, 0.0  ;;  %2640 = vmatmul.bf16.gmra.mxu2 %v11043_v10  ;;  %v7155_v44 = vor.u32 %v7941_v20, %v7152_v31  ;;  %v6899_v30 = vor.u32 %v7877_v60, %v6896_v32  ;;  %v11049_v32 = vld [vmem:[#allocation42_spill] sm:$0xff] }
 0x3ae   : > { %2729 = vmatmul.bf16.gmra.mxu3 %v11044_v17  ;;  %2944 = vmatpush.bf16.msrb.mxu2 %v7027_v8  ;;  %v6768_v17 = vld [vmem:[%s8769_s5 + $0x38] sm:$0xf0] }
 0x3af   : > { %v9734_v42 = vpack.c.bf16 %v3130_v7, %v3126_v37  ;;  %3033 = vmatpush.bf16.msrb.mxu3 %v7155_v44  ;;  %2855 = vmatpush.bf16.msrb.mxu1 %v6899_v30 }
 0x3b0   : > { %v2601_v18 = vpop.f32.mrf.mxu2 }
 0x3b1   : > { %11045 = vst [vmem:[#allocation85_spill] sm:$0xff] %v9734_v42  ;;  %v2602_v41 = vadd.f32 %v2601_v18, %v2513_v62  ;;  %v2690_v19 = vpop.f32.mrf.mxu3  ;;  %v2425_v39 = vpop.f32.mrf.mxu0  ;;  %v7845_v42 = vld [vmem:[%s8769_s5 + $0x2c] sm:$0xf] }
 0x3b2   : > { %v2426_v59 = vadd.f32 %v2425_v39, %v9703_v9  ;;  %v2514_v10 = vpop.f32.mrf.mxu1  ;;  %v6771_v29 = vor.u32 %v7845_v42, %v6768_v17  ;;  %v11048_v17 = vld [vmem:[#allocation41_spill] sm:$0xff] }
 0x3b3   : > { %v2691_v37 = vadd.f32 %v2690_v19, %v2602_v41  ;;  %v11046_v41 = vld [vmem:[#allocation39_spill] sm:$0xff]  ;;  %v11047_v19 = vld [vmem:[#allocation40_spill] sm:$0xff] }
 0x3b4   : > { %v2515_v7 = vadd.f32 %v2514_v10, %v2426_v59  ;;  %2766 = vmatpush.bf16.msrb.mxu0 %v6771_v29 }
 0x3b5   : > { %v3134_v59 = vmax.f32 %v2691_v37, 0.0 }
 0x3b8   : > { %v2603_v12 = vpop.f32.mrf.mxu2 }
 0x3b9   : > { %v2604_v63 = vadd.f32 %v2603_v12, %v2515_v7  ;;  %v2692_v62 = vpop.f32.mrf.mxu3  ;;  %v2428_v18 = vpop.f32.mrf.mxu0 }
 0x3ba   : > { %v2429_v20 = vadd.f32 %v2428_v18, %v9703_v9  ;;  %v2517_v31 = vpop.f32.mrf.mxu1 }
 0x3bb   : > { %v2693_v39 = vadd.f32 %v2692_v62, %v2604_v63 }
 0x3bc   : > { %v2518_v8 = vadd.f32 %v2517_v31, %v2429_v20  ;;  %2467 = vmatmul.bf16.gmra.mxu0 %v11046_v41  ;;  %2556 = vmatmul.bf16.gmra.mxu1 %v11047_v19  ;;  %v6880_v19 = vld [vmem:[%s8769_s5 + $0x118] sm:$0xf0] }
 0x3bd   : > { %v3138_v10 = vmax.f32 %v2693_v39, 0.0  ;;  %2645 = vmatmul.bf16.gmra.mxu2 %v11048_v17  ;;  %v7873_v17 = vld [vmem:[%s8769_s5 + $0x10c] sm:$0xf] }
 0x3be   : > { %2734 = vmatmul.bf16.gmra.mxu3 %v11049_v32  ;;  %v11052_v32 = vld [vmem:[#allocation45_spill] sm:$0xff]  ;;  %v6883_v41 = vor.u32 %v7873_v17, %v6880_v19  ;;  %v11059_v19 = vld [vmem:[#allocation52_spill] sm:$0xff] }
 0x3bf   : > { %v9750_v29 = vpack.c.bf16 %v3138_v10, %v3134_v59 }
 0x3c0   : > { %v2606_v60 = vpop.f32.mrf.mxu2  ;;  %2856 = vmatpush.bf16.msrb.mxu1 %v6883_v41 }
 0x3c1   : > { %11050 = vst [vmem:[#allocation86_spill] sm:$0xff] %v9750_v29  ;;  %v2607_v42 = vadd.f32 %v2606_v60, %v2518_v8  ;;  %v2695_v30 = vpop.f32.mrf.mxu3  ;;  %v2430_v44 = vpop.f32.mrf.mxu0  ;;  %v11051_v60 = vld [vmem:[#allocation44_spill] sm:$0xff] }
 0x3c2   : > { %v2431_v7 = vadd.f32 %v2430_v44, %v9703_v9  ;;  %v2519_v12 = vpop.f32.mrf.mxu1 }
 0x3c3   : > { %v2696_v63 = vadd.f32 %v2695_v30, %v2607_v42  ;;  %v11053_v42 = vld [vmem:[#allocation46_spill] sm:$0xff]  ;;  %v11054_v30 = vld [vmem:[#allocation47_spill] sm:$0xff] }
 0x3c4   : > { %v2520_v62 = vadd.f32 %v2519_v12, %v2431_v7  ;;  %v7905_v12 = vld [vmem:[%s8769_s5 + $0x20c] sm:$0xf] }
 0x3c5   : > { %v3142_v29 = vmax.f32 %v2696_v63, 0.0 }
 0x3c8   : > { %v2608_v37 = vpop.f32.mrf.mxu2 }
 0x3c9   : > { %v2609_v18 = vadd.f32 %v2608_v37, %v2520_v62  ;;  %v2697_v20 = vpop.f32.mrf.mxu3  ;;  %v2433_v31 = vpop.f32.mrf.mxu0  ;;  %v7008_v62 = vld [vmem:[%s8769_s5 + $0x218] sm:$0xf0]  ;;  %v7937_v37 = vld [vmem:[%s8769_s5 + $0x30c] sm:$0xf] }
 0x3ca   : > { %v2434_v39 = vadd.f32 %v2433_v31, %v9703_v9  ;;  %v2522_v59 = vpop.f32.mrf.mxu1 }
 0x3cb   : > { %v2698_v10 = vadd.f32 %v2697_v20, %v2609_v18  ;;  %v7011_v18 = vor.u32 %v7905_v12, %v7008_v62  ;;  %v7136_v20 = vld [vmem:[%s8769_s5 + $0x318] sm:$0xf0] }
 0x3cc   : > { %v2523_v8 = vadd.f32 %v2522_v59, %v2434_v39  ;;  %2472 = vmatmul.bf16.gmra.mxu0 %v11051_v60  ;;  %2561 = vmatmul.bf16.gmra.mxu1 %v11052_v32 }
 0x3cd   : > { %v3146_v44 = vmax.f32 %v2698_v10, 0.0  ;;  %2650 = vmatmul.bf16.gmra.mxu2 %v11053_v42  ;;  %v7139_v10 = vor.u32 %v7937_v37, %v7136_v20 }
 0x3ce   : > { %2739 = vmatmul.bf16.gmra.mxu3 %v11054_v30  ;;  %2945 = vmatpush.bf16.msrb.mxu2 %v7011_v18  ;;  %v6752_v30 = vld [vmem:[%s8769_s5 + $0x18] sm:$0xf0] }
 0x3cf   : > { %v9758_v7 = vpack.c.bf16 %v3146_v44, %v3142_v29  ;;  %3034 = vmatpush.bf16.msrb.mxu3 %v7139_v10 }
 0x3d0   : > { %v2611_v31 = vpop.f32.mrf.mxu2 }
 0x3d1   : > { %11055 = vst [vmem:[#allocation87_spill] sm:$0xff] %v9758_v7  ;;  %v2612_v63 = vadd.f32 %v2611_v31, %v2523_v8  ;;  %v2700_v39 = vpop.f32.mrf.mxu3  ;;  %v2435_v59 = vpop.f32.mrf.mxu0  ;;  %v7841_v7 = vld [vmem:[%s8769_s5 + $0xc] sm:$0xf] }
 0x3d2   : > { %v2436_v42 = vadd.f32 %v2435_v59, %v9703_v9  ;;  %v2524_v32 = vpop.f32.mrf.mxu1  ;;  %v6755_v60 = vor.u32 %v7841_v7, %v6752_v30  ;;  %v11058_v30 = vld [vmem:[#allocation51_spill] sm:$0xff] }
 0x3d3   : > { %v2701_v29 = vadd.f32 %v2700_v39, %v2612_v63  ;;  %v11056_v63 = vld [vmem:[#allocation49_spill] sm:$0xff]  ;;  %v11057_v39 = vld [vmem:[#allocation50_spill] sm:$0xff] }
 0x3d4   : > { %v2525_v44 = vadd.f32 %v2524_v32, %v2436_v42  ;;  %2767 = vmatpush.bf16.msrb.mxu0 %v6755_v60 }
 0x3d5   : > { %v3150_v32 = vmax.f32 %v2701_v29, 0.0 }
 0x3d8   : > { %v2613_v12 = vpop.f32.mrf.mxu2 }
 0x3d9   : > { %v2614_v62 = vadd.f32 %v2613_v12, %v2525_v44  ;;  %v2702_v8 = vpop.f32.mrf.mxu3  ;;  %v2438_v31 = vpop.f32.mrf.mxu0 }
 0x3da   : > { %v2439_v37 = vadd.f32 %v2438_v31, %v9703_v9  ;;  %v2527_v20 = vpop.f32.mrf.mxu1 }
 0x3db   : > { %v2703_v59 = vadd.f32 %v2702_v8, %v2614_v62 }
 0x3dc   : > { %v2528_v18 = vadd.f32 %v2527_v20, %v2439_v37  ;;  %2477 = vmatmul.bf16.gmra.mxu0 %v11056_v63  ;;  %2566 = vmatmul.bf16.gmra.mxu1 %v11057_v39  ;;  %v8030_v39 = vld [vmem:[%s8777_s9 + $0x1ec] sm:$0xf0] }
 0x3dd   : > { %v3154_v42 = vmax.f32 %v2703_v59, 0.0  ;;  %2655 = vmatmul.bf16.gmra.mxu2 %v11058_v30  ;;  %v7494_v30 = vld [vmem:[%s8777_s9 + $0x1e0] sm:$0xf] }
 0x3de   : > { %2744 = vmatmul.bf16.gmra.mxu3 %v11059_v19  ;;  %v11062_v19 = vld [vmem:[#allocation55_spill] sm:$0xff]  ;;  %v7495_v63 = vor.u32 %v8030_v39, %v7494_v30 }
 0x3df   : > { %v9774_v17 = vpack.c.bf16 %v3154_v42, %v3150_v32 }
 0x3e0   : > { %v2616_v60 = vpop.f32.mrf.mxu2  ;;  %4293 = vmatpush.bf16.msra.mxu1 %v7495_v63 }
 0x3e1   : > { %11060 = vst [vmem:[#allocation88_spill] sm:$0xff] %v9774_v17  ;;  %v2617_v7 = vadd.f32 %v2616_v60, %v2528_v18  ;;  %v2705_v41 = vpop.f32.mrf.mxu3  ;;  %v2440_v10 = vpop.f32.mrf.mxu0  ;;  %v11061_v60 = vld [vmem:[#allocation54_spill] sm:$0xff] }
 0x3e2   : > { %v2441_v44 = vadd.f32 %v2440_v10, %v9703_v9  ;;  %v2529_v12 = vpop.f32.mrf.mxu1 }
 0x3e3   : > { %v2706_v62 = vadd.f32 %v2705_v41, %v2617_v7  ;;  %v11063_v7 = vld [vmem:[#allocation56_spill] sm:$0xff]  ;;  %v11064_v41 = vld [vmem:[#allocation57_spill] sm:$0xff] }
 0x3e4   : > { %v2530_v8 = vadd.f32 %v2529_v12, %v2441_v44  ;;  %v7622_v12 = vld [vmem:[%s8777_s9 + $0x2e0] sm:$0xf] }
 0x3e5   : > { %v3158_v17 = vmax.f32 %v2706_v62, 0.0 }
 0x3e8   : > { %v2618_v29 = vpop.f32.mrf.mxu2 }
 0x3e9   : > { %v2619_v31 = vadd.f32 %v2618_v29, %v2530_v8  ;;  %v2707_v37 = vpop.f32.mrf.mxu3  ;;  %v2443_v20 = vpop.f32.mrf.mxu0  ;;  %v8062_v8 = vld [vmem:[%s8777_s9 + $0x2ec] sm:$0xf0]  ;;  %v7750_v29 = vld [vmem:[%s8777_s9 + $0x3e0] sm:$0xf] }
 0x3ea   : > { %v2444_v59 = vadd.f32 %v2443_v20, %v9703_v9  ;;  %v2532_v32 = vpop.f32.mrf.mxu1 }
 0x3eb   : > { %v2708_v42 = vadd.f32 %v2707_v37, %v2619_v31  ;;  %v7623_v31 = vor.u32 %v8062_v8, %v7622_v12  ;;  %v8094_v37 = vld [vmem:[%s8777_s9 + $0x3ec] sm:$0xf0] }
 0x3ec   : > { %v2533_v18 = vadd.f32 %v2532_v32, %v2444_v59  ;;  %2482 = vmatmul.bf16.gmra.mxu0 %v11061_v60  ;;  %2571 = vmatmul.bf16.gmra.mxu1 %v11062_v19 }
 0x3ed   : > { %v3162_v10 = vmax.f32 %v2708_v42, 0.0  ;;  %2660 = vmatmul.bf16.gmra.mxu2 %v11063_v7  ;;  %v7751_v42 = vor.u32 %v8094_v37, %v7750_v29 }
 0x3ee   : > { %2749 = vmatmul.bf16.gmra.mxu3 %v11064_v41  ;;  %4382 = vmatpush.bf16.msra.mxu2 %v7623_v31  ;;  %v7998_v41 = vld [vmem:[%s8777_s9 + $0xec] sm:$0xf0] }
 0x3ef   : > { %v9782_v44 = vpack.c.bf16 %v3162_v10, %v3158_v17  ;;  %4471 = vmatpush.bf16.msra.mxu3 %v7751_v42 }
 0x3f0   : > { %v2621_v20 = vpop.f32.mrf.mxu2 }
 0x3f1   : > { %11065 = vst [vmem:[#allocation89_spill] sm:$0xff] %v9782_v44  ;;  %v2622_v62 = vadd.f32 %v2621_v20, %v2533_v18  ;;  %v2710_v59 = vpop.f32.mrf.mxu3  ;;  %v2445_v32 = vpop.f32.mrf.mxu0  ;;  %v7366_v44 = vld [vmem:[%s8777_s9 + $0xe0] sm:$0xf] }
 0x3f2   : > { %v2446_v7 = vadd.f32 %v2445_v32, %v9703_v9  ;;  %v2534_v19 = vpop.f32.mrf.mxu1  ;;  %v7367_v60 = vor.u32 %v7998_v41, %v7366_v44 }
 0x3f3   : > { %v2711_v17 = vadd.f32 %v2710_v59, %v2622_v62 }
 0x3f4   : > { %v2535_v10 = vadd.f32 %v2534_v19, %v2446_v7  ;;  %4204 = vmatpush.bf16.msra.mxu0 %v7367_v60 }
 0x3f5   : > { %v3166_v19 = vmax.f32 %v2711_v17, 0.0 }
 0x3f8   : > { %v2623_v12 = vpop.f32.mrf.mxu2 }
 0x3f9   : > { %v2624_v8 = vadd.f32 %v2623_v12, %v2535_v10  ;;  %v2712_v18 = vpop.f32.mrf.mxu3  ;;  %v2448_v20 = vpop.f32.mrf.mxu0 }
 0x3fa   : > { %v2449_v29 = vadd.f32 %v2448_v20, %v9703_v9  ;;  %v2537_v37 = vpop.f32.mrf.mxu1 }
 0x3fb   : > { %v2713_v32 = vadd.f32 %v2712_v18, %v2624_v8 }
 0x3fc   : > { %v2538_v31 = vadd.f32 %v2537_v37, %v2449_v29  ;;  %2487 = vmatmul.bf16.gmra.mxu0 %v9392_v11  ;;  %2576 = vmatmul.bf16.gmra.mxu1 %v9394_v6 }
 0x3fd   : > { %v3170_v7 = vmax.f32 %v2713_v32, 0.0  ;;  %2665 = vmatmul.bf16.gmra.mxu2 %v9396_v38 }
 0x3fe   : > { %2754 = vmatmul.bf16.gmra.mxu3 %v9399_v40 }
 0x3ff   : > { %v9798_v39 = vpack.c.bf16 %v3170_v7, %v3166_v19  ;;  %v7606_v7 = vld [vmem:[%s8777_s9 + $0x2c0] sm:$0xf] }
 0x400   : > { %v2626_v30 = vpop.f32.mrf.mxu2 }
 0x401   : > { %11066 = vst [vmem:[#allocation90_spill] sm:$0xff] %v9798_v39  ;;  %v2627_v60 = vadd.f32 %v2626_v30, %v2538_v31  ;;  %v2715_v63 = vpop.f32.mrf.mxu3  ;;  %v2450_v41 = vpop.f32.mrf.mxu0  ;;  %v8058_v30 = vld [vmem:[%s8777_s9 + $0x2cc] sm:$0xf0] }
 0x402   : > { %v2451_v44 = vadd.f32 %v2450_v41, %v9703_v9  ;;  %v2539_v62 = vpop.f32.mrf.mxu1  ;;  %v7607_v41 = vor.u32 %v8058_v30, %v7606_v7 }
 0x403   : > { %v2716_v59 = vadd.f32 %v2715_v63, %v2627_v60  ;;  %v7734_v60 = vld [vmem:[%s8777_s9 + $0x3c0] sm:$0xf] }
 0x404   : > { %v2540_v42 = vadd.f32 %v2539_v62, %v2451_v44  ;;  %4383 = vmatpush.bf16.msra.mxu2 %v7607_v41 }
 0x405   : > { %v3174_v32 = vmax.f32 %v2716_v59, 0.0 }
 0x408   : > { %v2628_v17 = vpop.f32.mrf.mxu2 }
 0x409   : > { %v2629_v10 = vadd.f32 %v2628_v17, %v2540_v42  ;;  %v2717_v12 = vpop.f32.mrf.mxu3  ;;  %v2453_v8 = vpop.f32.mrf.mxu0 }
 0x40a   : > { %v2454_v18 = vadd.f32 %v2453_v8, %v9703_v9  ;;  %v2542_v20 = vpop.f32.mrf.mxu1 }
 0x40b   : > { %v2718_v29 = vadd.f32 %v2717_v12, %v2629_v10  ;;  %v7350_v10 = vld [vmem:[%s8777_s9 + $0xc0] sm:$0xf]  ;;  %v7994_v12 = vld [vmem:[%s8777_s9 + $0xcc] sm:$0xf0] }
 0x40c   : > { %v2543_v37 = vadd.f32 %v2542_v20, %v2454_v18  ;;  %2768 = vmatmul.bf16.vlgmr.msrb.gmra.mxu0 %v8997_v48  ;;  %2857 = vmatmul.bf16.vlgmr.msrb.gmra.mxu1 %v9001_v52  ;;  %v8090_v48 = vld [vmem:[%s8777_s9 + $0x3cc] sm:$0xf0]  ;;  %v7351_v8 = vor.u32 %v7994_v12, %v7350_v10  ;;  %v7478_v18 = vld [vmem:[%s8777_s9 + $0x1c0] sm:$0xf] }
 0x40d   : > { %v3178_v31 = vmax.f32 %v2718_v29, 0.0  ;;  %2946 = vmatmul.bf16.vlgmr.msrb.gmra.mxu2 %v9003_v53  ;;  %v7735_v52 = vor.u32 %v8090_v48, %v7734_v60  ;;  %v8026_v20 = vld [vmem:[%s8777_s9 + $0x1cc] sm:$0xf0] }
 0x40e   : > { %3035 = vmatmul.bf16.vlgmr.msrb.gmra.mxu3 %v9005_v54  ;;  %v7479_v29 = vor.u32 %v8026_v20, %v7478_v18  ;;  %4205 = vmatpush.bf16.msra.mxu0 %v7351_v8 }
 0x40f   : > { %v9806_v19 = vpack.c.bf16 %v3178_v31, %v3174_v32  ;;  %4472 = vmatpush.bf16.msra.mxu3 %v7735_v52 }
 0x410   : > { %v2631_v63 = vpop.f32.mrf.mxu2  ;;  %4294 = vmatpush.bf16.msra.mxu1 %v7479_v29 }
 0x411   : > { %11067 = vst [vmem:[#allocation91_spill] sm:$0xff] %v9806_v19  ;;  %v2632_v44 = vadd.f32 %v2631_v63, %v2543_v37  ;;  %v2720_v62 = vpop.f32.mrf.mxu3  ;;  %v2455_v59 = vpop.f32.mrf.mxu0 }
 0x412   : > { %v2456_v53 = vadd.f32 %v2455_v59, %v9703_v9  ;;  %v2544_v42 = vpop.f32.mrf.mxu1 }
 0x413   : > { %v2721_v54 = vadd.f32 %v2720_v62, %v2632_v44 }
 0x414   : > { %v2545_v17 = vadd.f32 %v2544_v42, %v2456_v53 }
 0x415   : > { %v3182_v48 = vmax.f32 %v2721_v54, 0.0 }
 0x418   : > { %v2633_v32 = vpop.f32.mrf.mxu2 }
 0x419   : > { %v2634_v31 = vadd.f32 %v2633_v32, %v2545_v17  ;;  %v2722_v37 = vpop.f32.mrf.mxu3  ;;  %v2458_v7 = vpop.f32.mrf.mxu0 }
 0x41a   : > { %v2459_v30 = vadd.f32 %v2458_v7, %v9703_v9  ;;  %v2547_v60 = vpop.f32.mrf.mxu1  ;;  %v7590_v7 = vld [vmem:[%s8777_s9 + $0x2a0] sm:$0xf] }
 0x41b   : > { %v2723_v63 = vadd.f32 %v2722_v37, %v2634_v31 }
 0x41c   : > { %v2548_v41 = vadd.f32 %v2547_v60, %v2459_v30  ;;  %2773 = vmatmul.bf16.gmra.mxu0 %v9027_v13  ;;  %2862 = vmatmul.bf16.gmra.mxu1 %v9029_v14  ;;  %v8054_v30 = vld [vmem:[%s8777_s9 + $0x2ac] sm:$0xf0]  ;;  %v7718_v60 = vld [vmem:[%s8777_s9 + $0x3a0] sm:$0xf] }
 0x41d   : > { %v3186_v44 = vmax.f32 %v2723_v63, 0.0  ;;  %2951 = vmatmul.bf16.gmra.mxu2 %v9031_v15 }
 0x41e   : > { %3040 = vmatmul.bf16.gmra.mxu3 %v9033_v16 }
 0x41f   : > { %v9822_v62 = vpack.c.bf16 %v3186_v44, %v3182_v48 }
 0x420   : > { %v2636_v59 = vpop.f32.mrf.mxu2 }
 0x421   : > { %11068 = vst [vmem:[#allocation92_spill] sm:$0xff] %v9822_v62  ;;  %v2637_v52 = vadd.f32 %v2636_v59, %v2548_v41  ;;  %v2725_v53 = vpop.f32.mrf.mxu3  ;;  %v2460_v42 = vpop.f32.mrf.mxu0  ;;  %v7591_v41 = vor.u32 %v8054_v30, %v7590_v7 }
 0x422   : > { %v2461_v17 = vadd.f32 %v2460_v42, %v9703_v9  ;;  %v2549_v10 = vpop.f32.mrf.mxu1  ;;  %v7334_v42 = vld [vmem:[%s8777_s9 + $0xa0] sm:$0xf] }
 0x423   : > { %v2726_v12 = vadd.f32 %v2725_v53, %v2637_v52  ;;  %4384 = vmatpush.bf16.msra.mxu2 %v7591_v41 }
 0x424   : > { %v2550_v8 = vadd.f32 %v2549_v10, %v2461_v17  ;;  %v7990_v17 = vld [vmem:[%s8777_s9 + $0xac] sm:$0xf0] }
 0x425   : > { %v3190_v32 = vmax.f32 %v2726_v12, 0.0  ;;  %v7335_v10 = vor.u32 %v7990_v17, %v7334_v42  ;;  %v7462_v12 = vld [vmem:[%s8777_s9 + $0x1a0] sm:$0xf] }
 0x427   : > { %4206 = vmatpush.bf16.msra.mxu0 %v7335_v10 }
 0x428   : > { %v2638_v13 = vpop.f32.mrf.mxu2 }
 0x429   : > { %v2639_v54 = vadd.f32 %v2638_v13, %v2550_v8  ;;  %v2727_v14 = vpop.f32.mrf.mxu3  ;;  %v2463_v15 = vpop.f32.mrf.mxu0  ;;  %v8022_v8 = vld [vmem:[%s8777_s9 + $0x1ac] sm:$0xf0] }
 0x42a   : > { %v2464_v16 = vadd.f32 %v2463_v15, %v9703_v9  ;;  %v2552_v18 = vpop.f32.mrf.mxu1  ;;  %v7463_v13 = vor.u32 %v8022_v8, %v7462_v12  ;;  %v7574_v12 = vld [vmem:[%s8777_s9 + $0x280] sm:$0xf]  ;;  %v8050_v8 = vld [vmem:[%s8777_s9 + $0x28c] sm:$0xf0] }
 0x42b   : > { %v2728_v20 = vadd.f32 %v2727_v14, %v2639_v54 }
 0x42c   : > { %v2553_v29 = vadd.f32 %v2552_v18, %v2464_v16  ;;  %2778 = vmatmul.bf16.gmra.mxu0 %v9047_v25  ;;  %2867 = vmatmul.bf16.gmra.mxu1 %v9049_v26  ;;  %v8086_v25 = vld [vmem:[%s8777_s9 + $0x3ac] sm:$0xf0] }
 0x42d   : > { %v3194_v31 = vmax.f32 %v2728_v20, 0.0  ;;  %2956 = vmatmul.bf16.gmra.mxu2 %v9051_v27  ;;  %v7719_v26 = vor.u32 %v8086_v25, %v7718_v60  ;;  %4295 = vmatpush.bf16.msra.mxu1 %v7463_v13  ;;  %v7702_v13 = vld [vmem:[%s8777_s9 + $0x380] sm:$0xf] }
 0x42e   : > { %3045 = vmatmul.bf16.gmra.mxu3 %v9053_v28 }
 0x42f   : > { %v9830_v37 = vpack.c.bf16 %v3194_v31, %v3190_v32  ;;  %4473 = vmatpush.bf16.msra.mxu3 %v7719_v26 }
 0x430   : > { %v2641_v63 = vpop.f32.mrf.mxu2 }
 0x431   : > { %v2642_v48 = vadd.f32 %v2641_v63, %v2553_v29  ;;  %v2730_v44 = vpop.f32.mrf.mxu3  ;;  %v2465_v59 = vpop.f32.mrf.mxu0 }
 0x432   : > { %v2466_v27 = vadd.f32 %v2465_v59, %v9703_v9  ;;  %v2554_v52 = vpop.f32.mrf.mxu1 }
 0x433   : > { %v2731_v28 = vadd.f32 %v2730_v44, %v2642_v48 }
 0x434   : > { %v2555_v53 = vadd.f32 %v2554_v52, %v2466_v27 }
 0x435   : > { %v3198_v31 = vmax.f32 %v2731_v28, 0.0 }
 0x438   : > { %v2643_v54 = vpop.f32.mrf.mxu2 }
 0x439   : > { %v2644_v14 = vadd.f32 %v2643_v54, %v2555_v53  ;;  %v2732_v15 = vpop.f32.mrf.mxu3  ;;  %v2468_v16 = vpop.f32.mrf.mxu0 }
 0x43a   : > { %v2469_v18 = vadd.f32 %v2468_v16, %v9703_v9  ;;  %v2557_v20 = vpop.f32.mrf.mxu1 }
 0x43b   : > { %v2733_v29 = vadd.f32 %v2732_v15, %v2644_v14  ;;  %v7575_v14 = vor.u32 %v8050_v8, %v7574_v12 }
 0x43c   : > { %v2558_v32 = vadd.f32 %v2557_v20, %v2469_v18  ;;  %2783 = vmatmul.bf16.gmra.mxu0 %v9075_v50  ;;  %2872 = vmatmul.bf16.gmra.mxu1 %v9077_v51 }
 0x43d   : > { %v3202_v7 = vmax.f32 %v2733_v29, 0.0  ;;  %2961 = vmatmul.bf16.gmra.mxu2 %v9079_v55 }
 0x43e   : > { %3050 = vmatmul.bf16.gmra.mxu3 %v9081_v56  ;;  %4385 = vmatpush.bf16.msra.mxu2 %v7575_v14 }
 0x43f   : > { %v9846_v30 = vpack.c.bf16 %v3202_v7, %v3198_v31  ;;  %v7986_v31 = vld [vmem:[%s8777_s9 + $0x8c] sm:$0xf0] }
 0x440   : > { %v2646_v60 = vpop.f32.mrf.mxu2 }
 0x441   : > { %11069 = vst [vmem:[#allocation93_spill] sm:$0xff] %v9846_v30  ;;  %v2647_v63 = vadd.f32 %v2646_v60, %v2558_v32  ;;  %v2735_v41 = vpop.f32.mrf.mxu3  ;;  %v2470_v25 = vpop.f32.mrf.mxu0  ;;  %v7318_v32 = vld [vmem:[%s8777_s9 + $0x80] sm:$0xf] }
 0x442   : > { %v2471_v48 = vadd.f32 %v2470_v25, %v9703_v9  ;;  %v2559_v44 = vpop.f32.mrf.mxu1  ;;  %v7319_v7 = vor.u32 %v7986_v31, %v7318_v32  ;;  %v7446_v60 = vld [vmem:[%s8777_s9 + $0x180] sm:$0xf] }
 0x443   : > { %v2736_v59 = vadd.f32 %v2735_v41, %v2647_v63  ;;  %v8018_v63 = vld [vmem:[%s8777_s9 + $0x18c] sm:$0xf0] }
 0x444   : > { %v2560_v26 = vadd.f32 %v2559_v44, %v2471_v48  ;;  %v7447_v41 = vor.u32 %v8018_v63, %v7446_v60  ;;  %4207 = vmatpush.bf16.msra.mxu0 %v7319_v7 }
 0x445   : > { %v3206_v42 = vmax.f32 %v2736_v59, 0.0 }
 0x446   : > { %4296 = vmatpush.bf16.msra.mxu1 %v7447_v41 }
 0x448   : > { %v2648_v50 = vpop.f32.mrf.mxu2 }
 0x449   : > { %v2649_v27 = vadd.f32 %v2648_v50, %v2560_v26  ;;  %v2737_v51 = vpop.f32.mrf.mxu3  ;;  %v2473_v55 = vpop.f32.mrf.mxu0 }
 0x44a   : > { %v2474_v56 = vadd.f32 %v2473_v55, %v9703_v9  ;;  %v2562_v52 = vpop.f32.mrf.mxu1 }
 0x44b   : > { %v2738_v28 = vadd.f32 %v2737_v51, %v2649_v27 }
 0x44c   : > { %v2563_v53 = vadd.f32 %v2562_v52, %v2474_v56  ;;  %2788 = vmatmul.bf16.gmra.mxu0 %v9095_v1  ;;  %2877 = vmatmul.bf16.gmra.mxu1 %v9097_v2  ;;  %v8082_v1 = vld [vmem:[%s8777_s9 + $0x38c] sm:$0xf0] }
 0x44d   : > { %v3210_v17 = vmax.f32 %v2738_v28, 0.0  ;;  %2966 = vmatmul.bf16.gmra.mxu2 %v9099_v3  ;;  %v7703_v2 = vor.u32 %v8082_v1, %v7702_v13 }
 0x44e   : > { %3055 = vmatmul.bf16.gmra.mxu3 %v9101_v4 }
 0x44f   : > { %v9854_v10 = vpack.c.bf16 %v3210_v17, %v3206_v42  ;;  %4474 = vmatpush.bf16.msra.mxu3 %v7703_v2 }
 0x450   : > { %v2651_v54 = vpop.f32.mrf.mxu2 }
 0x451   : > { %v2652_v15 = vadd.f32 %v2651_v54, %v2563_v53  ;;  %v2740_v16 = vpop.f32.mrf.mxu3  ;;  %v2475_v18 = vpop.f32.mrf.mxu0 }
 0x452   : > { %v2476_v3 = vadd.f32 %v2475_v18, %v9703_v9  ;;  %v2564_v20 = vpop.f32.mrf.mxu1 }
 0x453   : > { %v2741_v4 = vadd.f32 %v2740_v16, %v2652_v15 }
 0x454   : > { %v2565_v29 = vadd.f32 %v2564_v20, %v2476_v3  ;;  %v7558_v20 = vld [vmem:[%s8777_s9 + $0x260] sm:$0xf] }
 0x455   : > { %v3214_v55 = vmax.f32 %v2741_v4, 0.0  ;;  %v8046_v4 = vld [vmem:[%s8777_s9 + $0x26c] sm:$0xf0] }
 0x456   : > { %v7559_v31 = vor.u32 %v8046_v4, %v7558_v20 }
 0x458   : > { %v2653_v25 = vpop.f32.mrf.mxu2  ;;  %4386 = vmatpush.bf16.msra.mxu2 %v7559_v31 }
 0x459   : > { %v2654_v48 = vadd.f32 %v2653_v25, %v2565_v29  ;;  %v2742_v44 = vpop.f32.mrf.mxu3  ;;  %v2478_v59 = vpop.f32.mrf.mxu0  ;;  %v7686_v29 = vld [vmem:[%s8777_s9 + $0x360] sm:$0xf] }
 0x45a   : > { %v2479_v26 = vadd.f32 %v2478_v59, %v9703_v9  ;;  %v2567_v50 = vpop.f32.mrf.mxu1 }
 0x45b   : > { %v2743_v27 = vadd.f32 %v2742_v44, %v2654_v48  ;;  %v7302_v48 = vld [vmem:[%s8777_s9 + $0x60] sm:$0xf]  ;;  %v7982_v44 = vld [vmem:[%s8777_s9 + $0x6c] sm:$0xf0] }
 0x45c   : > { %v2568_v51 = vadd.f32 %v2567_v50, %v2479_v26  ;;  %2793 = vmatmul.bf16.gmra.mxu0 %v9123_v33  ;;  %2882 = vmatmul.bf16.gmra.mxu1 %v9125_v34  ;;  %v7303_v59 = vor.u32 %v7982_v44, %v7302_v48  ;;  %v7430_v26 = vld [vmem:[%s8777_s9 + $0x160] sm:$0xf]  ;;  %v8014_v50 = vld [vmem:[%s8777_s9 + $0x16c] sm:$0xf0] }
 0x45d   : > { %v3218_v56 = vmax.f32 %v2743_v27, 0.0  ;;  %2971 = vmatmul.bf16.gmra.mxu2 %v9127_v35  ;;  %v7431_v27 = vor.u32 %v8014_v50, %v7430_v26  ;;  %v7978_v26 = vld [vmem:[%s8777_s9 + $0x4c] sm:$0xf0] }
 0x45e   : > { %3060 = vmatmul.bf16.gmra.mxu3 %v9129_v36  ;;  %4208 = vmatpush.bf16.msra.mxu0 %v7303_v59  ;;  %v7286_v59 = vld [vmem:[%s8777_s9 + $0x40] sm:$0xf] }
 0x45f   : > { %v9870_v52 = vpack.c.bf16 %v3218_v56, %v3214_v55  ;;  %4297 = vmatpush.bf16.msra.mxu1 %v7431_v27  ;;  %v7287_v50 = vor.u32 %v7978_v26, %v7286_v59  ;;  %v7414_v27 = vld [vmem:[%s8777_s9 + $0x140] sm:$0xf] }
 0x460   : > { %v2656_v28 = vpop.f32.mrf.mxu2 }
 0x461   : > { %11070 = vst [vmem:[#allocation94_spill] sm:$0xff] %v9870_v52  ;;  %v2657_v53 = vadd.f32 %v2656_v28, %v2568_v51  ;;  %v2745_v42 = vpop.f32.mrf.mxu3  ;;  %v2480_v17 = vpop.f32.mrf.mxu0 }
 0x462   : > { %v2481_v12 = vadd.f32 %v2480_v17, %v9703_v9  ;;  %v2569_v8 = vpop.f32.mrf.mxu1  ;;  %4209 = vmatpush.bf16.msra.mxu0 %v7287_v50 }
 0x463   : > { %v2746_v13 = vadd.f32 %v2745_v42, %v2657_v53 }
 0x464   : > { %v2570_v54 = vadd.f32 %v2569_v8, %v2481_v12 }
 0x465   : > { %v3222_v18 = vmax.f32 %v2746_v13, 0.0 }
 0x468   : > { %v2658_v33 = vpop.f32.mrf.mxu2 }
 0x469   : > { %v2659_v14 = vadd.f32 %v2658_v33, %v2570_v54  ;;  %v2747_v34 = vpop.f32.mrf.mxu3  ;;  %v2483_v35 = vpop.f32.mrf.mxu0 }
 0x46a   : > { %v2484_v36 = vadd.f32 %v2483_v35, %v9703_v9  ;;  %v2572_v1 = vpop.f32.mrf.mxu1 }
 0x46b   : > { %v2748_v15 = vadd.f32 %v2747_v34, %v2659_v14 }
 0x46c   : > { %v2573_v16 = vadd.f32 %v2572_v1, %v2484_v36  ;;  %2798 = vmatmul.bf16.gmra.mxu0 %v9143_v45  ;;  %2887 = vmatmul.bf16.gmra.mxu1 %v9145_v46  ;;  %v8078_v45 = vld [vmem:[%s8777_s9 + $0x36c] sm:$0xf0] }
 0x46d   : > { %v3226_v2 = vmax.f32 %v2748_v15, 0.0  ;;  %2976 = vmatmul.bf16.gmra.mxu2 %v9147_v47  ;;  %v7687_v46 = vor.u32 %v8078_v45, %v7686_v29 }
 0x46e   : > { %3065 = vmatmul.bf16.gmra.mxu3 %v9149_v49 }
 0x46f   : > { %v9878_v3 = vpack.c.bf16 %v3226_v2, %v3222_v18  ;;  %4475 = vmatpush.bf16.msra.mxu3 %v7687_v46 }
 0x470   : > { %v2661_v32 = vpop.f32.mrf.mxu2 }
 0x471   : > { %v2662_v7 = vadd.f32 %v2661_v32, %v2573_v16  ;;  %v2750_v60 = vpop.f32.mrf.mxu3  ;;  %v2485_v63 = vpop.f32.mrf.mxu0 }
 0x472   : > { %v2486_v47 = vadd.f32 %v2485_v63, %v9703_v9  ;;  %v2574_v41 = vpop.f32.mrf.mxu1  ;;  %v7670_v63 = vld [vmem:[%s8777_s9 + $0x340] sm:$0xf] }
 0x473   : > { %v2751_v49 = vadd.f32 %v2750_v60, %v2662_v7  ;;  %v7542_v7 = vld [vmem:[%s8777_s9 + $0x240] sm:$0xf]  ;;  %v8042_v60 = vld [vmem:[%s8777_s9 + $0x24c] sm:$0xf0] }
 0x474   : > { %v2575_v25 = vadd.f32 %v2574_v41, %v2486_v47  ;;  %v7543_v47 = vor.u32 %v8042_v60, %v7542_v7  ;;  %v11075_v7 = vld [vmem:[#allocation34_spill] sm:$0xff] }
 0x475   : > { %v3230_v8 = vmax.f32 %v2751_v49, 0.0 }
 0x476   : > { %4387 = vmatpush.bf16.msra.mxu2 %v7543_v47  ;;  %v11077_v47 = vld [vmem:[#allocation36_spill] sm:$0xff] }
 0x478   : > { %v2663_v51 = vpop.f32.mrf.mxu2 }
 0x479   : > { %v2664_v55 = vadd.f32 %v2663_v51, %v2575_v25  ;;  %v2752_v56 = vpop.f32.mrf.mxu3  ;;  %v2488_v28 = vpop.f32.mrf.mxu0  ;;  %v8010_v51 = vld [vmem:[%s8777_s9 + $0x14c] sm:$0xf0] }
 0x47a   : > { %v2489_v53 = vadd.f32 %v2488_v28, %v9703_v9  ;;  %v2577_v42 = vpop.f32.mrf.mxu1 }
 0x47b   : > { %v2753_v17 = vadd.f32 %v2752_v56, %v2664_v55  ;;  %v7415_v55 = vor.u32 %v8010_v51, %v7414_v27 }
 0x47c   : > { %v2578_v12 = vadd.f32 %v2577_v42, %v2489_v53  ;;  %2803 = vmatmul.bf16.gmra.mxu0 %v9171_v21  ;;  %2892 = vmatmul.bf16.gmra.mxu1 %v9173_v22  ;;  %v8233_v21 = vld [vmem:[%s8775_s24] sm:$0xf] }
 0x47d   : > { %v3234_v13 = vmax.f32 %v2753_v17, 0.0  ;;  %2981 = vmatmul.bf16.gmra.mxu2 %v9175_v23  ;;  %v9898_v18 = vperm.slane %v8233_v21, 3  ;;  %4298 = vmatpush.bf16.msra.mxu1 %v7415_v55 }
 0x47e   : > { %3070 = vmatmul.bf16.gmra.mxu3 %v9177_v24 }
 0x47f   : > { %v9894_v54 = vpack.c.bf16 %v3234_v13, %v3230_v8 }
 0x480   : > { %v2666_v33 = vpop.f32.mrf.mxu2 }
 0x481   : > { %11071 = vst [vmem:[#allocation95_spill] sm:$0xff] %v9894_v54  ;;  %v2667_v14 = vadd.f32 %v2666_v33, %v2578_v12  ;;  %v2755_v34 = vpop.f32.mrf.mxu3  ;;  %v2490_v35 = vpop.f32.mrf.mxu0 }
 0x482   : > { %v2491_v36 = vadd.f32 %v2490_v35, %v9703_v9  ;;  %v2579_v1 = vpop.f32.mrf.mxu1  ;;  %v11073_v35 = vld [vmem:[#allocation32_spill] sm:$0xff] }
 0x483   : > { %v2756_v15 = vadd.f32 %v2755_v34, %v2667_v14  ;;  %v11072_v34 = vld [vmem:[#allocation31_spill] sm:$0xff] }
 0x484   : > { %v2580_v16 = vadd.f32 %v2579_v1, %v2491_v36 }
 0x485   : > { %v3238_v9 = vmax.f32 %v2756_v15, 0.0 }
 0x488   : > { %v2668_v22 = vpop.f32.mrf.mxu2 }
 0x489   : > { %v2669_v23 = vadd.f32 %v2668_v22, %v2580_v16  ;;  %v2757_v24 = vpop.f32.mrf.mxu3  ;;  %v2769_v2 = vpop.f32.mrf.mxu0 }
 0x48a   : > { %v2770_v20 = vadd.f32 %v2769_v2, %v9898_v18  ;;  %v2858_v4 = vpop.f32.mrf.mxu1 }
 0x48b   : > { %v2758_v29 = vadd.f32 %v2757_v24, %v2669_v23 }
 0x48c   : > { %v2859_v32 = vadd.f32 %v2858_v4, %v2770_v20  ;;  %2808 = vmatmul.bf16.gmra.mxu0 %v9194_v43  ;;  %2897 = vmatmul.bf16.gmra.mxu1 %v9196_v57  ;;  %v8074_v43 = vld [vmem:[%s8777_s9 + $0x34c] sm:$0xf0] }
 0x48d   : > { %v3242_v31 = vmax.f32 %v2758_v29, 0.0  ;;  %2986 = vmatmul.bf16.gmra.mxu2 %v9198_v58  ;;  %v7671_v57 = vor.u32 %v8074_v43, %v7670_v63  ;;  %v11078_v43 = vld [vmem:[#allocation37_spill] sm:$0xff] }
 0x48e   : > { %3075 = vmatmul.bf16.gmra.mxu3 %v9201_v61 }
 0x48f   : > { %v9905_v45 = vpack.c.bf16 %v3242_v31, %v3238_v9  ;;  %4476 = vmatpush.bf16.msra.mxu3 %v7671_v57  ;;  %v7654_v57 = vld [vmem:[%s8777_s9 + $0x320] sm:$0xf] }
 0x490   : > { %v2947_v46 = vpop.f32.mrf.mxu2 }
 0x491   : > { %v2948_v41 = vadd.f32 %v2947_v46, %v2859_v32  ;;  %v3036_v49 = vpop.f32.mrf.mxu3  ;;  %v2771_v25 = vpop.f32.mrf.mxu0  ;;  %v11076_v46 = vld [vmem:[#allocation35_spill] sm:$0xff] }
 0x492   : > { %v2772_v58 = vadd.f32 %v2771_v25, %v9898_v18  ;;  %v2860_v48 = vpop.f32.mrf.mxu1  ;;  %v8038_v25 = vld [vmem:[%s8777_s9 + $0x22c] sm:$0xf0] }
 0x493   : > { %v3037_v61 = vadd.f32 %v3036_v49, %v2948_v41  ;;  %v7526_v49 = vld [vmem:[%s8777_s9 + $0x220] sm:$0xf] }
 0x494   : > { %v2861_v44 = vadd.f32 %v2860_v48, %v2772_v58  ;;  %v7527_v48 = vor.u32 %v8038_v25, %v7526_v49 }
 0x495   : > { %v3119_v33 = vmax.f32 %v3037_v61, 0.0  ;;  %v8070_v61 = vld [vmem:[%s8777_s9 + $0x32c] sm:$0xf0] }
 0x496   : > { %v7655_v50 = vor.u32 %v8070_v61, %v7654_v57  ;;  %4388 = vmatpush.bf16.msra.mxu2 %v7527_v48  ;;  %v11083_v48 = vld [vmem:[#allocation44_spill] sm:$0xff] }
 0x498   : > { %v2949_v56 = vpop.f32.mrf.mxu2  ;;  %4477 = vmatpush.bf16.msra.mxu3 %v7655_v50  ;;  %v11086_v50 = vld [vmem:[#allocation47_spill] sm:$0xff] }
 0x499   : > { %v2950_v28 = vadd.f32 %v2949_v56, %v2861_v44  ;;  %v3038_v53 = vpop.f32.mrf.mxu3  ;;  %v2774_v42 = vpop.f32.mrf.mxu0 }
 0x49a   : > { %v2775_v17 = vadd.f32 %v2774_v42, %v9898_v18  ;;  %v2863_v12 = vpop.f32.mrf.mxu1 }
 0x49b   : > { %v3039_v8 = vadd.f32 %v3038_v53, %v2950_v28  ;;  %v7270_v28 = vld [vmem:[%s8777_s9 + $0x20] sm:$0xf]  ;;  %v7974_v53 = vld [vmem:[%s8777_s9 + $0x2c] sm:$0xf0] }
 0x49c   : > { %v2864_v13 = vadd.f32 %v2863_v12, %v2775_v17  ;;  %2813 = vmatmul.bf16.gmra.mxu0 %v9224_v5  ;;  %2902 = vmatmul.bf16.gmra.mxu1 %v11037_v0  ;;  %v7271_v42 = vor.u32 %v7974_v53, %v7270_v28  ;;  %v7398_v17 = vld [vmem:[%s8777_s9 + $0x120] sm:$0xf]  ;;  %v8006_v12 = vld [vmem:[%s8777_s9 + $0x12c] sm:$0xf0] }
 0x49d   : > { %v3123_v14 = vmax.f32 %v3039_v8, 0.0  ;;  %2991 = vmatmul.bf16.gmra.mxu2 %v11072_v34  ;;  %v7399_v8 = vor.u32 %v8006_v12, %v7398_v17 }
 0x49e   : > { %3080 = vmatmul.bf16.gmra.mxu3 %v11073_v35  ;;  %4210 = vmatpush.bf16.msra.mxu0 %v7271_v42  ;;  %v8066_v42 = vld [vmem:[%s8777_s9 + $0x30c] sm:$0xf0] }
 0x49f   : > { %v9921_v36 = vpack.c.bf16 %v3123_v14, %v3119_v33  ;;  %4299 = vmatpush.bf16.msra.mxu1 %v7399_v8 }
 0x4a0   : > { %v2952_v1 = vpop.f32.mrf.mxu2 }
 0x4a1   : > { %11074 = vst [vmem:[#allocation31_spill] sm:$0xff] %v9921_v36  ;;  %v2953_v15 = vadd.f32 %v2952_v1, %v2864_v13  ;;  %v3041_v16 = vpop.f32.mrf.mxu3  ;;  %v2776_v21 = vpop.f32.mrf.mxu0 }
 0x4a2   : > { %v2777_v22 = vadd.f32 %v2776_v21, %v9898_v18  ;;  %v2865_v23 = vpop.f32.mrf.mxu1  ;;  %v11079_v21 = vld [vmem:[#allocation39_spill] sm:$0xff] }
 0x4a3   : > { %v3042_v24 = vadd.f32 %v3041_v16, %v2953_v15 }
 0x4a4   : > { %v2866_v2 = vadd.f32 %v2865_v23, %v2777_v22 }
 0x4a5   : > { %v3127_v60 = vmax.f32 %v3042_v24, 0.0  ;;  %v11080_v24 = vld [vmem:[#allocation40_spill] sm:$0xff] }
 0x4a8   : > { %v2954_v5 = vpop.f32.mrf.mxu2 }
 0x4a9   : > { %v2955_v20 = vadd.f32 %v2954_v5, %v2866_v2  ;;  %v3043_v0 = vpop.f32.mrf.mxu3  ;;  %v2779_v4 = vpop.f32.mrf.mxu0  ;;  %v11081_v2 = vld [vmem:[#allocation41_spill] sm:$0xff]  ;;  %v11082_v5 = vld [vmem:[#allocation42_spill] sm:$0xff] }
 0x4aa   : > { %v2780_v29 = vadd.f32 %v2779_v4, %v9898_v18  ;;  %v2868_v32 = vpop.f32.mrf.mxu1 }
 0x4ab   : > { %v3044_v9 = vadd.f32 %v3043_v0, %v2955_v20 }
 0x4ac   : > { %v2869_v31 = vadd.f32 %v2868_v32, %v2780_v29  ;;  %2818 = vmatmul.bf16.gmra.mxu0 %v11075_v7  ;;  %2907 = vmatmul.bf16.gmra.mxu1 %v11076_v46 }
 0x4ad   : > { %v3131_v63 = vmax.f32 %v3044_v9, 0.0  ;;  %2996 = vmatmul.bf16.gmra.mxu2 %v11077_v47 }
 0x4ae   : > { %3085 = vmatmul.bf16.gmra.mxu3 %v11078_v43 }
 0x4af   : > { %v9929_v41 = vpack.c.bf16 %v3131_v63, %v3127_v60 }
 0x4b0   : > { %v2957_v58 = vpop.f32.mrf.mxu2 }
 0x4b1   : > { %v2958_v44 = vadd.f32 %v2957_v58, %v2869_v31  ;;  %v3046_v59 = vpop.f32.mrf.mxu3  ;;  %v2781_v26 = vpop.f32.mrf.mxu0 }
 0x4b2   : > { %v2782_v27 = vadd.f32 %v2781_v26, %v9898_v18  ;;  %v2870_v51 = vpop.f32.mrf.mxu1  ;;  %v11085_v26 = vld [vmem:[#allocation46_spill] sm:$0xff] }
 0x4b3   : > { %v3047_v55 = vadd.f32 %v3046_v59, %v2958_v44  ;;  %v11084_v59 = vld [vmem:[#allocation45_spill] sm:$0xff] }
 0x4b4   : > { %v2871_v56 = vadd.f32 %v2870_v51, %v2782_v27  ;;  %v7510_v51 = vld [vmem:[%s8777_s9 + $0x200] sm:$0xf] }
 0x4b5   : > { %v3135_v22 = vmax.f32 %v3047_v55, 0.0  ;;  %v8034_v55 = vld [vmem:[%s8777_s9 + $0x20c] sm:$0xf0] }
 0x4b6   : > { %v7511_v53 = vor.u32 %v8034_v55, %v7510_v51 }
 0x4b8   : > { %v2959_v13 = vpop.f32.mrf.mxu2  ;;  %4389 = vmatpush.bf16.msra.mxu2 %v7511_v53 }
 0x4b9   : > { %v2960_v33 = vadd.f32 %v2959_v13, %v2871_v56  ;;  %v3048_v14 = vpop.f32.mrf.mxu3  ;;  %v2784_v34 = vpop.f32.mrf.mxu0  ;;  %v7638_v56 = vld [vmem:[%s8777_s9 + $0x300] sm:$0xf] }
 0x4ba   : > { %v2785_v35 = vadd.f32 %v2784_v34, %v9898_v18  ;;  %v2873_v1 = vpop.f32.mrf.mxu1  ;;  %v7639_v13 = vor.u32 %v8066_v42, %v7638_v56 }
 0x4bb   : > { %v3049_v15 = vadd.f32 %v3048_v14, %v2960_v33 }
 0x4bc   : > { %v2874_v16 = vadd.f32 %v2873_v1, %v2785_v35  ;;  %2823 = vmatmul.bf16.gmra.mxu0 %v11079_v21  ;;  %2912 = vmatmul.bf16.gmra.mxu1 %v11080_v24  ;;  %v7254_v1 = vld [vmem:[%s8777_s9] sm:$0xf] }
 0x4bd   : > { %v3139_v23 = vmax.f32 %v3049_v15, 0.0  ;;  %3001 = vmatmul.bf16.gmra.mxu2 %v11081_v2  ;;  %4478 = vmatpush.bf16.msra.mxu3 %v7639_v13  ;;  %v7970_v15 = vld [vmem:[%s8777_s9 + $0xc] sm:$0xf0]  ;;  %v7382_v21 = vld [vmem:[%s8777_s9 + $0x100] sm:$0xf] }
 0x4be   : > { %3090 = vmatmul.bf16.gmra.mxu3 %v11082_v5  ;;  %v11092_v13 = vld [vmem:[#allocation55_spill] sm:$0xff] }
 0x4bf   : > { %v9945_v20 = vpack.c.bf16 %v3139_v23, %v3135_v22  ;;  %v8002_v22 = vld [vmem:[%s8777_s9 + $0x10c] sm:$0xf0] }
 0x4c0   : > { %v2962_v0 = vpop.f32.mrf.mxu2  ;;  %v7383_v23 = vor.u32 %v8002_v22, %v7382_v21  ;;  %v7752_v22 = vld [vmem:[%s8777_s9 + $0x3f0] sm:$0xf0] }
 0x4c1   : > { %v2963_v4 = vadd.f32 %v2962_v0, %v2874_v16  ;;  %v3051_v29 = vpop.f32.mrf.mxu3  ;;  %v2786_v32 = vpop.f32.mrf.mxu0  ;;  %v7255_v16 = vor.u32 %v7970_v15, %v7254_v1  ;;  %v7624_v1 = vld [vmem:[%s8777_s9 + $0x2f0] sm:$0xf0]  ;;  %v8092_v15 = vld [vmem:[%s8777_s9 + $0x3e4] sm:$0xf] }
 0x4c2   : > { %v2787_v9 = vadd.f32 %v2786_v32, %v9898_v18  ;;  %v2875_v31 = vpop.f32.mrf.mxu1  ;;  %4300 = vmatpush.bf16.msra.mxu1 %v7383_v23 }
 0x4c3   : > { %v3052_v7 = vadd.f32 %v3051_v29, %v2963_v4  ;;  %4211 = vmatpush.bf16.msra.mxu0 %v7255_v16 }
 0x4c4   : > { %v2876_v60 = vadd.f32 %v2875_v31, %v2787_v9  ;;  %v11087_v31 = vld [vmem:[#allocation49_spill] sm:$0xff] }
 0x4c5   : > { %v3143_v61 = vmax.f32 %v3052_v7, 0.0 }
 0x4c8   : > { %v2964_v63 = vpop.f32.mrf.mxu2 }
 0x4c9   : > { %v2965_v46 = vadd.f32 %v2964_v63, %v2876_v60  ;;  %v3053_v47 = vpop.f32.mrf.mxu3  ;;  %v2789_v43 = vpop.f32.mrf.mxu0  ;;  %v11088_v63 = vld [vmem:[#allocation50_spill] sm:$0xff] }
 0x4ca   : > { %v2790_v49 = vadd.f32 %v2789_v43, %v9898_v18  ;;  %v2878_v25 = vpop.f32.mrf.mxu1 }
 0x4cb   : > { %v3054_v57 = vadd.f32 %v3053_v47, %v2965_v46  ;;  %v11089_v46 = vld [vmem:[#allocation51_spill] sm:$0xff]  ;;  %v11090_v47 = vld [vmem:[#allocation52_spill] sm:$0xff] }
 0x4cc   : > { %v2879_v58 = vadd.f32 %v2878_v25, %v2790_v49  ;;  %2828 = vmatmul.bf16.gmra.mxu0 %v11083_v48  ;;  %2917 = vmatmul.bf16.gmra.mxu1 %v11084_v59 }
 0x4cd   : > { %v3147_v44 = vmax.f32 %v3054_v57, 0.0  ;;  %3006 = vmatmul.bf16.gmra.mxu2 %v11085_v26 }
 0x4ce   : > { %3095 = vmatmul.bf16.gmra.mxu3 %v11086_v50 }
 0x4cf   : > { %v9953_v27 = vpack.c.bf16 %v3147_v44, %v3143_v61 }
 0x4d0   : > { %v2967_v28 = vpop.f32.mrf.mxu2 }
 0x4d1   : > { %v2968_v17 = vadd.f32 %v2967_v28, %v2879_v58  ;;  %v3056_v12 = vpop.f32.mrf.mxu3  ;;  %v2791_v8 = vpop.f32.mrf.mxu0 }
 0x4d2   : > { %v2792_v33 = vadd.f32 %v2791_v8, %v9898_v18  ;;  %v2880_v14 = vpop.f32.mrf.mxu1 }
 0x4d3   : > { %v3057_v34 = vadd.f32 %v3056_v12, %v2968_v17  ;;  %v11091_v17 = vld [vmem:[#allocation54_spill] sm:$0xff] }
 0x4d4   : > { %v2881_v35 = vadd.f32 %v2880_v14, %v2792_v33  ;;  %v11093_v33 = vld [vmem:[#allocation56_spill] sm:$0xff]  ;;  %v11094_v14 = vld [vmem:[#allocation57_spill] sm:$0xff] }
 0x4d5   : > { %v3151_v7 = vmax.f32 %v3057_v34, 0.0 }
 0x4d8   : > { %v2969_v24 = vpop.f32.mrf.mxu2 }
 0x4d9   : > { %v2970_v2 = vadd.f32 %v2969_v24, %v2881_v35  ;;  %v3058_v5 = vpop.f32.mrf.mxu3  ;;  %v2794_v0 = vpop.f32.mrf.mxu0  ;;  %v8060_v35 = vld [vmem:[%s8777_s9 + $0x2e4] sm:$0xf] }
 0x4da   : > { %v2795_v4 = vadd.f32 %v2794_v0, %v9898_v18  ;;  %v2883_v29 = vpop.f32.mrf.mxu1  ;;  %v7627_v21 = vor.u32 %v8060_v35, %v7624_v1  ;;  %v11096_v35 = vld [vmem:[#allocation33_spill] sm:$0xff] }
 0x4db   : > { %v3059_v32 = vadd.f32 %v3058_v5, %v2970_v2  ;;  %v7755_v5 = vor.u32 %v8092_v15, %v7752_v22 }
 0x4dc   : > { %v2884_v9 = vadd.f32 %v2883_v29, %v2795_v4  ;;  %2833 = vmatmul.bf16.gmra.mxu0 %v11087_v31  ;;  %2922 = vmatmul.bf16.gmra.mxu1 %v11088_v63  ;;  %v7368_v31 = vld [vmem:[%s8777_s9 + $0xf0] sm:$0xf0] }
 0x4dd   : > { %v3155_v60 = vmax.f32 %v3059_v32, 0.0  ;;  %3011 = vmatmul.bf16.gmra.mxu2 %v11089_v46  ;;  %4827 = vmatpush.bf16.msrb.mxu3 %v7755_v5  ;;  %v7496_v63 = vld [vmem:[%s8777_s9 + $0x1f0] sm:$0xf0] }
 0x4de   : > { %3100 = vmatmul.bf16.gmra.mxu3 %v11090_v47  ;;  %4738 = vmatpush.bf16.msrb.mxu2 %v7627_v21  ;;  %v11098_v21 = vld [vmem:[#allocation30_spill] sm:$0xff] }
 0x4df   : > { %v9969_v43 = vpack.c.bf16 %v3155_v60, %v3151_v7  ;;  %v8028_v60 = vld [vmem:[%s8777_s9 + $0x1e4] sm:$0xf] }
 0x4e0   : > { %v2972_v49 = vpop.f32.mrf.mxu2  ;;  %v7499_v46 = vor.u32 %v8028_v60, %v7496_v63 }
 0x4e1   : > { %v2973_v25 = vadd.f32 %v2972_v49, %v2884_v9  ;;  %v3061_v57 = vpop.f32.mrf.mxu3  ;;  %v2796_v58 = vpop.f32.mrf.mxu0  ;;  %v7996_v9 = vld [vmem:[%s8777_s9 + $0xe4] sm:$0xf] }
 0x4e2   : > { %v2797_v48 = vadd.f32 %v2796_v58, %v9898_v18  ;;  %v2885_v61 = vpop.f32.mrf.mxu1  ;;  %v7371_v7 = vor.u32 %v7996_v9, %v7368_v31  ;;  %4649 = vmatpush.bf16.msrb.mxu1 %v7499_v46 }
 0x4e3   : > { %v3062_v44 = vadd.f32 %v3061_v57, %v2973_v25 }
 0x4e4   : > { %v2886_v59 = vadd.f32 %v2885_v61, %v2797_v48  ;;  %4560 = vmatpush.bf16.msrb.mxu0 %v7371_v7 }
 0x4e5   : > { %v3159_v12 = vmax.f32 %v3062_v44, 0.0 }
 0x4e8   : > { %v2974_v26 = vpop.f32.mrf.mxu2 }
 0x4e9   : > { %v2975_v50 = vadd.f32 %v2974_v26, %v2886_v59  ;;  %v3063_v51 = vpop.f32.mrf.mxu3  ;;  %v2799_v55 = vpop.f32.mrf.mxu0 }
 0x4ea   : > { %v2800_v56 = vadd.f32 %v2799_v55, %v9898_v18  ;;  %v2888_v28 = vpop.f32.mrf.mxu1 }
 0x4eb   : > { %v3064_v53 = vadd.f32 %v3063_v51, %v2975_v50 }
 0x4ec   : > { %v2889_v42 = vadd.f32 %v2888_v28, %v2800_v56  ;;  %2838 = vmatmul.bf16.gmra.mxu0 %v11091_v17  ;;  %2927 = vmatmul.bf16.gmra.mxu1 %v11092_v13 }
 0x4ed   : > { %v3163_v8 = vmax.f32 %v3064_v53, 0.0  ;;  %3016 = vmatmul.bf16.gmra.mxu2 %v11093_v33 }
 0x4ee   : > { %3105 = vmatmul.bf16.gmra.mxu3 %v11094_v14 }
 0x4ef   : > { %v9977_v34 = vpack.c.bf16 %v3163_v8, %v3159_v12 }
 0x4f0   : > { %v2977_v16 = vpop.f32.mrf.mxu2 }
 0x4f1   : > { %v2978_v23 = vadd.f32 %v2977_v16, %v2889_v42  ;;  %v3066_v24 = vpop.f32.mrf.mxu3  ;;  %v2801_v2 = vpop.f32.mrf.mxu0  ;;  %v11097_v16 = vld [vmem:[#allocation69_spill] sm:$0xff] }
 0x4f2   : > { %v2802_v0 = vadd.f32 %v2801_v2, %v9898_v18  ;;  %v2890_v4 = vpop.f32.mrf.mxu1  ;;  %v8088_v2 = vld [vmem:[%s8777_s9 + $0x3c4] sm:$0xf] }
 0x4f3   : > { %v3067_v29 = vadd.f32 %v3066_v24, %v2978_v23  ;;  %v8056_v23 = vld [vmem:[%s8777_s9 + $0x2c4] sm:$0xf]  ;;  %v7608_v24 = vld [vmem:[%s8777_s9 + $0x2d0] sm:$0xf0] }
 0x4f4   : > { %v2891_v32 = vadd.f32 %v2890_v4, %v2802_v0  ;;  %v7611_v0 = vor.u32 %v8056_v23, %v7608_v24  ;;  %v7736_v4 = vld [vmem:[%s8777_s9 + $0x3d0] sm:$0xf0] }
 0x4f5   : > { %v3167_v59 = vmax.f32 %v3067_v29, 0.0  ;;  %v7739_v31 = vor.u32 %v8088_v2, %v7736_v4 }
 0x4f6   : > { %4739 = vmatpush.bf16.msrb.mxu2 %v7611_v0 }
 0x4f7   : > { %4828 = vmatpush.bf16.msrb.mxu3 %v7739_v31 }
 0x4f8   : > { %v2979_v47 = vpop.f32.mrf.mxu2 }
 0x4f9   : > { %v2980_v49 = vadd.f32 %v2979_v47, %v2891_v32  ;;  %v3068_v25 = vpop.f32.mrf.mxu3  ;;  %v2804_v57 = vpop.f32.mrf.mxu0  ;;  %v7992_v47 = vld [vmem:[%s8777_s9 + $0xc4] sm:$0xf] }
 0x4fa   : > { %v2805_v58 = vadd.f32 %v2804_v57, %v9898_v18  ;;  %v2893_v48 = vpop.f32.mrf.mxu1  ;;  %v8024_v57 = vld [vmem:[%s8777_s9 + $0x1c4] sm:$0xf] }
 0x4fb   : > { %v3069_v61 = vadd.f32 %v3068_v25, %v2980_v49  ;;  %v7352_v49 = vld [vmem:[%s8777_s9 + $0xd0] sm:$0xf0] }
 0x4fc   : > { %v2894_v44 = vadd.f32 %v2893_v48, %v2805_v58  ;;  %2843 = vmatmul.bf16.gmra.mxu0 %v9392_v11  ;;  %2932 = vmatmul.bf16.gmra.mxu1 %v9394_v6  ;;  %v7355_v25 = vor.u32 %v7992_v47, %v7352_v49  ;;  %v7480_v58 = vld [vmem:[%s8777_s9 + $0x1d0] sm:$0xf0]  ;;  %v8052_v47 = vld [vmem:[%s8777_s9 + $0x2a4] sm:$0xf] }
 0x4fd   : > { %v3171_v26 = vmax.f32 %v3069_v61, 0.0  ;;  %3021 = vmatmul.bf16.gmra.mxu2 %v9396_v38  ;;  %v7483_v48 = vor.u32 %v8024_v57, %v7480_v58  ;;  %v7592_v49 = vld [vmem:[%s8777_s9 + $0x2b0] sm:$0xf0] }
 0x4fe   : > { %3110 = vmatmul.bf16.gmra.mxu3 %v9399_v40  ;;  %4561 = vmatpush.bf16.msrb.mxu0 %v7355_v25  ;;  %v8084_v25 = vld [vmem:[%s8777_s9 + $0x3a4] sm:$0xf]  ;;  %v7595_v58 = vor.u32 %v8052_v47, %v7592_v49 }
 0x4ff   : > { %v9993_v50 = vpack.c.bf16 %v3171_v26, %v3167_v59  ;;  %4650 = vmatpush.bf16.msrb.mxu1 %v7483_v48  ;;  %v7720_v48 = vld [vmem:[%s8777_s9 + $0x3b0] sm:$0xf0] }
 0x500   : > { %v2982_v51 = vpop.f32.mrf.mxu2  ;;  %4740 = vmatpush.bf16.msrb.mxu2 %v7595_v58 }
 0x501   : > { %11095 = vst [vmem:[#allocation32_spill] sm:$0xff] %v9993_v50  ;;  %v2983_v55 = vadd.f32 %v2982_v51, %v2894_v44  ;;  %v3071_v56 = vpop.f32.mrf.mxu3  ;;  %v2806_v28 = vpop.f32.mrf.mxu0 }
 0x502   : > { %v2807_v53 = vadd.f32 %v2806_v28, %v9898_v18  ;;  %v2895_v42 = vpop.f32.mrf.mxu1 }
 0x503   : > { %v3072_v17 = vadd.f32 %v3071_v56, %v2983_v55 }
 0x504   : > { %v2896_v12 = vadd.f32 %v2895_v42, %v2807_v53  ;;  %v11100_v53 = vld [vmem:[#allocation38_spill] sm:$0xff] }
 0x505   : > { %v3175_v1 = vmax.f32 %v3072_v17, 0.0 }
 0x508   : > { %v2984_v11 = vpop.f32.mrf.mxu2 }
 0x509   : > { %v2985_v8 = vadd.f32 %v2984_v11, %v2896_v12  ;;  %v3073_v6 = vpop.f32.mrf.mxu3  ;;  %v2809_v38 = vpop.f32.mrf.mxu0  ;;  %v11101_v12 = vld [vmem:[#allocation70_spill] sm:$0xff]  ;;  %v11102_v11 = vld [vmem:[#allocation85_spill] sm:$0xff] }
 0x50a   : > { %v2810_v40 = vadd.f32 %v2809_v38, %v9898_v18  ;;  %v2898_v13 = vpop.f32.mrf.mxu1 }
 0x50b   : > { %v3074_v33 = vadd.f32 %v3073_v6, %v2985_v8 }
 0x50c   : > { %v2899_v14 = vadd.f32 %v2898_v13, %v2810_v40  ;;  %4212 = vmatmul.bf16.vlgmr.msra.gmra.mxu0 %v11096_v35  ;;  %4301 = vmatmul.bf16.vlgmr.msra.gmra.mxu1 %v11097_v16 }
 0x50d   : > { %v3179_v15 = vmax.f32 %v3074_v33, 0.0  ;;  %4390 = vmatmul.bf16.vlgmr.msra.gmra.mxu2 %v11098_v21 }
 0x50e   : > { %4479 = vmatmul.bf16.vlgmr.msra.gmra.mxu3 %v9921_v36 }
 0x50f   : > { %v10001_v22 = vpack.c.bf16 %v3179_v15, %v3175_v1 }
 0x510   : > { %v2987_v5 = vpop.f32.mrf.mxu2 }
 0x511   : > { %11099 = vst [vmem:[#allocation34_spill] sm:$0xff] %v10001_v22  ;;  %v2988_v29 = vadd.f32 %v2987_v5, %v2899_v14  ;;  %v3076_v32 = vpop.f32.mrf.mxu3  ;;  %v2811_v9 = vpop.f32.mrf.mxu0 }
 0x512   : > { %v2812_v7 = vadd.f32 %v2811_v9, %v9898_v18  ;;  %v2900_v60 = vpop.f32.mrf.mxu1  ;;  %v11104_v9 = vld [vmem:[#allocation43_spill] sm:$0xff] }
 0x513   : > { %v3077_v63 = vadd.f32 %v3076_v32, %v2988_v29 }
 0x514   : > { %v2901_v46 = vadd.f32 %v2900_v60, %v2812_v7  ;;  %v11105_v60 = vld [vmem:[#allocation71_spill] sm:$0xff] }
 0x515   : > { %v3183_v42 = vmax.f32 %v3077_v63, 0.0  ;;  %v11106_v63 = vld [vmem:[#allocation86_spill] sm:$0xff] }
 0x518   : > { %v2989_v61 = vpop.f32.mrf.mxu2 }
 0x519   : > { %v2990_v44 = vadd.f32 %v2989_v61, %v2901_v46  ;;  %v3078_v59 = vpop.f32.mrf.mxu3  ;;  %v2814_v26 = vpop.f32.mrf.mxu0 }
 0x51a   : > { %v2815_v51 = vadd.f32 %v2814_v26, %v9898_v18  ;;  %v2903_v55 = vpop.f32.mrf.mxu1  ;;  %v7723_v26 = vor.u32 %v8084_v25, %v7720_v48 }
 0x51b   : > { %v3079_v56 = vadd.f32 %v3078_v59, %v2990_v44 }
 0x51c   : > { %v2904_v28 = vadd.f32 %v2903_v55, %v2815_v51  ;;  %4217 = vmatmul.bf16.gmra.mxu0 %v11100_v53  ;;  %4306 = vmatmul.bf16.gmra.mxu1 %v11101_v12 }
 0x51d   : > { %v3187_v17 = vmax.f32 %v3079_v56, 0.0  ;;  %4395 = vmatmul.bf16.gmra.mxu2 %v11102_v11  ;;  %4829 = vmatpush.bf16.msrb.mxu3 %v7723_v26 }
 0x51e   : > { %4484 = vmatmul.bf16.gmra.mxu3 %v9929_v41 }
 0x51f   : > { %v10017_v8 = vpack.c.bf16 %v3187_v17, %v3183_v42  ;;  %v7988_v42 = vld [vmem:[%s8777_s9 + $0xa4] sm:$0xf]  ;;  %v7336_v17 = vld [vmem:[%s8777_s9 + $0xb0] sm:$0xf0] }
 0x520   : > { %v2992_v6 = vpop.f32.mrf.mxu2 }
 0x521   : > { %11103 = vst [vmem:[#allocation35_spill] sm:$0xff] %v10017_v8  ;;  %v2993_v38 = vadd.f32 %v2992_v6, %v2904_v28  ;;  %v3081_v40 = vpop.f32.mrf.mxu3  ;;  %v2816_v13 = vpop.f32.mrf.mxu0  ;;  %v7339_v6 = vor.u32 %v7988_v42, %v7336_v17 }
 0x522   : > { %v2817_v33 = vadd.f32 %v2816_v13, %v9898_v18  ;;  %v2905_v14 = vpop.f32.mrf.mxu1 }
 0x523   : > { %v3082_v1 = vadd.f32 %v3081_v40, %v2993_v38  ;;  %v8020_v38 = vld [vmem:[%s8777_s9 + $0x1a4] sm:$0xf]  ;;  %v7464_v40 = vld [vmem:[%s8777_s9 + $0x1b0] sm:$0xf0]  ;;  %4562 = vmatpush.bf16.msrb.mxu0 %v7339_v6  ;;  %v11111_v6 = vld [vmem:[#allocation53_spill] sm:$0xff] }
 0x524   : > { %v2906_v15 = vadd.f32 %v2905_v14, %v2817_v33  ;;  %v7467_v13 = vor.u32 %v8020_v38, %v7464_v40 }
 0x525   : > { %v3191_v31 = vmax.f32 %v3082_v1, 0.0 }
 0x526   : > { %4651 = vmatpush.bf16.msrb.mxu1 %v7467_v13  ;;  %v11112_v13 = vld [vmem:[#allocation73_spill] sm:$0xff] }
 0x528   : > { %v2994_v23 = vpop.f32.mrf.mxu2 }
 0x529   : > { %v2995_v24 = vadd.f32 %v2994_v23, %v2906_v15  ;;  %v3083_v2 = vpop.f32.mrf.mxu3  ;;  %v2819_v5 = vpop.f32.mrf.mxu0 }
 0x52a   : > { %v2820_v0 = vadd.f32 %v2819_v5, %v9898_v18  ;;  %v2908_v4 = vpop.f32.mrf.mxu1 }
 0x52b   : > { %v3084_v29 = vadd.f32 %v3083_v2, %v2995_v24 }
 0x52c   : > { %v2909_v32 = vadd.f32 %v2908_v4, %v2820_v0  ;;  %4222 = vmatmul.bf16.gmra.mxu0 %v11104_v9  ;;  %4311 = vmatmul.bf16.gmra.mxu1 %v11105_v60  ;;  %v11107_v0 = vld [vmem:[#allocation48_spill] sm:$0xff] }
 0x52d   : > { %v3195_v7 = vmax.f32 %v3084_v29, 0.0  ;;  %4400 = vmatmul.bf16.gmra.mxu2 %v11106_v63 }
 0x52e   : > { %4489 = vmatmul.bf16.gmra.mxu3 %v9945_v20 }
 0x52f   : > { %v10025_v46 = vpack.c.bf16 %v3195_v7, %v3191_v31  ;;  %v11109_v31 = vld [vmem:[#allocation87_spill] sm:$0xff] }
 0x530   : > { %v2997_v57 = vpop.f32.mrf.mxu2 }
 0x531   : > { %v2998_v61 = vadd.f32 %v2997_v57, %v2909_v32  ;;  %v3086_v44 = vpop.f32.mrf.mxu3  ;;  %v2821_v59 = vpop.f32.mrf.mxu0  ;;  %v11108_v32 = vld [vmem:[#allocation72_spill] sm:$0xff] }
 0x532   : > { %v2822_v51 = vadd.f32 %v2821_v59, %v9898_v18  ;;  %v2910_v55 = vpop.f32.mrf.mxu1 }
 0x533   : > { %v3087_v56 = vadd.f32 %v3086_v44, %v2998_v61 }
 0x534   : > { %v2911_v28 = vadd.f32 %v2910_v55, %v2822_v51 }
 0x535   : > { %v3199_v4 = vmax.f32 %v3087_v56, 0.0 }
 0x538   : > { %v2999_v33 = vpop.f32.mrf.mxu2 }
 0x539   : > { %v3000_v14 = vadd.f32 %v2999_v33, %v2911_v28  ;;  %v3088_v1 = vpop.f32.mrf.mxu3  ;;  %v2824_v15 = vpop.f32.mrf.mxu0  ;;  %v11113_v33 = vld [vmem:[#allocation88_spill] sm:$0xff] }
 0x53a   : > { %v2825_v23 = vadd.f32 %v2824_v15, %v9898_v18  ;;  %v2913_v24 = vpop.f32.mrf.mxu1  ;;  %v7576_v15 = vld [vmem:[%s8777_s9 + $0x290] sm:$0xf0] }
 0x53b   : > { %v3089_v2 = vadd.f32 %v3088_v1, %v3000_v14  ;;  %v8048_v1 = vld [vmem:[%s8777_s9 + $0x284] sm:$0xf] }
 0x53c   : > { %v2914_v5 = vadd.f32 %v2913_v24, %v2825_v23  ;;  %4227 = vmatmul.bf16.gmra.mxu0 %v11107_v0  ;;  %4316 = vmatmul.bf16.gmra.mxu1 %v11108_v32  ;;  %v8080_v23 = vld [vmem:[%s8777_s9 + $0x384] sm:$0xf] }
 0x53d   : > { %v3203_v29 = vmax.f32 %v3089_v2, 0.0  ;;  %4405 = vmatmul.bf16.gmra.mxu2 %v11109_v31  ;;  %v7579_v2 = vor.u32 %v8048_v1, %v7576_v15 }
 0x53e   : > { %4494 = vmatmul.bf16.gmra.mxu3 %v9953_v27 }
 0x53f   : > { %v10041_v7 = vpack.c.bf16 %v3203_v29, %v3199_v4  ;;  %4741 = vmatpush.bf16.msrb.mxu2 %v7579_v2 }
 0x540   : > { %v3002_v47 = vpop.f32.mrf.mxu2 }
 0x541   : > { %11110 = vst [vmem:[#allocation36_spill] sm:$0xff] %v10041_v7  ;;  %v3003_v49 = vadd.f32 %v3002_v47, %v2914_v5  ;;  %v3091_v25 = vpop.f32.mrf.mxu3  ;;  %v2826_v57 = vpop.f32.mrf.mxu0  ;;  %v7704_v5 = vld [vmem:[%s8777_s9 + $0x390] sm:$0xf0] }
 0x542   : > { %v2827_v58 = vadd.f32 %v2826_v57, %v9898_v18  ;;  %v2915_v48 = vpop.f32.mrf.mxu1 }
 0x543   : > { %v3092_v61 = vadd.f32 %v3091_v25, %v3003_v49  ;;  %v7707_v49 = vor.u32 %v8080_v23, %v7704_v5  ;;  %v11114_v23 = vld [vmem:[#allocation58_spill] sm:$0xff] }
 0x544   : > { %v2916_v44 = vadd.f32 %v2915_v48, %v2827_v58  ;;  %v11115_v5 = vld [vmem:[#allocation74_spill] sm:$0xff] }
 0x545   : > { %v3207_v38 = vmax.f32 %v3092_v61, 0.0  ;;  %4830 = vmatpush.bf16.msrb.mxu3 %v7707_v49  ;;  %v7984_v61 = vld [vmem:[%s8777_s9 + $0x84] sm:$0xf] }
 0x548   : > { %v3004_v59 = vpop.f32.mrf.mxu2 }
 0x549   : > { %v3005_v26 = vadd.f32 %v3004_v59, %v2916_v44  ;;  %v3093_v51 = vpop.f32.mrf.mxu3  ;;  %v2829_v55 = vpop.f32.mrf.mxu0  ;;  %v7320_v44 = vld [vmem:[%s8777_s9 + $0x90] sm:$0xf0] }
 0x54a   : > { %v2830_v56 = vadd.f32 %v2829_v55, %v9898_v18  ;;  %v2918_v28 = vpop.f32.mrf.mxu1  ;;  %v7323_v59 = vor.u32 %v7984_v61, %v7320_v44 }
 0x54b   : > { %v3094_v42 = vadd.f32 %v3093_v51, %v3005_v26  ;;  %v8016_v26 = vld [vmem:[%s8777_s9 + $0x184] sm:$0xf]  ;;  %v7448_v51 = vld [vmem:[%s8777_s9 + $0x190] sm:$0xf0] }
 0x54c   : > { %v2919_v17 = vadd.f32 %v2918_v28, %v2830_v56  ;;  %4232 = vmatmul.bf16.gmra.mxu0 %v11111_v6  ;;  %4321 = vmatmul.bf16.gmra.mxu1 %v11112_v13  ;;  %v7451_v55 = vor.u32 %v8016_v26, %v7448_v51 }
 0x54d   : > { %v3211_v40 = vmax.f32 %v3094_v42, 0.0  ;;  %4410 = vmatmul.bf16.gmra.mxu2 %v11113_v33  ;;  %4563 = vmatpush.bf16.msrb.mxu0 %v7323_v59 }
 0x54e   : > { %4499 = vmatmul.bf16.gmra.mxu3 %v9969_v43  ;;  %4652 = vmatpush.bf16.msrb.mxu1 %v7451_v55 }
 0x54f   : > { %v10049_v14 = vpack.c.bf16 %v3211_v40, %v3207_v38 }
 0x550   : > { %v3007_v24 = vpop.f32.mrf.mxu2 }
 0x551   : > { %v3008_v4 = vadd.f32 %v3007_v24, %v2919_v17  ;;  %v3096_v29 = vpop.f32.mrf.mxu3  ;;  %v2831_v47 = vpop.f32.mrf.mxu0 }
 0x552   : > { %v2832_v25 = vadd.f32 %v2831_v47, %v9898_v18  ;;  %v2920_v57 = vpop.f32.mrf.mxu1 }
 0x553   : > { %v3097_v58 = vadd.f32 %v3096_v29, %v3008_v4  ;;  %v11116_v4 = vld [vmem:[#allocation89_spill] sm:$0xff] }
 0x554   : > { %v2921_v48 = vadd.f32 %v2920_v57, %v2832_v25 }
 0x555   : > { %v3215_v24 = vmax.f32 %v3097_v58, 0.0 }
 0x558   : > { %v3009_v56 = vpop.f32.mrf.mxu2 }
 0x559   : > { %v3010_v28 = vadd.f32 %v3009_v56, %v2921_v48  ;;  %v3098_v42 = vpop.f32.mrf.mxu3  ;;  %v2834_v17 = vpop.f32.mrf.mxu0 }
 0x55a   : > { %v2835_v38 = vadd.f32 %v2834_v17, %v9898_v18  ;;  %v2923_v40 = vpop.f32.mrf.mxu1 }
 0x55b   : > { %v3099_v1 = vadd.f32 %v3098_v42, %v3010_v28 }
 0x55c   : > { %v2924_v15 = vadd.f32 %v2923_v40, %v2835_v38  ;;  %4237 = vmatmul.bf16.gmra.mxu0 %v11114_v23  ;;  %4326 = vmatmul.bf16.gmra.mxu1 %v11115_v5  ;;  %v11118_v38 = vld [vmem:[#allocation59_spill] sm:$0xff] }
 0x55d   : > { %v3219_v2 = vmax.f32 %v3099_v1, 0.0  ;;  %4415 = vmatmul.bf16.gmra.mxu2 %v11116_v4 }
 0x55e   : > { %4504 = vmatmul.bf16.gmra.mxu3 %v9977_v34 }
 0x55f   : > { %v10065_v29 = vpack.c.bf16 %v3219_v2, %v3215_v24  ;;  %v8044_v2 = vld [vmem:[%s8777_s9 + $0x264] sm:$0xf] }
 0x560   : > { %v3012_v47 = vpop.f32.mrf.mxu2 }
 0x561   : > { %11117 = vst [vmem:[#allocation37_spill] sm:$0xff] %v10065_v29  ;;  %v3013_v49 = vadd.f32 %v3012_v47, %v2924_v15  ;;  %v3101_v25 = vpop.f32.mrf.mxu3  ;;  %v2836_v57 = vpop.f32.mrf.mxu0  ;;  %v11119_v15 = vld [vmem:[#allocation75_spill] sm:$0xff]  ;;  %v7560_v47 = vld [vmem:[%s8777_s9 + $0x270] sm:$0xf0] }
 0x562   : > { %v2837_v48 = vadd.f32 %v2836_v57, %v9898_v18  ;;  %v2925_v61 = vpop.f32.mrf.mxu1  ;;  %v7563_v57 = vor.u32 %v8044_v2, %v7560_v47 }
 0x563   : > { %v3102_v44 = vadd.f32 %v3101_v25, %v3013_v49  ;;  %v8076_v49 = vld [vmem:[%s8777_s9 + $0x364] sm:$0xf] }
 0x564   : > { %v2926_v59 = vadd.f32 %v2925_v61, %v2837_v48  ;;  %v7688_v48 = vld [vmem:[%s8777_s9 + $0x370] sm:$0xf0]  ;;  %4742 = vmatpush.bf16.msrb.mxu2 %v7563_v57 }
 0x565   : > { %v3223_v40 = vmax.f32 %v3102_v44, 0.0 }
 0x568   : > { %v3014_v58 = vpop.f32.mrf.mxu2 }
 0x569   : > { %v3015_v26 = vadd.f32 %v3014_v58, %v2926_v59  ;;  %v3103_v51 = vpop.f32.mrf.mxu3  ;;  %v2839_v55 = vpop.f32.mrf.mxu0  ;;  %v7691_v58 = vor.u32 %v8076_v49, %v7688_v48 }
 0x56a   : > { %v2840_v56 = vadd.f32 %v2839_v55, %v9898_v18  ;;  %v2928_v28 = vpop.f32.mrf.mxu1 }
 0x56b   : > { %v3104_v42 = vadd.f32 %v3103_v51, %v3015_v26  ;;  %4831 = vmatpush.bf16.msrb.mxu3 %v7691_v58  ;;  %v11121_v58 = vld [vmem:[#allocation76_spill] sm:$0xff] }
 0x56c   : > { %v2929_v17 = vadd.f32 %v2928_v28, %v2840_v56  ;;  %4242 = vmatmul.bf16.gmra.mxu0 %v11118_v38  ;;  %4331 = vmatmul.bf16.gmra.mxu1 %v11119_v15  ;;  %v7980_v28 = vld [vmem:[%s8777_s9 + $0x64] sm:$0xf] }
 0x56d   : > { %v3227_v1 = vmax.f32 %v3104_v42, 0.0  ;;  %4420 = vmatmul.bf16.gmra.mxu2 %v9798_v39  ;;  %v7304_v42 = vld [vmem:[%s8777_s9 + $0x70] sm:$0xf0] }
 0x56e   : > { %4509 = vmatmul.bf16.gmra.mxu3 %v9993_v50  ;;  %v7307_v50 = vor.u32 %v7980_v28, %v7304_v42  ;;  %v7432_v39 = vld [vmem:[%s8777_s9 + $0x170] sm:$0xf0] }
 0x56f   : > { %v10073_v24 = vpack.c.bf16 %v3227_v1, %v3223_v40  ;;  %v8012_v40 = vld [vmem:[%s8777_s9 + $0x164] sm:$0xf] }
 0x570   : > { %v3017_v25 = vpop.f32.mrf.mxu2  ;;  %4564 = vmatpush.bf16.msrb.mxu0 %v7307_v50 }
 0x571   : > { %v3018_v61 = vadd.f32 %v3017_v25, %v2929_v17  ;;  %v3106_v44 = vpop.f32.mrf.mxu3  ;;  %v2841_v59 = vpop.f32.mrf.mxu0  ;;  %v7435_v17 = vor.u32 %v8012_v40, %v7432_v39 }
 0x572   : > { %v2842_v26 = vadd.f32 %v2841_v59, %v9898_v18  ;;  %v2930_v51 = vpop.f32.mrf.mxu1 }
 0x573   : > { %v3107_v55 = vadd.f32 %v3106_v44, %v3018_v61  ;;  %4653 = vmatpush.bf16.msrb.mxu1 %v7435_v17  ;;  %v11120_v61 = vld [vmem:[#allocation60_spill] sm:$0xff] }
 0x574   : > { %v2931_v56 = vadd.f32 %v2930_v51, %v2842_v26 }
 0x575   : > { %v3231_v44 = vmax.f32 %v3107_v55, 0.0 }
 0x578   : > { %v3019_v1 = vpop.f32.mrf.mxu2 }
 0x579   : > { %v3020_v2 = vadd.f32 %v3019_v1, %v2931_v56  ;;  %v3108_v47 = vpop.f32.mrf.mxu3  ;;  %v2844_v15 = vpop.f32.mrf.mxu0 }
 0x57a   : > { %v2845_v25 = vadd.f32 %v2844_v15, %v9898_v18  ;;  %v2933_v49 = vpop.f32.mrf.mxu1 }
 0x57b   : > { %v3109_v48 = vadd.f32 %v3108_v47, %v3020_v2 }
 0x57c   : > { %v2934_v57 = vadd.f32 %v2933_v49, %v2845_v25  ;;  %4247 = vmatmul.bf16.gmra.mxu0 %v11120_v61  ;;  %4336 = vmatmul.bf16.gmra.mxu1 %v11121_v58  ;;  %v11123_v49 = vld [vmem:[#allocation61_spill] sm:$0xff] }
 0x57d   : > { %v3235_v59 = vmax.f32 %v3109_v48, 0.0  ;;  %4425 = vmatmul.bf16.gmra.mxu2 %v9806_v19  ;;  %v3248_v19 = vld [vmem:[#allocation2 + $0x50] sm:$0xff] }
 0x57e   : > { %4514 = vmatmul.bf16.gmra.mxu3 %v10001_v22 }
 0x57f   : > { %v10089_v26 = vpack.c.bf16 %v3235_v59, %v3231_v44  ;;  %v11124_v44 = vld [vmem:[#allocation77_spill] sm:$0xff] }
 0x580   : > { %v3022_v39 = vpop.f32.mrf.mxu2 }
 0x581   : > { %11122 = vst [vmem:[#allocation39_spill] sm:$0xff] %v10089_v26  ;;  %v3023_v51 = vadd.f32 %v3022_v39, %v2934_v57  ;;  %v3111_v15 = vpop.f32.mrf.mxu3  ;;  %v2846_v56 = vpop.f32.mrf.mxu0  ;;  %v8040_v39 = vld [vmem:[%s8777_s9 + $0x244] sm:$0xf] }
 0x582   : > { %v2847_v50 = vadd.f32 %v2846_v56, %v9898_v18  ;;  %v2935_v28 = vpop.f32.mrf.mxu1 }
 0x583   : > { %v3112_v42 = vadd.f32 %v3111_v15, %v3023_v51  ;;  %v7544_v51 = vld [vmem:[%s8777_s9 + $0x250] sm:$0xf0]  ;;  %v8072_v15 = vld [vmem:[%s8777_s9 + $0x344] sm:$0xf] }
 0x584   : > { %v2936_v40 = vadd.f32 %v2935_v28, %v2847_v50  ;;  %v7547_v50 = vor.u32 %v8040_v39, %v7544_v51  ;;  %v7672_v28 = vld [vmem:[%s8777_s9 + $0x350] sm:$0xf0]  ;;  %v8008_v39 = vld [vmem:[%s8777_s9 + $0x144] sm:$0xf] }
 0x585   : > { %v3239_v48 = vmax.f32 %v3112_v42, 0.0  ;;  %v7416_v51 = vld [vmem:[%s8777_s9 + $0x150] sm:$0xf0] }
 0x586   : > { %4743 = vmatpush.bf16.msrb.mxu2 %v7547_v50  ;;  %v7419_v22 = vor.u32 %v8008_v39, %v7416_v51  ;;  %v11125_v50 = vld [vmem:[#allocation62_spill] sm:$0xff]  ;;  %v3256_v51 = vld [vmem:[#allocation2 + $0x320] sm:$0xff] }
 0x588   : > { %v3024_v55 = vpop.f32.mrf.mxu2  ;;  %4654 = vmatpush.bf16.msrb.mxu1 %v7419_v22 }
 0x589   : > { %v3025_v1 = vadd.f32 %v3024_v55, %v2936_v40  ;;  %v3113_v2 = vpop.f32.mrf.mxu3  ;;  %v4213_v47 = vpop.f32.mrf.mxu0 }
 0x58a   : > { %v4302_v17 = vpop.f32.mrf.mxu1 }
 0x58b   : > { %v3114_v25 = vadd.f32 %v3113_v2, %v3025_v1  ;;  %v4303_v59 = vadd.f32 %v4302_v17, %v4213_v47  ;;  %v7675_v1 = vor.u32 %v8072_v15, %v7672_v28  ;;  %v3244_v2 = vld [vmem:[#allocation2 + $0x2b0] sm:$0xff] }
 0x58c   : > { %4252 = vmatmul.bf16.gmra.mxu0 %v11123_v49  ;;  %4341 = vmatmul.bf16.gmra.mxu1 %v11124_v44 }
 0x58d   : > { %v3243_v57 = vmax.f32 %v3114_v25, 0.0  ;;  %4430 = vmatmul.bf16.gmra.mxu2 %v9822_v62  ;;  %4832 = vmatpush.bf16.msrb.mxu3 %v7675_v1 }
 0x58e   : > { %4519 = vmatmul.bf16.gmra.mxu3 %v10017_v8  ;;  %v7288_v8 = vld [vmem:[%s8777_s9 + $0x50] sm:$0xf0] }
 0x58f   : > { %v10096_v18 = vpack.c.bf16 %v3243_v57, %v3239_v48  ;;  %v7976_v57 = vld [vmem:[%s8777_s9 + $0x44] sm:$0xf] }
 0x590   : > { %v4391_v56 = vpop.f32.mrf.mxu2  ;;  %v7291_v44 = vor.u32 %v7976_v57, %v7288_v8 }
 0x591   : > { %v4392_v40 = vadd.f32 %v4391_v56, %v4303_v59  ;;  %v4480_v42 = vpop.f32.mrf.mxu3  ;;  %v4215_v55 = vpop.f32.mrf.mxu0 }
 0x592   : > { %v4304_v25 = vpop.f32.mrf.mxu1  ;;  %4565 = vmatpush.bf16.msrb.mxu0 %v7291_v44 }
 0x593   : > { %v4481_v48 = vadd.f32 %v4480_v42, %v4392_v40  ;;  %v4305_v17 = vadd.f32 %v4304_v25, %v4215_v55  ;;  %v11126_v42 = vld [vmem:[#allocation78_spill] sm:$0xff]  ;;  %v3252_v25 = vld [vmem:[#allocation2 + $0x380] sm:$0xff] }
 0x595   : > { %v5628_v47 = vadd.f32 %v4481_v48, %v3244_v2 }
 0x597   : > { %5756 = vst [vmem:[#allocation2 + $0x2b0] sm:$0xff] %v5628_v47 }
 0x598   : > { %v4393_v62 = vpop.f32.mrf.mxu2 }
 0x599   : > { %v4394_v59 = vadd.f32 %v4393_v62, %v4305_v17  ;;  %v4482_v56 = vpop.f32.mrf.mxu3  ;;  %v4218_v49 = vpop.f32.mrf.mxu0 }
 0x59a   : > { %v4307_v15 = vpop.f32.mrf.mxu1 }
 0x59b   : > { %v4483_v28 = vadd.f32 %v4482_v56, %v4394_v59  ;;  %v4308_v8 = vadd.f32 %v4307_v15, %v4218_v49  ;;  %v11127_v56 = vld [vmem:[#allocation63_spill] sm:$0xff] }
 0x59c   : > { %4257 = vmatmul.bf16.gmra.mxu0 %v11125_v50  ;;  %4346 = vmatmul.bf16.gmra.mxu1 %v11126_v42 }
 0x59d   : > { %v5632_v40 = vadd.f32 %v4483_v28, %v3248_v19  ;;  %4435 = vmatmul.bf16.gmra.mxu2 %v9830_v37  ;;  %v11128_v28 = vld [vmem:[#allocation79_spill] sm:$0xff] }
 0x59e   : > { %4524 = vmatmul.bf16.gmra.mxu3 %v10025_v46 }
 0x59f   : > { %5760 = vst [vmem:[#allocation2 + $0x50] sm:$0xff] %v5632_v40 }
 0x5a0   : > { %v4396_v62 = vpop.f32.mrf.mxu2 }
 0x5a1   : > { %v4397_v55 = vadd.f32 %v4396_v62, %v4308_v8  ;;  %v4485_v1 = vpop.f32.mrf.mxu3  ;;  %v4220_v2 = vpop.f32.mrf.mxu0  ;;  %v8036_v8 = vld [vmem:[%s8777_s9 + $0x224] sm:$0xf]  ;;  %v7528_v62 = vld [vmem:[%s8777_s9 + $0x230] sm:$0xf0] }
 0x5a2   : > { %v4309_v48 = vpop.f32.mrf.mxu1 }
 0x5a3   : > { %v4486_v44 = vadd.f32 %v4485_v1, %v4397_v55  ;;  %v4310_v22 = vadd.f32 %v4309_v48, %v4220_v2  ;;  %v7531_v1 = vor.u32 %v8036_v8, %v7528_v62  ;;  %v8068_v2 = vld [vmem:[%s8777_s9 + $0x324] sm:$0xf] }
 0x5a4   : > { %v8004_v62 = vld [vmem:[%s8777_s9 + $0x124] sm:$0xf] }
 0x5a5   : > { %v5636_v47 = vadd.f32 %v4486_v44, %v3252_v25  ;;  %v7656_v25 = vld [vmem:[%s8777_s9 + $0x330] sm:$0xf0]  ;;  %4744 = vmatpush.bf16.msrb.mxu2 %v7531_v1 }
 0x5a6   : > { %v11129_v1 = vld [vmem:[#allocation64_spill] sm:$0xff] }
 0x5a7   : > { %5764 = vst [vmem:[#allocation2 + $0x380] sm:$0xff] %v5636_v47 }
 0x5a8   : > { %v4398_v19 = vpop.f32.mrf.mxu2 }
 0x5a9   : > { %v4399_v17 = vadd.f32 %v4398_v19, %v4310_v22  ;;  %v4487_v57 = vpop.f32.mrf.mxu3  ;;  %v4223_v39 = vpop.f32.mrf.mxu0  ;;  %v7659_v22 = vor.u32 %v8068_v2, %v7656_v25  ;;  %v3260_v19 = vld [vmem:[#allocation2 + $0x2e0] sm:$0xff] }
 0x5aa   : > { %v4312_v49 = vpop.f32.mrf.mxu1 }
 0x5ab   : > { %v4488_v59 = vadd.f32 %v4487_v57, %v4399_v17  ;;  %v4313_v40 = vadd.f32 %v4312_v49, %v4223_v39  ;;  %4833 = vmatpush.bf16.msrb.mxu3 %v7659_v22  ;;  %v7972_v49 = vld [vmem:[%s8777_s9 + $0x24] sm:$0xf] }
 0x5ac   : > { %4262 = vmatmul.bf16.gmra.mxu0 %v11127_v56  ;;  %4351 = vmatmul.bf16.gmra.mxu1 %v11128_v28  ;;  %v3264_v56 = vld [vmem:[#allocation2 + $0x80] sm:$0xff] }
 0x5ad   : > { %v5640_v15 = vadd.f32 %v4488_v59, %v3256_v51  ;;  %4440 = vmatmul.bf16.gmra.mxu2 %v9846_v30  ;;  %v7272_v59 = vld [vmem:[%s8777_s9 + $0x30] sm:$0xf0] }
 0x5ae   : > { %4529 = vmatmul.bf16.gmra.mxu3 %v10041_v7  ;;  %v7275_v8 = vor.u32 %v7972_v49, %v7272_v59  ;;  %v7400_v7 = vld [vmem:[%s8777_s9 + $0x130] sm:$0xf0] }
 0x5af   : > { %5768 = vst [vmem:[#allocation2 + $0x320] sm:$0xff] %v5640_v15  ;;  %v7403_v28 = vor.u32 %v8004_v62, %v7400_v7  ;;  %v3272_v62 = vld [vmem:[#allocation2 + $0x138] sm:$0xff] }
 0x5b0   : > { %v4401_v55 = vpop.f32.mrf.mxu2  ;;  %4566 = vmatpush.bf16.msrb.mxu0 %v7275_v8 }
 0x5b1   : > { %v4402_v48 = vadd.f32 %v4401_v55, %v4313_v40  ;;  %v4490_v44 = vpop.f32.mrf.mxu3  ;;  %v4225_v47 = vpop.f32.mrf.mxu0  ;;  %4655 = vmatpush.bf16.msrb.mxu1 %v7403_v28 }
 0x5b2   : > { %v4314_v17 = vpop.f32.mrf.mxu1 }
 0x5b3   : > { %v4491_v57 = vadd.f32 %v4490_v44, %v4402_v48  ;;  %v4315_v51 = vadd.f32 %v4314_v17, %v4225_v47  ;;  %v11130_v44 = vld [vmem:[#allocation80_spill] sm:$0xff] }
 0x5b5   : > { %v5644_v39 = vadd.f32 %v4491_v57, %v3260_v19  ;;  %v3268_v57 = vld [vmem:[#allocation2 + $0x3e8] sm:$0xff] }
 0x5b7   : > { %5772 = vst [vmem:[#allocation2 + $0x2e0] sm:$0xff] %v5644_v39 }
 0x5b8   : > { %v4403_v15 = vpop.f32.mrf.mxu2 }
 0x5b9   : > { %v4404_v40 = vadd.f32 %v4403_v15, %v4315_v51  ;;  %v4492_v55 = vpop.f32.mrf.mxu3  ;;  %v4228_v30 = vpop.f32.mrf.mxu0 }
 0x5ba   : > { %v4317_v2 = vpop.f32.mrf.mxu1 }
 0x5bb   : > { %v4493_v25 = vadd.f32 %v4492_v55, %v4404_v40  ;;  %v4318_v47 = vadd.f32 %v4317_v2, %v4228_v30  ;;  %v11131_v55 = vld [vmem:[#allocation65_spill] sm:$0xff] }
 0x5bc   : > { %4267 = vmatmul.bf16.gmra.mxu0 %v11129_v1  ;;  %4356 = vmatmul.bf16.gmra.mxu1 %v11130_v44 }
 0x5bd   : > { %v5648_v48 = vadd.f32 %v4493_v25, %v3264_v56  ;;  %4445 = vmatmul.bf16.gmra.mxu2 %v9854_v10  ;;  %v11132_v25 = vld [vmem:[#allocation81_spill] sm:$0xff] }
 0x5be   : > { %4534 = vmatmul.bf16.gmra.mxu3 %v10049_v14 }
 0x5bf   : > { %5776 = vst [vmem:[#allocation2 + $0x80] sm:$0xff] %v5648_v48 }
 0x5c0   : > { %v4406_v22 = vpop.f32.mrf.mxu2 }
 0x5c1   : > { %v4407_v19 = vadd.f32 %v4406_v22, %v4318_v47  ;;  %v4495_v17 = vpop.f32.mrf.mxu3  ;;  %v4230_v7 = vpop.f32.mrf.mxu0  ;;  %v8032_v47 = vld [vmem:[%s8777_s9 + $0x204] sm:$0xf]  ;;  %v7512_v22 = vld [vmem:[%s8777_s9 + $0x210] sm:$0xf0] }
 0x5c2   : > { %v4319_v39 = vpop.f32.mrf.mxu1 }
 0x5c3   : > { %v4496_v51 = vadd.f32 %v4495_v17, %v4407_v19  ;;  %v4320_v28 = vadd.f32 %v4319_v39, %v4230_v7  ;;  %v7515_v17 = vor.u32 %v8032_v47, %v7512_v22  ;;  %v8064_v7 = vld [vmem:[%s8777_s9 + $0x304] sm:$0xf] }
 0x5c4   : > { %v8000_v22 = vld [vmem:[%s8777_s9 + $0x104] sm:$0xf] }
 0x5c5   : > { %v5652_v49 = vadd.f32 %v4496_v51, %v3268_v57  ;;  %v7640_v57 = vld [vmem:[%s8777_s9 + $0x310] sm:$0xf0]  ;;  %4745 = vmatpush.bf16.msrb.mxu2 %v7515_v17  ;;  %v11133_v17 = vld [vmem:[#allocation66_spill] sm:$0xff] }
 0x5c7   : > { %5780 = vst [vmem:[#allocation2 + $0x3e8] sm:$0xff] %v5652_v49 }
 0x5c8   : > { %v4408_v56 = vpop.f32.mrf.mxu2 }
 0x5c9   : > { %v4409_v59 = vadd.f32 %v4408_v56, %v4320_v28  ;;  %v4497_v15 = vpop.f32.mrf.mxu3  ;;  %v4233_v8 = vpop.f32.mrf.mxu0  ;;  %v7643_v28 = vor.u32 %v8064_v7, %v7640_v57  ;;  %v3276_v56 = vld [vmem:[#allocation2 + $0x100] sm:$0xff] }
 0x5ca   : > { %v4322_v30 = vpop.f32.mrf.mxu1 }
 0x5cb   : > { %v4498_v40 = vadd.f32 %v4497_v15, %v4409_v59  ;;  %v4323_v48 = vadd.f32 %v4322_v30, %v4233_v8  ;;  %4834 = vmatpush.bf16.msrb.mxu3 %v7643_v28  ;;  %v7968_v30 = vld [vmem:[%s8777_s9 + $0x4] sm:$0xf] }
 0x5cc   : > { %4272 = vmatmul.bf16.gmra.mxu0 %v11131_v55  ;;  %4361 = vmatmul.bf16.gmra.mxu1 %v11132_v25  ;;  %v3280_v55 = vld [vmem:[#allocation2 + $0x218] sm:$0xff] }
 0x5cd   : > { %v5656_v2 = vadd.f32 %v4498_v40, %v3272_v62  ;;  %4450 = vmatmul.bf16.gmra.mxu2 %v9870_v52  ;;  %v7256_v40 = vld [vmem:[%s8777_s9 + $0x10] sm:$0xf0] }
 0x5ce   : > { %4539 = vmatmul.bf16.gmra.mxu3 %v10065_v29  ;;  %v7259_v47 = vor.u32 %v7968_v30, %v7256_v40  ;;  %v7384_v29 = vld [vmem:[%s8777_s9 + $0x110] sm:$0xf0] }
 0x5cf   : > { %5784 = vst [vmem:[#allocation2 + $0x138] sm:$0xff] %v5656_v2  ;;  %v7387_v25 = vor.u32 %v8000_v22, %v7384_v29  ;;  %v3288_v22 = vld [vmem:[#allocation2 + $0xb0] sm:$0xff] }
 0x5d0   : > { %v4411_v19 = vpop.f32.mrf.mxu2  ;;  %4567 = vmatpush.bf16.msrb.mxu0 %v7259_v47 }
 0x5d1   : > { %v4412_v39 = vadd.f32 %v4411_v19, %v4323_v48  ;;  %v4500_v51 = vpop.f32.mrf.mxu3  ;;  %v4235_v49 = vpop.f32.mrf.mxu0  ;;  %4656 = vmatpush.bf16.msrb.mxu1 %v7387_v25 }
 0x5d2   : > { %v4324_v59 = vpop.f32.mrf.mxu1 }
 0x5d3   : > { %v4501_v15 = vadd.f32 %v4500_v51, %v4412_v39  ;;  %v4325_v62 = vadd.f32 %v4324_v59, %v4235_v49  ;;  %v11134_v51 = vld [vmem:[#allocation82_spill] sm:$0xff] }
 0x5d5   : > { %v5660_v8 = vadd.f32 %v4501_v15, %v3276_v56  ;;  %v3284_v15 = vld [vmem:[#allocation2 + $0x2a0] sm:$0xff] }
 0x5d7   : > { %5788 = vst [vmem:[#allocation2 + $0x100] sm:$0xff] %v5660_v8 }
 0x5d8   : > { %v4413_v2 = vpop.f32.mrf.mxu2 }
 0x5d9   : > { %v4414_v48 = vadd.f32 %v4413_v2, %v4325_v62  ;;  %v4502_v19 = vpop.f32.mrf.mxu3  ;;  %v4238_v52 = vpop.f32.mrf.mxu0 }
 0x5da   : > { %v4327_v7 = vpop.f32.mrf.mxu1 }
 0x5db   : > { %v4503_v57 = vadd.f32 %v4502_v19, %v4414_v48  ;;  %v4328_v49 = vadd.f32 %v4327_v7, %v4238_v52  ;;  %v11135_v19 = vld [vmem:[#allocation67_spill] sm:$0xff] }
 0x5dc   : > { %4277 = vmatmul.bf16.gmra.mxu0 %v11133_v17  ;;  %4366 = vmatmul.bf16.gmra.mxu1 %v11134_v51 }
 0x5dd   : > { %v5664_v39 = vadd.f32 %v4503_v57, %v3280_v55  ;;  %4455 = vmatmul.bf16.gmra.mxu2 %v9878_v3  ;;  %v11136_v57 = vld [vmem:[#allocation83_spill] sm:$0xff] }
 0x5de   : > { %4544 = vmatmul.bf16.gmra.mxu3 %v10073_v24 }
 0x5df   : > { %5792 = vst [vmem:[#allocation2 + $0x218] sm:$0xff] %v5664_v39 }
 0x5e0   : > { %v4416_v28 = vpop.f32.mrf.mxu2 }
 0x5e1   : > { %v4417_v56 = vadd.f32 %v4416_v28, %v4328_v49  ;;  %v4505_v59 = vpop.f32.mrf.mxu3  ;;  %v4240_v29 = vpop.f32.mrf.mxu0  ;;  %v7630_v49 = vld [vmem:[%s8777_s9 + $0x2e8] sm:$0xf]  ;;  %v8063_v28 = vld [vmem:[%s8777_s9 + $0x2f4] sm:$0xf0] }
 0x5e2   : > { %v4329_v8 = vpop.f32.mrf.mxu1 }
 0x5e3   : > { %v4506_v62 = vadd.f32 %v4505_v59, %v4417_v56  ;;  %v4330_v25 = vadd.f32 %v4329_v8, %v4240_v29  ;;  %v7631_v59 = vor.u32 %v8063_v28, %v7630_v49  ;;  %v7758_v29 = vld [vmem:[%s8777_s9 + $0x3e8] sm:$0xf] }
 0x5e4   : > { %v7502_v28 = vld [vmem:[%s8777_s9 + $0x1e8] sm:$0xf] }
 0x5e5   : > { %v5668_v30 = vadd.f32 %v4506_v62, %v3284_v15  ;;  %v8095_v15 = vld [vmem:[%s8777_s9 + $0x3f4] sm:$0xf0]  ;;  %5094 = vmatpush.bf16.msra.mxu2 %v7631_v59 }
 0x5e6   : > { %v11137_v59 = vld [vmem:[#allocation68_spill] sm:$0xff] }
 0x5e7   : > { %5796 = vst [vmem:[#allocation2 + $0x2a0] sm:$0xff] %v5668_v30 }
 0x5e8   : > { %v4418_v55 = vpop.f32.mrf.mxu2 }
 0x5e9   : > { %v4419_v40 = vadd.f32 %v4418_v55, %v4330_v25  ;;  %v4507_v2 = vpop.f32.mrf.mxu3  ;;  %v4243_v47 = vpop.f32.mrf.mxu0  ;;  %v7759_v25 = vor.u32 %v8095_v15, %v7758_v29  ;;  %v3292_v55 = vld [vmem:[#allocation2 + $0x230] sm:$0xff] }
 0x5ea   : > { %v4332_v52 = vpop.f32.mrf.mxu1 }
 0x5eb   : > { %v4508_v48 = vadd.f32 %v4507_v2, %v4419_v40  ;;  %v4333_v39 = vadd.f32 %v4332_v52, %v4243_v47  ;;  %5183 = vmatpush.bf16.msra.mxu3 %v7759_v25  ;;  %v7374_v52 = vld [vmem:[%s8777_s9 + $0xe8] sm:$0xf] }
 0x5ec   : > { %4282 = vmatmul.bf16.gmra.mxu0 %v11135_v19  ;;  %4371 = vmatmul.bf16.gmra.mxu1 %v11136_v57  ;;  %v3296_v19 = vld [vmem:[#allocation2 + $0x208] sm:$0xff] }
 0x5ed   : > { %v5672_v7 = vadd.f32 %v4508_v48, %v3288_v22  ;;  %4460 = vmatmul.bf16.gmra.mxu2 %v9894_v54  ;;  %v7999_v48 = vld [vmem:[%s8777_s9 + $0xf4] sm:$0xf0] }
 0x5ee   : > { %4549 = vmatmul.bf16.gmra.mxu3 %v10089_v26  ;;  %v7375_v49 = vor.u32 %v7999_v48, %v7374_v52  ;;  %v8031_v26 = vld [vmem:[%s8777_s9 + $0x1f4] sm:$0xf0] }
 0x5ef   : > { %5800 = vst [vmem:[#allocation2 + $0xb0] sm:$0xff] %v5672_v7  ;;  %v7503_v57 = vor.u32 %v8031_v26, %v7502_v28  ;;  %v3304_v28 = vld [vmem:[#allocation2 + $0x1d8] sm:$0xff] }
 0x5f0   : > { %v4421_v56 = vpop.f32.mrf.mxu2  ;;  %4916 = vmatpush.bf16.msra.mxu0 %v7375_v49 }
 0x5f1   : > { %v4422_v8 = vadd.f32 %v4421_v56, %v4333_v39  ;;  %v4510_v62 = vpop.f32.mrf.mxu3  ;;  %v4245_v30 = vpop.f32.mrf.mxu0  ;;  %5005 = vmatpush.bf16.msra.mxu1 %v7503_v57 }
 0x5f2   : > { %v4334_v40 = vpop.f32.mrf.mxu1 }
 0x5f3   : > { %v4511_v2 = vadd.f32 %v4510_v62, %v4422_v8  ;;  %v4335_v22 = vadd.f32 %v4334_v40, %v4245_v30  ;;  %v11138_v62 = vld [vmem:[#allocation84_spill] sm:$0xff] }
 0x5f5   : > { %v5676_v47 = vadd.f32 %v4511_v2, %v3292_v55  ;;  %v3300_v2 = vld [vmem:[#allocation2 + $0x358] sm:$0xff] }
 0x5f7   : > { %5804 = vst [vmem:[#allocation2 + $0x230] sm:$0xff] %v5676_v47 }
 0x5f8   : > { %v4423_v7 = vpop.f32.mrf.mxu2 }
 0x5f9   : > { %v4424_v39 = vadd.f32 %v4423_v7, %v4335_v22  ;;  %v4512_v56 = vpop.f32.mrf.mxu3  ;;  %v4248_v54 = vpop.f32.mrf.mxu0 }
 0x5fa   : > { %v4337_v29 = vpop.f32.mrf.mxu1 }
 0x5fb   : > { %v4513_v15 = vadd.f32 %v4512_v56, %v4424_v39  ;;  %v4338_v30 = vadd.f32 %v4337_v29, %v4248_v54 }
 0x5fc   : > { %4287 = vmatmul.bf16.gmra.mxu0 %v11137_v59  ;;  %4376 = vmatmul.bf16.gmra.mxu1 %v11138_v62 }
 0x5fd   : > { %v5680_v8 = vadd.f32 %v4513_v15, %v3296_v19  ;;  %4465 = vmatmul.bf16.gmra.mxu2 %v9905_v45  ;;  %v7614_v15 = vld [vmem:[%s8777_s9 + $0x2c8] sm:$0xf] }
 0x5fe   : > { %4554 = vmatmul.bf16.gmra.mxu3 %v10096_v18 }
 0x5ff   : > { %5808 = vst [vmem:[#allocation2 + $0x208] sm:$0xff] %v5680_v8  ;;  %v8059_v8 = vld [vmem:[%s8777_s9 + $0x2d4] sm:$0xf0] }
 0x600   : > { %v4426_v25 = vpop.f32.mrf.mxu2 }
 0x601   : > { %v4427_v55 = vadd.f32 %v4426_v25, %v4338_v30  ;;  %v4515_v40 = vpop.f32.mrf.mxu3  ;;  %v4250_v26 = vpop.f32.mrf.mxu0  ;;  %v7615_v25 = vor.u32 %v8059_v8, %v7614_v15  ;;  %v8027_v15 = vld [vmem:[%s8777_s9 + $0x1d4] sm:$0xf0] }
 0x602   : > { %v4339_v47 = vpop.f32.mrf.mxu1 }
 0x603   : > { %v4516_v22 = vadd.f32 %v4515_v40, %v4427_v55  ;;  %v4340_v57 = vadd.f32 %v4339_v47, %v4250_v26  ;;  %v7742_v55 = vld [vmem:[%s8777_s9 + $0x3c8] sm:$0xf]  ;;  %v8091_v40 = vld [vmem:[%s8777_s9 + $0x3d4] sm:$0xf0]  ;;  %5095 = vmatpush.bf16.msra.mxu2 %v7615_v25 }
 0x605   : > { %v5684_v52 = vadd.f32 %v4516_v22, %v3300_v2  ;;  %v7743_v22 = vor.u32 %v8091_v40, %v7742_v55 }
 0x607   : > { %5812 = vst [vmem:[#allocation2 + $0x358] sm:$0xff] %v5684_v52  ;;  %v3308_v52 = vld [vmem:[#allocation2 + $0x130] sm:$0xff]  ;;  %5184 = vmatpush.bf16.msra.mxu3 %v7743_v22 }
 0x608   : > { %v4428_v19 = vpop.f32.mrf.mxu2 }
 0x609   : > { %v4429_v48 = vadd.f32 %v4428_v19, %v4340_v57  ;;  %v4517_v7 = vpop.f32.mrf.mxu3  ;;  %v4253_v49 = vpop.f32.mrf.mxu0 }
 0x60a   : > { %v4342_v54 = vpop.f32.mrf.mxu1 }
 0x60b   : > { %v4518_v39 = vadd.f32 %v4517_v7, %v4429_v48  ;;  %v4343_v29 = vadd.f32 %v4342_v54, %v4253_v49  ;;  %v7358_v49 = vld [vmem:[%s8777_s9 + $0xc8] sm:$0xf] }
 0x60c   : > { %4568 = vmatmul.bf16.vlgmr.msrb.gmra.mxu0 %v11096_v35  ;;  %4657 = vmatmul.bf16.vlgmr.msrb.gmra.mxu1 %v11097_v16 }
 0x60d   : > { %v5688_v56 = vadd.f32 %v4518_v39, %v3304_v28  ;;  %4746 = vmatmul.bf16.vlgmr.msrb.gmra.mxu2 %v11098_v21  ;;  %v7995_v28 = vld [vmem:[%s8777_s9 + $0xd4] sm:$0xf0]  ;;  %v3312_v21 = vld [vmem:[#allocation2 + $0x70] sm:$0xff] }
 0x60e   : > { %4835 = vmatmul.bf16.vlgmr.msrb.gmra.mxu3 %v9921_v36  ;;  %v7359_v39 = vor.u32 %v7995_v28, %v7358_v49 }
 0x60f   : > { %5816 = vst [vmem:[#allocation2 + $0x1d8] sm:$0xff] %v5688_v56  ;;  %v7486_v56 = vld [vmem:[%s8777_s9 + $0x1c8] sm:$0xf] }
 0x610   : > { %v4431_v30 = vpop.f32.mrf.mxu2  ;;  %v7487_v36 = vor.u32 %v8027_v15, %v7486_v56  ;;  %4917 = vmatpush.bf16.msra.mxu0 %v7359_v39  ;;  %v3320_v39 = vld [vmem:[#allocation2 + $0x248] sm:$0xff] }
 0x611   : > { %v4432_v26 = vadd.f32 %v4431_v30, %v4343_v29  ;;  %v4520_v2 = vpop.f32.mrf.mxu3  ;;  %v4255_v47 = vpop.f32.mrf.mxu0 }
 0x612   : > { %v4344_v57 = vpop.f32.mrf.mxu1  ;;  %5006 = vmatpush.bf16.msra.mxu1 %v7487_v36 }
 0x613   : > { %v4521_v19 = vadd.f32 %v4520_v2, %v4432_v26  ;;  %v4345_v7 = vadd.f32 %v4344_v57, %v4255_v47  ;;  %v3316_v57 = vld [vmem:[#allocation2 + $0x328] sm:$0xff] }
 0x615   : > { %v5692_v48 = vadd.f32 %v4521_v19, %v3308_v52 }
 0x617   : > { %5820 = vst [vmem:[#allocation2 + $0x130] sm:$0xff] %v5692_v48 }
 0x618   : > { %v4433_v54 = vpop.f32.mrf.mxu2 }
 0x619   : > { %v4434_v29 = vadd.f32 %v4433_v54, %v4345_v7  ;;  %v4522_v8 = vpop.f32.mrf.mxu3  ;;  %v4258_v30 = vpop.f32.mrf.mxu0 }
 0x61a   : > { %v4347_v55 = vpop.f32.mrf.mxu1 }
 0x61b   : > { %v4523_v40 = vadd.f32 %v4522_v8, %v4434_v29  ;;  %v4348_v26 = vadd.f32 %v4347_v55, %v4258_v30  ;;  %v7598_v30 = vld [vmem:[%s8777_s9 + $0x2a8] sm:$0xf]  ;;  %v8055_v55 = vld [vmem:[%s8777_s9 + $0x2b4] sm:$0xf0] }
 0x61c   : > { %4573 = vmatmul.bf16.gmra.mxu0 %v11100_v53  ;;  %4662 = vmatmul.bf16.gmra.mxu1 %v11101_v12 }
 0x61d   : > { %v5696_v25 = vadd.f32 %v4523_v40, %v3312_v21  ;;  %4751 = vmatmul.bf16.gmra.mxu2 %v11102_v11 }
 0x61e   : > { %4840 = vmatmul.bf16.gmra.mxu3 %v9929_v41 }
 0x61f   : > { %5824 = vst [vmem:[#allocation2 + $0x70] sm:$0xff] %v5696_v25  ;;  %v7599_v25 = vor.u32 %v8055_v55, %v7598_v30 }
 0x620   : > { %v4436_v2 = vpop.f32.mrf.mxu2 }
 0x621   : > { %v4437_v47 = vadd.f32 %v4436_v2, %v4348_v26  ;;  %v4525_v22 = vpop.f32.mrf.mxu3  ;;  %v4260_v52 = vpop.f32.mrf.mxu0  ;;  %v7726_v26 = vld [vmem:[%s8777_s9 + $0x3a8] sm:$0xf]  ;;  %v8087_v2 = vld [vmem:[%s8777_s9 + $0x3b4] sm:$0xf0]  ;;  %5096 = vmatpush.bf16.msra.mxu2 %v7599_v25 }
 0x622   : > { %v4349_v19 = vpop.f32.mrf.mxu1 }
 0x623   : > { %v4526_v48 = vadd.f32 %v4525_v22, %v4437_v47  ;;  %v4350_v36 = vadd.f32 %v4349_v19, %v4260_v52  ;;  %v3324_v19 = vld [vmem:[#allocation2 + $0x288] sm:$0xff] }
 0x625   : > { %v5700_v7 = vadd.f32 %v4526_v48, %v3316_v57  ;;  %v7727_v57 = vor.u32 %v8087_v2, %v7726_v26 }
 0x627   : > { %5828 = vst [vmem:[#allocation2 + $0x328] sm:$0xff] %v5700_v7  ;;  %5185 = vmatpush.bf16.msra.mxu3 %v7727_v57 }
 0x628   : > { %v4438_v21 = vpop.f32.mrf.mxu2 }
 0x629   : > { %v4439_v49 = vadd.f32 %v4438_v21, %v4350_v36  ;;  %v4527_v28 = vpop.f32.mrf.mxu3  ;;  %v4263_v54 = vpop.f32.mrf.mxu0 }
 0x62a   : > { %v4352_v56 = vpop.f32.mrf.mxu1 }
 0x62b   : > { %v4528_v15 = vadd.f32 %v4527_v28, %v4439_v49  ;;  %v4353_v8 = vadd.f32 %v4352_v56, %v4263_v54  ;;  %v7342_v49 = vld [vmem:[%s8777_s9 + $0xa8] sm:$0xf]  ;;  %v7991_v28 = vld [vmem:[%s8777_s9 + $0xb4] sm:$0xf0] }
 0x62c   : > { %4578 = vmatmul.bf16.gmra.mxu0 %v11104_v9  ;;  %4667 = vmatmul.bf16.gmra.mxu1 %v11105_v60  ;;  %v7470_v56 = vld [vmem:[%s8777_s9 + $0x1a8] sm:$0xf] }
 0x62d   : > { %v5704_v29 = vadd.f32 %v4528_v15, %v3320_v39  ;;  %4756 = vmatmul.bf16.gmra.mxu2 %v11106_v63  ;;  %v7343_v39 = vor.u32 %v7991_v28, %v7342_v49  ;;  %v8023_v15 = vld [vmem:[%s8777_s9 + $0x1b4] sm:$0xf0] }
 0x62e   : > { %4845 = vmatmul.bf16.gmra.mxu3 %v9945_v20  ;;  %v7471_v55 = vor.u32 %v8023_v15, %v7470_v56  ;;  %v3336_v15 = vld [vmem:[#allocation2 + $0x58] sm:$0xff] }
 0x62f   : > { %5832 = vst [vmem:[#allocation2 + $0x248] sm:$0xff] %v5704_v29  ;;  %4918 = vmatpush.bf16.msra.mxu0 %v7343_v39 }
 0x630   : > { %v4441_v40 = vpop.f32.mrf.mxu2  ;;  %5007 = vmatpush.bf16.msra.mxu1 %v7471_v55 }
 0x631   : > { %v4442_v47 = vadd.f32 %v4441_v40, %v4353_v8  ;;  %v4530_v22 = vpop.f32.mrf.mxu3  ;;  %v4265_v52 = vpop.f32.mrf.mxu0  ;;  %v3328_v40 = vld [vmem:[#allocation2 + $0x2c8] sm:$0xff] }
 0x632   : > { %v4354_v48 = vpop.f32.mrf.mxu1 }
 0x633   : > { %v4531_v7 = vadd.f32 %v4530_v22, %v4442_v47  ;;  %v4355_v21 = vadd.f32 %v4354_v48, %v4265_v52  ;;  %v3332_v48 = vld [vmem:[#allocation2 + $0x1b0] sm:$0xff] }
 0x635   : > { %v5708_v36 = vadd.f32 %v4531_v7, %v3324_v19 }
 0x637   : > { %5836 = vst [vmem:[#allocation2 + $0x288] sm:$0xff] %v5708_v36 }
 0x638   : > { %v4443_v54 = vpop.f32.mrf.mxu2 }
 0x639   : > { %v4444_v29 = vadd.f32 %v4443_v54, %v4355_v21  ;;  %v4532_v8 = vpop.f32.mrf.mxu3  ;;  %v4268_v30 = vpop.f32.mrf.mxu0 }
 0x63a   : > { %v4357_v26 = vpop.f32.mrf.mxu1 }
 0x63b   : > { %v4533_v2 = vadd.f32 %v4532_v8, %v4444_v29  ;;  %v4358_v47 = vadd.f32 %v4357_v26, %v4268_v30  ;;  %v8051_v26 = vld [vmem:[%s8777_s9 + $0x294] sm:$0xf0] }
 0x63c   : > { %4583 = vmatmul.bf16.gmra.mxu0 %v11107_v0  ;;  %4672 = vmatmul.bf16.gmra.mxu1 %v11108_v32 }
 0x63d   : > { %v5712_v25 = vadd.f32 %v4533_v2, %v3328_v40  ;;  %4761 = vmatmul.bf16.gmra.mxu2 %v11109_v31  ;;  %v7582_v40 = vld [vmem:[%s8777_s9 + $0x288] sm:$0xf] }
 0x63e   : > { %4850 = vmatmul.bf16.gmra.mxu3 %v9953_v27 }
 0x63f   : > { %5840 = vst [vmem:[#allocation2 + $0x2c8] sm:$0xff] %v5712_v25  ;;  %v7583_v25 = vor.u32 %v8051_v26, %v7582_v40 }
 0x640   : > { %v4446_v22 = vpop.f32.mrf.mxu2 }
 0x641   : > { %v4447_v52 = vadd.f32 %v4446_v22, %v4358_v47  ;;  %v4535_v57 = vpop.f32.mrf.mxu3  ;;  %v4270_v19 = vpop.f32.mrf.mxu0  ;;  %v7710_v47 = vld [vmem:[%s8777_s9 + $0x388] sm:$0xf]  ;;  %v8083_v22 = vld [vmem:[%s8777_s9 + $0x394] sm:$0xf0]  ;;  %5097 = vmatpush.bf16.msra.mxu2 %v7583_v25 }
 0x642   : > { %v4359_v7 = vpop.f32.mrf.mxu1 }
 0x643   : > { %v4536_v36 = vadd.f32 %v4535_v57, %v4447_v52  ;;  %v4360_v49 = vadd.f32 %v4359_v7, %v4270_v19  ;;  %v3340_v7 = vld [vmem:[#allocation2 + $0x1f8] sm:$0xff] }
 0x645   : > { %v5716_v21 = vadd.f32 %v4536_v36, %v3332_v48  ;;  %v7711_v48 = vor.u32 %v8083_v22, %v7710_v47 }
 0x647   : > { %5844 = vst [vmem:[#allocation2 + $0x1b0] sm:$0xff] %v5716_v21  ;;  %5186 = vmatpush.bf16.msra.mxu3 %v7711_v48 }
 0x648   : > { %v4448_v28 = vpop.f32.mrf.mxu2 }
 0x649   : > { %v4449_v54 = vadd.f32 %v4448_v28, %v4360_v49  ;;  %v4537_v39 = vpop.f32.mrf.mxu3  ;;  %v4273_v56 = vpop.f32.mrf.mxu0 }
 0x64a   : > { %v4362_v29 = vpop.f32.mrf.mxu1 }
 0x64b   : > { %v4538_v8 = vadd.f32 %v4537_v39, %v4449_v54  ;;  %v4363_v55 = vadd.f32 %v4362_v29, %v4273_v56  ;;  %v7326_v54 = vld [vmem:[%s8777_s9 + $0x88] sm:$0xf]  ;;  %v7987_v39 = vld [vmem:[%s8777_s9 + $0x94] sm:$0xf0] }
 0x64c   : > { %4588 = vmatmul.bf16.gmra.mxu0 %v11111_v6  ;;  %4677 = vmatmul.bf16.gmra.mxu1 %v11112_v13  ;;  %v7454_v29 = vld [vmem:[%s8777_s9 + $0x188] sm:$0xf] }
 0x64d   : > { %v5720_v30 = vadd.f32 %v4538_v8, %v3336_v15  ;;  %4766 = vmatmul.bf16.gmra.mxu2 %v11113_v33  ;;  %v7327_v15 = vor.u32 %v7987_v39, %v7326_v54  ;;  %v8019_v8 = vld [vmem:[%s8777_s9 + $0x194] sm:$0xf0] }
 0x64e   : > { %4855 = vmatmul.bf16.gmra.mxu3 %v9969_v43  ;;  %v7455_v26 = vor.u32 %v8019_v8, %v7454_v29  ;;  %v3352_v8 = vld [vmem:[#allocation2 + $0x250] sm:$0xff] }
 0x64f   : > { %5848 = vst [vmem:[#allocation2 + $0x58] sm:$0xff] %v5720_v30  ;;  %4919 = vmatpush.bf16.msra.mxu0 %v7327_v15 }
 0x650   : > { %v4451_v2 = vpop.f32.mrf.mxu2  ;;  %5008 = vmatpush.bf16.msra.mxu1 %v7455_v26  ;;  %v11139_v26 = vld [vmem:[#allocation75_spill] sm:$0xff] }
 0x651   : > { %v4452_v52 = vadd.f32 %v4451_v2, %v4363_v55  ;;  %v4540_v57 = vpop.f32.mrf.mxu3  ;;  %v4275_v19 = vpop.f32.mrf.mxu0  ;;  %v3344_v2 = vld [vmem:[#allocation2 + $0x1a0] sm:$0xff] }
 0x652   : > { %v4364_v36 = vpop.f32.mrf.mxu1 }
 0x653   : > { %v4541_v21 = vadd.f32 %v4540_v57, %v4452_v52  ;;  %v4365_v28 = vadd.f32 %v4364_v36, %v4275_v19  ;;  %v3348_v36 = vld [vmem:[#allocation2 + $0xf0] sm:$0xff] }
 0x655   : > { %v5724_v49 = vadd.f32 %v4541_v21, %v3340_v7 }
 0x657   : > { %5852 = vst [vmem:[#allocation2 + $0x1f8] sm:$0xff] %v5724_v49 }
 0x658   : > { %v4453_v56 = vpop.f32.mrf.mxu2 }
 0x659   : > { %v4454_v30 = vadd.f32 %v4453_v56, %v4365_v28  ;;  %v4542_v55 = vpop.f32.mrf.mxu3  ;;  %v4278_v40 = vpop.f32.mrf.mxu0 }
 0x65a   : > { %v4367_v47 = vpop.f32.mrf.mxu1 }
 0x65b   : > { %v4543_v22 = vadd.f32 %v4542_v55, %v4454_v30  ;;  %v4368_v52 = vadd.f32 %v4367_v47, %v4278_v40  ;;  %v11141_v47 = vld [vmem:[#allocation32_spill] sm:$0xff] }
 0x65c   : > { %4593 = vmatmul.bf16.gmra.mxu0 %v11114_v23  ;;  %4682 = vmatmul.bf16.gmra.mxu1 %v11115_v5 }
 0x65d   : > { %v5728_v25 = vadd.f32 %v4543_v22, %v3344_v2  ;;  %4771 = vmatmul.bf16.gmra.mxu2 %v11116_v4  ;;  %v11140_v2 = vld [vmem:[#allocation90_spill] sm:$0xff] }
 0x65e   : > { %4860 = vmatmul.bf16.gmra.mxu3 %v9977_v34 }
 0x65f   : > { %5856 = vst [vmem:[#allocation2 + $0x1a0] sm:$0xff] %v5728_v25  ;;  %v7566_v25 = vld [vmem:[%s8777_s9 + $0x268] sm:$0xf] }
 0x660   : > { %v4456_v57 = vpop.f32.mrf.mxu2 }
 0x661   : > { %v4457_v19 = vadd.f32 %v4456_v57, %v4368_v52  ;;  %v4545_v48 = vpop.f32.mrf.mxu3  ;;  %v4280_v7 = vpop.f32.mrf.mxu0  ;;  %v8047_v52 = vld [vmem:[%s8777_s9 + $0x274] sm:$0xf0] }
 0x662   : > { %v4369_v21 = vpop.f32.mrf.mxu1 }
 0x663   : > { %v4546_v49 = vadd.f32 %v4545_v48, %v4457_v19  ;;  %v4370_v54 = vadd.f32 %v4369_v21, %v4280_v7  ;;  %v7567_v19 = vor.u32 %v8047_v52, %v7566_v25  ;;  %v7694_v48 = vld [vmem:[%s8777_s9 + $0x368] sm:$0xf]  ;;  %v8079_v7 = vld [vmem:[%s8777_s9 + $0x374] sm:$0xf0] }
 0x664   : > { %v7438_v25 = vld [vmem:[%s8777_s9 + $0x168] sm:$0xf]  ;;  %v8015_v52 = vld [vmem:[%s8777_s9 + $0x174] sm:$0xf0] }
 0x665   : > { %v5732_v28 = vadd.f32 %v4546_v49, %v3348_v36  ;;  %5098 = vmatpush.bf16.msra.mxu2 %v7567_v19 }
 0x667   : > { %5860 = vst [vmem:[#allocation2 + $0xf0] sm:$0xff] %v5732_v28  ;;  %v7695_v28 = vor.u32 %v8079_v7, %v7694_v48 }
 0x668   : > { %v4458_v39 = vpop.f32.mrf.mxu2 }
 0x669   : > { %v4459_v56 = vadd.f32 %v4458_v39, %v4370_v54  ;;  %v4547_v15 = vpop.f32.mrf.mxu3  ;;  %v4283_v29 = vpop.f32.mrf.mxu0  ;;  %v3356_v54 = vld [vmem:[#allocation2 + $0x78] sm:$0xff]  ;;  %5187 = vmatpush.bf16.msra.mxu3 %v7695_v28 }
 0x66a   : > { %v4372_v30 = vpop.f32.mrf.mxu1 }
 0x66b   : > { %v4548_v55 = vadd.f32 %v4547_v15, %v4459_v56  ;;  %v4373_v22 = vadd.f32 %v4372_v30, %v4283_v29  ;;  %v7983_v30 = vld [vmem:[%s8777_s9 + $0x74] sm:$0xf0] }
 0x66c   : > { %4598 = vmatmul.bf16.gmra.mxu0 %v11118_v38  ;;  %4687 = vmatmul.bf16.gmra.mxu1 %v11139_v26  ;;  %v3360_v26 = vld [vmem:[#allocation2 + $0x278] sm:$0xff] }
 0x66d   : > { %v5736_v40 = vadd.f32 %v4548_v55, %v3352_v8  ;;  %4776 = vmatmul.bf16.gmra.mxu2 %v11140_v2  ;;  %v7310_v8 = vld [vmem:[%s8777_s9 + $0x68] sm:$0xf]  ;;  %v7439_v2 = vor.u32 %v8015_v52, %v7438_v25  ;;  %v3368_v52 = vld [vmem:[#allocation2 + $0x298] sm:$0xff] }
 0x66e   : > { %4865 = vmatmul.bf16.gmra.mxu3 %v11141_v47 }
 0x66f   : > { %5864 = vst [vmem:[#allocation2 + $0x250] sm:$0xff] %v5736_v40  ;;  %v7311_v40 = vor.u32 %v7983_v30, %v7310_v8  ;;  %5009 = vmatpush.bf16.msra.mxu1 %v7439_v2 }
 0x670   : > { %v4461_v57 = vpop.f32.mrf.mxu2 }
 0x671   : > { %v4462_v36 = vadd.f32 %v4461_v57, %v4373_v22  ;;  %v4550_v21 = vpop.f32.mrf.mxu3  ;;  %v4285_v49 = vpop.f32.mrf.mxu0  ;;  %4920 = vmatpush.bf16.msra.mxu0 %v7311_v40 }
 0x672   : > { %v4374_v39 = vpop.f32.mrf.mxu1 }
 0x673   : > { %v4551_v56 = vadd.f32 %v4550_v21, %v4462_v36  ;;  %v4375_v29 = vadd.f32 %v4374_v39, %v4285_v49  ;;  %v11142_v36 = vld [vmem:[#allocation91_spill] sm:$0xff]  ;;  %v11143_v21 = vld [vmem:[#allocation34_spill] sm:$0xff] }
 0x675   : > { %v5740_v15 = vadd.f32 %v4551_v56, %v3356_v54 }
 0x677   : > { %5868 = vst [vmem:[#allocation2 + $0x78] sm:$0xff] %v5740_v15  ;;  %v3364_v15 = vld [vmem:[#allocation2 + $0x148] sm:$0xff] }
 0x678   : > { %v4463_v55 = vpop.f32.mrf.mxu2 }
 0x679   : > { %v4464_v22 = vadd.f32 %v4463_v55, %v4375_v29  ;;  %v4552_v57 = vpop.f32.mrf.mxu3  ;;  %v4288_v47 = vpop.f32.mrf.mxu0 }
 0x67a   : > { %v4377_v48 = vpop.f32.mrf.mxu1 }
 0x67b   : > { %v4553_v7 = vadd.f32 %v4552_v57, %v4464_v22  ;;  %v4378_v49 = vadd.f32 %v4377_v48, %v4288_v47  ;;  %v11144_v57 = vld [vmem:[#allocation61_spill] sm:$0xff] }
 0x67c   : > { %4603 = vmatmul.bf16.gmra.mxu0 %v11120_v61  ;;  %4692 = vmatmul.bf16.gmra.mxu1 %v11121_v58 }
 0x67d   : > { %v5744_v19 = vadd.f32 %v4553_v7, %v3360_v26  ;;  %4781 = vmatmul.bf16.gmra.mxu2 %v11142_v36  ;;  %v11145_v7 = vld [vmem:[#allocation77_spill] sm:$0xff] }
 0x67e   : > { %4870 = vmatmul.bf16.gmra.mxu3 %v11143_v21  ;;  %v3249_v36 = vld [vmem:[#allocation2 + $0x368] sm:$0xff] }
 0x67f   : > { %5872 = vst [vmem:[#allocation2 + $0x278] sm:$0xff] %v5744_v19  ;;  %v11146_v19 = vld [vmem:[#allocation92_spill] sm:$0xff] }
 0x680   : > { %v4466_v28 = vpop.f32.mrf.mxu2 }
 0x681   : > { %v4467_v54 = vadd.f32 %v4466_v28, %v4378_v49  ;;  %v4555_v39 = vpop.f32.mrf.mxu3  ;;  %v4290_v56 = vpop.f32.mrf.mxu0  ;;  %v11147_v49 = vld [vmem:[#allocation35_spill] sm:$0xff] }
 0x682   : > { %v4379_v29 = vpop.f32.mrf.mxu1 }
 0x683   : > { %v4556_v8 = vadd.f32 %v4555_v39, %v4467_v54  ;;  %v4380_v2 = vadd.f32 %v4379_v29, %v4290_v56  ;;  %v7550_v54 = vld [vmem:[%s8777_s9 + $0x248] sm:$0xf]  ;;  %v8043_v39 = vld [vmem:[%s8777_s9 + $0x254] sm:$0xf0] }
 0x684   : > { %v7678_v29 = vld [vmem:[%s8777_s9 + $0x348] sm:$0xf] }
 0x685   : > { %v5748_v30 = vadd.f32 %v4556_v8, %v3364_v15  ;;  %v7551_v15 = vor.u32 %v8043_v39, %v7550_v54  ;;  %v8075_v8 = vld [vmem:[%s8777_s9 + $0x354] sm:$0xf0] }
 0x687   : > { %5876 = vst [vmem:[#allocation2 + $0x148] sm:$0xff] %v5748_v30  ;;  %5099 = vmatpush.bf16.msra.mxu2 %v7551_v15 }
 0x688   : > { %v4468_v26 = vpop.f32.mrf.mxu2 }
 0x689   : > { %v4469_v55 = vadd.f32 %v4468_v26, %v4380_v2  ;;  %v4557_v40 = vpop.f32.mrf.mxu3  ;;  %v4569_v25 = vpop.f32.mrf.mxu0 }
 0x68a   : > { %v4658_v47 = vpop.f32.mrf.mxu1 }
 0x68b   : > { %v4558_v22 = vadd.f32 %v4557_v40, %v4469_v55  ;;  %v4659_v28 = vadd.f32 %v4658_v47, %v4569_v25  ;;  %v7679_v55 = vor.u32 %v8075_v8, %v7678_v29  ;;  %v3245_v40 = vld [vmem:[#allocation2 + $0x3b0] sm:$0xff] }
 0x68c   : > { %4608 = vmatmul.bf16.gmra.mxu0 %v11144_v57  ;;  %4697 = vmatmul.bf16.gmra.mxu1 %v11145_v7  ;;  %v8011_v7 = vld [vmem:[%s8777_s9 + $0x154] sm:$0xf0] }
 0x68d   : > { %v5752_v48 = vadd.f32 %v4558_v22, %v3368_v52  ;;  %4786 = vmatmul.bf16.gmra.mxu2 %v11146_v19  ;;  %5188 = vmatpush.bf16.msra.mxu3 %v7679_v55  ;;  %v7422_v19 = vld [vmem:[%s8777_s9 + $0x148] sm:$0xf] }
 0x68e   : > { %4875 = vmatmul.bf16.gmra.mxu3 %v11147_v49  ;;  %v7979_v49 = vld [vmem:[%s8777_s9 + $0x54] sm:$0xf0]  ;;  %v7423_v21 = vor.u32 %v8011_v7, %v7422_v19  ;;  %v3253_v19 = vld [vmem:[#allocation2 + $0x110] sm:$0xff] }
 0x68f   : > { %5880 = vst [vmem:[#allocation2 + $0x298] sm:$0xff] %v5752_v48  ;;  %v7294_v48 = vld [vmem:[%s8777_s9 + $0x48] sm:$0xf] }
 0x690   : > { %v4747_v56 = vpop.f32.mrf.mxu2  ;;  %v7295_v39 = vor.u32 %v7979_v49, %v7294_v48  ;;  %5010 = vmatpush.bf16.msra.mxu1 %v7423_v21  ;;  %v3257_v48 = vld [vmem:[#allocation2 + $0x150] sm:$0xff] }
 0x691   : > { %v4748_v30 = vadd.f32 %v4747_v56, %v4659_v28  ;;  %v4836_v2 = vpop.f32.mrf.mxu3  ;;  %v4571_v26 = vpop.f32.mrf.mxu0 }
 0x692   : > { %v4660_v52 = vpop.f32.mrf.mxu1  ;;  %4921 = vmatpush.bf16.msra.mxu0 %v7295_v39  ;;  %v11148_v39 = vld [vmem:[#allocation63_spill] sm:$0xff] }
 0x693   : > { %v4837_v22 = vadd.f32 %v4836_v2, %v4748_v30  ;;  %v4661_v47 = vadd.f32 %v4660_v52, %v4571_v26 }
 0x695   : > { %v5629_v25 = vadd.f32 %v4837_v22, %v3245_v40 }
 0x697   : > { %5757 = vst [vmem:[#allocation2 + $0x3b0] sm:$0xff] %v5629_v25 }
 0x698   : > { %v4749_v54 = vpop.f32.mrf.mxu2 }
 0x699   : > { %v4750_v28 = vadd.f32 %v4749_v54, %v4661_v47  ;;  %v4838_v56 = vpop.f32.mrf.mxu3  ;;  %v4574_v57 = vpop.f32.mrf.mxu0 }
 0x69a   : > { %v4663_v29 = vpop.f32.mrf.mxu1 }
 0x69b   : > { %v4839_v8 = vadd.f32 %v4838_v56, %v4750_v28  ;;  %v4664_v49 = vadd.f32 %v4663_v29, %v4574_v57  ;;  %v11149_v56 = vld [vmem:[#allocation79_spill] sm:$0xff]  ;;  %v11150_v29 = vld [vmem:[#allocation93_spill] sm:$0xff] }
 0x69c   : > { %4613 = vmatmul.bf16.gmra.mxu0 %v11125_v50  ;;  %4702 = vmatmul.bf16.gmra.mxu1 %v11126_v42 }
 0x69d   : > { %v5633_v15 = vadd.f32 %v4839_v8, %v3249_v36  ;;  %4791 = vmatmul.bf16.gmra.mxu2 %v9830_v37  ;;  %v11151_v8 = vld [vmem:[#allocation36_spill] sm:$0xff] }
 0x69e   : > { %4880 = vmatmul.bf16.gmra.mxu3 %v10025_v46 }
 0x69f   : > { %5761 = vst [vmem:[#allocation2 + $0x368] sm:$0xff] %v5633_v15 }
 0x6a0   : > { %v4752_v30 = vpop.f32.mrf.mxu2 }
 0x6a1   : > { %v4753_v2 = vadd.f32 %v4752_v30, %v4664_v49  ;;  %v4841_v26 = vpop.f32.mrf.mxu3  ;;  %v4576_v7 = vpop.f32.mrf.mxu0  ;;  %v7534_v49 = vld [vmem:[%s8777_s9 + $0x228] sm:$0xf]  ;;  %v8039_v30 = vld [vmem:[%s8777_s9 + $0x234] sm:$0xf0] }
 0x6a2   : > { %v4665_v55 = vpop.f32.mrf.mxu1 }
 0x6a3   : > { %v4842_v40 = vadd.f32 %v4841_v26, %v4753_v2  ;;  %v4666_v21 = vadd.f32 %v4665_v55, %v4576_v7  ;;  %v7535_v26 = vor.u32 %v8039_v30, %v7534_v49  ;;  %v7662_v7 = vld [vmem:[%s8777_s9 + $0x328] sm:$0xf] }
 0x6a4   : > { %v7406_v30 = vld [vmem:[%s8777_s9 + $0x128] sm:$0xf] }
 0x6a5   : > { %v5637_v52 = vadd.f32 %v4842_v40, %v3253_v19  ;;  %v8071_v19 = vld [vmem:[%s8777_s9 + $0x334] sm:$0xf0]  ;;  %5100 = vmatpush.bf16.msra.mxu2 %v7535_v26 }
 0x6a7   : > { %5765 = vst [vmem:[#allocation2 + $0x110] sm:$0xff] %v5637_v52 }
 0x6a8   : > { %v4754_v36 = vpop.f32.mrf.mxu2 }
 0x6a9   : > { %v4755_v22 = vadd.f32 %v4754_v36, %v4666_v21  ;;  %v4843_v25 = vpop.f32.mrf.mxu3  ;;  %v4579_v47 = vpop.f32.mrf.mxu0  ;;  %v7663_v21 = vor.u32 %v8071_v19, %v7662_v7  ;;  %v3261_v36 = vld [vmem:[#allocation2 + $0x388] sm:$0xff] }
 0x6aa   : > { %v4668_v57 = vpop.f32.mrf.mxu1 }
 0x6ab   : > { %v4844_v54 = vadd.f32 %v4843_v25, %v4755_v22  ;;  %v4669_v15 = vadd.f32 %v4668_v57, %v4579_v47  ;;  %5189 = vmatpush.bf16.msra.mxu3 %v7663_v21  ;;  %v7278_v57 = vld [vmem:[%s8777_s9 + $0x28] sm:$0xf] }
 0x6ac   : > { %4618 = vmatmul.bf16.gmra.mxu0 %v11148_v39  ;;  %4707 = vmatmul.bf16.gmra.mxu1 %v11149_v56  ;;  %v3265_v39 = vld [vmem:[#allocation2 + $0x1a8] sm:$0xff] }
 0x6ad   : > { %v5641_v28 = vadd.f32 %v4844_v54, %v3257_v48  ;;  %4796 = vmatmul.bf16.gmra.mxu2 %v11150_v29  ;;  %v7975_v54 = vld [vmem:[%s8777_s9 + $0x34] sm:$0xf0] }
 0x6ae   : > { %4885 = vmatmul.bf16.gmra.mxu3 %v11151_v8  ;;  %v7279_v49 = vor.u32 %v7975_v54, %v7278_v57  ;;  %v8007_v8 = vld [vmem:[%s8777_s9 + $0x134] sm:$0xf0] }
 0x6af   : > { %5769 = vst [vmem:[#allocation2 + $0x150] sm:$0xff] %v5641_v28  ;;  %v7407_v56 = vor.u32 %v8007_v8, %v7406_v30  ;;  %v11152_v30 = vld [vmem:[#allocation65_spill] sm:$0xff] }
 0x6b0   : > { %v4757_v2 = vpop.f32.mrf.mxu2  ;;  %4922 = vmatpush.bf16.msra.mxu0 %v7279_v49 }
 0x6b1   : > { %v4758_v55 = vadd.f32 %v4757_v2, %v4669_v15  ;;  %v4846_v40 = vpop.f32.mrf.mxu3  ;;  %v4581_v52 = vpop.f32.mrf.mxu0  ;;  %5011 = vmatpush.bf16.msra.mxu1 %v7407_v56 }
 0x6b2   : > { %v4670_v22 = vpop.f32.mrf.mxu1 }
 0x6b3   : > { %v4847_v25 = vadd.f32 %v4846_v40, %v4758_v55  ;;  %v4671_v48 = vadd.f32 %v4670_v22, %v4581_v52 }
 0x6b5   : > { %v5645_v47 = vadd.f32 %v4847_v25, %v3261_v36  ;;  %v3269_v36 = vld [vmem:[#allocation2 + $0x2f8] sm:$0xff] }
 0x6b7   : > { %5773 = vst [vmem:[#allocation2 + $0x388] sm:$0xff] %v5645_v47 }
 0x6b8   : > { %v4759_v28 = vpop.f32.mrf.mxu2 }
 0x6b9   : > { %v4760_v15 = vadd.f32 %v4759_v28, %v4671_v48  ;;  %v4848_v2 = vpop.f32.mrf.mxu3  ;;  %v4584_v29 = vpop.f32.mrf.mxu0  ;;  %v3273_v28 = vld [vmem:[#allocation2 + $0xc0] sm:$0xff] }
 0x6ba   : > { %v4673_v7 = vpop.f32.mrf.mxu1 }
 0x6bb   : > { %v4849_v19 = vadd.f32 %v4848_v2, %v4760_v15  ;;  %v4674_v55 = vadd.f32 %v4673_v7, %v4584_v29  ;;  %v11153_v2 = vld [vmem:[#allocation81_spill] sm:$0xff]  ;;  %v11154_v7 = vld [vmem:[#allocation94_spill] sm:$0xff] }
 0x6bc   : > { %4623 = vmatmul.bf16.gmra.mxu0 %v11129_v1  ;;  %4712 = vmatmul.bf16.gmra.mxu1 %v11130_v44 }
 0x6bd   : > { %v5649_v26 = vadd.f32 %v4849_v19, %v3265_v39  ;;  %4801 = vmatmul.bf16.gmra.mxu2 %v9854_v10  ;;  %v11155_v19 = vld [vmem:[#allocation37_spill] sm:$0xff] }
 0x6be   : > { %4890 = vmatmul.bf16.gmra.mxu3 %v10049_v14 }
 0x6bf   : > { %5777 = vst [vmem:[#allocation2 + $0x1a8] sm:$0xff] %v5649_v26 }
 0x6c0   : > { %v4762_v40 = vpop.f32.mrf.mxu2 }
 0x6c1   : > { %v4763_v52 = vadd.f32 %v4762_v40, %v4674_v55  ;;  %v4851_v21 = vpop.f32.mrf.mxu3  ;;  %v4586_v8 = vpop.f32.mrf.mxu0  ;;  %v7518_v55 = vld [vmem:[%s8777_s9 + $0x208] sm:$0xf]  ;;  %v8035_v40 = vld [vmem:[%s8777_s9 + $0x214] sm:$0xf0] }
 0x6c2   : > { %v4675_v22 = vpop.f32.mrf.mxu1 }
 0x6c3   : > { %v4852_v25 = vadd.f32 %v4851_v21, %v4763_v52  ;;  %v4676_v56 = vadd.f32 %v4675_v22, %v4586_v8  ;;  %v7519_v21 = vor.u32 %v8035_v40, %v7518_v55  ;;  %v7646_v8 = vld [vmem:[%s8777_s9 + $0x308] sm:$0xf] }
 0x6c4   : > { %v7390_v40 = vld [vmem:[%s8777_s9 + $0x108] sm:$0xf] }
 0x6c5   : > { %v5653_v47 = vadd.f32 %v4852_v25, %v3269_v36  ;;  %v8067_v36 = vld [vmem:[%s8777_s9 + $0x314] sm:$0xf0]  ;;  %5101 = vmatpush.bf16.msra.mxu2 %v7519_v21 }
 0x6c7   : > { %5781 = vst [vmem:[#allocation2 + $0x2f8] sm:$0xff] %v5653_v47 }
 0x6c8   : > { %v4764_v39 = vpop.f32.mrf.mxu2 }
 0x6c9   : > { %v4765_v48 = vadd.f32 %v4764_v39, %v4676_v56  ;;  %v4853_v57 = vpop.f32.mrf.mxu3  ;;  %v4589_v54 = vpop.f32.mrf.mxu0  ;;  %v7647_v56 = vor.u32 %v8067_v36, %v7646_v8  ;;  %v3277_v39 = vld [vmem:[#allocation2 + $0x3c0] sm:$0xff] }
 0x6ca   : > { %v4678_v29 = vpop.f32.mrf.mxu1 }
 0x6cb   : > { %v4854_v49 = vadd.f32 %v4853_v57, %v4765_v48  ;;  %v4679_v26 = vadd.f32 %v4678_v29, %v4589_v54  ;;  %5190 = vmatpush.bf16.msra.mxu3 %v7647_v56  ;;  %v7262_v29 = vld [vmem:[%s8777_s9 + $0x8] sm:$0xf] }
 0x6cc   : > { %4628 = vmatmul.bf16.gmra.mxu0 %v11152_v30  ;;  %4717 = vmatmul.bf16.gmra.mxu1 %v11153_v2  ;;  %v3281_v30 = vld [vmem:[#allocation2 + $0x3f8] sm:$0xff] }
 0x6cd   : > { %v5657_v15 = vadd.f32 %v4854_v49, %v3273_v28  ;;  %4806 = vmatmul.bf16.gmra.mxu2 %v11154_v7  ;;  %v7971_v49 = vld [vmem:[%s8777_s9 + $0x14] sm:$0xf0] }
 0x6ce   : > { %4895 = vmatmul.bf16.gmra.mxu3 %v11155_v19  ;;  %v7263_v55 = vor.u32 %v7971_v49, %v7262_v29  ;;  %v8003_v19 = vld [vmem:[%s8777_s9 + $0x114] sm:$0xf0] }
 0x6cf   : > { %5785 = vst [vmem:[#allocation2 + $0xc0] sm:$0xff] %v5657_v15  ;;  %v7391_v2 = vor.u32 %v8003_v19, %v7390_v40  ;;  %v11156_v40 = vld [vmem:[#allocation67_spill] sm:$0xff] }
 0x6d0   : > { %v4767_v52 = vpop.f32.mrf.mxu2  ;;  %4923 = vmatpush.bf16.msra.mxu0 %v7263_v55 }
 0x6d1   : > { %v4768_v22 = vadd.f32 %v4767_v52, %v4679_v26  ;;  %v4856_v25 = vpop.f32.mrf.mxu3  ;;  %v4591_v47 = vpop.f32.mrf.mxu0  ;;  %5012 = vmatpush.bf16.msra.mxu1 %v7391_v2 }
 0x6d2   : > { %v4680_v48 = vpop.f32.mrf.mxu1 }
 0x6d3   : > { %v4857_v57 = vadd.f32 %v4856_v25, %v4768_v22  ;;  %v4681_v28 = vadd.f32 %v4680_v48, %v4591_v47 }
 0x6d5   : > { %v5661_v54 = vadd.f32 %v4857_v57, %v3277_v39  ;;  %v3285_v39 = vld [vmem:[#allocation2 + $0x3f0] sm:$0xff] }
 0x6d7   : > { %5789 = vst [vmem:[#allocation2 + $0x3c0] sm:$0xff] %v5661_v54 }
 0x6d8   : > { %v4769_v15 = vpop.f32.mrf.mxu2 }
 0x6d9   : > { %v4770_v26 = vadd.f32 %v4769_v15, %v4681_v28  ;;  %v4858_v52 = vpop.f32.mrf.mxu3  ;;  %v4594_v7 = vpop.f32.mrf.mxu0  ;;  %v3289_v15 = vld [vmem:[#allocation2 + $0x1e0] sm:$0xff] }
 0x6da   : > { %v4683_v8 = vpop.f32.mrf.mxu1 }
 0x6db   : > { %v4859_v36 = vadd.f32 %v4858_v52, %v4770_v26  ;;  %v4684_v22 = vadd.f32 %v4683_v8, %v4594_v7  ;;  %v11157_v52 = vld [vmem:[#allocation83_spill] sm:$0xff] }
 0x6dc   : > { %4633 = vmatmul.bf16.gmra.mxu0 %v11133_v17  ;;  %4722 = vmatmul.bf16.gmra.mxu1 %v11134_v51  ;;  %v11158_v8 = vld [vmem:[#allocation95_spill] sm:$0xff] }
 0x6dd   : > { %v5665_v21 = vadd.f32 %v4859_v36, %v3281_v30  ;;  %4811 = vmatmul.bf16.gmra.mxu2 %v9878_v3  ;;  %v11159_v36 = vld [vmem:[#allocation39_spill] sm:$0xff] }
 0x6de   : > { %4900 = vmatmul.bf16.gmra.mxu3 %v10073_v24 }
 0x6df   : > { %5793 = vst [vmem:[#allocation2 + $0x3f8] sm:$0xff] %v5665_v21 }
 0x6e0   : > { %v4772_v25 = vpop.f32.mrf.mxu2 }
 0x6e1   : > { %v4773_v47 = vadd.f32 %v4772_v25, %v4684_v22  ;;  %v4861_v56 = vpop.f32.mrf.mxu3  ;;  %v4596_v19 = vpop.f32.mrf.mxu0  ;;  %v8061_v22 = vld [vmem:[%s8777_s9 + $0x2ec] sm:$0xf]  ;;  %v7632_v25 = vld [vmem:[%s8777_s9 + $0x2f8] sm:$0xf0] }
 0x6e2   : > { %v4685_v48 = vpop.f32.mrf.mxu1 }
 0x6e3   : > { %v4862_v57 = vadd.f32 %v4861_v56, %v4773_v47  ;;  %v4686_v2 = vadd.f32 %v4685_v48, %v4596_v19  ;;  %v7635_v56 = vor.u32 %v8061_v22, %v7632_v25  ;;  %v8093_v19 = vld [vmem:[%s8777_s9 + $0x3ec] sm:$0xf] }
 0x6e4   : > { %v8029_v25 = vld [vmem:[%s8777_s9 + $0x1ec] sm:$0xf] }
 0x6e5   : > { %v5669_v54 = vadd.f32 %v4862_v57, %v3285_v39  ;;  %v7760_v39 = vld [vmem:[%s8777_s9 + $0x3f8] sm:$0xf0]  ;;  %5450 = vmatpush.bf16.msrb.mxu2 %v7635_v56 }
 0x6e7   : > { %5797 = vst [vmem:[#allocation2 + $0x3f0] sm:$0xff] %v5669_v54 }
 0x6e8   : > { %v4774_v30 = vpop.f32.mrf.mxu2 }
 0x6e9   : > { %v4775_v28 = vadd.f32 %v4774_v30, %v4686_v2  ;;  %v4863_v29 = vpop.f32.mrf.mxu3  ;;  %v4599_v49 = vpop.f32.mrf.mxu0  ;;  %v7763_v2 = vor.u32 %v8093_v19, %v7760_v39  ;;  %v3293_v30 = vld [vmem:[#allocation2 + $0x240] sm:$0xff] }
 0x6ea   : > { %v4688_v7 = vpop.f32.mrf.mxu1 }
 0x6eb   : > { %v4864_v55 = vadd.f32 %v4863_v29, %v4775_v28  ;;  %v4689_v21 = vadd.f32 %v4688_v7, %v4599_v49  ;;  %5539 = vmatpush.bf16.msrb.mxu3 %v7763_v2  ;;  %v7997_v7 = vld [vmem:[%s8777_s9 + $0xec] sm:$0xf] }
 0x6ec   : > { %4638 = vmatmul.bf16.gmra.mxu0 %v11156_v40  ;;  %4727 = vmatmul.bf16.gmra.mxu1 %v11157_v52  ;;  %v3297_v40 = vld [vmem:[#allocation2 + $0xd0] sm:$0xff] }
 0x6ed   : > { %v5673_v26 = vadd.f32 %v4864_v55, %v3289_v15  ;;  %4816 = vmatmul.bf16.gmra.mxu2 %v11158_v8  ;;  %v7376_v55 = vld [vmem:[%s8777_s9 + $0xf8] sm:$0xf0] }
 0x6ee   : > { %4905 = vmatmul.bf16.gmra.mxu3 %v11159_v36  ;;  %v7379_v22 = vor.u32 %v7997_v7, %v7376_v55  ;;  %v7504_v36 = vld [vmem:[%s8777_s9 + $0x1f8] sm:$0xf0] }
 0x6ef   : > { %5801 = vst [vmem:[#allocation2 + $0x1e0] sm:$0xff] %v5673_v26  ;;  %v7507_v52 = vor.u32 %v8029_v25, %v7504_v36 }
 0x6f0   : > { %v4777_v47 = vpop.f32.mrf.mxu2  ;;  %5272 = vmatpush.bf16.msrb.mxu0 %v7379_v22 }
 0x6f1   : > { %v4778_v48 = vadd.f32 %v4777_v47, %v4689_v21  ;;  %v4866_v57 = vpop.f32.mrf.mxu3  ;;  %v4601_v54 = vpop.f32.mrf.mxu0  ;;  %5361 = vmatpush.bf16.msrb.mxu1 %v7507_v52 }
 0x6f2   : > { %v4690_v28 = vpop.f32.mrf.mxu1 }
 0x6f3   : > { %v4867_v29 = vadd.f32 %v4866_v57, %v4778_v48  ;;  %v4691_v15 = vadd.f32 %v4690_v28, %v4601_v54 }
 0x6f5   : > { %v5677_v49 = vadd.f32 %v4867_v29, %v3293_v30  ;;  %v3301_v30 = vld [vmem:[#allocation2 + $0x268] sm:$0xff] }
 0x6f7   : > { %5805 = vst [vmem:[#allocation2 + $0x240] sm:$0xff] %v5677_v49 }
 0x6f8   : > { %v4779_v26 = vpop.f32.mrf.mxu2 }
 0x6f9   : > { %v4780_v21 = vadd.f32 %v4779_v26, %v4691_v15  ;;  %v4868_v47 = vpop.f32.mrf.mxu3  ;;  %v4604_v8 = vpop.f32.mrf.mxu0  ;;  %v3305_v26 = vld [vmem:[#allocation2 + $0x30] sm:$0xff] }
 0x6fa   : > { %v4693_v19 = vpop.f32.mrf.mxu1 }
 0x6fb   : > { %v4869_v39 = vadd.f32 %v4868_v47, %v4780_v21  ;;  %v4694_v48 = vadd.f32 %v4693_v19, %v4604_v8  ;;  %v11160_v21 = vld [vmem:[#allocation30_spill] sm:$0xff]  ;;  %v11161_v47 = vld [vmem:[#allocation31_spill] sm:$0xff] }
 0x6fc   : > { %4643 = vmatmul.bf16.gmra.mxu0 %v11137_v59  ;;  %4732 = vmatmul.bf16.gmra.mxu1 %v11138_v62 }
 0x6fd   : > { %v5681_v56 = vadd.f32 %v4869_v39, %v3297_v40  ;;  %4821 = vmatmul.bf16.gmra.mxu2 %v9905_v45  ;;  %v8057_v39 = vld [vmem:[%s8777_s9 + $0x2cc] sm:$0xf] }
 0x6fe   : > { %4910 = vmatmul.bf16.gmra.mxu3 %v10096_v18 }
 0x6ff   : > { %5809 = vst [vmem:[#allocation2 + $0xd0] sm:$0xff] %v5681_v56  ;;  %v7616_v56 = vld [vmem:[%s8777_s9 + $0x2d8] sm:$0xf0] }
 0x700   : > { %v4782_v57 = vpop.f32.mrf.mxu2 }
 0x701   : > { %v4783_v54 = vadd.f32 %v4782_v57, %v4694_v48  ;;  %v4871_v2 = vpop.f32.mrf.mxu3  ;;  %v4606_v36 = vpop.f32.mrf.mxu0  ;;  %v7619_v57 = vor.u32 %v8057_v39, %v7616_v56  ;;  %v7488_v39 = vld [vmem:[%s8777_s9 + $0x1d8] sm:$0xf0] }
 0x702   : > { %v4695_v28 = vpop.f32.mrf.mxu1 }
 0x703   : > { %v4872_v29 = vadd.f32 %v4871_v2, %v4783_v54  ;;  %v4696_v52 = vadd.f32 %v4695_v28, %v4606_v36  ;;  %v8089_v54 = vld [vmem:[%s8777_s9 + $0x3cc] sm:$0xf]  ;;  %v7744_v2 = vld [vmem:[%s8777_s9 + $0x3d8] sm:$0xf0]  ;;  %5451 = vmatpush.bf16.msrb.mxu2 %v7619_v57 }
 0x705   : > { %v5685_v49 = vadd.f32 %v4872_v29, %v3301_v30  ;;  %v7747_v29 = vor.u32 %v8089_v54, %v7744_v2 }
 0x707   : > { %5813 = vst [vmem:[#allocation2 + $0x268] sm:$0xff] %v5685_v49  ;;  %v3309_v49 = vld [vmem:[#allocation2 + $0x200] sm:$0xff]  ;;  %5540 = vmatpush.bf16.msrb.mxu3 %v7747_v29 }
 0x708   : > { %v4784_v40 = vpop.f32.mrf.mxu2 }
 0x709   : > { %v4785_v15 = vadd.f32 %v4784_v40, %v4696_v52  ;;  %v4873_v7 = vpop.f32.mrf.mxu3  ;;  %v4609_v55 = vpop.f32.mrf.mxu0 }
 0x70a   : > { %v4698_v8 = vpop.f32.mrf.mxu1 }
 0x70b   : > { %v4874_v22 = vadd.f32 %v4873_v7, %v4785_v15  ;;  %v4699_v19 = vadd.f32 %v4698_v8, %v4609_v55  ;;  %v7993_v55 = vld [vmem:[%s8777_s9 + $0xcc] sm:$0xf] }
 0x70c   : > { %4924 = vmatmul.bf16.vlgmr.msra.gmra.mxu0 %v11096_v35  ;;  %5013 = vmatmul.bf16.vlgmr.msra.gmra.mxu1 %v11097_v16 }
 0x70d   : > { %v5689_v25 = vadd.f32 %v4874_v22, %v3305_v26  ;;  %5102 = vmatmul.bf16.vlgmr.msra.gmra.mxu2 %v11160_v21  ;;  %v7360_v26 = vld [vmem:[%s8777_s9 + $0xd8] sm:$0xf0] }
 0x70e   : > { %5191 = vmatmul.bf16.vlgmr.msra.gmra.mxu3 %v11161_v47  ;;  %v7363_v22 = vor.u32 %v7993_v55, %v7360_v26  ;;  %v3313_v21 = vld [vmem:[#allocation2 + $0x300] sm:$0xff] }
 0x70f   : > { %5817 = vst [vmem:[#allocation2 + $0x30] sm:$0xff] %v5689_v25  ;;  %v8025_v25 = vld [vmem:[%s8777_s9 + $0x1cc] sm:$0xf] }
 0x710   : > { %v4787_v48 = vpop.f32.mrf.mxu2  ;;  %v7491_v47 = vor.u32 %v8025_v25, %v7488_v39  ;;  %5273 = vmatpush.bf16.msrb.mxu0 %v7363_v22  ;;  %v3321_v22 = vld [vmem:[#allocation2 + $0x40] sm:$0xff] }
 0x711   : > { %v4788_v36 = vadd.f32 %v4787_v48, %v4699_v19  ;;  %v4876_v30 = vpop.f32.mrf.mxu3  ;;  %v4611_v28 = vpop.f32.mrf.mxu0 }
 0x712   : > { %v4700_v52 = vpop.f32.mrf.mxu1  ;;  %5362 = vmatpush.bf16.msrb.mxu1 %v7491_v47 }
 0x713   : > { %v4877_v40 = vadd.f32 %v4876_v30, %v4788_v36  ;;  %v4701_v7 = vadd.f32 %v4700_v52, %v4611_v28  ;;  %v3317_v52 = vld [vmem:[#allocation2 + $0x260] sm:$0xff] }
 0x715   : > { %v5693_v15 = vadd.f32 %v4877_v40, %v3309_v49 }
 0x717   : > { %5821 = vst [vmem:[#allocation2 + $0x200] sm:$0xff] %v5693_v15 }
 0x718   : > { %v4789_v8 = vpop.f32.mrf.mxu2 }
 0x719   : > { %v4790_v19 = vadd.f32 %v4789_v8, %v4701_v7  ;;  %v4878_v56 = vpop.f32.mrf.mxu3  ;;  %v4614_v48 = vpop.f32.mrf.mxu0 }
 0x71a   : > { %v4703_v54 = vpop.f32.mrf.mxu1 }
 0x71b   : > { %v4879_v2 = vadd.f32 %v4878_v56, %v4790_v19  ;;  %v4704_v36 = vadd.f32 %v4703_v54, %v4614_v48  ;;  %v8053_v48 = vld [vmem:[%s8777_s9 + $0x2ac] sm:$0xf]  ;;  %v7600_v54 = vld [vmem:[%s8777_s9 + $0x2b8] sm:$0xf0] }
 0x71c   : > { %4929 = vmatmul.bf16.gmra.mxu0 %v11100_v53  ;;  %5018 = vmatmul.bf16.gmra.mxu1 %v11101_v12 }
 0x71d   : > { %v5697_v57 = vadd.f32 %v4879_v2, %v3313_v21  ;;  %5107 = vmatmul.bf16.gmra.mxu2 %v11102_v11 }
 0x71e   : > { %5196 = vmatmul.bf16.gmra.mxu3 %v9929_v41 }
 0x71f   : > { %5825 = vst [vmem:[#allocation2 + $0x300] sm:$0xff] %v5697_v57  ;;  %v7603_v57 = vor.u32 %v8053_v48, %v7600_v54 }
 0x720   : > { %v4792_v30 = vpop.f32.mrf.mxu2 }
 0x721   : > { %v4793_v28 = vadd.f32 %v4792_v30, %v4704_v36  ;;  %v4881_v29 = vpop.f32.mrf.mxu3  ;;  %v4616_v49 = vpop.f32.mrf.mxu0  ;;  %v8085_v36 = vld [vmem:[%s8777_s9 + $0x3ac] sm:$0xf]  ;;  %v7728_v30 = vld [vmem:[%s8777_s9 + $0x3b8] sm:$0xf0]  ;;  %5452 = vmatpush.bf16.msrb.mxu2 %v7603_v57 }
 0x722   : > { %v4705_v40 = vpop.f32.mrf.mxu1 }
 0x723   : > { %v4882_v15 = vadd.f32 %v4881_v29, %v4793_v28  ;;  %v4706_v47 = vadd.f32 %v4705_v40, %v4616_v49  ;;  %v3325_v40 = vld [vmem:[#allocation2 + $0x3a8] sm:$0xff] }
 0x725   : > { %v5701_v7 = vadd.f32 %v4882_v15, %v3317_v52  ;;  %v7731_v52 = vor.u32 %v8085_v36, %v7728_v30 }
 0x727   : > { %5829 = vst [vmem:[#allocation2 + $0x260] sm:$0xff] %v5701_v7  ;;  %5541 = vmatpush.bf16.msrb.mxu3 %v7731_v52 }
 0x728   : > { %v4794_v21 = vpop.f32.mrf.mxu2 }
 0x729   : > { %v4795_v55 = vadd.f32 %v4794_v21, %v4706_v47  ;;  %v4883_v26 = vpop.f32.mrf.mxu3  ;;  %v4619_v8 = vpop.f32.mrf.mxu0 }
 0x72a   : > { %v4708_v25 = vpop.f32.mrf.mxu1 }
 0x72b   : > { %v4884_v39 = vadd.f32 %v4883_v26, %v4795_v55  ;;  %v4709_v56 = vadd.f32 %v4708_v25, %v4619_v8  ;;  %v7989_v55 = vld [vmem:[%s8777_s9 + $0xac] sm:$0xf]  ;;  %v7344_v26 = vld [vmem:[%s8777_s9 + $0xb8] sm:$0xf0] }
 0x72c   : > { %4934 = vmatmul.bf16.gmra.mxu0 %v11104_v9  ;;  %5023 = vmatmul.bf16.gmra.mxu1 %v11105_v60  ;;  %v8021_v25 = vld [vmem:[%s8777_s9 + $0x1ac] sm:$0xf] }
 0x72d   : > { %v5705_v19 = vadd.f32 %v4884_v39, %v3321_v22  ;;  %5112 = vmatmul.bf16.gmra.mxu2 %v11106_v63  ;;  %v7347_v22 = vor.u32 %v7989_v55, %v7344_v26  ;;  %v7472_v39 = vld [vmem:[%s8777_s9 + $0x1b8] sm:$0xf0] }
 0x72e   : > { %5201 = vmatmul.bf16.gmra.mxu3 %v9945_v20  ;;  %v7475_v54 = vor.u32 %v8021_v25, %v7472_v39  ;;  %v3337_v39 = vld [vmem:[#allocation2 + $0x120] sm:$0xff] }
 0x72f   : > { %5833 = vst [vmem:[#allocation2 + $0x40] sm:$0xff] %v5705_v19  ;;  %5274 = vmatpush.bf16.msrb.mxu0 %v7347_v22 }
 0x730   : > { %v4797_v2 = vpop.f32.mrf.mxu2  ;;  %5363 = vmatpush.bf16.msrb.mxu1 %v7475_v54 }
 0x731   : > { %v4798_v28 = vadd.f32 %v4797_v2, %v4709_v56  ;;  %v4886_v29 = vpop.f32.mrf.mxu3  ;;  %v4621_v49 = vpop.f32.mrf.mxu0  ;;  %v3329_v2 = vld [vmem:[#allocation2 + $0x210] sm:$0xff] }
 0x732   : > { %v4710_v15 = vpop.f32.mrf.mxu1 }
 0x733   : > { %v4887_v7 = vadd.f32 %v4886_v29, %v4798_v28  ;;  %v4711_v21 = vadd.f32 %v4710_v15, %v4621_v49  ;;  %v3333_v15 = vld [vmem:[#allocation2 + $0x1c8] sm:$0xff] }
 0x735   : > { %v5709_v47 = vadd.f32 %v4887_v7, %v3325_v40 }
 0x737   : > { %5837 = vst [vmem:[#allocation2 + $0x3a8] sm:$0xff] %v5709_v47 }
 0x738   : > { %v4799_v8 = vpop.f32.mrf.mxu2 }
 0x739   : > { %v4800_v19 = vadd.f32 %v4799_v8, %v4711_v21  ;;  %v4888_v56 = vpop.f32.mrf.mxu3  ;;  %v4624_v48 = vpop.f32.mrf.mxu0 }
 0x73a   : > { %v4713_v36 = vpop.f32.mrf.mxu1 }
 0x73b   : > { %v4889_v30 = vadd.f32 %v4888_v56, %v4800_v19  ;;  %v4714_v28 = vadd.f32 %v4713_v36, %v4624_v48  ;;  %v7584_v36 = vld [vmem:[%s8777_s9 + $0x298] sm:$0xf0] }
 0x73c   : > { %4939 = vmatmul.bf16.gmra.mxu0 %v11107_v0  ;;  %5028 = vmatmul.bf16.gmra.mxu1 %v11108_v32 }
 0x73d   : > { %v5713_v57 = vadd.f32 %v4889_v30, %v3329_v2  ;;  %5117 = vmatmul.bf16.gmra.mxu2 %v11109_v31  ;;  %v8049_v2 = vld [vmem:[%s8777_s9 + $0x28c] sm:$0xf] }
 0x73e   : > { %5206 = vmatmul.bf16.gmra.mxu3 %v9953_v27 }
 0x73f   : > { %5841 = vst [vmem:[#allocation2 + $0x210] sm:$0xff] %v5713_v57  ;;  %v7587_v57 = vor.u32 %v8049_v2, %v7584_v36 }
 0x740   : > { %v4802_v29 = vpop.f32.mrf.mxu2 }
 0x741   : > { %v4803_v49 = vadd.f32 %v4802_v29, %v4714_v28  ;;  %v4891_v52 = vpop.f32.mrf.mxu3  ;;  %v4626_v40 = vpop.f32.mrf.mxu0  ;;  %v8081_v28 = vld [vmem:[%s8777_s9 + $0x38c] sm:$0xf]  ;;  %v7712_v29 = vld [vmem:[%s8777_s9 + $0x398] sm:$0xf0]  ;;  %5453 = vmatpush.bf16.msrb.mxu2 %v7587_v57 }
 0x742   : > { %v4715_v7 = vpop.f32.mrf.mxu1 }
 0x743   : > { %v4892_v47 = vadd.f32 %v4891_v52, %v4803_v49  ;;  %v4716_v55 = vadd.f32 %v4715_v7, %v4626_v40  ;;  %v3341_v7 = vld [vmem:[#allocation2 + $0x238] sm:$0xff] }
 0x745   : > { %v5717_v21 = vadd.f32 %v4892_v47, %v3333_v15  ;;  %v7715_v15 = vor.u32 %v8081_v28, %v7712_v29 }
 0x747   : > { %5845 = vst [vmem:[#allocation2 + $0x1c8] sm:$0xff] %v5717_v21  ;;  %5542 = vmatpush.bf16.msrb.mxu3 %v7715_v15 }
 0x748   : > { %v4804_v26 = vpop.f32.mrf.mxu2 }
 0x749   : > { %v4805_v8 = vadd.f32 %v4804_v26, %v4716_v55  ;;  %v4893_v22 = vpop.f32.mrf.mxu3  ;;  %v4629_v25 = vpop.f32.mrf.mxu0 }
 0x74a   : > { %v4718_v19 = vpop.f32.mrf.mxu1 }
 0x74b   : > { %v4894_v56 = vadd.f32 %v4893_v22, %v4805_v8  ;;  %v4719_v54 = vadd.f32 %v4718_v19, %v4629_v25  ;;  %v7985_v8 = vld [vmem:[%s8777_s9 + $0x8c] sm:$0xf]  ;;  %v7328_v22 = vld [vmem:[%s8777_s9 + $0x98] sm:$0xf0] }
 0x74c   : > { %4944 = vmatmul.bf16.gmra.mxu0 %v11111_v6  ;;  %5033 = vmatmul.bf16.gmra.mxu1 %v11112_v13  ;;  %v8017_v19 = vld [vmem:[%s8777_s9 + $0x18c] sm:$0xf] }
 0x74d   : > { %v5721_v48 = vadd.f32 %v4894_v56, %v3337_v39  ;;  %5122 = vmatmul.bf16.gmra.mxu2 %v11113_v33  ;;  %v7331_v39 = vor.u32 %v7985_v8, %v7328_v22  ;;  %v7456_v56 = vld [vmem:[%s8777_s9 + $0x198] sm:$0xf0] }
 0x74e   : > { %5211 = vmatmul.bf16.gmra.mxu3 %v9969_v43  ;;  %v7459_v36 = vor.u32 %v8017_v19, %v7456_v56  ;;  %v3353_v56 = vld [vmem:[#allocation2 + $0x378] sm:$0xff] }
 0x74f   : > { %5849 = vst [vmem:[#allocation2 + $0x120] sm:$0xff] %v5721_v48  ;;  %5275 = vmatpush.bf16.msrb.mxu0 %v7331_v39 }
 0x750   : > { %v4807_v30 = vpop.f32.mrf.mxu2  ;;  %5364 = vmatpush.bf16.msrb.mxu1 %v7459_v36  ;;  %v11162_v36 = vld [vmem:[#allocation75_spill] sm:$0xff] }
 0x751   : > { %v4808_v49 = vadd.f32 %v4807_v30, %v4719_v54  ;;  %v4896_v52 = vpop.f32.mrf.mxu3  ;;  %v4631_v40 = vpop.f32.mrf.mxu0  ;;  %v3345_v30 = vld [vmem:[#allocation2 + $0xa8] sm:$0xff] }
 0x752   : > { %v4720_v47 = vpop.f32.mrf.mxu1 }
 0x753   : > { %v4897_v21 = vadd.f32 %v4896_v52, %v4808_v49  ;;  %v4721_v26 = vadd.f32 %v4720_v47, %v4631_v40  ;;  %v3349_v47 = vld [vmem:[#allocation2 + $0x180] sm:$0xff] }
 0x755   : > { %v5725_v55 = vadd.f32 %v4897_v21, %v3341_v7 }
 0x757   : > { %5853 = vst [vmem:[#allocation2 + $0x238] sm:$0xff] %v5725_v55 }
 0x758   : > { %v4809_v25 = vpop.f32.mrf.mxu2 }
 0x759   : > { %v4810_v48 = vadd.f32 %v4809_v25, %v4721_v26  ;;  %v4898_v54 = vpop.f32.mrf.mxu3  ;;  %v4634_v2 = vpop.f32.mrf.mxu0 }
 0x75a   : > { %v4723_v28 = vpop.f32.mrf.mxu1 }
 0x75b   : > { %v4899_v29 = vadd.f32 %v4898_v54, %v4810_v48  ;;  %v4724_v49 = vadd.f32 %v4723_v28, %v4634_v2  ;;  %v11164_v28 = vld [vmem:[#allocation32_spill] sm:$0xff] }
 0x75c   : > { %4949 = vmatmul.bf16.gmra.mxu0 %v11114_v23  ;;  %5038 = vmatmul.bf16.gmra.mxu1 %v11115_v5 }
 0x75d   : > { %v5729_v57 = vadd.f32 %v4899_v29, %v3345_v30  ;;  %5127 = vmatmul.bf16.gmra.mxu2 %v11116_v4  ;;  %v11163_v30 = vld [vmem:[#allocation90_spill] sm:$0xff] }
 0x75e   : > { %5216 = vmatmul.bf16.gmra.mxu3 %v9977_v34 }
 0x75f   : > { %5857 = vst [vmem:[#allocation2 + $0xa8] sm:$0xff] %v5729_v57  ;;  %v8045_v57 = vld [vmem:[%s8777_s9 + $0x26c] sm:$0xf] }
 0x760   : > { %v4812_v52 = vpop.f32.mrf.mxu2 }
 0x761   : > { %v4813_v40 = vadd.f32 %v4812_v52, %v4724_v49  ;;  %v4901_v15 = vpop.f32.mrf.mxu3  ;;  %v4636_v7 = vpop.f32.mrf.mxu0  ;;  %v7568_v49 = vld [vmem:[%s8777_s9 + $0x278] sm:$0xf0] }
 0x762   : > { %v4725_v21 = vpop.f32.mrf.mxu1 }
 0x763   : > { %v4902_v55 = vadd.f32 %v4901_v15, %v4813_v40  ;;  %v4726_v8 = vadd.f32 %v4725_v21, %v4636_v7  ;;  %v7571_v40 = vor.u32 %v8045_v57, %v7568_v49  ;;  %v8077_v15 = vld [vmem:[%s8777_s9 + $0x36c] sm:$0xf]  ;;  %v7696_v7 = vld [vmem:[%s8777_s9 + $0x378] sm:$0xf0] }
 0x764   : > { %v8013_v57 = vld [vmem:[%s8777_s9 + $0x16c] sm:$0xf]  ;;  %v7440_v49 = vld [vmem:[%s8777_s9 + $0x178] sm:$0xf0] }
 0x765   : > { %v5733_v26 = vadd.f32 %v4902_v55, %v3349_v47  ;;  %5454 = vmatpush.bf16.msrb.mxu2 %v7571_v40 }
 0x767   : > { %5861 = vst [vmem:[#allocation2 + $0x180] sm:$0xff] %v5733_v26  ;;  %v7699_v26 = vor.u32 %v8077_v15, %v7696_v7 }
 0x768   : > { %v4814_v22 = vpop.f32.mrf.mxu2 }
 0x769   : > { %v4815_v25 = vadd.f32 %v4814_v22, %v4726_v8  ;;  %v4903_v39 = vpop.f32.mrf.mxu3  ;;  %v4639_v19 = vpop.f32.mrf.mxu0  ;;  %v3357_v8 = vld [vmem:[#allocation2 + $0x308] sm:$0xff]  ;;  %5543 = vmatpush.bf16.msrb.mxu3 %v7699_v26 }
 0x76a   : > { %v4728_v48 = vpop.f32.mrf.mxu1 }
 0x76b   : > { %v4904_v54 = vadd.f32 %v4903_v39, %v4815_v25  ;;  %v4729_v29 = vadd.f32 %v4728_v48, %v4639_v19  ;;  %v7312_v48 = vld [vmem:[%s8777_s9 + $0x78] sm:$0xf0] }
 0x76c   : > { %4954 = vmatmul.bf16.gmra.mxu0 %v11118_v38  ;;  %5043 = vmatmul.bf16.gmra.mxu1 %v11162_v36  ;;  %v3361_v36 = vld [vmem:[#allocation2 + $0x360] sm:$0xff] }
 0x76d   : > { %v5737_v2 = vadd.f32 %v4904_v54, %v3353_v56  ;;  %5132 = vmatmul.bf16.gmra.mxu2 %v11163_v30  ;;  %v7981_v56 = vld [vmem:[%s8777_s9 + $0x6c] sm:$0xf]  ;;  %v7443_v30 = vor.u32 %v8013_v57, %v7440_v49 }
 0x76e   : > { %5221 = vmatmul.bf16.gmra.mxu3 %v11164_v28  ;;  %v3369_v49 = vld [vmem:[#allocation2 + $0x270] sm:$0xff] }
 0x76f   : > { %5865 = vst [vmem:[#allocation2 + $0x378] sm:$0xff] %v5737_v2  ;;  %v7315_v2 = vor.u32 %v7981_v56, %v7312_v48  ;;  %5365 = vmatpush.bf16.msrb.mxu1 %v7443_v30 }
 0x770   : > { %v4817_v52 = vpop.f32.mrf.mxu2 }
 0x771   : > { %v4818_v47 = vadd.f32 %v4817_v52, %v4729_v29  ;;  %v4906_v21 = vpop.f32.mrf.mxu3  ;;  %v4641_v55 = vpop.f32.mrf.mxu0  ;;  %5276 = vmatpush.bf16.msrb.mxu0 %v7315_v2 }
 0x772   : > { %v4730_v22 = vpop.f32.mrf.mxu1 }
 0x773   : > { %v4907_v25 = vadd.f32 %v4906_v21, %v4818_v47  ;;  %v4731_v19 = vadd.f32 %v4730_v22, %v4641_v55  ;;  %v11165_v47 = vld [vmem:[#allocation91_spill] sm:$0xff]  ;;  %v11166_v21 = vld [vmem:[#allocation34_spill] sm:$0xff] }
 0x775   : > { %v5741_v39 = vadd.f32 %v4907_v25, %v3357_v8 }
 0x777   : > { %5869 = vst [vmem:[#allocation2 + $0x308] sm:$0xff] %v5741_v39  ;;  %v3365_v39 = vld [vmem:[#allocation2 + $0xf8] sm:$0xff] }
 0x778   : > { %v4819_v54 = vpop.f32.mrf.mxu2 }
 0x779   : > { %v4820_v29 = vadd.f32 %v4819_v54, %v4731_v19  ;;  %v4908_v52 = vpop.f32.mrf.mxu3  ;;  %v4644_v28 = vpop.f32.mrf.mxu0 }
 0x77a   : > { %v4733_v15 = vpop.f32.mrf.mxu1 }
 0x77b   : > { %v4909_v7 = vadd.f32 %v4908_v52, %v4820_v29  ;;  %v4734_v55 = vadd.f32 %v4733_v15, %v4644_v28  ;;  %v11167_v52 = vld [vmem:[#allocation61_spill] sm:$0xff] }
 0x77c   : > { %4959 = vmatmul.bf16.gmra.mxu0 %v11120_v61  ;;  %5048 = vmatmul.bf16.gmra.mxu1 %v11121_v58 }
 0x77d   : > { %v5745_v40 = vadd.f32 %v4909_v7, %v3361_v36  ;;  %5137 = vmatmul.bf16.gmra.mxu2 %v11165_v47  ;;  %v11168_v7 = vld [vmem:[#allocation77_spill] sm:$0xff]  ;;  %v3250_v47 = vld [vmem:[#allocation2 + $0x330] sm:$0xff] }
 0x77e   : > { %5226 = vmatmul.bf16.gmra.mxu3 %v11166_v21 }
 0x77f   : > { %5873 = vst [vmem:[#allocation2 + $0x360] sm:$0xff] %v5745_v40  ;;  %v11169_v40 = vld [vmem:[#allocation92_spill] sm:$0xff] }
 0x780   : > { %v4822_v26 = vpop.f32.mrf.mxu2 }
 0x781   : > { %v4823_v8 = vadd.f32 %v4822_v26, %v4734_v55  ;;  %v4911_v22 = vpop.f32.mrf.mxu3  ;;  %v4646_v25 = vpop.f32.mrf.mxu0  ;;  %v11170_v55 = vld [vmem:[#allocation35_spill] sm:$0xff] }
 0x782   : > { %v4735_v19 = vpop.f32.mrf.mxu1 }
 0x783   : > { %v4912_v56 = vadd.f32 %v4911_v22, %v4823_v8  ;;  %v4736_v30 = vadd.f32 %v4735_v19, %v4646_v25  ;;  %v8041_v8 = vld [vmem:[%s8777_s9 + $0x24c] sm:$0xf]  ;;  %v7552_v22 = vld [vmem:[%s8777_s9 + $0x258] sm:$0xf0] }
 0x784   : > { %v8073_v19 = vld [vmem:[%s8777_s9 + $0x34c] sm:$0xf] }
 0x785   : > { %v5749_v48 = vadd.f32 %v4912_v56, %v3365_v39  ;;  %v7555_v39 = vor.u32 %v8041_v8, %v7552_v22  ;;  %v7680_v56 = vld [vmem:[%s8777_s9 + $0x358] sm:$0xf0] }
 0x787   : > { %5877 = vst [vmem:[#allocation2 + $0xf8] sm:$0xff] %v5749_v48  ;;  %5455 = vmatpush.bf16.msrb.mxu2 %v7555_v39 }
 0x788   : > { %v4824_v36 = vpop.f32.mrf.mxu2 }
 0x789   : > { %v4825_v54 = vadd.f32 %v4824_v36, %v4736_v30  ;;  %v4913_v2 = vpop.f32.mrf.mxu3  ;;  %v4925_v57 = vpop.f32.mrf.mxu0 }
 0x78a   : > { %v5014_v28 = vpop.f32.mrf.mxu1 }
 0x78b   : > { %v4914_v29 = vadd.f32 %v4913_v2, %v4825_v54  ;;  %v5015_v26 = vadd.f32 %v5014_v28, %v4925_v57  ;;  %v7683_v54 = vor.u32 %v8073_v19, %v7680_v56  ;;  %v3246_v2 = vld [vmem:[#allocation2 + $0xd8] sm:$0xff] }
 0x78c   : > { %4964 = vmatmul.bf16.gmra.mxu0 %v11167_v52  ;;  %5053 = vmatmul.bf16.gmra.mxu1 %v11168_v7  ;;  %v7424_v7 = vld [vmem:[%s8777_s9 + $0x158] sm:$0xf0] }
 0x78d   : > { %v5753_v15 = vadd.f32 %v4914_v29, %v3369_v49  ;;  %5142 = vmatmul.bf16.gmra.mxu2 %v11169_v40  ;;  %5544 = vmatpush.bf16.msrb.mxu3 %v7683_v54  ;;  %v8009_v40 = vld [vmem:[%s8777_s9 + $0x14c] sm:$0xf] }
 0x78e   : > { %5231 = vmatmul.bf16.gmra.mxu3 %v11170_v55  ;;  %v7296_v55 = vld [vmem:[%s8777_s9 + $0x58] sm:$0xf0]  ;;  %v7427_v21 = vor.u32 %v8009_v40, %v7424_v7  ;;  %v3254_v40 = vld [vmem:[#allocation2 + $0x118] sm:$0xff] }
 0x78f   : > { %5881 = vst [vmem:[#allocation2 + $0x270] sm:$0xff] %v5753_v15  ;;  %v7977_v15 = vld [vmem:[%s8777_s9 + $0x4c] sm:$0xf] }
 0x790   : > { %v5103_v25 = vpop.f32.mrf.mxu2  ;;  %v7299_v22 = vor.u32 %v7977_v15, %v7296_v55  ;;  %5366 = vmatpush.bf16.msrb.mxu1 %v7427_v21  ;;  %v3258_v15 = vld [vmem:[#allocation2 + $0x108] sm:$0xff] }
 0x791   : > { %v5104_v48 = vadd.f32 %v5103_v25, %v5015_v26  ;;  %v5192_v30 = vpop.f32.mrf.mxu3  ;;  %v4927_v36 = vpop.f32.mrf.mxu0 }
 0x792   : > { %v5016_v49 = vpop.f32.mrf.mxu1  ;;  %5277 = vmatpush.bf16.msrb.mxu0 %v7299_v22  ;;  %v11171_v22 = vld [vmem:[#allocation63_spill] sm:$0xff] }
 0x793   : > { %v5193_v29 = vadd.f32 %v5192_v30, %v5104_v48  ;;  %v5017_v28 = vadd.f32 %v5016_v49, %v4927_v36 }
 0x795   : > { %v5630_v57 = vadd.f32 %v5193_v29, %v3246_v2 }
 0x797   : > { %5758 = vst [vmem:[#allocation2 + $0xd8] sm:$0xff] %v5630_v57 }
 0x798   : > { %v5105_v8 = vpop.f32.mrf.mxu2 }
 0x799   : > { %v5106_v26 = vadd.f32 %v5105_v8, %v5017_v28  ;;  %v5194_v25 = vpop.f32.mrf.mxu3  ;;  %v4930_v52 = vpop.f32.mrf.mxu0 }
 0x79a   : > { %v5019_v19 = vpop.f32.mrf.mxu1 }
 0x79b   : > { %v5195_v56 = vadd.f32 %v5194_v25, %v5106_v26  ;;  %v5020_v55 = vadd.f32 %v5019_v19, %v4930_v52  ;;  %v11172_v25 = vld [vmem:[#allocation79_spill] sm:$0xff]  ;;  %v11173_v19 = vld [vmem:[#allocation93_spill] sm:$0xff] }
 0x79c   : > { %4969 = vmatmul.bf16.gmra.mxu0 %v11125_v50  ;;  %5058 = vmatmul.bf16.gmra.mxu1 %v11126_v42 }
 0x79d   : > { %v5634_v39 = vadd.f32 %v5195_v56, %v3250_v47  ;;  %5147 = vmatmul.bf16.gmra.mxu2 %v9830_v37  ;;  %v11174_v56 = vld [vmem:[#allocation36_spill] sm:$0xff] }
 0x79e   : > { %5236 = vmatmul.bf16.gmra.mxu3 %v10025_v46 }
 0x79f   : > { %5762 = vst [vmem:[#allocation2 + $0x330] sm:$0xff] %v5634_v39 }
 0x7a0   : > { %v5108_v48 = vpop.f32.mrf.mxu2 }
 0x7a1   : > { %v5109_v30 = vadd.f32 %v5108_v48, %v5020_v55  ;;  %v5197_v36 = vpop.f32.mrf.mxu3  ;;  %v4932_v7 = vpop.f32.mrf.mxu0  ;;  %v8037_v55 = vld [vmem:[%s8777_s9 + $0x22c] sm:$0xf]  ;;  %v7536_v48 = vld [vmem:[%s8777_s9 + $0x238] sm:$0xf0] }
 0x7a2   : > { %v5021_v54 = vpop.f32.mrf.mxu1 }
 0x7a3   : > { %v5198_v2 = vadd.f32 %v5197_v36, %v5109_v30  ;;  %v5022_v21 = vadd.f32 %v5021_v54, %v4932_v7  ;;  %v7539_v36 = vor.u32 %v8037_v55, %v7536_v48  ;;  %v8069_v7 = vld [vmem:[%s8777_s9 + $0x32c] sm:$0xf] }
 0x7a4   : > { %v8005_v48 = vld [vmem:[%s8777_s9 + $0x12c] sm:$0xf] }
 0x7a5   : > { %v5638_v49 = vadd.f32 %v5198_v2, %v3254_v40  ;;  %v7664_v40 = vld [vmem:[%s8777_s9 + $0x338] sm:$0xf0]  ;;  %5456 = vmatpush.bf16.msrb.mxu2 %v7539_v36 }
 0x7a7   : > { %5766 = vst [vmem:[#allocation2 + $0x118] sm:$0xff] %v5638_v49 }
 0x7a8   : > { %v5110_v47 = vpop.f32.mrf.mxu2 }
 0x7a9   : > { %v5111_v29 = vadd.f32 %v5110_v47, %v5022_v21  ;;  %v5199_v57 = vpop.f32.mrf.mxu3  ;;  %v4935_v28 = vpop.f32.mrf.mxu0  ;;  %v7667_v21 = vor.u32 %v8069_v7, %v7664_v40  ;;  %v3262_v47 = vld [vmem:[#allocation2 + $0x338] sm:$0xff] }
 0x7aa   : > { %v5024_v52 = vpop.f32.mrf.mxu1 }
 0x7ab   : > { %v5200_v8 = vadd.f32 %v5199_v57, %v5111_v29  ;;  %v5025_v39 = vadd.f32 %v5024_v52, %v4935_v28  ;;  %5545 = vmatpush.bf16.msrb.mxu3 %v7667_v21  ;;  %v7973_v52 = vld [vmem:[%s8777_s9 + $0x2c] sm:$0xf] }
 0x7ac   : > { %4974 = vmatmul.bf16.gmra.mxu0 %v11171_v22  ;;  %5063 = vmatmul.bf16.gmra.mxu1 %v11172_v25  ;;  %v3266_v22 = vld [vmem:[#allocation2 + $0x1b8] sm:$0xff] }
 0x7ad   : > { %v5642_v26 = vadd.f32 %v5200_v8, %v3258_v15  ;;  %5152 = vmatmul.bf16.gmra.mxu2 %v11173_v19  ;;  %v7280_v8 = vld [vmem:[%s8777_s9 + $0x38] sm:$0xf0] }
 0x7ae   : > { %5241 = vmatmul.bf16.gmra.mxu3 %v11174_v56  ;;  %v7283_v55 = vor.u32 %v7973_v52, %v7280_v8  ;;  %v7408_v56 = vld [vmem:[%s8777_s9 + $0x138] sm:$0xf0] }
 0x7af   : > { %5770 = vst [vmem:[#allocation2 + $0x108] sm:$0xff] %v5642_v26  ;;  %v7411_v25 = vor.u32 %v8005_v48, %v7408_v56  ;;  %v11175_v48 = vld [vmem:[#allocation65_spill] sm:$0xff] }
 0x7b0   : > { %v5113_v30 = vpop.f32.mrf.mxu2  ;;  %5278 = vmatpush.bf16.msrb.mxu0 %v7283_v55 }
 0x7b1   : > { %v5114_v54 = vadd.f32 %v5113_v30, %v5025_v39  ;;  %v5202_v2 = vpop.f32.mrf.mxu3  ;;  %v4937_v49 = vpop.f32.mrf.mxu0  ;;  %5367 = vmatpush.bf16.msrb.mxu1 %v7411_v25 }
 0x7b2   : > { %v5026_v29 = vpop.f32.mrf.mxu1 }
 0x7b3   : > { %v5203_v57 = vadd.f32 %v5202_v2, %v5114_v54  ;;  %v5027_v15 = vadd.f32 %v5026_v29, %v4937_v49 }
 0x7b5   : > { %v5646_v28 = vadd.f32 %v5203_v57, %v3262_v47  ;;  %v3270_v47 = vld [vmem:[#allocation2 + $0x290] sm:$0xff] }
 0x7b7   : > { %5774 = vst [vmem:[#allocation2 + $0x338] sm:$0xff] %v5646_v28 }
 0x7b8   : > { %v5115_v26 = vpop.f32.mrf.mxu2 }
 0x7b9   : > { %v5116_v39 = vadd.f32 %v5115_v26, %v5027_v15  ;;  %v5204_v30 = vpop.f32.mrf.mxu3  ;;  %v4940_v19 = vpop.f32.mrf.mxu0  ;;  %v3274_v26 = vld [vmem:[#allocation2 + $0x1c0] sm:$0xff] }
 0x7ba   : > { %v5029_v7 = vpop.f32.mrf.mxu1 }
 0x7bb   : > { %v5205_v40 = vadd.f32 %v5204_v30, %v5116_v39  ;;  %v5030_v54 = vadd.f32 %v5029_v7, %v4940_v19  ;;  %v11176_v30 = vld [vmem:[#allocation81_spill] sm:$0xff]  ;;  %v11177_v7 = vld [vmem:[#allocation94_spill] sm:$0xff] }
 0x7bc   : > { %4979 = vmatmul.bf16.gmra.mxu0 %v11129_v1  ;;  %5068 = vmatmul.bf16.gmra.mxu1 %v11130_v44 }
 0x7bd   : > { %v5650_v36 = vadd.f32 %v5205_v40, %v3266_v22  ;;  %5157 = vmatmul.bf16.gmra.mxu2 %v9854_v10  ;;  %v11178_v40 = vld [vmem:[#allocation37_spill] sm:$0xff] }
 0x7be   : > { %5246 = vmatmul.bf16.gmra.mxu3 %v10049_v14 }
 0x7bf   : > { %5778 = vst [vmem:[#allocation2 + $0x1b8] sm:$0xff] %v5650_v36 }
 0x7c0   : > { %v5118_v2 = vpop.f32.mrf.mxu2 }
 0x7c1   : > { %v5119_v49 = vadd.f32 %v5118_v2, %v5030_v54  ;;  %v5207_v21 = vpop.f32.mrf.mxu3  ;;  %v4942_v56 = vpop.f32.mrf.mxu0  ;;  %v8033_v54 = vld [vmem:[%s8777_s9 + $0x20c] sm:$0xf]  ;;  %v7520_v2 = vld [vmem:[%s8777_s9 + $0x218] sm:$0xf0] }
 0x7c2   : > { %v5031_v29 = vpop.f32.mrf.mxu1 }
 0x7c3   : > { %v5208_v57 = vadd.f32 %v5207_v21, %v5119_v49  ;;  %v5032_v25 = vadd.f32 %v5031_v29, %v4942_v56  ;;  %v7523_v21 = vor.u32 %v8033_v54, %v7520_v2  ;;  %v8065_v56 = vld [vmem:[%s8777_s9 + $0x30c] sm:$0xf] }
 0x7c4   : > { %v8001_v2 = vld [vmem:[%s8777_s9 + $0x10c] sm:$0xf] }
 0x7c5   : > { %v5654_v28 = vadd.f32 %v5208_v57, %v3270_v47  ;;  %v7648_v47 = vld [vmem:[%s8777_s9 + $0x318] sm:$0xf0]  ;;  %5457 = vmatpush.bf16.msrb.mxu2 %v7523_v21 }
 0x7c7   : > { %5782 = vst [vmem:[#allocation2 + $0x290] sm:$0xff] %v5654_v28 }
 0x7c8   : > { %v5120_v22 = vpop.f32.mrf.mxu2 }
 0x7c9   : > { %v5121_v15 = vadd.f32 %v5120_v22, %v5032_v25  ;;  %v5209_v52 = vpop.f32.mrf.mxu3  ;;  %v4945_v8 = vpop.f32.mrf.mxu0  ;;  %v7651_v25 = vor.u32 %v8065_v56, %v7648_v47  ;;  %v3278_v22 = vld [vmem:[#allocation2 + $0x158] sm:$0xff] }
 0x7ca   : > { %v5034_v19 = vpop.f32.mrf.mxu1 }
 0x7cb   : > { %v5210_v55 = vadd.f32 %v5209_v52, %v5121_v15  ;;  %v5035_v36 = vadd.f32 %v5034_v19, %v4945_v8  ;;  %5546 = vmatpush.bf16.msrb.mxu3 %v7651_v25  ;;  %v7969_v19 = vld [vmem:[%s8777_s9 + $0xc] sm:$0xf] }
 0x7cc   : > { %4984 = vmatmul.bf16.gmra.mxu0 %v11175_v48  ;;  %5073 = vmatmul.bf16.gmra.mxu1 %v11176_v30  ;;  %v3282_v48 = vld [vmem:[#allocation2 + $0x8] sm:$0xff] }
 0x7cd   : > { %v5658_v39 = vadd.f32 %v5210_v55, %v3274_v26  ;;  %5162 = vmatmul.bf16.gmra.mxu2 %v11177_v7  ;;  %v7264_v55 = vld [vmem:[%s8777_s9 + $0x18] sm:$0xf0] }
 0x7ce   : > { %5251 = vmatmul.bf16.gmra.mxu3 %v11178_v40  ;;  %v7267_v54 = vor.u32 %v7969_v19, %v7264_v55  ;;  %v7392_v40 = vld [vmem:[%s8777_s9 + $0x118] sm:$0xf0] }
 0x7cf   : > { %5786 = vst [vmem:[#allocation2 + $0x1c0] sm:$0xff] %v5658_v39  ;;  %v7395_v30 = vor.u32 %v8001_v2, %v7392_v40 }
 0x7d0   : > { %v5123_v49 = vpop.f32.mrf.mxu2  ;;  %5279 = vmatpush.bf16.msrb.mxu0 %v7267_v54 }
 0x7d1   : > { %v5124_v29 = vadd.f32 %v5123_v49, %v5035_v36  ;;  %v5212_v57 = vpop.f32.mrf.mxu3  ;;  %v4947_v28 = vpop.f32.mrf.mxu0  ;;  %5368 = vmatpush.bf16.msrb.mxu1 %v7395_v30 }
 0x7d2   : > { %v5036_v15 = vpop.f32.mrf.mxu1 }
 0x7d3   : > { %v5213_v52 = vadd.f32 %v5212_v57, %v5124_v29  ;;  %v5037_v26 = vadd.f32 %v5036_v15, %v4947_v28 }
 0x7d5   : > { %v5662_v8 = vadd.f32 %v5213_v52, %v3278_v22  ;;  %v3286_v22 = vld [vmem:[#allocation2 + $0xa0] sm:$0xff] }
 0x7d7   : > { %5790 = vst [vmem:[#allocation2 + $0x158] sm:$0xff] %v5662_v8 }
 0x7d8   : > { %v5125_v39 = vpop.f32.mrf.mxu2 }
 0x7d9   : > { %v5126_v36 = vadd.f32 %v5125_v39, %v5037_v26  ;;  %v5214_v49 = vpop.f32.mrf.mxu3  ;;  %v4950_v7 = vpop.f32.mrf.mxu0  ;;  %v3290_v39 = vld [vmem:[#allocation2 + $0x1f0] sm:$0xff] }
 0x7da   : > { %v5039_v56 = vpop.f32.mrf.mxu1 }
 0x7db   : > { %v5215_v47 = vadd.f32 %v5214_v49, %v5126_v36  ;;  %v5040_v29 = vadd.f32 %v5039_v56, %v4950_v7  ;;  %v11179_v36 = vld [vmem:[#allocation67_spill] sm:$0xff] }
 0x7dc   : > { %4989 = vmatmul.bf16.gmra.mxu0 %v11133_v17  ;;  %5078 = vmatmul.bf16.gmra.mxu1 %v11134_v51  ;;  %v11180_v49 = vld [vmem:[#allocation83_spill] sm:$0xff] }
 0x7dd   : > { %v5666_v21 = vadd.f32 %v5215_v47, %v3282_v48  ;;  %5167 = vmatmul.bf16.gmra.mxu2 %v9878_v3  ;;  %v11181_v56 = vld [vmem:[#allocation95_spill] sm:$0xff] }
 0x7de   : > { %5256 = vmatmul.bf16.gmra.mxu3 %v10073_v24  ;;  %v11182_v47 = vld [vmem:[#allocation39_spill] sm:$0xff] }
 0x7df   : > { %5794 = vst [vmem:[#allocation2 + $0x8] sm:$0xff] %v5666_v21 }
 0x7e0   : > { %v5128_v57 = vpop.f32.mrf.mxu2 }
 0x7e1   : > { %v5129_v28 = vadd.f32 %v5128_v57, %v5040_v29  ;;  %v5217_v25 = vpop.f32.mrf.mxu3  ;;  %v4952_v40 = vpop.f32.mrf.mxu0 }
 0x7e2   : > { %v5041_v15 = vpop.f32.mrf.mxu1 }
 0x7e3   : > { %v5218_v52 = vadd.f32 %v5217_v25, %v5129_v28  ;;  %v5042_v30 = vadd.f32 %v5041_v15, %v4952_v40  ;;  %v3294_v40 = vld [vmem:[#allocation2 + $0x90] sm:$0xff] }
 0x7e5   : > { %v5670_v8 = vadd.f32 %v5218_v52, %v3286_v22 }
 0x7e7   : > { %5798 = vst [vmem:[#allocation2 + $0xa0] sm:$0xff] %v5670_v8 }
 0x7e8   : > { %v5130_v26 = vpop.f32.mrf.mxu2 }
 0x7e9   : > { %v5131_v48 = vadd.f32 %v5130_v26, %v5042_v30  ;;  %v5219_v19 = vpop.f32.mrf.mxu3  ;;  %v4955_v55 = vpop.f32.mrf.mxu0 }
 0x7ea   : > { %v5044_v54 = vpop.f32.mrf.mxu1 }
 0x7eb   : > { %v5220_v2 = vadd.f32 %v5219_v19, %v5131_v48  ;;  %v5045_v21 = vadd.f32 %v5044_v54, %v4955_v55 }
 0x7ec   : > { %4994 = vmatmul.bf16.gmra.mxu0 %v11179_v36  ;;  %5083 = vmatmul.bf16.gmra.mxu1 %v11180_v49 }
 0x7ed   : > { %v5674_v7 = vadd.f32 %v5220_v2, %v3290_v39  ;;  %5172 = vmatmul.bf16.gmra.mxu2 %v11181_v56  ;;  %v3298_v39 = vld [vmem:[#allocation2 + $0x88] sm:$0xff] }
 0x7ee   : > { %5261 = vmatmul.bf16.gmra.mxu3 %v11182_v47 }
 0x7ef   : > { %5802 = vst [vmem:[#allocation2 + $0x1f0] sm:$0xff] %v5674_v7 }
 0x7f0   : > { %v5133_v29 = vpop.f32.mrf.mxu2 }
 0x7f1   : > { %v5134_v57 = vadd.f32 %v5133_v29, %v5045_v21  ;;  %v5222_v28 = vpop.f32.mrf.mxu3  ;;  %v4957_v25 = vpop.f32.mrf.mxu0 }
 0x7f2   : > { %v5046_v22 = vpop.f32.mrf.mxu1 }
 0x7f3   : > { %v5223_v15 = vadd.f32 %v5222_v28, %v5134_v57  ;;  %v5047_v8 = vadd.f32 %v5046_v22, %v4957_v25  ;;  %v3302_v28 = vld [vmem:[#allocation2 + $0x350] sm:$0xff] }
 0x7f5   : > { %v5678_v52 = vadd.f32 %v5223_v15, %v3294_v40 }
 0x7f7   : > { %5806 = vst [vmem:[#allocation2 + $0x90] sm:$0xff] %v5678_v52 }
 0x7f8   : > { %v5135_v30 = vpop.f32.mrf.mxu2 }
 0x7f9   : > { %v5136_v26 = vadd.f32 %v5135_v30, %v5047_v8  ;;  %v5224_v48 = vpop.f32.mrf.mxu3  ;;  %v4960_v19 = vpop.f32.mrf.mxu0 }
 0x7fa   : > { %v5049_v2 = vpop.f32.mrf.mxu1 }
 0x7fb   : > { %v5225_v56 = vadd.f32 %v5224_v48, %v5136_v26  ;;  %v5050_v54 = vadd.f32 %v5049_v2, %v4960_v19  ;;  %v3306_v26 = vld [vmem:[#allocation2 + $0x140] sm:$0xff]  ;;  %v11183_v2 = vld [vmem:[#allocation30_spill] sm:$0xff] }
 0x7fc   : > { %4999 = vmatmul.bf16.gmra.mxu0 %v11137_v59  ;;  %5088 = vmatmul.bf16.gmra.mxu1 %v11138_v62 }
 0x7fd   : > { %v5682_v55 = vadd.f32 %v5225_v56, %v3298_v39  ;;  %5177 = vmatmul.bf16.gmra.mxu2 %v9905_v45 }
 0x7fe   : > { %5266 = vmatmul.bf16.gmra.mxu3 %v10096_v18 }
 0x7ff   : > { %5810 = vst [vmem:[#allocation2 + $0x88] sm:$0xff] %v5682_v55  ;;  %v11184_v55 = vld [vmem:[#allocation31_spill] sm:$0xff] }
 0x800   : > { %v5138_v7 = vpop.f32.mrf.mxu2 }
 0x801   : > { %v5139_v21 = vadd.f32 %v5138_v7, %v5050_v54  ;;  %v5227_v29 = vpop.f32.mrf.mxu3  ;;  %v4962_v57 = vpop.f32.mrf.mxu0 }
 0x802   : > { %v5051_v25 = vpop.f32.mrf.mxu1 }
 0x803   : > { %v5228_v40 = vadd.f32 %v5227_v29, %v5139_v21  ;;  %v5052_v15 = vadd.f32 %v5051_v25, %v4962_v57 }
 0x805   : > { %v5686_v22 = vadd.f32 %v5228_v40, %v3302_v28  ;;  %v3310_v28 = vld [vmem:[#allocation2 + $0x318] sm:$0xff] }
 0x807   : > { %5814 = vst [vmem:[#allocation2 + $0x350] sm:$0xff] %v5686_v22 }
 0x808   : > { %v5140_v52 = vpop.f32.mrf.mxu2 }
 0x809   : > { %v5141_v56 = vadd.f32 %v5140_v52, %v5052_v15  ;;  %v5229_v8 = vpop.f32.mrf.mxu3  ;;  %v4965_v30 = vpop.f32.mrf.mxu0 }
 0x80a   : > { %v5054_v48 = vpop.f32.mrf.mxu1 }
 0x80b   : > { %v5230_v39 = vadd.f32 %v5229_v8, %v5141_v56  ;;  %v5055_v54 = vadd.f32 %v5054_v48, %v4965_v30  ;;  %v3314_v8 = vld [vmem:[#allocation2 + $0xe0] sm:$0xff] }
 0x80c   : > { %5280 = vmatmul.bf16.vlgmr.msrb.gmra.mxu0 %v11096_v35  ;;  %5369 = vmatmul.bf16.vlgmr.msrb.gmra.mxu1 %v11097_v16 }
 0x80d   : > { %v5690_v19 = vadd.f32 %v5230_v39, %v3306_v26  ;;  %5458 = vmatmul.bf16.vlgmr.msrb.gmra.mxu2 %v11183_v2 }
 0x80e   : > { %5547 = vmatmul.bf16.vlgmr.msrb.gmra.mxu3 %v11184_v55 }
 0x80f   : > { %5818 = vst [vmem:[#allocation2 + $0x140] sm:$0xff] %v5690_v19 }
 0x810   : > { %v5143_v7 = vpop.f32.mrf.mxu2 }
 0x811   : > { %v5144_v21 = vadd.f32 %v5143_v7, %v5055_v54  ;;  %v5232_v29 = vpop.f32.mrf.mxu3  ;;  %v4967_v57 = vpop.f32.mrf.mxu0  ;;  %v3318_v7 = vld [vmem:[#allocation2 + $0x3b8] sm:$0xff] }
 0x812   : > { %v5056_v25 = vpop.f32.mrf.mxu1 }
 0x813   : > { %v5233_v40 = vadd.f32 %v5232_v29, %v5144_v21  ;;  %v5057_v15 = vadd.f32 %v5056_v25, %v4967_v57 }
 0x815   : > { %v5694_v22 = vadd.f32 %v5233_v40, %v3310_v28 }
 0x817   : > { %5822 = vst [vmem:[#allocation2 + $0x318] sm:$0xff] %v5694_v22  ;;  %v3322_v22 = vld [vmem:[#allocation2 + $0x20] sm:$0xff] }
 0x818   : > { %v5145_v35 = vpop.f32.mrf.mxu2 }
 0x819   : > { %v5146_v52 = vadd.f32 %v5145_v35, %v5057_v15  ;;  %v5234_v56 = vpop.f32.mrf.mxu3  ;;  %v4970_v16 = vpop.f32.mrf.mxu0 }
 0x81a   : > { %v5059_v26 = vpop.f32.mrf.mxu1 }
 0x81b   : > { %v5235_v39 = vadd.f32 %v5234_v56, %v5146_v52  ;;  %v5060_v48 = vadd.f32 %v5059_v26, %v4970_v16  ;;  %v3326_v26 = vld [vmem:[#allocation2 + $0x3c8] sm:$0xff] }
 0x81c   : > { %5285 = vmatmul.bf16.gmra.mxu0 %v11100_v53  ;;  %5374 = vmatmul.bf16.gmra.mxu1 %v11101_v12 }
 0x81d   : > { %v5698_v30 = vadd.f32 %v5235_v39, %v3314_v8  ;;  %5463 = vmatmul.bf16.gmra.mxu2 %v11102_v11 }
 0x81e   : > { %5552 = vmatmul.bf16.gmra.mxu3 %v9929_v41 }
 0x81f   : > { %5826 = vst [vmem:[#allocation2 + $0xe0] sm:$0xff] %v5698_v30 }
 0x820   : > { %v5148_v19 = vpop.f32.mrf.mxu2 }
 0x821   : > { %v5149_v2 = vadd.f32 %v5148_v19, %v5060_v48  ;;  %v5237_v55 = vpop.f32.mrf.mxu3  ;;  %v4972_v54 = vpop.f32.mrf.mxu0 }
 0x822   : > { %v5061_v21 = vpop.f32.mrf.mxu1 }
 0x823   : > { %v5238_v29 = vadd.f32 %v5237_v55, %v5149_v2  ;;  %v5062_v28 = vadd.f32 %v5061_v21, %v4972_v54  ;;  %v3330_v54 = vld [vmem:[#allocation2 + $0x3d8] sm:$0xff] }
 0x825   : > { %v5702_v57 = vadd.f32 %v5238_v29, %v3318_v7 }
 0x827   : > { %5830 = vst [vmem:[#allocation2 + $0x3b8] sm:$0xff] %v5702_v57 }
 0x828   : > { %v5150_v53 = vpop.f32.mrf.mxu2 }
 0x829   : > { %v5151_v25 = vadd.f32 %v5150_v53, %v5062_v28  ;;  %v5239_v40 = vpop.f32.mrf.mxu3  ;;  %v4975_v12 = vpop.f32.mrf.mxu0 }
 0x82a   : > { %v5064_v11 = vpop.f32.mrf.mxu1 }
 0x82b   : > { %v5240_v15 = vadd.f32 %v5239_v40, %v5151_v25  ;;  %v5065_v35 = vadd.f32 %v5064_v11, %v4975_v12  ;;  %v3334_v25 = vld [vmem:[#allocation2 + $0x2d0] sm:$0xff] }
 0x82c   : > { %5290 = vmatmul.bf16.gmra.mxu0 %v11104_v9  ;;  %5379 = vmatmul.bf16.gmra.mxu1 %v11105_v60 }
 0x82d   : > { %v5706_v41 = vadd.f32 %v5240_v15, %v3322_v22  ;;  %5468 = vmatmul.bf16.gmra.mxu2 %v11106_v63 }
 0x82e   : > { %5557 = vmatmul.bf16.gmra.mxu3 %v9945_v20 }
 0x82f   : > { %5834 = vst [vmem:[#allocation2 + $0x20] sm:$0xff] %v5706_v41 }
 0x830   : > { %v5153_v52 = vpop.f32.mrf.mxu2 }
 0x831   : > { %v5154_v56 = vadd.f32 %v5153_v52, %v5065_v35  ;;  %v5242_v16 = vpop.f32.mrf.mxu3  ;;  %v4977_v8 = vpop.f32.mrf.mxu0  ;;  %v3338_v35 = vld [vmem:[#allocation2 + $0x198] sm:$0xff] }
 0x832   : > { %v5066_v39 = vpop.f32.mrf.mxu1 }
 0x833   : > { %v5243_v30 = vadd.f32 %v5242_v16, %v5154_v56  ;;  %v5067_v19 = vadd.f32 %v5066_v39, %v4977_v8 }
 0x835   : > { %v5710_v48 = vadd.f32 %v5243_v30, %v3326_v26  ;;  %v3342_v30 = vld [vmem:[#allocation2 + $0x398] sm:$0xff] }
 0x837   : > { %5838 = vst [vmem:[#allocation2 + $0x3c8] sm:$0xff] %v5710_v48 }
 0x838   : > { %v5155_v9 = vpop.f32.mrf.mxu2 }
 0x839   : > { %v5156_v2 = vadd.f32 %v5155_v9, %v5067_v19  ;;  %v5244_v55 = vpop.f32.mrf.mxu3  ;;  %v4980_v60 = vpop.f32.mrf.mxu0 }
 0x83a   : > { %v5069_v63 = vpop.f32.mrf.mxu1 }
 0x83b   : > { %v5245_v7 = vadd.f32 %v5244_v55, %v5156_v2  ;;  %v5070_v21 = vadd.f32 %v5069_v63, %v4980_v60 }
 0x83c   : > { %5295 = vmatmul.bf16.gmra.mxu0 %v11107_v0  ;;  %5384 = vmatmul.bf16.gmra.mxu1 %v11108_v32 }
 0x83d   : > { %v5714_v20 = vadd.f32 %v5245_v7, %v3330_v54  ;;  %5473 = vmatmul.bf16.gmra.mxu2 %v11109_v31  ;;  %v3346_v54 = vld [vmem:[#allocation2 + $0x258] sm:$0xff] }
 0x83e   : > { %5562 = vmatmul.bf16.gmra.mxu3 %v9953_v27 }
 0x83f   : > { %5842 = vst [vmem:[#allocation2 + $0x3d8] sm:$0xff] %v5714_v20 }
 0x840   : > { %v5158_v29 = vpop.f32.mrf.mxu2 }
 0x841   : > { %v5159_v57 = vadd.f32 %v5158_v29, %v5070_v21  ;;  %v5247_v28 = vpop.f32.mrf.mxu3  ;;  %v4982_v53 = vpop.f32.mrf.mxu0 }
 0x842   : > { %v5071_v40 = vpop.f32.mrf.mxu1 }
 0x843   : > { %v5248_v12 = vadd.f32 %v5247_v28, %v5159_v57  ;;  %v5072_v11 = vadd.f32 %v5071_v40, %v4982_v53  ;;  %v3350_v28 = vld [vmem:[#allocation2 + $0x170] sm:$0xff] }
 0x845   : > { %v5718_v22 = vadd.f32 %v5248_v12, %v3334_v25 }
 0x847   : > { %5846 = vst [vmem:[#allocation2 + $0x2d0] sm:$0xff] %v5718_v22 }
 0x848   : > { %v5160_v0 = vpop.f32.mrf.mxu2 }
 0x849   : > { %v5161_v15 = vadd.f32 %v5160_v0, %v5072_v11  ;;  %v5249_v41 = vpop.f32.mrf.mxu3  ;;  %v4985_v32 = vpop.f32.mrf.mxu0  ;;  %v3354_v0 = vld [vmem:[#allocation2 + $0xb8] sm:$0xff] }
 0x84a   : > { %v5074_v31 = vpop.f32.mrf.mxu1 }
 0x84b   : > { %v5250_v52 = vadd.f32 %v5249_v41, %v5161_v15  ;;  %v5075_v56 = vadd.f32 %v5074_v31, %v4985_v32  ;;  %v11185_v41 = vld [vmem:[#allocation75_spill] sm:$0xff]  ;;  %v11186_v32 = vld [vmem:[#allocation90_spill] sm:$0xff] }
 0x84c   : > { %5300 = vmatmul.bf16.gmra.mxu0 %v11111_v6  ;;  %5389 = vmatmul.bf16.gmra.mxu1 %v11112_v13 }
 0x84d   : > { %v5722_v27 = vadd.f32 %v5250_v52, %v3338_v35  ;;  %5478 = vmatmul.bf16.gmra.mxu2 %v11113_v33  ;;  %v11187_v35 = vld [vmem:[#allocation32_spill] sm:$0xff] }
 0x84e   : > { %5567 = vmatmul.bf16.gmra.mxu3 %v9969_v43 }
 0x84f   : > { %5850 = vst [vmem:[#allocation2 + $0x198] sm:$0xff] %v5722_v27 }
 0x850   : > { %v5163_v16 = vpop.f32.mrf.mxu2 }
 0x851   : > { %v5164_v8 = vadd.f32 %v5163_v16, %v5075_v56  ;;  %v5252_v26 = vpop.f32.mrf.mxu3  ;;  %v4987_v39 = vpop.f32.mrf.mxu0 }
 0x852   : > { %v5076_v48 = vpop.f32.mrf.mxu1 }
 0x853   : > { %v5253_v19 = vadd.f32 %v5252_v26, %v5164_v8  ;;  %v5077_v2 = vadd.f32 %v5076_v48, %v4987_v39  ;;  %v3358_v8 = vld [vmem:[#allocation2 + $0x370] sm:$0xff] }
 0x855   : > { %v5726_v9 = vadd.f32 %v5253_v19, %v3342_v30 }
 0x857   : > { %5854 = vst [vmem:[#allocation2 + $0x398] sm:$0xff] %v5726_v9 }
 0x858   : > { %v5165_v6 = vpop.f32.mrf.mxu2 }
 0x859   : > { %v5166_v55 = vadd.f32 %v5165_v6, %v5077_v2  ;;  %v5254_v60 = vpop.f32.mrf.mxu3  ;;  %v4990_v13 = vpop.f32.mrf.mxu0  ;;  %v3362_v6 = vld [vmem:[#allocation2 + $0x228] sm:$0xff] }
 0x85a   : > { %v5079_v33 = vpop.f32.mrf.mxu1 }
 0x85b   : > { %v5255_v63 = vadd.f32 %v5254_v60, %v5166_v55  ;;  %v5080_v7 = vadd.f32 %v5079_v33, %v4990_v13  ;;  %v11189_v33 = vld [vmem:[#allocation34_spill] sm:$0xff] }
 0x85c   : > { %5305 = vmatmul.bf16.gmra.mxu0 %v11114_v23  ;;  %5394 = vmatmul.bf16.gmra.mxu1 %v11115_v5 }
 0x85d   : > { %v5730_v43 = vadd.f32 %v5255_v63, %v3346_v54  ;;  %5483 = vmatmul.bf16.gmra.mxu2 %v11116_v4  ;;  %v11188_v54 = vld [vmem:[#allocation91_spill] sm:$0xff] }
 0x85e   : > { %5572 = vmatmul.bf16.gmra.mxu3 %v9977_v34 }
 0x85f   : > { %5858 = vst [vmem:[#allocation2 + $0x258] sm:$0xff] %v5730_v43 }
 0x860   : > { %v5168_v20 = vpop.f32.mrf.mxu2 }
 0x861   : > { %v5169_v21 = vadd.f32 %v5168_v20, %v5080_v7  ;;  %v5257_v29 = vpop.f32.mrf.mxu3  ;;  %v4992_v57 = vpop.f32.mrf.mxu0 }
 0x862   : > { %v5081_v53 = vpop.f32.mrf.mxu1 }
 0x863   : > { %v5258_v25 = vadd.f32 %v5257_v29, %v5169_v21  ;;  %v5082_v12 = vadd.f32 %v5081_v53, %v4992_v57  ;;  %v3366_v29 = vld [vmem:[#allocation2 + $0x68] sm:$0xff] }
 0x865   : > { %v5734_v40 = vadd.f32 %v5258_v25, %v3350_v28 }
 0x867   : > { %5862 = vst [vmem:[#allocation2 + $0x170] sm:$0xff] %v5734_v40 }
 0x868   : > { %v5170_v23 = vpop.f32.mrf.mxu2 }
 0x869   : > { %v5171_v22 = vadd.f32 %v5170_v23, %v5082_v12  ;;  %v5259_v11 = vpop.f32.mrf.mxu3  ;;  %v4995_v5 = vpop.f32.mrf.mxu0  ;;  %v3370_v23 = vld [vmem:[#allocation2 + $0x310] sm:$0xff] }
 0x86a   : > { %v5084_v4 = vpop.f32.mrf.mxu1 }
 0x86b   : > { %v5260_v15 = vadd.f32 %v5259_v11, %v5171_v22  ;;  %v5085_v31 = vadd.f32 %v5084_v4, %v4995_v5  ;;  %v11190_v5 = vld [vmem:[#allocation61_spill] sm:$0xff] }
 0x86c   : > { %5310 = vmatmul.bf16.gmra.mxu0 %v11118_v38  ;;  %5399 = vmatmul.bf16.gmra.mxu1 %v11185_v41  ;;  %v11191_v4 = vld [vmem:[#allocation77_spill] sm:$0xff] }
 0x86d   : > { %v5738_v34 = vadd.f32 %v5260_v15, %v3354_v0  ;;  %5488 = vmatmul.bf16.gmra.mxu2 %v11186_v32  ;;  %v11192_v15 = vld [vmem:[#allocation92_spill] sm:$0xff] }
 0x86e   : > { %5577 = vmatmul.bf16.gmra.mxu3 %v11187_v35 }
 0x86f   : > { %5866 = vst [vmem:[#allocation2 + $0xb8] sm:$0xff] %v5738_v34  ;;  %v11193_v34 = vld [vmem:[#allocation35_spill] sm:$0xff] }
 0x870   : > { %v5173_v52 = vpop.f32.mrf.mxu2 }
 0x871   : > { %v5174_v27 = vadd.f32 %v5173_v52, %v5085_v31  ;;  %v5262_v56 = vpop.f32.mrf.mxu3  ;;  %v4997_v16 = vpop.f32.mrf.mxu0 }
 0x872   : > { %v5086_v26 = vpop.f32.mrf.mxu1 }
 0x873   : > { %v5263_v39 = vadd.f32 %v5262_v56, %v5174_v27  ;;  %v5087_v48 = vadd.f32 %v5086_v26, %v4997_v16  ;;  %v3247_v27 = vld [vmem:[#allocation2 + $0x18] sm:$0xff] }
 0x875   : > { %v5742_v30 = vadd.f32 %v5263_v39, %v3358_v8 }
 0x877   : > { %5870 = vst [vmem:[#allocation2 + $0x370] sm:$0xff] %v5742_v30 }
 0x878   : > { %v5175_v38 = vpop.f32.mrf.mxu2 }
 0x879   : > { %v5176_v19 = vadd.f32 %v5175_v38, %v5087_v48  ;;  %v5264_v9 = vpop.f32.mrf.mxu3  ;;  %v5000_v2 = vpop.f32.mrf.mxu0 }
 0x87a   : > { %v5089_v55 = vpop.f32.mrf.mxu1 }
 0x87b   : > { %v5265_v60 = vadd.f32 %v5264_v9, %v5176_v19  ;;  %v5090_v63 = vadd.f32 %v5089_v55, %v5000_v2  ;;  %v3251_v19 = vld [vmem:[#allocation2 + $0x48] sm:$0xff] }
 0x87c   : > { %5315 = vmatmul.bf16.gmra.mxu0 %v11120_v61  ;;  %5404 = vmatmul.bf16.gmra.mxu1 %v11121_v58 }
 0x87d   : > { %v5746_v13 = vadd.f32 %v5265_v60, %v3362_v6  ;;  %5493 = vmatmul.bf16.gmra.mxu2 %v11188_v54 }
 0x87e   : > { %5582 = vmatmul.bf16.gmra.mxu3 %v11189_v33 }
 0x87f   : > { %5874 = vst [vmem:[#allocation2 + $0x228] sm:$0xff] %v5746_v13 }
 0x880   : > { %v5178_v43 = vpop.f32.mrf.mxu2 }
 0x881   : > { %v5179_v7 = vadd.f32 %v5178_v43, %v5090_v63  ;;  %v5267_v20 = vpop.f32.mrf.mxu3  ;;  %v5002_v21 = vpop.f32.mrf.mxu0  ;;  %v3255_v63 = vld [vmem:[#allocation2 + $0x98] sm:$0xff] }
 0x882   : > { %v5091_v57 = vpop.f32.mrf.mxu1 }
 0x883   : > { %v5268_v28 = vadd.f32 %v5267_v20, %v5179_v7  ;;  %v5092_v25 = vadd.f32 %v5091_v57, %v5002_v21 }
 0x885   : > { %v5750_v53 = vadd.f32 %v5268_v28, %v3366_v29  ;;  %v3259_v28 = vld [vmem:[#allocation2 + $0x60] sm:$0xff] }
 0x887   : > { %5878 = vst [vmem:[#allocation2 + $0x68] sm:$0xff] %v5750_v53 }
 0x888   : > { %v5180_v61 = vpop.f32.mrf.mxu2 }
 0x889   : > { %v5181_v40 = vadd.f32 %v5180_v61, %v5092_v25  ;;  %v5269_v12 = vpop.f32.mrf.mxu3  ;;  %v5281_v58 = vpop.f32.mrf.mxu0  ;;  %v11195_v61 = vld [vmem:[#allocation79_spill] sm:$0xff] }
 0x88a   : > { %v5370_v22 = vpop.f32.mrf.mxu1 }
 0x88b   : > { %v5270_v11 = vadd.f32 %v5269_v12, %v5181_v40  ;;  %v5371_v41 = vadd.f32 %v5370_v22, %v5281_v58  ;;  %v11196_v40 = vld [vmem:[#allocation93_spill] sm:$0xff]  ;;  %v11197_v12 = vld [vmem:[#allocation36_spill] sm:$0xff] }
 0x88c   : > { %5320 = vmatmul.bf16.gmra.mxu0 %v11190_v5  ;;  %5409 = vmatmul.bf16.gmra.mxu1 %v11191_v4 }
 0x88d   : > { %v5754_v0 = vadd.f32 %v5270_v11, %v3370_v23  ;;  %5498 = vmatmul.bf16.gmra.mxu2 %v11192_v15 }
 0x88e   : > { %5587 = vmatmul.bf16.gmra.mxu3 %v11193_v34 }
 0x88f   : > { %5882 = vst [vmem:[#allocation2 + $0x310] sm:$0xff] %v5754_v0  ;;  %v3263_v0 = vld [vmem:[#allocation2 + $0x340] sm:$0xff] }
 0x890   : > { %v5459_v32 = vpop.f32.mrf.mxu2 }
 0x891   : > { %v5460_v35 = vadd.f32 %v5459_v32, %v5371_v41  ;;  %v5548_v31 = vpop.f32.mrf.mxu3  ;;  %v5283_v52 = vpop.f32.mrf.mxu0 }
 0x892   : > { %v5372_v56 = vpop.f32.mrf.mxu1 }
 0x893   : > { %v5549_v16 = vadd.f32 %v5548_v31, %v5460_v35  ;;  %v5373_v26 = vadd.f32 %v5372_v56, %v5283_v52 }
 0x895   : > { %v5631_v8 = vadd.f32 %v5549_v16, %v3247_v27  ;;  %v3267_v27 = vld [vmem:[#allocation2 + $0x168] sm:$0xff] }
 0x897   : > { %5759 = vst [vmem:[#allocation2 + $0x18] sm:$0xff] %v5631_v8 }
 0x898   : > { %v5461_v39 = vpop.f32.mrf.mxu2 }
 0x899   : > { %v5462_v30 = vadd.f32 %v5461_v39, %v5373_v26  ;;  %v5550_v48 = vpop.f32.mrf.mxu3  ;;  %v5286_v38 = vpop.f32.mrf.mxu0 }
 0x89a   : > { %v5375_v9 = vpop.f32.mrf.mxu1 }
 0x89b   : > { %v5551_v2 = vadd.f32 %v5550_v48, %v5462_v30  ;;  %v5376_v55 = vadd.f32 %v5375_v9, %v5286_v38 }
 0x89c   : > { %5325 = vmatmul.bf16.gmra.mxu0 %v11125_v50  ;;  %5414 = vmatmul.bf16.gmra.mxu1 %v11126_v42 }
 0x89d   : > { %v5635_v6 = vadd.f32 %v5551_v2, %v3251_v19  ;;  %5503 = vmatmul.bf16.gmra.mxu2 %v9830_v37  ;;  %v3271_v19 = vld [vmem:[#allocation2 + $0x28] sm:$0xff] }
 0x89e   : > { %5592 = vmatmul.bf16.gmra.mxu3 %v10025_v46  ;;  %v11194_v46 = vld [vmem:[#allocation63_spill] sm:$0xff] }
 0x89f   : > { %5763 = vst [vmem:[#allocation2 + $0x48] sm:$0xff] %v5635_v6 }
 0x8a0   : > { %v5464_v60 = vpop.f32.mrf.mxu2 }
 0x8a1   : > { %v5465_v13 = vadd.f32 %v5464_v60, %v5376_v55  ;;  %v5553_v54 = vpop.f32.mrf.mxu3  ;;  %v5288_v33 = vpop.f32.mrf.mxu0 }
 0x8a2   : > { %v5377_v43 = vpop.f32.mrf.mxu1 }
 0x8a3   : > { %v5554_v7 = vadd.f32 %v5553_v54, %v5465_v13  ;;  %v5378_v21 = vadd.f32 %v5377_v43, %v5288_v33  ;;  %v3275_v54 = vld [vmem:[#allocation2 + $0x280] sm:$0xff] }
 0x8a4   : > { %v11199_v43 = vld [vmem:[#allocation81_spill] sm:$0xff] }
 0x8a5   : > { %v5639_v20 = vadd.f32 %v5554_v7, %v3255_v63  ;;  %v11200_v7 = vld [vmem:[#allocation94_spill] sm:$0xff] }
 0x8a7   : > { %5767 = vst [vmem:[#allocation2 + $0x98] sm:$0xff] %v5639_v20  ;;  %v11201_v20 = vld [vmem:[#allocation37_spill] sm:$0xff] }
 0x8a8   : > { %v5466_v50 = vpop.f32.mrf.mxu2 }
 0x8a9   : > { %v5467_v29 = vadd.f32 %v5466_v50, %v5378_v21  ;;  %v5555_v57 = vpop.f32.mrf.mxu3  ;;  %v5291_v42 = vpop.f32.mrf.mxu0 }
 0x8aa   : > { %v5380_v37 = vpop.f32.mrf.mxu1 }
 0x8ab   : > { %v5556_v53 = vadd.f32 %v5555_v57, %v5467_v29  ;;  %v5381_v58 = vadd.f32 %v5380_v37, %v5291_v42 }
 0x8ac   : > { %5330 = vmatmul.bf16.gmra.mxu0 %v11194_v46  ;;  %5419 = vmatmul.bf16.gmra.mxu1 %v11195_v61 }
 0x8ad   : > { %v5643_v25 = vadd.f32 %v5556_v53, %v3259_v28  ;;  %5508 = vmatmul.bf16.gmra.mxu2 %v11196_v40  ;;  %v3279_v28 = vld [vmem:[#allocation2 + $0x3e0] sm:$0xff] }
 0x8ae   : > { %5597 = vmatmul.bf16.gmra.mxu3 %v11197_v12 }
 0x8af   : > { %5771 = vst [vmem:[#allocation2 + $0x60] sm:$0xff] %v5643_v25 }
 0x8b0   : > { %v5469_v23 = vpop.f32.mrf.mxu2 }
 0x8b1   : > { %v5470_v22 = vadd.f32 %v5469_v23, %v5381_v58  ;;  %v5558_v11 = vpop.f32.mrf.mxu3  ;;  %v5293_v5 = vpop.f32.mrf.mxu0  ;;  %v3283_v23 = vld [vmem:[#allocation2 + $0x128] sm:$0xff] }
 0x8b2   : > { %v5382_v4 = vpop.f32.mrf.mxu1 }
 0x8b3   : > { %v5559_v15 = vadd.f32 %v5558_v11, %v5470_v22  ;;  %v5383_v41 = vadd.f32 %v5382_v4, %v5293_v5 }
 0x8b5   : > { %v5647_v34 = vadd.f32 %v5559_v15, %v3263_v0 }
 0x8b7   : > { %5775 = vst [vmem:[#allocation2 + $0x340] sm:$0xff] %v5647_v34 }
 0x8b8   : > { %v5471_v32 = vpop.f32.mrf.mxu2 }
 0x8b9   : > { %v5472_v35 = vadd.f32 %v5471_v32, %v5383_v41  ;;  %v5560_v31 = vpop.f32.mrf.mxu3  ;;  %v5296_v52 = vpop.f32.mrf.mxu0  ;;  %v3287_v32 = vld [vmem:[#allocation2 + $0x2c0] sm:$0xff] }
 0x8ba   : > { %v5385_v56 = vpop.f32.mrf.mxu1 }
 0x8bb   : > { %v5561_v16 = vadd.f32 %v5560_v31, %v5472_v35  ;;  %v5386_v26 = vadd.f32 %v5385_v56, %v5296_v52 }
 0x8bc   : > { %5335 = vmatmul.bf16.gmra.mxu0 %v11129_v1  ;;  %5424 = vmatmul.bf16.gmra.mxu1 %v11130_v44 }
 0x8bd   : > { %v5651_v8 = vadd.f32 %v5561_v16, %v3267_v27  ;;  %5513 = vmatmul.bf16.gmra.mxu2 %v9854_v10 }
 0x8be   : > { %5602 = vmatmul.bf16.gmra.mxu3 %v10049_v14  ;;  %v11198_v14 = vld [vmem:[#allocation65_spill] sm:$0xff] }
 0x8bf   : > { %5779 = vst [vmem:[#allocation2 + $0x168] sm:$0xff] %v5651_v8  ;;  %v3291_v8 = vld [vmem:[#allocation2 + $0x10] sm:$0xff] }
 0x8c0   : > { %v5474_v39 = vpop.f32.mrf.mxu2 }
 0x8c1   : > { %v5475_v30 = vadd.f32 %v5474_v39, %v5386_v26  ;;  %v5563_v48 = vpop.f32.mrf.mxu3  ;;  %v5298_v38 = vpop.f32.mrf.mxu0  ;;  %v11202_v39 = vld [vmem:[#allocation95_spill] sm:$0xff] }
 0x8c2   : > { %v5387_v9 = vpop.f32.mrf.mxu1 }
 0x8c3   : > { %v5564_v2 = vadd.f32 %v5563_v48, %v5475_v30  ;;  %v5388_v55 = vadd.f32 %v5387_v9, %v5298_v38 }
 0x8c5   : > { %v5655_v6 = vadd.f32 %v5564_v2, %v3271_v19  ;;  %v3295_v2 = vld [vmem:[#allocation2 + $0x3a0] sm:$0xff] }
 0x8c7   : > { %5783 = vst [vmem:[#allocation2 + $0x28] sm:$0xff] %v5655_v6 }
 0x8c8   : > { %v5476_v1 = vpop.f32.mrf.mxu2 }
 0x8c9   : > { %v5477_v60 = vadd.f32 %v5476_v1, %v5388_v55  ;;  %v5565_v13 = vpop.f32.mrf.mxu3  ;;  %v5301_v44 = vpop.f32.mrf.mxu0 }
 0x8ca   : > { %v5390_v10 = vpop.f32.mrf.mxu1 }
 0x8cb   : > { %v5566_v33 = vadd.f32 %v5565_v13, %v5477_v60  ;;  %v5391_v21 = vadd.f32 %v5390_v10, %v5301_v44 }
 0x8cc   : > { %5340 = vmatmul.bf16.gmra.mxu0 %v11198_v14  ;;  %5429 = vmatmul.bf16.gmra.mxu1 %v11199_v43 }
 0x8cd   : > { %v5659_v63 = vadd.f32 %v5566_v33, %v3275_v54  ;;  %5518 = vmatmul.bf16.gmra.mxu2 %v11200_v7  ;;  %v3299_v54 = vld [vmem:[#allocation2 + $0x2f0] sm:$0xff] }
 0x8ce   : > { %5607 = vmatmul.bf16.gmra.mxu3 %v11201_v20 }
 0x8cf   : > { %5787 = vst [vmem:[#allocation2 + $0x280] sm:$0xff] %v5659_v63 }
 0x8d0   : > { %v5479_v50 = vpop.f32.mrf.mxu2 }
 0x8d1   : > { %v5480_v29 = vadd.f32 %v5479_v50, %v5391_v21  ;;  %v5568_v57 = vpop.f32.mrf.mxu3  ;;  %v5303_v42 = vpop.f32.mrf.mxu0  ;;  %v3303_v21 = vld [vmem:[#allocation2 + $0x188] sm:$0xff] }
 0x8d2   : > { %v5392_v37 = vpop.f32.mrf.mxu1 }
 0x8d3   : > { %v5569_v53 = vadd.f32 %v5568_v57, %v5480_v29  ;;  %v5393_v25 = vadd.f32 %v5392_v37, %v5303_v42 }
 0x8d5   : > { %v5663_v46 = vadd.f32 %v5569_v53, %v3279_v28  ;;  %v3307_v53 = vld [vmem:[#allocation2 + $0x2a8] sm:$0xff] }
 0x8d7   : > { %5791 = vst [vmem:[#allocation2 + $0x3e0] sm:$0xff] %v5663_v46 }
 0x8d8   : > { %v5481_v61 = vpop.f32.mrf.mxu2 }
 0x8d9   : > { %v5482_v40 = vadd.f32 %v5481_v61, %v5393_v25  ;;  %v5570_v12 = vpop.f32.mrf.mxu3  ;;  %v5306_v58 = vpop.f32.mrf.mxu0 }
 0x8da   : > { %v5395_v22 = vpop.f32.mrf.mxu1 }
 0x8db   : > { %v5571_v11 = vadd.f32 %v5570_v12, %v5482_v40  ;;  %v5396_v0 = vadd.f32 %v5395_v22, %v5306_v58 }
 0x8dc   : > { %5345 = vmatmul.bf16.gmra.mxu0 %v11133_v17  ;;  %5434 = vmatmul.bf16.gmra.mxu1 %v11134_v51 }
 0x8dd   : > { %v5667_v5 = vadd.f32 %v5571_v11, %v3283_v23  ;;  %5523 = vmatmul.bf16.gmra.mxu2 %v9878_v3  ;;  %v3311_v23 = vld [vmem:[#allocation2 + $0x220] sm:$0xff] }
 0x8de   : > { %5612 = vmatmul.bf16.gmra.mxu3 %v10073_v24 }
 0x8df   : > { %5795 = vst [vmem:[#allocation2 + $0x128] sm:$0xff] %v5667_v5 }
 0x8e0   : > { %v5484_v4 = vpop.f32.mrf.mxu2 }
 0x8e1   : > { %v5485_v15 = vadd.f32 %v5484_v4, %v5396_v0  ;;  %v5573_v34 = vpop.f32.mrf.mxu3  ;;  %v5308_v41 = vpop.f32.mrf.mxu0 }
 0x8e2   : > { %v5397_v35 = vpop.f32.mrf.mxu1 }
 0x8e3   : > { %v5574_v31 = vadd.f32 %v5573_v34, %v5485_v15  ;;  %v5398_v27 = vadd.f32 %v5397_v35, %v5308_v41 }
 0x8e5   : > { %v5671_v52 = vadd.f32 %v5574_v31, %v3287_v32  ;;  %v3315_v32 = vld [vmem:[#allocation2 + $0x178] sm:$0xff] }
 0x8e7   : > { %5799 = vst [vmem:[#allocation2 + $0x2c0] sm:$0xff] %v5671_v52 }
 0x8e8   : > { %v5486_v17 = vpop.f32.mrf.mxu2 }
 0x8e9   : > { %v5487_v56 = vadd.f32 %v5486_v17, %v5398_v27  ;;  %v5575_v16 = vpop.f32.mrf.mxu3  ;;  %v5311_v51 = vpop.f32.mrf.mxu0 }
 0x8ea   : > { %v5400_v3 = vpop.f32.mrf.mxu1 }
 0x8eb   : > { %v5576_v26 = vadd.f32 %v5575_v16, %v5487_v56  ;;  %v5401_v30 = vadd.f32 %v5400_v3, %v5311_v51 }
 0x8ec   : > { %5350 = vmatmul.bf16.gmra.mxu0 %v11179_v36  ;;  %5439 = vmatmul.bf16.gmra.mxu1 %v11180_v49 }
 0x8ed   : > { %v5675_v24 = vadd.f32 %v5576_v26, %v3291_v8  ;;  %5528 = vmatmul.bf16.gmra.mxu2 %v11202_v39  ;;  %v3319_v8 = vld [vmem:[#allocation2 + $0x2b8] sm:$0xff] }
 0x8ee   : > { %5617 = vmatmul.bf16.gmra.mxu3 %v11182_v47 }
 0x8ef   : > { %5803 = vst [vmem:[#allocation2 + $0x10] sm:$0xff] %v5675_v24 }
 0x8f0   : > { %v5489_v48 = vpop.f32.mrf.mxu2 }
 0x8f1   : > { %v5490_v38 = vadd.f32 %v5489_v48, %v5401_v30  ;;  %v5578_v19 = vpop.f32.mrf.mxu3  ;;  %v5313_v9 = vpop.f32.mrf.mxu0 }
 0x8f2   : > { %v5402_v6 = vpop.f32.mrf.mxu1 }
 0x8f3   : > { %v5579_v55 = vadd.f32 %v5578_v19, %v5490_v38  ;;  %v5403_v60 = vadd.f32 %v5402_v6, %v5313_v9  ;;  %v3323_v9 = vld [vmem:[#allocation2 + $0xe8] sm:$0xff] }
 0x8f5   : > { %v5679_v1 = vadd.f32 %v5579_v55, %v3295_v2 }
 0x8f7   : > { %5807 = vst [vmem:[#allocation2 + $0x3a0] sm:$0xff] %v5679_v1 }
 0x8f8   : > { %v5491_v36 = vpop.f32.mrf.mxu2 }
 0x8f9   : > { %v5492_v13 = vadd.f32 %v5491_v36, %v5403_v60  ;;  %v5580_v44 = vpop.f32.mrf.mxu3  ;;  %v5316_v49 = vpop.f32.mrf.mxu0 }
 0x8fa   : > { %v5405_v10 = vpop.f32.mrf.mxu1 }
 0x8fb   : > { %v5581_v33 = vadd.f32 %v5580_v44, %v5492_v13  ;;  %v5406_v14 = vadd.f32 %v5405_v10, %v5316_v49  ;;  %v3327_v49 = vld [vmem:[#allocation2 + $0x160] sm:$0xff] }
 0x8fc   : > { %5355 = vmatmul.bf16.gmra.mxu0 %v11137_v59  ;;  %5444 = vmatmul.bf16.gmra.mxu1 %v11138_v62 }
 0x8fd   : > { %v5683_v47 = vadd.f32 %v5581_v33, %v3299_v54  ;;  %5533 = vmatmul.bf16.gmra.mxu2 %v9905_v45 }
 0x8fe   : > { %5622 = vmatmul.bf16.gmra.mxu3 %v10096_v18 }
 0x8ff   : > { %5811 = vst [vmem:[#allocation2 + $0x2f0] sm:$0xff] %v5683_v47 }
 0x900   : > { %v5494_v63 = vpop.f32.mrf.mxu2 }
 0x901   : > { %v5495_v43 = vadd.f32 %v5494_v63, %v5406_v14  ;;  %v5583_v7 = vpop.f32.mrf.mxu3  ;;  %v5318_v20 = vpop.f32.mrf.mxu0 }
 0x902   : > { %v5407_v50 = vpop.f32.mrf.mxu1 }
 0x903   : > { %v5584_v29 = vadd.f32 %v5583_v7, %v5495_v43  ;;  %v5408_v42 = vadd.f32 %v5407_v50, %v5318_v20  ;;  %v3331_v20 = vld [vmem:[#allocation2 + $0x1e8] sm:$0xff] }
 0x905   : > { %v5687_v57 = vadd.f32 %v5584_v29, %v3303_v21 }
 0x907   : > { %5815 = vst [vmem:[#allocation2 + $0x188] sm:$0xff] %v5687_v57 }
 0x908   : > { %v5496_v59 = vpop.f32.mrf.mxu2 }
 0x909   : > { %v5497_v28 = vadd.f32 %v5496_v59, %v5408_v42  ;;  %v5585_v37 = vpop.f32.mrf.mxu3  ;;  %v5321_v62 = vpop.f32.mrf.mxu0 }
 0x90a   : > { %v5410_v45 = vpop.f32.mrf.mxu1 }
 0x90b   : > { %v5586_v46 = vadd.f32 %v5585_v37, %v5497_v28  ;;  %v5411_v25 = vadd.f32 %v5410_v45, %v5321_v62  ;;  %v3335_v62 = vld [vmem:[#allocation2 + $0x1d0] sm:$0xff] }
 0x90d   : > { %v5691_v18 = vadd.f32 %v5586_v46, %v3307_v53 }
 0x90f   : > { %5819 = vst [vmem:[#allocation2 + $0x2a8] sm:$0xff] %v5691_v18 }
 0x910   : > { %v5499_v61 = vpop.f32.mrf.mxu2 }
 0x911   : > { %v5500_v40 = vadd.f32 %v5499_v61, %v5411_v25  ;;  %v5588_v12 = vpop.f32.mrf.mxu3  ;;  %v5323_v58 = vpop.f32.mrf.mxu0 }
 0x912   : > { %v5412_v22 = vpop.f32.mrf.mxu1 }
 0x913   : > { %v5589_v11 = vadd.f32 %v5588_v12, %v5500_v40  ;;  %v5413_v0 = vadd.f32 %v5412_v22, %v5323_v58  ;;  %v3339_v58 = vld [vmem:[#allocation2 + $0x2e8] sm:$0xff] }
 0x915   : > { %v5695_v5 = vadd.f32 %v5589_v11, %v3311_v23 }
 0x917   : > { %5823 = vst [vmem:[#allocation2 + $0x220] sm:$0xff] %v5695_v5 }
 0x918   : > { %v5501_v4 = vpop.f32.mrf.mxu2 }
 0x919   : > { %v5502_v15 = vadd.f32 %v5501_v4, %v5413_v0  ;;  %v5590_v34 = vpop.f32.mrf.mxu3  ;;  %v5326_v41 = vpop.f32.mrf.mxu0 }
 0x91a   : > { %v5415_v35 = vpop.f32.mrf.mxu1 }
 0x91b   : > { %v5591_v31 = vadd.f32 %v5590_v34, %v5502_v15  ;;  %v5416_v27 = vadd.f32 %v5415_v35, %v5326_v41  ;;  %v3343_v41 = vld [vmem:[#allocation2 + $0x390] sm:$0xff] }
 0x91d   : > { %v5699_v52 = vadd.f32 %v5591_v31, %v3315_v32 }
 0x91f   : > { %5827 = vst [vmem:[#allocation2 + $0x178] sm:$0xff] %v5699_v52 }
 0x920   : > { %v5504_v17 = vpop.f32.mrf.mxu2 }
 0x921   : > { %v5505_v56 = vadd.f32 %v5504_v17, %v5416_v27  ;;  %v5593_v16 = vpop.f32.mrf.mxu3  ;;  %v5328_v51 = vpop.f32.mrf.mxu0 }
 0x922   : > { %v5417_v3 = vpop.f32.mrf.mxu1 }
 0x923   : > { %v5594_v26 = vadd.f32 %v5593_v16, %v5505_v56  ;;  %v5418_v39 = vadd.f32 %v5417_v3, %v5328_v51  ;;  %v3347_v51 = vld [vmem:[#allocation2 + $0x2d8] sm:$0xff] }
 0x925   : > { %v5703_v24 = vadd.f32 %v5594_v26, %v3319_v8 }
 0x927   : > { %5831 = vst [vmem:[#allocation2 + $0x2b8] sm:$0xff] %v5703_v24 }
 0x928   : > { %v5506_v30 = vpop.f32.mrf.mxu2 }
 0x929   : > { %v5507_v48 = vadd.f32 %v5506_v30, %v5418_v39  ;;  %v5595_v38 = vpop.f32.mrf.mxu3  ;;  %v5331_v19 = vpop.f32.mrf.mxu0 }
 0x92a   : > { %v5420_v2 = vpop.f32.mrf.mxu1 }
 0x92b   : > { %v5596_v6 = vadd.f32 %v5595_v38, %v5507_v48  ;;  %v5421_v1 = vadd.f32 %v5420_v2, %v5331_v19  ;;  %v3351_v19 = vld [vmem:[#allocation2 + $0x3d0] sm:$0xff] }
 0x92d   : > { %v5707_v55 = vadd.f32 %v5596_v6, %v3323_v9 }
 0x92f   : > { %5835 = vst [vmem:[#allocation2 + $0xe8] sm:$0xff] %v5707_v55 }
 0x930   : > { %v5509_v60 = vpop.f32.mrf.mxu2 }
 0x931   : > { %v5510_v36 = vadd.f32 %v5509_v60, %v5421_v1  ;;  %v5598_v13 = vpop.f32.mrf.mxu3  ;;  %v5333_v44 = vpop.f32.mrf.mxu0 }
 0x932   : > { %v5422_v54 = vpop.f32.mrf.mxu1 }
 0x933   : > { %v5599_v10 = vadd.f32 %v5598_v13, %v5510_v36  ;;  %v5423_v47 = vadd.f32 %v5422_v54, %v5333_v44  ;;  %v3355_v44 = vld [vmem:[#allocation2 + $0x38] sm:$0xff] }
 0x935   : > { %v5711_v33 = vadd.f32 %v5599_v10, %v3327_v49 }
 0x937   : > { %5839 = vst [vmem:[#allocation2 + $0x160] sm:$0xff] %v5711_v33 }
 0x938   : > { %v5511_v14 = vpop.f32.mrf.mxu2 }
 0x939   : > { %v5512_v63 = vadd.f32 %v5511_v14, %v5423_v47  ;;  %v5600_v43 = vpop.f32.mrf.mxu3  ;;  %v5336_v7 = vpop.f32.mrf.mxu0 }
 0x93a   : > { %v5425_v21 = vpop.f32.mrf.mxu1 }
 0x93b   : > { %v5601_v50 = vadd.f32 %v5600_v43, %v5512_v63  ;;  %v5426_v57 = vadd.f32 %v5425_v21, %v5336_v7  ;;  %v3359_v7 = vld [vmem:[#allocation2 + $0xc8] sm:$0xff] }
 0x93d   : > { %v5715_v29 = vadd.f32 %v5601_v50, %v3331_v20 }
 0x93f   : > { %5843 = vst [vmem:[#allocation2 + $0x1e8] sm:$0xff] %v5715_v29 }
 0x940   : > { %v5514_v42 = vpop.f32.mrf.mxu2 }
 0x941   : > { %v5515_v59 = vadd.f32 %v5514_v42, %v5426_v57  ;;  %v5603_v28 = vpop.f32.mrf.mxu3  ;;  %v5338_v37 = vpop.f32.mrf.mxu0 }
 0x942   : > { %v5427_v53 = vpop.f32.mrf.mxu1 }
 0x943   : > { %v5604_v45 = vadd.f32 %v5603_v28, %v5515_v59  ;;  %v5428_v18 = vadd.f32 %v5427_v53, %v5338_v37  ;;  %v3363_v28 = vld [vmem:[#allocation2 + $0x348] sm:$0xff] }
 0x945   : > { %v5719_v46 = vadd.f32 %v5604_v45, %v3335_v62 }
 0x947   : > { %5847 = vst [vmem:[#allocation2 + $0x1d0] sm:$0xff] %v5719_v46 }
 0x948   : > { %v5516_v25 = vpop.f32.mrf.mxu2 }
 0x949   : > { %v5517_v61 = vadd.f32 %v5516_v25, %v5428_v18  ;;  %v5605_v40 = vpop.f32.mrf.mxu3  ;;  %v5341_v12 = vpop.f32.mrf.mxu0 }
 0x94a   : > { %v5430_v23 = vpop.f32.mrf.mxu1 }
 0x94b   : > { %v5606_v22 = vadd.f32 %v5605_v40, %v5517_v61  ;;  %v5431_v5 = vadd.f32 %v5430_v23, %v5341_v12  ;;  %v3367_v40 = vld [vmem:[#allocation2] sm:$0xff] }
 0x94d   : > { %v5723_v11 = vadd.f32 %v5606_v22, %v3339_v58 }
 0x94f   : > { %5851 = vst [vmem:[#allocation2 + $0x2e8] sm:$0xff] %v5723_v11 }
 0x950   : > { %v5519_v0 = vpop.f32.mrf.mxu2 }
 0x951   : > { %v5520_v4 = vadd.f32 %v5519_v0, %v5431_v5  ;;  %v5608_v15 = vpop.f32.mrf.mxu3  ;;  %v5343_v34 = vpop.f32.mrf.mxu0 }
 0x952   : > { %v5432_v32 = vpop.f32.mrf.mxu1 }
 0x953   : > { %v5609_v35 = vadd.f32 %v5608_v15, %v5520_v4  ;;  %v5433_v52 = vadd.f32 %v5432_v32, %v5343_v34  ;;  %v3371_v4 = vld [vmem:[#allocation2 + $0x190] sm:$0xff] }
 0x955   : > { %v5727_v31 = vadd.f32 %v5609_v35, %v3343_v41 }
 0x957   : > { %5855 = vst [vmem:[#allocation2 + $0x390] sm:$0xff] %v5727_v31 }
 0x958   : > { %v5521_v27 = vpop.f32.mrf.mxu2 }
 0x959   : > { %v5522_v17 = vadd.f32 %v5521_v27, %v5433_v52  ;;  %v5610_v56 = vpop.f32.mrf.mxu3  ;;  %v5346_v16 = vpop.f32.mrf.mxu0 }
 0x95a   : > { %v5435_v8 = vpop.f32.mrf.mxu1 }
 0x95b   : > { %v5611_v3 = vadd.f32 %v5610_v56, %v5522_v17  ;;  %v5436_v24 = vadd.f32 %v5435_v8, %v5346_v16 }
 0x95d   : > { %v5731_v26 = vadd.f32 %v5611_v3, %v3347_v51 }
 0x95f   : > { %5859 = vst [vmem:[#allocation2 + $0x2d8] sm:$0xff] %v5731_v26 }
 0x960   : > { %v5524_v39 = vpop.f32.mrf.mxu2 }
 0x961   : > { %v5525_v30 = vadd.f32 %v5524_v39, %v5436_v24  ;;  %v5613_v48 = vpop.f32.mrf.mxu3  ;;  %v5348_v38 = vpop.f32.mrf.mxu0 }
 0x962   : > { %v5437_v9 = vpop.f32.mrf.mxu1 }
 0x963   : > { %v5614_v2 = vadd.f32 %v5613_v48, %v5525_v30  ;;  %v5438_v55 = vadd.f32 %v5437_v9, %v5348_v38 }
 0x965   : > { %v5735_v6 = vadd.f32 %v5614_v2, %v3351_v19 }
 0x967   : > { %5863 = vst [vmem:[#allocation2 + $0x3d0] sm:$0xff] %v5735_v6 }
 0x968   : > { %v5526_v1 = vpop.f32.mrf.mxu2 }
 0x969   : > { %v5527_v60 = vadd.f32 %v5526_v1, %v5438_v55  ;;  %v5615_v36 = vpop.f32.mrf.mxu3  ;;  %v5351_v13 = vpop.f32.mrf.mxu0 }
 0x96a   : > { %v5440_v49 = vpop.f32.mrf.mxu1 }
 0x96b   : > { %v5616_v54 = vadd.f32 %v5615_v36, %v5527_v60  ;;  %v5441_v33 = vadd.f32 %v5440_v49, %v5351_v13 }
 0x96d   : > { %v5739_v10 = vadd.f32 %v5616_v54, %v3355_v44 }
 0x96f   : > { %5867 = vst [vmem:[#allocation2 + $0x38] sm:$0xff] %v5739_v10 }
 0x970   : > { %v5529_v47 = vpop.f32.mrf.mxu2 }
 0x971   : > { %v5530_v14 = vadd.f32 %v5529_v47, %v5441_v33  ;;  %v5618_v63 = vpop.f32.mrf.mxu3  ;;  %v5353_v43 = vpop.f32.mrf.mxu0 }
 0x972   : > { %v5442_v20 = vpop.f32.mrf.mxu1 }
 0x973   : > { %v5619_v21 = vadd.f32 %v5618_v63, %v5530_v14  ;;  %v5443_v29 = vadd.f32 %v5442_v20, %v5353_v43 }
 0x975   : > { %v5743_v50 = vadd.f32 %v5619_v21, %v3359_v7 }
 0x977   : > { %5871 = vst [vmem:[#allocation2 + $0xc8] sm:$0xff] %v5743_v50 }
 0x978   : > { %v5531_v57 = vpop.f32.mrf.mxu2 }
 0x979   : > { %v5532_v42 = vadd.f32 %v5531_v57, %v5443_v29  ;;  %v5620_v59 = vpop.f32.mrf.mxu3  ;;  %v5356_v37 = vpop.f32.mrf.mxu0 }
 0x97a   : > { %v5445_v62 = vpop.f32.mrf.mxu1 }
 0x97b   : > { %v5621_v53 = vadd.f32 %v5620_v59, %v5532_v42  ;;  %v5446_v46 = vadd.f32 %v5445_v62, %v5356_v37 }
 0x97d   : > { %v5747_v45 = vadd.f32 %v5621_v53, %v3363_v28 }
 0x97f   : > { %5875 = vst [vmem:[#allocation2 + $0x348] sm:$0xff] %v5747_v45 }
 0x980   : > { %v5534_v18 = vpop.f32.mrf.mxu2 }
 0x981   : > { %v5535_v25 = vadd.f32 %v5534_v18, %v5446_v46  ;;  %v5623_v61 = vpop.f32.mrf.mxu3  ;;  %v5358_v58 = vpop.f32.mrf.mxu0 }
 0x982   : > { %v5447_v23 = vpop.f32.mrf.mxu1 }
 0x983   : > { %v5624_v12 = vadd.f32 %v5623_v61, %v5535_v25  ;;  %v5448_v11 = vadd.f32 %v5447_v23, %v5358_v58 }
 0x985   : > { %v5751_v22 = vadd.f32 %v5624_v12, %v3367_v40 }
 0x987   : > { %5879 = vst [vmem:[#allocation2] sm:$0xff] %v5751_v22 }
 0x988   : > { %v5536_v5 = vpop.f32.mrf.mxu2 }
 0x989   : > { %v5537_v0 = vadd.f32 %v5536_v5, %v5448_v11  ;;  %v5625_v15 = vpop.f32.mrf.mxu3 }
 0x98b   : > { %v5626_v34 = vadd.f32 %v5625_v15, %v5537_v0  ;;  %5887 = sbr.rel (%p7764_p8) target bundleno = 2581 (0xa15), region = 68 }
 0x98d   : > { %v5755_v41 = vadd.f32 %v5626_v34, %v3371_v4 }
 0x98f   : > { %5883 = vst [vmem:[#allocation2 + $0x190] sm:$0xff] %v5755_v41 }
 0x990   : > { %v5888_v32 = vld [vmem:[#allocation2 + $0x2b0] sm:$0xff]  ;;  %v6016_v35 = vld [vmem:[#allocation11] sm:$0xf]  ;;  %v5890_v17 = vld [vmem:[#allocation2 + $0xd8] sm:$0xff] }
 0x991   : > { %v5889_v31 = vld [vmem:[#allocation2 + $0x3b0] sm:$0xff]  ;;  %v10471_v52 = vperm.slane %v6016_v35, 0  ;;  %v10473_v27 = vperm.slane %v6016_v35, 1  ;;  %v10475_v56 = vperm.slane %v6016_v35, 2  ;;  %v5891_v16 = vld [vmem:[#allocation2 + $0x18] sm:$0xff]  ;;  %v10477_v51 = vperm.slane %v6016_v35, 3 }
 0x992   : > { %v5892_v8 = vld [vmem:[#allocation2 + $0x50] sm:$0xff]  ;;  %v5893_v39 = vld [vmem:[#allocation2 + $0x368] sm:$0xff]  ;;  %v5896_v2 = vld [vmem:[#allocation2 + $0x380] sm:$0xff] }
 0x993   : > { %v6026_v3 = vadd.f32 %v10471_v52, %v5888_v32  ;;  %v6027_v26 = vadd.f32 %v10473_v27, %v5889_v31  ;;  %v6028_v24 = vadd.f32 %v10475_v56, %v5890_v17  ;;  %v6029_v30 = vadd.f32 %v10477_v51, %v5891_v16  ;;  %v5894_v48 = vld [vmem:[#allocation2 + $0x330] sm:$0xff]  ;;  %v5895_v19 = vld [vmem:[#allocation2 + $0x48] sm:$0xff]  ;;  %v5898_v60 = vld [vmem:[#allocation2 + $0x118] sm:$0xff] }
 0x994   : > { %v6030_v38 = vadd.f32 %v10471_v52, %v5892_v8  ;;  %v6031_v9 = vadd.f32 %v10473_v27, %v5893_v39  ;;  %v6032_v6 = vadd.f32 %v10475_v56, %v5894_v48  ;;  %v5897_v55 = vld [vmem:[#allocation2 + $0x110] sm:$0xff]  ;;  %v6033_v1 = vadd.f32 %v10477_v51, %v5895_v19  ;;  %v5899_v13 = vld [vmem:[#allocation2 + $0x98] sm:$0xff]  ;;  %v5900_v49 = vld [vmem:[#allocation2 + $0x320] sm:$0xff] }
 0x995   : > { %6154 = vst [vmem:[%s8788_s10] sm:$0xff] %v6026_v3  ;;  %v6034_v36 = vadd.f32 %v10471_v52, %v5896_v2  ;;  %v6035_v44 = vadd.f32 %v10473_v27, %v5897_v55  ;;  %v6036_v54 = vadd.f32 %v10475_v56, %v5898_v60  ;;  %v5901_v10 = vld [vmem:[#allocation2 + $0x150] sm:$0xff]  ;;  %v6037_v33 = vadd.f32 %v10477_v51, %v5899_v13  ;;  %v5902_v47 = vld [vmem:[#allocation2 + $0x108] sm:$0xff]  ;;  %v5903_v63 = vld [vmem:[#allocation2 + $0x60] sm:$0xff] }
 0x996   : > { %6155 = vst [vmem:[%s8788_s10 + $0x8] sm:$0xff] %v6027_v26  ;;  %v6038_v14 = vadd.f32 %v10471_v52, %v5900_v49  ;;  %v6039_v43 = vadd.f32 %v10473_v27, %v5901_v10  ;;  %v5904_v7 = vld [vmem:[#allocation2 + $0x2e0] sm:$0xff]  ;;  %v6040_v20 = vadd.f32 %v10475_v56, %v5902_v47  ;;  %v5905_v21 = vld [vmem:[#allocation2 + $0x388] sm:$0xff]  ;;  %v6041_v50 = vadd.f32 %v10477_v51, %v5903_v63  ;;  %v5906_v29 = vld [vmem:[#allocation2 + $0x338] sm:$0xff] }
 0x997   : > { %6156 = vst [vmem:[%s8788_s10 + $0x10] sm:$0xff] %v6028_v24  ;;  %v6042_v57 = vadd.f32 %v10471_v52, %v5904_v7  ;;  %v5907_v42 = vld [vmem:[#allocation2 + $0x340] sm:$0xff]  ;;  %v6043_v59 = vadd.f32 %v10473_v27, %v5905_v21  ;;  %v6044_v37 = vadd.f32 %v10475_v56, %v5906_v29  ;;  %v5909_v62 = vld [vmem:[#allocation2 + $0x1a8] sm:$0xff]  ;;  %v5910_v45 = vld [vmem:[#allocation2 + $0x1b8] sm:$0xff] }
 0x998   : > { %6157 = vst [vmem:[%s8788_s10 + $0x18] sm:$0xff] %v6029_v30  ;;  %v5908_v28 = vld [vmem:[#allocation2 + $0x80] sm:$0xff]  ;;  %v6045_v53 = vadd.f32 %v10477_v51, %v5907_v42  ;;  %v5911_v18 = vld [vmem:[#allocation2 + $0x168] sm:$0xff]  ;;  %v6047_v25 = vadd.f32 %v10473_v27, %v5909_v62  ;;  %v6048_v40 = vadd.f32 %v10475_v56, %v5910_v45  ;;  %v5913_v12 = vld [vmem:[#allocation2 + $0x2f8] sm:$0xff] }
 0x999   : > { %6158 = vst [vmem:[%s8788_s10 + $0x20] sm:$0xff] %v6030_v38  ;;  %v6046_v46 = vadd.f32 %v10471_v52, %v5908_v28  ;;  %v5912_v61 = vld [vmem:[#allocation2 + $0x3e8] sm:$0xff]  ;;  %v6049_v58 = vadd.f32 %v10477_v51, %v5911_v18  ;;  %v5914_v23 = vld [vmem:[#allocation2 + $0x290] sm:$0xff]  ;;  %v6051_v5 = vadd.f32 %v10473_v27, %v5913_v12  ;;  %v5916_v0 = vld [vmem:[#allocation2 + $0x138] sm:$0xff] }
 0x99a   : > { %6159 = vst [vmem:[%s8788_s10 + $0x28] sm:$0xff] %v6031_v9  ;;  %v6050_v22 = vadd.f32 %v10471_v52, %v5912_v61  ;;  %v5915_v11 = vld [vmem:[#allocation2 + $0x28] sm:$0xff]  ;;  %v6052_v4 = vadd.f32 %v10475_v56, %v5914_v23  ;;  %v5917_v15 = vld [vmem:[#allocation2 + $0xc0] sm:$0xff]  ;;  %v6054_v32 = vadd.f32 %v10471_v52, %v5916_v0  ;;  %v5922_v26 = vld [vmem:[#allocation2 + $0x158] sm:$0xff] }
 0x99b   : > { %6160 = vst [vmem:[%s8788_s10 + $0x30] sm:$0xff] %v6032_v6  ;;  %v6053_v34 = vadd.f32 %v10477_v51, %v5915_v11  ;;  %v5918_v41 = vld [vmem:[#allocation2 + $0x1c0] sm:$0xff]  ;;  %v6055_v31 = vadd.f32 %v10473_v27, %v5917_v15  ;;  %v5924_v48 = vld [vmem:[#allocation2 + $0x218] sm:$0xff]  ;;  %v6060_v38 = vadd.f32 %v10475_v56, %v5922_v26  ;;  %v5926_v2 = vld [vmem:[#allocation2 + $0x8] sm:$0xff] }
 0x99c   : > { %6161 = vst [vmem:[%s8788_s10 + $0x38] sm:$0xff] %v6033_v1  ;;  %v5919_v35 = vld [vmem:[#allocation2 + $0x280] sm:$0xff]  ;;  %v6056_v16 = vadd.f32 %v10475_v56, %v5918_v41  ;;  %v5925_v19 = vld [vmem:[#allocation2 + $0x3f8] sm:$0xff]  ;;  %v6062_v6 = vadd.f32 %v10471_v52, %v5924_v48  ;;  %v5927_v55 = vld [vmem:[#allocation2 + $0x128] sm:$0xff] }
 0x99d   : > { %6162 = vst [vmem:[%s8788_s10 + $0x40] sm:$0xff] %v6034_v36  ;;  %v5920_v17 = vld [vmem:[#allocation2 + $0x100] sm:$0xff]  ;;  %v6057_v3 = vadd.f32 %v10477_v51, %v5919_v35  ;;  %v6063_v1 = vadd.f32 %v10473_v27, %v5925_v19  ;;  %v6064_v36 = vadd.f32 %v10475_v56, %v5926_v2  ;;  %v5929_v13 = vld [vmem:[#allocation2 + $0x3f0] sm:$0xff]  ;;  %v5940_v45 = vld [vmem:[#allocation2 + $0x208] sm:$0xff] }
 0x99e   : > { %6163 = vst [vmem:[%s8788_s10 + $0x48] sm:$0xff] %v6035_v44  ;;  %v5921_v8 = vld [vmem:[#allocation2 + $0x3c0] sm:$0xff]  ;;  %v6058_v24 = vadd.f32 %v10471_v52, %v5920_v17  ;;  %v6065_v44 = vadd.f32 %v10477_v51, %v5927_v55  ;;  %v5932_v47 = vld [vmem:[#allocation2 + $0xb0] sm:$0xff]  ;;  %v5942_v61 = vld [vmem:[#allocation2 + $0x88] sm:$0xff] }
 0x99f   : > { %6164 = vst [vmem:[%s8788_s10 + $0x50] sm:$0xff] %v6036_v54  ;;  %v5923_v39 = vld [vmem:[#allocation2 + $0x3e0] sm:$0xff]  ;;  %v6059_v30 = vadd.f32 %v10473_v27, %v5921_v8  ;;  %v5934_v7 = vld [vmem:[#allocation2 + $0x1f0] sm:$0xff]  ;;  %v5944_v23 = vld [vmem:[#allocation2 + $0x358] sm:$0xff] }
 0x9a0   : > { %6165 = vst [vmem:[%s8788_s10 + $0x58] sm:$0xff] %v6037_v33  ;;  %v6061_v9 = vadd.f32 %v10477_v51, %v5923_v39  ;;  %v5928_v60 = vld [vmem:[#allocation2 + $0x2a0] sm:$0xff]  ;;  %v6067_v33 = vadd.f32 %v10473_v27, %v5929_v13  ;;  %v5935_v21 = vld [vmem:[#allocation2 + $0x10] sm:$0xff]  ;;  %v5945_v11 = vld [vmem:[#allocation2 + $0x268] sm:$0xff] }
 0x9a1   : > { %6166 = vst [vmem:[%s8788_s10 + $0x60] sm:$0xff] %v6038_v14  ;;  %v5930_v49 = vld [vmem:[#allocation2 + $0xa0] sm:$0xff]  ;;  %v6066_v54 = vadd.f32 %v10471_v52, %v5928_v60  ;;  %v5936_v29 = vld [vmem:[#allocation2 + $0x230] sm:$0xff]  ;;  %v5947_v15 = vld [vmem:[#allocation2 + $0x188] sm:$0xff] }
 0x9a2   : > { %6167 = vst [vmem:[%s8788_s10 + $0x68] sm:$0xff] %v6039_v43  ;;  %v5931_v10 = vld [vmem:[#allocation2 + $0x2c0] sm:$0xff]  ;;  %v6068_v14 = vadd.f32 %v10475_v56, %v5930_v49  ;;  %v5938_v28 = vld [vmem:[#allocation2 + $0x90] sm:$0xff]  ;;  %v5948_v41 = vld [vmem:[#allocation2 + $0x1d8] sm:$0xff] }
 0x9a3   : > { %6168 = vst [vmem:[%s8788_s10 + $0x70] sm:$0xff] %v6040_v20  ;;  %v5933_v63 = vld [vmem:[#allocation2 + $0x1e0] sm:$0xff]  ;;  %v6069_v43 = vadd.f32 %v10477_v51, %v5931_v10  ;;  %v6070_v20 = vadd.f32 %v10471_v52, %v5932_v47  ;;  %v5941_v18 = vld [vmem:[#allocation2 + $0xd0] sm:$0xff]  ;;  %v5951_v8 = vld [vmem:[#allocation2 + $0x2a8] sm:$0xff] }
 0x9a4   : > { %6169 = vst [vmem:[%s8788_s10 + $0x78] sm:$0xff] %v6041_v50  ;;  %v6071_v50 = vadd.f32 %v10473_v27, %v5933_v63  ;;  %v5937_v42 = vld [vmem:[#allocation2 + $0x240] sm:$0xff]  ;;  %v5943_v12 = vld [vmem:[#allocation2 + $0x2f0] sm:$0xff]  ;;  %v5954_v48 = vld [vmem:[#allocation2 + $0x318] sm:$0xff] }
 0x9a5   : > { %6170 = vst [vmem:[%s8788_s10 + $0x80] sm:$0xff] %v6042_v57  ;;  %v6072_v57 = vadd.f32 %v10475_v56, %v5934_v7  ;;  %v5939_v62 = vld [vmem:[#allocation2 + $0x3a0] sm:$0xff]  ;;  %v5946_v0 = vld [vmem:[#allocation2 + $0x350] sm:$0xff]  ;;  %v5959_v13 = vld [vmem:[#allocation2 + $0x178] sm:$0xff] }
 0x9a6   : > { %6171 = vst [vmem:[%s8788_s10 + $0x88] sm:$0xff] %v6043_v59  ;;  %v6073_v59 = vadd.f32 %v10477_v51, %v5935_v21  ;;  %v5949_v35 = vld [vmem:[#allocation2 + $0x30] sm:$0xff]  ;;  %v5950_v17 = vld [vmem:[#allocation2 + $0x140] sm:$0xff]  ;;  %v5960_v49 = vld [vmem:[#allocation2 + $0x328] sm:$0xff] }
 0x9a7   : > { %6172 = vst [vmem:[%s8788_s10 + $0x90] sm:$0xff] %v6044_v37  ;;  %v6074_v37 = vadd.f32 %v10471_v52, %v5936_v29  ;;  %v5952_v26 = vld [vmem:[#allocation2 + $0x130] sm:$0xff]  ;;  %v5953_v39 = vld [vmem:[#allocation2 + $0x200] sm:$0xff]  ;;  %v5962_v47 = vld [vmem:[#allocation2 + $0x3b8] sm:$0xff] }
 0x9a8   : > { %6173 = vst [vmem:[%s8788_s10 + $0x98] sm:$0xff] %v6045_v53  ;;  %v6075_v53 = vadd.f32 %v10473_v27, %v5937_v42  ;;  %v5955_v19 = vld [vmem:[#allocation2 + $0x220] sm:$0xff]  ;;  %v5956_v2 = vld [vmem:[#allocation2 + $0x70] sm:$0xff]  ;;  %v5963_v63 = vld [vmem:[#allocation2 + $0x2b8] sm:$0xff] }
 0x9a9   : > { %6174 = vst [vmem:[%s8788_s10 + $0xa0] sm:$0xff] %v6046_v46  ;;  %v6076_v46 = vadd.f32 %v10475_v56, %v5938_v28  ;;  %v5957_v55 = vld [vmem:[#allocation2 + $0x300] sm:$0xff]  ;;  %v5964_v7 = vld [vmem:[#allocation2 + $0x248] sm:$0xff] }
 0x9aa   : > { %6175 = vst [vmem:[%s8788_s10 + $0xa8] sm:$0xff] %v6047_v25  ;;  %v6077_v25 = vadd.f32 %v10477_v51, %v5939_v62  ;;  %v5958_v60 = vld [vmem:[#allocation2 + $0xe0] sm:$0xff]  ;;  %v5967_v42 = vld [vmem:[#allocation2 + $0xe8] sm:$0xff] }
 0x9ab   : > { %6176 = vst [vmem:[%s8788_s10 + $0xb0] sm:$0xff] %v6048_v40  ;;  %v6078_v40 = vadd.f32 %v10471_v52, %v5940_v45  ;;  %v5961_v10 = vld [vmem:[#allocation2 + $0x260] sm:$0xff]  ;;  %v5968_v28 = vld [vmem:[#allocation2 + $0x288] sm:$0xff] }
 0x9ac   : > { %6177 = vst [vmem:[%s8788_s10 + $0xb8] sm:$0xff] %v6049_v58  ;;  %v6079_v58 = vadd.f32 %v10473_v27, %v5941_v18  ;;  %v5965_v21 = vld [vmem:[#allocation2 + $0x40] sm:$0xff]  ;;  %v5969_v62 = vld [vmem:[#allocation2 + $0x3a8] sm:$0xff] }
 0x9ad   : > { %6178 = vst [vmem:[%s8788_s10 + $0xc0] sm:$0xff] %v6050_v22  ;;  %v6080_v22 = vadd.f32 %v10475_v56, %v5942_v61  ;;  %v5966_v29 = vld [vmem:[#allocation2 + $0x20] sm:$0xff]  ;;  %v5970_v45 = vld [vmem:[#allocation2 + $0x3c8] sm:$0xff] }
 0x9ae   : > { %6179 = vst [vmem:[%s8788_s10 + $0xc8] sm:$0xff] %v6051_v5  ;;  %v6081_v5 = vadd.f32 %v10477_v51, %v5943_v12  ;;  %v5971_v18 = vld [vmem:[#allocation2 + $0x160] sm:$0xff]  ;;  %v5972_v61 = vld [vmem:[#allocation2 + $0x2c8] sm:$0xff]  ;;  %v5973_v12 = vld [vmem:[#allocation2 + $0x210] sm:$0xff] }
 0x9af   : > { %6180 = vst [vmem:[%s8788_s10 + $0xd0] sm:$0xff] %v6052_v4  ;;  %v6082_v4 = vadd.f32 %v10471_v52, %v5944_v23  ;;  %v5974_v23 = vld [vmem:[#allocation2 + $0x3d8] sm:$0xff] }
 0x9b0   : > { %6181 = vst [vmem:[%s8788_s10 + $0xd8] sm:$0xff] %v6053_v34  ;;  %v6083_v34 = vadd.f32 %v10473_v27, %v5945_v11  ;;  %v5975_v11 = vld [vmem:[#allocation2 + $0x1e8] sm:$0xff] }
 0x9b1   : > { %6182 = vst [vmem:[%s8788_s10 + $0xe0] sm:$0xff] %v6054_v32  ;;  %v6084_v32 = vadd.f32 %v10475_v56, %v5946_v0  ;;  %v5976_v0 = vld [vmem:[#allocation2 + $0x1b0] sm:$0xff] }
 0x9b2   : > { %6183 = vst [vmem:[%s8788_s10 + $0xe8] sm:$0xff] %v6055_v31  ;;  %v6085_v31 = vadd.f32 %v10477_v51, %v5947_v15  ;;  %v5977_v15 = vld [vmem:[#allocation2 + $0x1c8] sm:$0xff] }
 0x9b3   : > { %6184 = vst [vmem:[%s8788_s10 + $0xf0] sm:$0xff] %v6056_v16  ;;  %v6086_v16 = vadd.f32 %v10471_v52, %v5948_v41  ;;  %v5978_v41 = vld [vmem:[#allocation2 + $0x2d0] sm:$0xff] }
 0x9b4   : > { %6185 = vst [vmem:[%s8788_s10 + $0xf8] sm:$0xff] %v6057_v3  ;;  %v6087_v3 = vadd.f32 %v10473_v27, %v5949_v35  ;;  %v5979_v35 = vld [vmem:[#allocation2 + $0x1d0] sm:$0xff] }
 0x9b5   : > { %6186 = vst [vmem:[%s8788_s10 + $0x100] sm:$0xff] %v6058_v24  ;;  %v6088_v24 = vadd.f32 %v10475_v56, %v5950_v17  ;;  %v5980_v17 = vld [vmem:[#allocation2 + $0x58] sm:$0xff] }
 0x9b6   : > { %6187 = vst [vmem:[%s8788_s10 + $0x108] sm:$0xff] %v6059_v30  ;;  %v6089_v30 = vadd.f32 %v10477_v51, %v5951_v8  ;;  %v5981_v8 = vld [vmem:[#allocation2 + $0x120] sm:$0xff] }
 0x9b7   : > { %6188 = vst [vmem:[%s8788_s10 + $0x110] sm:$0xff] %v6060_v38  ;;  %v6090_v38 = vadd.f32 %v10471_v52, %v5952_v26  ;;  %v5982_v26 = vld [vmem:[#allocation2 + $0x198] sm:$0xff] }
 0x9b8   : > { %6189 = vst [vmem:[%s8788_s10 + $0x118] sm:$0xff] %v6061_v9  ;;  %v6091_v9 = vadd.f32 %v10473_v27, %v5953_v39  ;;  %v5983_v39 = vld [vmem:[#allocation2 + $0x2e8] sm:$0xff] }
 0x9b9   : > { %6190 = vst [vmem:[%s8788_s10 + $0x120] sm:$0xff] %v6062_v6  ;;  %v6092_v6 = vadd.f32 %v10475_v56, %v5954_v48  ;;  %v5984_v48 = vld [vmem:[#allocation2 + $0x1f8] sm:$0xff] }
 0x9ba   : > { %6191 = vst [vmem:[%s8788_s10 + $0x128] sm:$0xff] %v6063_v1  ;;  %v6093_v1 = vadd.f32 %v10477_v51, %v5955_v19  ;;  %v5985_v19 = vld [vmem:[#allocation2 + $0x238] sm:$0xff] }
 0x9bb   : > { %6192 = vst [vmem:[%s8788_s10 + $0x130] sm:$0xff] %v6064_v36  ;;  %v6094_v36 = vadd.f32 %v10471_v52, %v5956_v2  ;;  %v5986_v2 = vld [vmem:[#allocation2 + $0x398] sm:$0xff] }
 0x9bc   : > { %6193 = vst [vmem:[%s8788_s10 + $0x138] sm:$0xff] %v6065_v44  ;;  %v6095_v44 = vadd.f32 %v10473_v27, %v5957_v55  ;;  %v5987_v55 = vld [vmem:[#allocation2 + $0x390] sm:$0xff] }
 0x9bd   : > { %6194 = vst [vmem:[%s8788_s10 + $0x140] sm:$0xff] %v6066_v54  ;;  %v6096_v54 = vadd.f32 %v10475_v56, %v5958_v60  ;;  %v5988_v60 = vld [vmem:[#allocation2 + $0x1a0] sm:$0xff] }
 0x9be   : > { %6195 = vst [vmem:[%s8788_s10 + $0x148] sm:$0xff] %v6067_v33  ;;  %v6097_v33 = vadd.f32 %v10477_v51, %v5959_v13  ;;  %v5989_v13 = vld [vmem:[#allocation2 + $0xa8] sm:$0xff] }
 0x9bf   : > { %6196 = vst [vmem:[%s8788_s10 + $0x150] sm:$0xff] %v6068_v14  ;;  %v6098_v14 = vadd.f32 %v10471_v52, %v5960_v49  ;;  %v5990_v49 = vld [vmem:[#allocation2 + $0x258] sm:$0xff] }
 0x9c0   : > { %6197 = vst [vmem:[%s8788_s10 + $0x158] sm:$0xff] %v6069_v43  ;;  %v6099_v43 = vadd.f32 %v10473_v27, %v5961_v10  ;;  %v5991_v10 = vld [vmem:[#allocation2 + $0x2d8] sm:$0xff] }
 0x9c1   : > { %6198 = vst [vmem:[%s8788_s10 + $0x160] sm:$0xff] %v6070_v20  ;;  %v6100_v20 = vadd.f32 %v10475_v56, %v5962_v47  ;;  %v5992_v47 = vld [vmem:[#allocation2 + $0xf0] sm:$0xff] }
 0x9c2   : > { %6199 = vst [vmem:[%s8788_s10 + $0x168] sm:$0xff] %v6071_v50  ;;  %v6101_v50 = vadd.f32 %v10477_v51, %v5963_v63  ;;  %v5993_v63 = vld [vmem:[#allocation2 + $0x180] sm:$0xff] }
 0x9c3   : > { %6200 = vst [vmem:[%s8788_s10 + $0x170] sm:$0xff] %v6072_v57  ;;  %v6102_v57 = vadd.f32 %v10471_v52, %v5964_v7  ;;  %v5994_v7 = vld [vmem:[#allocation2 + $0x170] sm:$0xff] }
 0x9c4   : > { %6201 = vst [vmem:[%s8788_s10 + $0x178] sm:$0xff] %v6073_v59  ;;  %v6103_v59 = vadd.f32 %v10473_v27, %v5965_v21  ;;  %v5995_v21 = vld [vmem:[#allocation2 + $0x3d0] sm:$0xff] }
 0x9c5   : > { %6202 = vst [vmem:[%s8788_s10 + $0x180] sm:$0xff] %v6074_v37  ;;  %v6104_v37 = vadd.f32 %v10475_v56, %v5966_v29  ;;  %v5996_v29 = vld [vmem:[#allocation2 + $0x250] sm:$0xff] }
 0x9c6   : > { %6203 = vst [vmem:[%s8788_s10 + $0x188] sm:$0xff] %v6075_v53  ;;  %v6105_v53 = vadd.f32 %v10477_v51, %v5967_v42  ;;  %v5997_v42 = vld [vmem:[#allocation2 + $0x378] sm:$0xff] }
 0x9c7   : > { %6204 = vst [vmem:[%s8788_s10 + $0x190] sm:$0xff] %v6076_v46  ;;  %v6106_v46 = vadd.f32 %v10471_v52, %v5968_v28  ;;  %v5998_v28 = vld [vmem:[#allocation2 + $0xb8] sm:$0xff] }
 0x9c8   : > { %6205 = vst [vmem:[%s8788_s10 + $0x198] sm:$0xff] %v6077_v25  ;;  %v6107_v25 = vadd.f32 %v10473_v27, %v5969_v62  ;;  %v5999_v62 = vld [vmem:[#allocation2 + $0x38] sm:$0xff] }
 0x9c9   : > { %6206 = vst [vmem:[%s8788_s10 + $0x1a0] sm:$0xff] %v6078_v40  ;;  %v6108_v40 = vadd.f32 %v10475_v56, %v5970_v45  ;;  %v6000_v45 = vld [vmem:[#allocation2 + $0x78] sm:$0xff] }
 0x9ca   : > { %6207 = vst [vmem:[%s8788_s10 + $0x1a8] sm:$0xff] %v6079_v58  ;;  %v6109_v58 = vadd.f32 %v10477_v51, %v5971_v18  ;;  %v6001_v18 = vld [vmem:[#allocation2 + $0x308] sm:$0xff] }
 0x9cb   : > { %6208 = vst [vmem:[%s8788_s10 + $0x1b0] sm:$0xff] %v6080_v22  ;;  %v6110_v22 = vadd.f32 %v10471_v52, %v5972_v61  ;;  %v6002_v61 = vld [vmem:[#allocation2 + $0x370] sm:$0xff] }
 0x9cc   : > { %6209 = vst [vmem:[%s8788_s10 + $0x1b8] sm:$0xff] %v6081_v5  ;;  %v6111_v5 = vadd.f32 %v10473_v27, %v5973_v12  ;;  %v6003_v12 = vld [vmem:[#allocation2 + $0xc8] sm:$0xff] }
 0x9cd   : > { %6210 = vst [vmem:[%s8788_s10 + $0x1c0] sm:$0xff] %v6082_v4  ;;  %v6112_v4 = vadd.f32 %v10475_v56, %v5974_v23  ;;  %v6004_v23 = vld [vmem:[#allocation2 + $0x278] sm:$0xff] }
 0x9ce   : > { %6211 = vst [vmem:[%s8788_s10 + $0x1c8] sm:$0xff] %v6083_v34  ;;  %v6113_v34 = vadd.f32 %v10477_v51, %v5975_v11  ;;  %v6005_v11 = vld [vmem:[#allocation2 + $0x360] sm:$0xff] }
 0x9cf   : > { %6212 = vst [vmem:[%s8788_s10 + $0x1d0] sm:$0xff] %v6084_v32  ;;  %v6114_v32 = vadd.f32 %v10471_v52, %v5976_v0  ;;  %v6006_v0 = vld [vmem:[#allocation2 + $0x228] sm:$0xff] }
 0x9d0   : > { %6213 = vst [vmem:[%s8788_s10 + $0x1d8] sm:$0xff] %v6085_v31  ;;  %v6115_v31 = vadd.f32 %v10473_v27, %v5977_v15  ;;  %v6007_v15 = vld [vmem:[#allocation2 + $0x348] sm:$0xff] }
 0x9d1   : > { %6214 = vst [vmem:[%s8788_s10 + $0x1e0] sm:$0xff] %v6086_v16  ;;  %v6116_v16 = vadd.f32 %v10475_v56, %v5978_v41  ;;  %v6008_v41 = vld [vmem:[#allocation2 + $0x148] sm:$0xff] }
 0x9d2   : > { %6215 = vst [vmem:[%s8788_s10 + $0x1e8] sm:$0xff] %v6087_v3  ;;  %v6117_v3 = vadd.f32 %v10477_v51, %v5979_v35  ;;  %v6009_v35 = vld [vmem:[#allocation2 + $0xf8] sm:$0xff] }
 0x9d3   : > { %6216 = vst [vmem:[%s8788_s10 + $0x1f0] sm:$0xff] %v6088_v24  ;;  %v6118_v24 = vadd.f32 %v10471_v52, %v5980_v17  ;;  %v6010_v17 = vld [vmem:[#allocation2 + $0x68] sm:$0xff] }
 0x9d4   : > { %6217 = vst [vmem:[%s8788_s10 + $0x1f8] sm:$0xff] %v6089_v30  ;;  %v6119_v30 = vadd.f32 %v10473_v27, %v5981_v8  ;;  %v6011_v8 = vld [vmem:[#allocation2] sm:$0xff] }
 0x9d5   : > { %6218 = vst [vmem:[%s8788_s10 + $0x200] sm:$0xff] %v6090_v38  ;;  %v6120_v38 = vadd.f32 %v10475_v56, %v5982_v26  ;;  %v6012_v26 = vld [vmem:[#allocation2 + $0x298] sm:$0xff] }
 0x9d6   : > { %6219 = vst [vmem:[%s8788_s10 + $0x208] sm:$0xff] %v6091_v9  ;;  %v6121_v9 = vadd.f32 %v10477_v51, %v5983_v39  ;;  %v6013_v39 = vld [vmem:[#allocation2 + $0x270] sm:$0xff] }
 0x9d7   : > { %6220 = vst [vmem:[%s8788_s10 + $0x210] sm:$0xff] %v6092_v6  ;;  %v6122_v6 = vadd.f32 %v10471_v52, %v5984_v48  ;;  %v6014_v48 = vld [vmem:[#allocation2 + $0x310] sm:$0xff] }
 0x9d8   : > { %6221 = vst [vmem:[%s8788_s10 + $0x218] sm:$0xff] %v6093_v1  ;;  %v6123_v1 = vadd.f32 %v10473_v27, %v5985_v19  ;;  %v6015_v19 = vld [vmem:[#allocation2 + $0x190] sm:$0xff] }
 0x9d9   : > { %6222 = vst [vmem:[%s8788_s10 + $0x220] sm:$0xff] %v6094_v36  ;;  %v6124_v36 = vadd.f32 %v10475_v56, %v5986_v2  ;;  %v6152_v2 = vadd.f32 %v10475_v56, %v6014_v48 }
 0x9da   : > { %6223 = vst [vmem:[%s8788_s10 + $0x228] sm:$0xff] %v6095_v44  ;;  %v6125_v44 = vadd.f32 %v10477_v51, %v5987_v55 }
 0x9db   : > { %6224 = vst [vmem:[%s8788_s10 + $0x230] sm:$0xff] %v6096_v54  ;;  %v6126_v54 = vadd.f32 %v10471_v52, %v5988_v60 }
 0x9dc   : > { %6225 = vst [vmem:[%s8788_s10 + $0x238] sm:$0xff] %v6097_v33  ;;  %v6127_v33 = vadd.f32 %v10473_v27, %v5989_v13 }
 0x9dd   : > { %6226 = vst [vmem:[%s8788_s10 + $0x240] sm:$0xff] %v6098_v14  ;;  %v6128_v14 = vadd.f32 %v10475_v56, %v5990_v49 }
 0x9de   : > { %6227 = vst [vmem:[%s8788_s10 + $0x248] sm:$0xff] %v6099_v43  ;;  %v6129_v43 = vadd.f32 %v10477_v51, %v5991_v10 }
 0x9df   : > { %6228 = vst [vmem:[%s8788_s10 + $0x250] sm:$0xff] %v6100_v20  ;;  %v6130_v20 = vadd.f32 %v10471_v52, %v5992_v47 }
 0x9e0   : > { %6229 = vst [vmem:[%s8788_s10 + $0x258] sm:$0xff] %v6101_v50  ;;  %v6131_v50 = vadd.f32 %v10473_v27, %v5993_v63 }
 0x9e1   : > { %6230 = vst [vmem:[%s8788_s10 + $0x260] sm:$0xff] %v6102_v57  ;;  %v6132_v57 = vadd.f32 %v10475_v56, %v5994_v7 }
 0x9e2   : > { %6231 = vst [vmem:[%s8788_s10 + $0x268] sm:$0xff] %v6103_v59  ;;  %v6133_v59 = vadd.f32 %v10477_v51, %v5995_v21 }
 0x9e3   : > { %6232 = vst [vmem:[%s8788_s10 + $0x270] sm:$0xff] %v6104_v37  ;;  %v6134_v37 = vadd.f32 %v10471_v52, %v5996_v29 }
 0x9e4   : > { %6233 = vst [vmem:[%s8788_s10 + $0x278] sm:$0xff] %v6105_v53  ;;  %v6135_v53 = vadd.f32 %v10473_v27, %v5997_v42 }
 0x9e5   : > { %6234 = vst [vmem:[%s8788_s10 + $0x280] sm:$0xff] %v6106_v46  ;;  %v6136_v46 = vadd.f32 %v10475_v56, %v5998_v28 }
 0x9e6   : > { %6235 = vst [vmem:[%s8788_s10 + $0x288] sm:$0xff] %v6107_v25  ;;  %v6137_v25 = vadd.f32 %v10477_v51, %v5999_v62 }
 0x9e7   : > { %6236 = vst [vmem:[%s8788_s10 + $0x290] sm:$0xff] %v6108_v40  ;;  %v6138_v40 = vadd.f32 %v10471_v52, %v6000_v45 }
 0x9e8   : > { %6237 = vst [vmem:[%s8788_s10 + $0x298] sm:$0xff] %v6109_v58  ;;  %v6139_v58 = vadd.f32 %v10473_v27, %v6001_v18 }
 0x9e9   : > { %6238 = vst [vmem:[%s8788_s10 + $0x2a0] sm:$0xff] %v6110_v22  ;;  %v6140_v22 = vadd.f32 %v10475_v56, %v6002_v61 }
 0x9ea   : > { %6239 = vst [vmem:[%s8788_s10 + $0x2a8] sm:$0xff] %v6111_v5  ;;  %v6141_v5 = vadd.f32 %v10477_v51, %v6003_v12 }
 0x9eb   : > { %6240 = vst [vmem:[%s8788_s10 + $0x2b0] sm:$0xff] %v6112_v4  ;;  %v6142_v4 = vadd.f32 %v10471_v52, %v6004_v23 }
 0x9ec   : > { %6241 = vst [vmem:[%s8788_s10 + $0x2b8] sm:$0xff] %v6113_v34  ;;  %v6143_v34 = vadd.f32 %v10473_v27, %v6005_v11 }
 0x9ed   : > { %6242 = vst [vmem:[%s8788_s10 + $0x2c0] sm:$0xff] %v6114_v32  ;;  %v6144_v32 = vadd.f32 %v10475_v56, %v6006_v0 }
 0x9ee   : > { %6243 = vst [vmem:[%s8788_s10 + $0x2c8] sm:$0xff] %v6115_v31  ;;  %v6145_v31 = vadd.f32 %v10477_v51, %v6007_v15 }
 0x9ef   : > { %6244 = vst [vmem:[%s8788_s10 + $0x2d0] sm:$0xff] %v6116_v16  ;;  %v6146_v16 = vadd.f32 %v10471_v52, %v6008_v41 }
 0x9f0   : > { %6245 = vst [vmem:[%s8788_s10 + $0x2d8] sm:$0xff] %v6117_v3  ;;  %v6147_v3 = vadd.f32 %v10473_v27, %v6009_v35 }
 0x9f1   : > { %6246 = vst [vmem:[%s8788_s10 + $0x2e0] sm:$0xff] %v6118_v24  ;;  %v6148_v24 = vadd.f32 %v10475_v56, %v6010_v17 }
 0x9f2   : > { %6247 = vst [vmem:[%s8788_s10 + $0x2e8] sm:$0xff] %v6119_v30  ;;  %v6149_v30 = vadd.f32 %v10477_v51, %v6011_v8 }
 0x9f3   : > { %6248 = vst [vmem:[%s8788_s10 + $0x2f0] sm:$0xff] %v6120_v38  ;;  %v6150_v38 = vadd.f32 %v10471_v52, %v6012_v26 }
 0x9f4   : > { %6249 = vst [vmem:[%s8788_s10 + $0x2f8] sm:$0xff] %v6121_v9  ;;  %v6151_v9 = vadd.f32 %v10473_v27, %v6013_v39 }
 0x9f5   : > { %6250 = vst [vmem:[%s8788_s10 + $0x300] sm:$0xff] %v6122_v6  ;;  %v6153_v6 = vadd.f32 %v10477_v51, %v6015_v19 }
 0x9f6   : > { %6251 = vst [vmem:[%s8788_s10 + $0x308] sm:$0xff] %v6123_v1 }
 0x9f7   : > { %6252 = vst [vmem:[%s8788_s10 + $0x310] sm:$0xff] %v6124_v36 }
 0x9f8   : > { %6253 = vst [vmem:[%s8788_s10 + $0x318] sm:$0xff] %v6125_v44 }
 0x9f9   : > { %6254 = vst [vmem:[%s8788_s10 + $0x320] sm:$0xff] %v6126_v54 }
 0x9fa   : > { %6255 = vst [vmem:[%s8788_s10 + $0x328] sm:$0xff] %v6127_v33 }
 0x9fb   : > { %6256 = vst [vmem:[%s8788_s10 + $0x330] sm:$0xff] %v6128_v14 }
 0x9fc   : > { %6257 = vst [vmem:[%s8788_s10 + $0x338] sm:$0xff] %v6129_v43 }
 0x9fd   : > { %6258 = vst [vmem:[%s8788_s10 + $0x340] sm:$0xff] %v6130_v20 }
 0x9fe   : > { %6259 = vst [vmem:[%s8788_s10 + $0x348] sm:$0xff] %v6131_v50 }
 0x9ff   : > { %6260 = vst [vmem:[%s8788_s10 + $0x350] sm:$0xff] %v6132_v57 }
 0xa00   : > { %6261 = vst [vmem:[%s8788_s10 + $0x358] sm:$0xff] %v6133_v59 }
 0xa01   : > { %6262 = vst [vmem:[%s8788_s10 + $0x360] sm:$0xff] %v6134_v37 }
 0xa02   : > { %6263 = vst [vmem:[%s8788_s10 + $0x368] sm:$0xff] %v6135_v53 }
 0xa03   : > { %6264 = vst [vmem:[%s8788_s10 + $0x370] sm:$0xff] %v6136_v46 }
 0xa04   : > { %6265 = vst [vmem:[%s8788_s10 + $0x378] sm:$0xff] %v6137_v25 }
 0xa05   : > { %6266 = vst [vmem:[%s8788_s10 + $0x380] sm:$0xff] %v6138_v40 }
 0xa06   : > { %6267 = vst [vmem:[%s8788_s10 + $0x388] sm:$0xff] %v6139_v58 }
 0xa07   : > { %6268 = vst [vmem:[%s8788_s10 + $0x390] sm:$0xff] %v6140_v22 }
 0xa08   : > { %6269 = vst [vmem:[%s8788_s10 + $0x398] sm:$0xff] %v6141_v5 }
 0xa09   : > { %6270 = vst [vmem:[%s8788_s10 + $0x3a0] sm:$0xff] %v6142_v4 }
 0xa0a   : > { %6271 = vst [vmem:[%s8788_s10 + $0x3a8] sm:$0xff] %v6143_v34 }
 0xa0b   : > { %6272 = vst [vmem:[%s8788_s10 + $0x3b0] sm:$0xff] %v6144_v32 }
 0xa0c   : > { %6273 = vst [vmem:[%s8788_s10 + $0x3b8] sm:$0xff] %v6145_v31 }
 0xa0d   : > { %6274 = vst [vmem:[%s8788_s10 + $0x3c0] sm:$0xff] %v6146_v16 }
 0xa0e   : > { %6275 = vst [vmem:[%s8788_s10 + $0x3c8] sm:$0xff] %v6147_v3 }
 0xa0f   : > { %6276 = vst [vmem:[%s8788_s10 + $0x3d0] sm:$0xff] %v6148_v24 }
 0xa10   : > { %6277 = vst [vmem:[%s8788_s10 + $0x3d8] sm:$0xff] %v6149_v30 }
 0xa11   : > { %6278 = vst [vmem:[%s8788_s10 + $0x3e0] sm:$0xff] %v6150_v38 }
 0xa12   : > { %6279 = vst [vmem:[%s8788_s10 + $0x3e8] sm:$0xff] %v6151_v9 }
 0xa13   : > { %6280 = vst [vmem:[%s8788_s10 + $0x3f0] sm:$0xff] %v6152_v2 }
 0xa14   : > { %6281 = vst [vmem:[%s8788_s10 + $0x3f8] sm:$0xff] %v6153_v6 }
 0xa15 PF: > { %s11204_s21 = sld [smem:[#allocation21_spill]]  ;;  %s6296_s27 = sshll.u32 %s8788_s10, 4  ;;  %s6297_s27 = int_to_ptr.vmem [resolvable:$true] %s6296_s27 }
 0xa16   : > { %s11206_s6 = sld [smem:[#allocation99_spill]]  ;;  %s6283_s17 = scalar_lea.sflag [#allocation5], %s8757_s0 }
 0xa1b   : > { %s8097_s25 = sshll.u32 %s11204_s21, 10 }
 0xa1c   : > { %s6295_s23 = scalar_lea.hbm %s11206_s6, %s8097_s25  ;;  %s8404_s5 = scalar_lea.hbm %s11206_s6, 2048 }
 0xa1d   : > { %s6298_s11 = sshll.u32 %s6295_s23, 4  ;;  %s6299_s11 = int_to_ptr.hbm [resolvable:$true] %s6298_s11 }
 0xa1e   : > { %s8398_s14 = sshra.s32 %s6299_s11, 4  ;;  %s8399_s14 = int_to_ptr.hbm [resolvable:$true] %s8398_s14 }
 0xa1f   : > { %s8400_s16 = scalar_lea.hbm %s8399_s14, 1024  ;;  %p8405_p11 = scmp.lt.s32.totalorder %s8399_s14, %s11206_s6 }
 0xa20   : > { %p8401_p9 = scmp.ne.s32.totalorder %s8399_s14, %s8400_s16  ;;  %p8406_p3 = scmp.lt.s32.totalorder %s8404_s5, %s8400_s16 }
 0xa22   : > { %p8402_p7 = pnand %p8401_p9, %p8706_p2  ;;  %p8407_p4 = por %p8406_p3, %p8405_p11 }
 0xa24   : > { %p8403_p10 = pneg %p8402_p7 }
 0xa26   : > { %p8408_p0 = pnand %p8407_p4, %p8403_p10 }
 0xa28   : > { %8411 = shalt.err (!%p8408_p0)
}
 0xa29   : > { %s8525_s0 = smov 512   ;;  %s8526_s7 = smov 32  }
 0xa2a   : > { %8110 = dma.vmem_to_hbm [thread:$0]  (%p8706_p2), %s6297_s27, 16384, %s6299_s11, %s6283_s17, %s8525_s0, %s8525_s0, %s8526_s7  }
 0xa2b PF: > { %s11207_s9 = sld [smem:[#allocation18_spill]]  ;;  %p8136_p6 = scmp.ge.s32.totalorder %s8518_s28, 2 }
 0xa2d   : > { %p8130_p5 = pnand %p8136_p6, %p8643_p12 }
 0xa2f   : > { %p8131_p13 = pneg %p8130_p5 }
 0xa31   : > { %s6313_s10 = sand.u32 1, %s11207_s9  }
 0xa32   : > { %s6314_s18 = scalar_lea.sflag [#allocation5], %s6313_s10 }
 0xa33   : > { %8473 = dma.done.wait (%p8131_p13), %s6314_s18, 16384  }
 0xa34   : > { %8475 = vsyncadd (%p8131_p13), %s6314_s18, 4294950912  ;;  %s27_s28 = sadd.s32 1, %s8518_s28   ;;  %s11209_s29 = sld [smem:[#allocation28_spill]] }
 0xa35   : > { %p24_p1 = scmp.ge.s32.totalorder %s27_s28, 10   ;;  %s11210_s8 = sld [smem:[#allocation19_spill]] }
 0xa36   : > { %s11211_s23 = sld [smem:[#allocation29_spill]]  ;;  %s11215_s18 = smov %s8482_s19 }
 0xa37   : > { %s11212_s25 = sld [smem:[#allocation22_spill]]  ;;  %s11216_s19 = smov %s8486_s20 }
 0xa38   : > { %s11213_s30 = sld [smem:[#allocation25_spill]]  ;;  %s11218_s21 = smov %s8494_s22 }
 0xa39   : > { %s11214_s27 = sld [smem:[#allocation27_spill]]  ;;  %s11220_s24 = smov %s8510_s26 }
 0xa3a   : > { %s11217_s20 = smov %s11209_s29  ;;  %26 = sbr.rel (!%p24_p1) target bundleno = 18 (0x12), region = 134 }
 0xa3b   : > { %s11219_s22 = smov %s11210_s8 }
 0xa3e   : > { %s11221_s26 = smov %s11213_s30 }
 0xa3f   :  { %6320 = vsyncpa [#allocation4], 1 }
 0xa40   :  { %6322 = vsyncpa [#allocation4 + $0x1], 1 }
 0xa41   :  { %6323 = vsyncpa [#allocation7], 1 }
 0xa42   :  { %6325 = vsyncpa [#allocation7 + $0x1], 1 }
 0xa43   :  { %6326 = vsyncpa [#allocation10], 1 }
 0xa44   :  { %6328 = vsyncpa [#allocation10 + $0x1], 1 }
 0xa45   :  { %6329 = vsyncpa [#allocation5], 1 }
 0xa46   :  { %6331 = vsyncpa [#allocation5 + $0x1], 1 }

</bundles_post_ra>
